<compile_context>
chip_gen: v7x
topology: tpu7x:2x2x1
jax: 0.10.0
libtpu: 0.0.40
codegen_flags: <defaults>
</compile_context>

<pallas_src>
import functools
import math

import jax
import jax.numpy as jnp
from jax import lax
from jax.experimental import pallas as pl
from jax.experimental.pallas import tpu as pltpu


# ----------------------------- fused decoder-layer kernel ---------------------
def _decoder_layer_kernel(
    # per-batch-block data
    x_ref, enc_ref, decmask_ref, encmask_ref,
    # LayerNorm params (VMEM-resident)
    ln0g_ref, ln0b_ref, ln1g_ref, ln1b_ref, ln2g_ref, ln2b_ref,
    # self-attention projection weights
    wq0_ref, bq0_ref, wk0_ref, bk0_ref, wv0_ref, bv0_ref, wo0_ref, bo0_ref,
    # encoder-decoder attention projection weights
    wq1_ref, bq1_ref, wk1_ref, bk1_ref, wv1_ref, bv1_ref, wo1_ref, bo1_ref,
    # feed-forward weights
    w1_ref, b1_ref, w2_ref, b2_ref,
    # output
    o_ref,
    *, heads, delta, use_bf16):
  BB, S_dec, D = x_ref.shape
  S_enc = enc_ref.shape[1]
  dk = D // heads
  scale = 1.0 / math.sqrt(dk)

  # Flatten batch into the matmul M dimension (fills MXU rows).
  x = x_ref[...].reshape(BB * S_dec, D)
  enc = enc_ref[...].reshape(BB * S_enc, D)

  # Mask -> additive bias, computed ONCE (not per head).  Adding -1e9 is
  # numerically identical to masked_fill here: exp() underflows to exactly 0
  # for masked entries whenever a row has at least one unmasked key.
  dbias = jnp.where(decmask_ref[...] == 0.0, jnp.float32(-1e9), jnp.float32(0.0))
  ebias = jnp.where(encmask_ref[...] == 0.0, jnp.float32(-1e9), jnp.float32(0.0))

  def mm(a, w_ref, b_ref):
    # Weight matmul on the MXU, fp32 accumulation.  Weights arrive already as
    # bf16 (host-side cast) when use_bf16; only the activation is cast here.
    if use_bf16:
      a = a.astype(jnp.bfloat16)
    return jnp.dot(a, w_ref[...], preferred_element_type=jnp.float32) + b_ref[...]

  def layer_norm(y, g_ref, b_ref):
    # Matches the custom torch Norm: unbiased std (N-1), delta added to std.
    mean = jnp.mean(y, axis=-1, keepdims=True)
    c = y - mean
    var = jnp.sum(c * c, axis=-1, keepdims=True) * (1.0 / (D - 1))
    inv_std = pl.reciprocal(jnp.sqrt(var) + delta, approx=False)
    return g_ref[...] * inv_std * c + b_ref[...]

  def mha(q_in, kv_in, bias, Sq, Sk,
          wq, bq, wk, bk, wv, bv, wo, bo):
    # Projections over all BB*S rows at once.
    q = mm(q_in, wq, bq)      # (BB*Sq, D) f32
    k = mm(kv_in, wk, bk)     # (BB*Sk, D)
    v = mm(kv_in, wv, bv)     # (BB*Sk, D)
    if use_bf16:
      q = q.astype(jnp.bfloat16)
      k = k.astype(jnp.bfloat16)
      v = v.astype(jnp.bfloat16)
    q = q.reshape(BB, Sq, D)
    k = k.reshape(BB, Sk, D)
    v = v.reshape(BB, Sk, D)

    head_outs = []
    for h in range(heads):                       # static unroll; heads is small
      sl = slice(h * dk, (h + 1) * dk)
      # Per-head contraction over dk only: Sq*Sk*dk FLOPs (not Sq*Sk*D).
      s = jnp.einsum("bqd,bkd->bqk", q[:, :, sl], k[:, :, sl],
                     preferred_element_type=jnp.float32) * scale + bias
      s = s - jnp.max(s, axis=-1, keepdims=True)          # stable softmax
      p = jnp.exp(s)
      p = p * pl.reciprocal(jnp.sum(p, axis=-1, keepdims=True), approx=True)
      head_outs.append(
          jnp.einsum("bqk,bkd->bqd", p.astype(v.dtype), v[:, :, sl],
                     preferred_element_type=jnp.float32))
    concat = jnp.concatenate(head_outs, axis=-1).reshape(BB * Sq, D)
    return mm(concat, wo, bo)

  # residual 0: masked self-attention (single pre-norm, reused for q and kv)
  xn0 = layer_norm(x, ln0g_ref, ln0b_ref)
  x1 = x + mha(xn0, xn0, dbias, S_dec, S_dec,
               wq0_ref, bq0_ref, wk0_ref, bk0_ref, wv0_ref, bv0_ref,
               wo0_ref, bo0_ref)

  # residual 1: enc-dec attention (q from normed decoder state, kv from raw enc)
  xn1 = layer_norm(x1, ln1g_ref, ln1b_ref)
  x2 = x1 + mha(xn1, enc, ebias, S_dec, S_enc,
                wq1_ref, bq1_ref, wk1_ref, bk1_ref, wv1_ref, bv1_ref,
                wo1_ref, bo1_ref)

  # residual 2: feed-forward (relu MLP), residual add fused into the epilogue
  xn2 = layer_norm(x2, ln2g_ref, ln2b_ref)
  hidden = jnp.maximum(mm(xn2, w1_ref, b1_ref), 0.0)
  ff = mm(hidden, w2_ref, b2_ref)
  o_ref[...] = (x2 + ff).reshape(BB, S_dec, D)


# ----------------------------- wrapper -----------------------------------------
def decoder_layer(x, enc_out, encmask, decmask, params, heads,
                  delta=1e-6, use_bf16=True, batch_block=None,
                  single_buffer_weights=True,
                  vmem_limit_bytes=48 * 1024 * 1024):
  B, S_dec, D = x.shape
  S_enc = enc_out.shape[1]
  assert D % heads == 0
  if batch_block is None:
    # One grid step over the whole batch: on single-TC chips (v5e/v6e) the grid
    # is a serial loop, so bigger blocks remove per-step overhead and give the
    # MXU M = batch_block*S_dec rows.  On v7x pass batch_block=B//2 so the
    # "parallel" grid axis is sharded across both TensorCores.
    batch_block = B
  assert B % batch_block == 0, "batch must be divisible by batch_block"
  BB = batch_block

  p0, p1, pf = params["attn0"], params["attn1"], params["ffn"]
  wdt = jnp.bfloat16 if use_bf16 else jnp.float32
  mat = lambda a: a.astype(wdt)                          # MXU weight operands
  row = lambda a: a.reshape(1, -1).astype(jnp.float32)   # biases / LN stay fp32

  weight_args = (
      row(params["ln0"]["gain"]), row(params["ln0"]["bias"]),
      row(params["ln1"]["gain"]), row(params["ln1"]["bias"]),
      row(params["ln2"]["gain"]), row(params["ln2"]["bias"]),
      mat(p0["wq"]), row(p0["bq"]), mat(p0["wk"]), row(p0["bk"]),
      mat(p0["wv"]), row(p0["bv"]), mat(p0["wo"]), row(p0["bo"]),
      mat(p1["wq"]), row(p1["bq"]), mat(p1["wk"]), row(p1["bk"]),
      mat(p1["wv"]), row(p1["bv"]), mat(p1["wo"]), row(p1["bo"]),
      mat(pf["w1"]), row(pf["b1"]), mat(pf["w2"]), row(pf["b2"]),
  )

  kernel = functools.partial(_decoder_layer_kernel,
                             heads=heads, delta=delta, use_bf16=use_bf16)

  data_specs = [
      pl.BlockSpec((BB, S_dec, D), lambda b: (b, 0, 0)),        # x
      pl.BlockSpec((BB, S_enc, D), lambda b: (b, 0, 0)),        # encoder output
      pl.BlockSpec((BB, S_dec, S_dec), lambda b: (b, 0, 0)),    # decoder mask
      pl.BlockSpec((BB, 1, S_enc), lambda b: (b, 0, 0)),        # encoder mask
  ]

  def build(single_buffer):
    def resident(arr):
      # Whole weight in VMEM; constant block index across the grid so it is
      # DMA'd once.  Single-buffered (no double buffer) when supported.
      nd = arr.ndim
      kw = dict(pipeline_mode=pl.Buffered(1)) if single_buffer else {}
      return pl.BlockSpec(arr.shape, lambda b, _nd=nd: (0,) * _nd, **kw)

    return pl.pallas_call(
        kernel,
        out_shape=jax.ShapeDtypeStruct((B, S_dec, D), jnp.float32),
        grid=(B // BB,),
        in_specs=data_specs + [resident(a) for a in weight_args],
        out_specs=pl.BlockSpec((BB, S_dec, D), lambda b: (b, 0, 0)),
        compiler_params=pltpu.CompilerParams(
            dimension_semantics=("parallel",),     # megacore sharding on v7x
            vmem_limit_bytes=vmem_limit_bytes,
        ),
    )

  args = (x, enc_out, decmask, encmask, *weight_args)
  if single_buffer_weights:
    try:
      return build(True)(*args)
    except Exception:
      # Older JAX: pipeline_mode=pl.Buffered on pallas_call BlockSpecs not
      # supported -> fall back to default (double-buffered) weights.
      pass
  return build(False)(*args)


# ----------------------------- pure-JAX reference -------------------------------
def decoder_layer_ref(x, enc_out, encmask, decmask, params, heads, delta=1e-6):
  HIGH = lax.Precision.HIGHEST

  def linear(v, w, b):
    return jnp.dot(v, w, precision=HIGH) + b

  def ln(v, p):
    mean = jnp.mean(v, axis=-1, keepdims=True)
    c = v - mean
    var = jnp.sum(c * c, axis=-1, keepdims=True) / (v.shape[-1] - 1)
    return p["gain"] / (jnp.sqrt(var) + delta) * c + p["bias"]

  def mha(q_in, kv_in, p, mask):
    B, Sq, D = q_in.shape
    Sk = kv_in.shape[1]
    dk = D // heads
    q = linear(q_in, p["wq"], p["bq"]).reshape(B, Sq, heads, dk).transpose(0, 2, 1, 3)
    k = linear(kv_in, p["wk"], p["bk"]).reshape(B, Sk, heads, dk).transpose(0, 2, 1, 3)
    v = linear(kv_in, p["wv"], p["bv"]).reshape(B, Sk, heads, dk).transpose(0, 2, 1, 3)
    s = jnp.einsum("bhqd,bhkd->bhqk", q, k, precision=HIGH) / math.sqrt(dk)
    s = jnp.where(mask[:, None, :, :] == 0.0, -1e9, s)
    pr = jax.nn.softmax(s, axis=-1)
    o = jnp.einsum("bhqk,bhkd->bhqd", pr, v, precision=HIGH)
    o = o.transpose(0, 2, 1, 3).reshape(B, Sq, D)
    return linear(o, p["wo"], p["bo"])

  x1 = x + mha(ln(x, params["ln0"]), ln(x, params["ln0"]), params["attn0"], decmask)
  x2 = x1 + mha(ln(x1, params["ln1"]), enc_out, params["attn1"], encmask)
  h = jax.nn.relu(linear(ln(x2, params["ln2"]), params["ffn"]["w1"], params["ffn"]["b1"]))
  return x2 + linear(h, params["ffn"]["w2"], params["ffn"]["b2"])


# ----------------------------- parameter init ------------------------------------
def _init_linear(key, fan_in, fan_out):
  kw, kb = jax.random.split(key)
  bound = 1.0 / math.sqrt(fan_in)
  w = jax.random.uniform(kw, (fan_in, fan_out), jnp.float32, -bound, bound)
  b = jax.random.uniform(kb, (fan_out,), jnp.float32, -bound, bound)
  return w, b


def init_params(key, dimension, dff=2048):
  keys = jax.random.split(key, 16)
  params = {}
  for idx, name in enumerate(["attn0", "attn1"]):
    wq, bq = _init_linear(keys[4 * idx + 0], dimension, dimension)
    wk, bk = _init_linear(keys[4 * idx + 1], dimension, dimension)
    wv, bv = _init_linear(keys[4 * idx + 2], dimension, dimension)
    wo, bo = _init_linear(keys[4 * idx + 3], dimension, dimension)
    params[name] = dict(wq=wq, bq=bq, wk=wk, bk=bk, wv=wv, bv=bv, wo=wo, bo=bo)
  w1, b1 = _init_linear(keys[8], dimension, dff)
  w2, b2 = _init_linear(keys[9], dff, dimension)
  params["ffn"] = dict(w1=w1, b1=b1, w2=w2, b2=b2)
  for name in ["ln0", "ln1", "ln2"]:
    params[name] = dict(
        gain=jnp.ones((dimension,), jnp.float32),
        bias=jnp.zeros((dimension,), jnp.float32),
    )
  return params


# ----------------------------- main ------------------------------------------------
if __name__ == "__main__":
  B, S_DEC, S_ENC, D, HEADS = 2, 8, 8, 32, 8
  DFF = 2048  # FeedForwardNet default

  key = jax.random.PRNGKey(0)
  k_x, k_enc, k_p = jax.random.split(key, 3)

  x = jax.random.normal(k_x, (B, S_DEC, D), jnp.float32)
  encoder_output = jax.random.normal(k_enc, (B, S_ENC, D), jnp.float32)
  # causal decoder mask (B, S_dec, S_dec); full encoder mask (B, 1, S_enc)
  decmask = jnp.broadcast_to(
      jnp.tril(jnp.ones((S_DEC, S_DEC), jnp.float32))[None], (B, S_DEC, S_DEC)
  )
  encmask = jnp.ones((B, 1, S_ENC), jnp.float32)

  params = init_params(k_p, D, DFF)

  out = decoder_layer(x, encoder_output, encmask, decmask, params, HEADS)
  jax.block_until_ready(out)
  assert out.shape == (B, S_DEC, D)

  ref = decoder_layer_ref(x, encoder_output, encmask, decmask, params, HEADS)
  max_err = float(jnp.max(jnp.abs(out - ref)))
  # bf16-weight MXU path (default) with fp32 accumulation: ~1e-3-level error vs
  # the fp32 reference.  Set use_bf16=False for near-bit-exact fp32 matmuls.
  assert jnp.allclose(out, ref, rtol=2e-2, atol=2e-2), f"max_err={max_err}"

  print("KERNEL_OK")
</pallas_src>

<mosaic_0001>
module attributes {stable_mosaic.version = 11 : i64} {
  func.func @_decoder_layer_kernel(%arg0: i32, %arg1: memref<2x8x32xf32, #tpu.memory_space<vmem>>, %arg2: memref<2x8x32xf32, #tpu.memory_space<vmem>>, %arg3: memref<2x8x8xf32, #tpu.memory_space<vmem>>, %arg4: memref<2x1x8xf32, #tpu.memory_space<vmem>>, %arg5: memref<1x32xf32, #tpu.memory_space<vmem>>, %arg6: memref<1x32xf32, #tpu.memory_space<vmem>>, %arg7: memref<1x32xf32, #tpu.memory_space<vmem>>, %arg8: memref<1x32xf32, #tpu.memory_space<vmem>>, %arg9: memref<1x32xf32, #tpu.memory_space<vmem>>, %arg10: memref<1x32xf32, #tpu.memory_space<vmem>>, %arg11: memref<32x32xbf16, #tpu.memory_space<vmem>>, %arg12: memref<1x32xf32, #tpu.memory_space<vmem>>, %arg13: memref<32x32xbf16, #tpu.memory_space<vmem>>, %arg14: memref<1x32xf32, #tpu.memory_space<vmem>>, %arg15: memref<32x32xbf16, #tpu.memory_space<vmem>>, %arg16: memref<1x32xf32, #tpu.memory_space<vmem>>, %arg17: memref<32x32xbf16, #tpu.memory_space<vmem>>, %arg18: memref<1x32xf32, #tpu.memory_space<vmem>>, %arg19: memref<32x32xbf16, #tpu.memory_space<vmem>>, %arg20: memref<1x32xf32, #tpu.memory_space<vmem>>, %arg21: memref<32x32xbf16, #tpu.memory_space<vmem>>, %arg22: memref<1x32xf32, #tpu.memory_space<vmem>>, %arg23: memref<32x32xbf16, #tpu.memory_space<vmem>>, %arg24: memref<1x32xf32, #tpu.memory_space<vmem>>, %arg25: memref<32x32xbf16, #tpu.memory_space<vmem>>, %arg26: memref<1x32xf32, #tpu.memory_space<vmem>>, %arg27: memref<32x2048xbf16, #tpu.memory_space<vmem>>, %arg28: memref<1x2048xf32, #tpu.memory_space<vmem>>, %arg29: memref<2048x32xbf16, #tpu.memory_space<vmem>>, %arg30: memref<1x32xf32, #tpu.memory_space<vmem>>, %arg31: memref<2x8x32xf32, #tpu.memory_space<vmem>>) attributes {dimension_semantics = [#tpu.dimension_semantics<parallel>], iteration_bounds = array<i64: 1>, scalar_prefetch = 0 : i64, scratch_operands = 0 : i64, tpu.core_type = #tpu.core_type<tc>, window_params = [{transform_indices = @transform_0, window_bounds = array<i64: 2, 8, 32>}, {transform_indices = @transform_1, window_bounds = array<i64: 2, 8, 32>}, {transform_indices = @transform_2, window_bounds = array<i64: 2, 8, 8>}, {transform_indices = @transform_3, window_bounds = array<i64: 2, 1, 8>}, {pipeline_mode = #tpu.pipeline_mode<synchronous>, transform_indices = @transform_4, window_bounds = array<i64: 1, 32>}, {pipeline_mode = #tpu.pipeline_mode<synchronous>, transform_indices = @transform_5, window_bounds = array<i64: 1, 32>}, {pipeline_mode = #tpu.pipeline_mode<synchronous>, transform_indices = @transform_6, window_bounds = array<i64: 1, 32>}, {pipeline_mode = #tpu.pipeline_mode<synchronous>, transform_indices = @transform_7, window_bounds = array<i64: 1, 32>}, {pipeline_mode = #tpu.pipeline_mode<synchronous>, transform_indices = @transform_8, window_bounds = array<i64: 1, 32>}, {pipeline_mode = #tpu.pipeline_mode<synchronous>, transform_indices = @transform_9, window_bounds = array<i64: 1, 32>}, {pipeline_mode = #tpu.pipeline_mode<synchronous>, transform_indices = @transform_10, window_bounds = array<i64: 32, 32>}, {pipeline_mode = #tpu.pipeline_mode<synchronous>, transform_indices = @transform_11, window_bounds = array<i64: 1, 32>}, {pipeline_mode = #tpu.pipeline_mode<synchronous>, transform_indices = @transform_12, window_bounds = array<i64: 32, 32>}, {pipeline_mode = #tpu.pipeline_mode<synchronous>, transform_indices = @transform_13, window_bounds = array<i64: 1, 32>}, {pipeline_mode = #tpu.pipeline_mode<synchronous>, transform_indices = @transform_14, window_bounds = array<i64: 32, 32>}, {pipeline_mode = #tpu.pipeline_mode<synchronous>, transform_indices = @transform_15, window_bounds = array<i64: 1, 32>}, {pipeline_mode = #tpu.pipeline_mode<synchronous>, transform_indices = @transform_16, window_bounds = array<i64: 32, 32>}, {pipeline_mode = #tpu.pipeline_mode<synchronous>, transform_indices = @transform_17, window_bounds = array<i64: 1, 32>}, {pipeline_mode = #tpu.pipeline_mode<synchronous>, transform_indices = @transform_18, window_bounds = array<i64: 32, 32>}, {pipeline_mode = #tpu.pipeline_mode<synchronous>, transform_indices = @transform_19, window_bounds = array<i64: 1, 32>}, {pipeline_mode = #tpu.pipeline_mode<synchronous>, transform_indices = @transform_20, window_bounds = array<i64: 32, 32>}, {pipeline_mode = #tpu.pipeline_mode<synchronous>, transform_indices = @transform_21, window_bounds = array<i64: 1, 32>}, {pipeline_mode = #tpu.pipeline_mode<synchronous>, transform_indices = @transform_22, window_bounds = array<i64: 32, 32>}, {pipeline_mode = #tpu.pipeline_mode<synchronous>, transform_indices = @transform_23, window_bounds = array<i64: 1, 32>}, {pipeline_mode = #tpu.pipeline_mode<synchronous>, transform_indices = @transform_24, window_bounds = array<i64: 32, 32>}, {pipeline_mode = #tpu.pipeline_mode<synchronous>, transform_indices = @transform_25, window_bounds = array<i64: 1, 32>}, {pipeline_mode = #tpu.pipeline_mode<synchronous>, transform_indices = @transform_26, window_bounds = array<i64: 32, 2048>}, {pipeline_mode = #tpu.pipeline_mode<synchronous>, transform_indices = @transform_27, window_bounds = array<i64: 1, 2048>}, {pipeline_mode = #tpu.pipeline_mode<synchronous>, transform_indices = @transform_28, window_bounds = array<i64: 2048, 32>}, {pipeline_mode = #tpu.pipeline_mode<synchronous>, transform_indices = @transform_29, window_bounds = array<i64: 1, 32>}, {transform_indices = @transform_30, window_bounds = array<i64: 2, 8, 32>}]} {
    %c0 = arith.constant 0 : index
    %c0_0 = arith.constant 0 : index
    %c0_1 = arith.constant 0 : index
    %0 = vector.load %arg1[%c0, %c0_0, %c0_1] : memref<2x8x32xf32, #tpu.memory_space<vmem>>, vector<2x8x32xf32>
    %1 = vector.shape_cast %0 : vector<2x8x32xf32> to vector<16x32xf32>
    %c0_2 = arith.constant 0 : index
    %c0_3 = arith.constant 0 : index
    %c0_4 = arith.constant 0 : index
    %2 = vector.load %arg2[%c0_2, %c0_3, %c0_4] : memref<2x8x32xf32, #tpu.memory_space<vmem>>, vector<2x8x32xf32>
    %3 = vector.shape_cast %2 : vector<2x8x32xf32> to vector<16x32xf32>
    %c0_5 = arith.constant 0 : index
    %c0_6 = arith.constant 0 : index
    %c0_7 = arith.constant 0 : index
    %4 = vector.load %arg3[%c0_5, %c0_6, %c0_7] : memref<2x8x8xf32, #tpu.memory_space<vmem>>, vector<2x8x8xf32>
    %cst = arith.constant 0.000000e+00 : f32
    %5 = vector.broadcast %cst : f32 to vector<2x8x8xf32>
    %6 = arith.cmpf oeq, %4, %5 : vector<2x8x8xf32>
    %cst_8 = arith.constant -1.000000e+09 : f32
    %cst_9 = arith.constant 0.000000e+00 : f32
    %7 = vector.broadcast %cst_8 : f32 to vector<2x8x8xf32>
    %8 = vector.broadcast %cst_9 : f32 to vector<2x8x8xf32>
    %9 = arith.select %6, %7, %8 : vector<2x8x8xi1>, vector<2x8x8xf32>
    %c0_10 = arith.constant 0 : index
    %c0_11 = arith.constant 0 : index
    %c0_12 = arith.constant 0 : index
    %10 = vector.load %arg4[%c0_10, %c0_11, %c0_12] : memref<2x1x8xf32, #tpu.memory_space<vmem>>, vector<2x1x8xf32>
    %cst_13 = arith.constant 0.000000e+00 : f32
    %11 = vector.broadcast %cst_13 : f32 to vector<2x1x8xf32>
    %12 = arith.cmpf oeq, %10, %11 : vector<2x1x8xf32>
    %cst_14 = arith.constant -1.000000e+09 : f32
    %cst_15 = arith.constant 0.000000e+00 : f32
    %13 = vector.broadcast %cst_14 : f32 to vector<2x1x8xf32>
    %14 = vector.broadcast %cst_15 : f32 to vector<2x1x8xf32>
    %15 = arith.select %12, %13, %14 : vector<2x1x8xi1>, vector<2x1x8xf32>
    %cst_16 = arith.constant dense<0.000000e+00> : vector<16xf32>
    %16 = vector.multi_reduction <add>, %1, %cst_16 [1] : vector<16x32xf32> to vector<16xf32>
    %17 = vector.shape_cast %16 : vector<16xf32> to vector<16x1xf32>
    %cst_17 = arith.constant 3.200000e+01 : f32
    %18 = vector.broadcast %cst_17 : f32 to vector<16x1xf32>
    %19 = arith.divf %17, %18 : vector<16x1xf32>
    %20 = vector.broadcast %19 : vector<16x1xf32> to vector<16x32xf32>
    %21 = arith.subf %1, %20 : vector<16x32xf32>
    %22 = arith.mulf %21, %21 : vector<16x32xf32>
    %cst_18 = arith.constant dense<0.000000e+00> : vector<16xf32>
    %23 = vector.multi_reduction <add>, %22, %cst_18 [1] : vector<16x32xf32> to vector<16xf32>
    %24 = vector.shape_cast %23 : vector<16xf32> to vector<16x1xf32>
    %cst_19 = arith.constant 0.0322580636 : f32
    %25 = vector.broadcast %cst_19 : f32 to vector<16x1xf32>
    %26 = arith.mulf %24, %25 : vector<16x1xf32>
    %27 = math.sqrt %26 : vector<16x1xf32>
    %cst_20 = arith.constant 9.99999997E-7 : f32
    %28 = vector.broadcast %cst_20 : f32 to vector<16x1xf32>
    %29 = arith.addf %27, %28 : vector<16x1xf32>
    %30 = tpu.reciprocal %29 : vector<16x1xf32> -> vector<16x1xf32>
    %c0_21 = arith.constant 0 : index
    %c0_22 = arith.constant 0 : index
    %31 = vector.load %arg5[%c0_21, %c0_22] : memref<1x32xf32, #tpu.memory_space<vmem>>, vector<1x32xf32>
    %32 = vector.broadcast %31 : vector<1x32xf32> to vector<16x32xf32>
    %33 = vector.broadcast %30 : vector<16x1xf32> to vector<16x32xf32>
    %34 = arith.mulf %32, %33 : vector<16x32xf32>
    %35 = arith.mulf %34, %21 : vector<16x32xf32>
    %c0_23 = arith.constant 0 : index
    %c0_24 = arith.constant 0 : index
    %36 = vector.load %arg6[%c0_23, %c0_24] : memref<1x32xf32, #tpu.memory_space<vmem>>, vector<1x32xf32>
    %37 = vector.broadcast %36 : vector<1x32xf32> to vector<16x32xf32>
    %38 = arith.addf %35, %37 : vector<16x32xf32>
    %39 = arith.truncf %38 : vector<16x32xf32> to vector<16x32xbf16>
    %c0_25 = arith.constant 0 : index
    %c0_26 = arith.constant 0 : index
    %40 = vector.load %arg11[%c0_25, %c0_26] : memref<32x32xbf16, #tpu.memory_space<vmem>>, vector<32x32xbf16>
    %cst_27 = arith.constant dense<0.000000e+00> : vector<16x32xf32>
    %41 = tpu.matmul %39, %40, %cst_27 {dimension_numbers = #tpu.dot_dimension_numbers<[1], [0], [0], [1], [0, 0, 1, 1], [], []>} : vector<16x32xbf16>, vector<32x32xbf16>, vector<16x32xf32> -> vector<16x32xf32>
    %c0_28 = arith.constant 0 : index
    %c0_29 = arith.constant 0 : index
    %42 = vector.load %arg12[%c0_28, %c0_29] : memref<1x32xf32, #tpu.memory_space<vmem>>, vector<1x32xf32>
    %43 = vector.broadcast %42 : vector<1x32xf32> to vector<16x32xf32>
    %44 = arith.addf %41, %43 : vector<16x32xf32>
    %45 = arith.truncf %38 : vector<16x32xf32> to vector<16x32xbf16>
    %c0_30 = arith.constant 0 : index
    %c0_31 = arith.constant 0 : index
    %46 = vector.load %arg13[%c0_30, %c0_31] : memref<32x32xbf16, #tpu.memory_space<vmem>>, vector<32x32xbf16>
    %cst_32 = arith.constant dense<0.000000e+00> : vector<16x32xf32>
    %47 = tpu.matmul %45, %46, %cst_32 {dimension_numbers = #tpu.dot_dimension_numbers<[1], [0], [0], [1], [0, 0, 1, 1], [], []>} : vector<16x32xbf16>, vector<32x32xbf16>, vector<16x32xf32> -> vector<16x32xf32>
    %c0_33 = arith.constant 0 : index
    %c0_34 = arith.constant 0 : index
    %48 = vector.load %arg14[%c0_33, %c0_34] : memref<1x32xf32, #tpu.memory_space<vmem>>, vector<1x32xf32>
    %49 = vector.broadcast %48 : vector<1x32xf32> to vector<16x32xf32>
    %50 = arith.addf %47, %49 : vector<16x32xf32>
    %51 = arith.truncf %38 : vector<16x32xf32> to vector<16x32xbf16>
    %c0_35 = arith.constant 0 : index
    %c0_36 = arith.constant 0 : index
    %52 = vector.load %arg15[%c0_35, %c0_36] : memref<32x32xbf16, #tpu.memory_space<vmem>>, vector<32x32xbf16>
    %cst_37 = arith.constant dense<0.000000e+00> : vector<16x32xf32>
    %53 = tpu.matmul %51, %52, %cst_37 {dimension_numbers = #tpu.dot_dimension_numbers<[1], [0], [0], [1], [0, 0, 1, 1], [], []>} : vector<16x32xbf16>, vector<32x32xbf16>, vector<16x32xf32> -> vector<16x32xf32>
    %c0_38 = arith.constant 0 : index
    %c0_39 = arith.constant 0 : index
    %54 = vector.load %arg16[%c0_38, %c0_39] : memref<1x32xf32, #tpu.memory_space<vmem>>, vector<1x32xf32>
    %55 = vector.broadcast %54 : vector<1x32xf32> to vector<16x32xf32>
    %56 = arith.addf %53, %55 : vector<16x32xf32>
    %57 = arith.truncf %44 : vector<16x32xf32> to vector<16x32xbf16>
    %58 = arith.truncf %50 : vector<16x32xf32> to vector<16x32xbf16>
    %59 = arith.truncf %56 : vector<16x32xf32> to vector<16x32xbf16>
    %60 = vector.shape_cast %57 : vector<16x32xbf16> to vector<2x8x32xbf16>
    %61 = vector.shape_cast %58 : vector<16x32xbf16> to vector<2x8x32xbf16>
    %62 = vector.shape_cast %59 : vector<16x32xbf16> to vector<2x8x32xbf16>
    %63 = vector.extract_strided_slice %60 {offsets = [0, 0, 0], sizes = [2, 8, 4], strides = [1, 1, 1]} : vector<2x8x32xbf16> to vector<2x8x4xbf16>
    %64 = vector.extract_strided_slice %61 {offsets = [0, 0, 0], sizes = [2, 8, 4], strides = [1, 1, 1]} : vector<2x8x32xbf16> to vector<2x8x4xbf16>
    "tpu.trace_start"() <{level = 10 : i32, message = "bqd,bkd->bqk"}> : () -> ()
    %cst_40 = arith.constant dense<0.000000e+00> : vector<2x8x8xf32>
    %65 = tpu.matmul %63, %64, %cst_40 {dimension_numbers = #tpu.dot_dimension_numbers<[2], [2], [1], [1], [0, 0, 0, 1, 1, 1], [0], [0]>} : vector<2x8x4xbf16>, vector<2x8x4xbf16>, vector<2x8x8xf32> -> vector<2x8x8xf32>
    "tpu.trace_stop"() : () -> ()
    %cst_41 = arith.constant 5.000000e-01 : f32
    %66 = vector.broadcast %cst_41 : f32 to vector<2x8x8xf32>
    %67 = arith.mulf %65, %66 : vector<2x8x8xf32>
    %68 = arith.addf %67, %9 : vector<2x8x8xf32>
    %cst_42 = arith.constant dense<0xFF800000> : vector<2x8xf32>
    %69 = vector.multi_reduction <maximumf>, %68, %cst_42 [2] : vector<2x8x8xf32> to vector<2x8xf32>
    %70 = vector.shape_cast %69 : vector<2x8xf32> to vector<2x8x1xf32>
    %71 = vector.broadcast %70 : vector<2x8x1xf32> to vector<2x8x8xf32>
    %72 = arith.subf %68, %71 : vector<2x8x8xf32>
    %73 = math.exp %72 : vector<2x8x8xf32>
    %cst_43 = arith.constant dense<0.000000e+00> : vector<2x8xf32>
    %74 = vector.multi_reduction <add>, %73, %cst_43 [2] : vector<2x8x8xf32> to vector<2x8xf32>
    %75 = vector.shape_cast %74 : vector<2x8xf32> to vector<2x8x1xf32>
    %76 = tpu.reciprocal %75 {approx = true} : vector<2x8x1xf32> -> vector<2x8x1xf32>
    %77 = vector.broadcast %76 : vector<2x8x1xf32> to vector<2x8x8xf32>
    %78 = arith.mulf %73, %77 : vector<2x8x8xf32>
    %79 = arith.truncf %78 : vector<2x8x8xf32> to vector<2x8x8xbf16>
    %80 = vector.extract_strided_slice %62 {offsets = [0, 0, 0], sizes = [2, 8, 4], strides = [1, 1, 1]} : vector<2x8x32xbf16> to vector<2x8x4xbf16>
    "tpu.trace_start"() <{level = 10 : i32, message = "bqk,bkd->bqd"}> : () -> ()
    %cst_44 = arith.constant dense<0.000000e+00> : vector<2x8x4xf32>
    %81 = tpu.matmul %79, %80, %cst_44 {dimension_numbers = #tpu.dot_dimension_numbers<[2], [1], [1], [2], [0, 0, 0, 1, 1, 2], [0], [0]>} : vector<2x8x8xbf16>, vector<2x8x4xbf16>, vector<2x8x4xf32> -> vector<2x8x4xf32>
    "tpu.trace_stop"() : () -> ()
    %82 = vector.extract_strided_slice %60 {offsets = [0, 0, 4], sizes = [2, 8, 4], strides = [1, 1, 1]} : vector<2x8x32xbf16> to vector<2x8x4xbf16>
    %83 = vector.extract_strided_slice %61 {offsets = [0, 0, 4], sizes = [2, 8, 4], strides = [1, 1, 1]} : vector<2x8x32xbf16> to vector<2x8x4xbf16>
    "tpu.trace_start"() <{level = 10 : i32, message = "bqd,bkd->bqk"}> : () -> ()
    %cst_45 = arith.constant dense<0.000000e+00> : vector<2x8x8xf32>
    %84 = tpu.matmul %82, %83, %cst_45 {dimension_numbers = #tpu.dot_dimension_numbers<[2], [2], [1], [1], [0, 0, 0, 1, 1, 1], [0], [0]>} : vector<2x8x4xbf16>, vector<2x8x4xbf16>, vector<2x8x8xf32> -> vector<2x8x8xf32>
    "tpu.trace_stop"() : () -> ()
    %cst_46 = arith.constant 5.000000e-01 : f32
    %85 = vector.broadcast %cst_46 : f32 to vector<2x8x8xf32>
    %86 = arith.mulf %84, %85 : vector<2x8x8xf32>
    %87 = arith.addf %86, %9 : vector<2x8x8xf32>
    %cst_47 = arith.constant dense<0xFF800000> : vector<2x8xf32>
    %88 = vector.multi_reduction <maximumf>, %87, %cst_47 [2] : vector<2x8x8xf32> to vector<2x8xf32>
    %89 = vector.shape_cast %88 : vector<2x8xf32> to vector<2x8x1xf32>
    %90 = vector.broadcast %89 : vector<2x8x1xf32> to vector<2x8x8xf32>
    %91 = arith.subf %87, %90 : vector<2x8x8xf32>
    %92 = math.exp %91 : vector<2x8x8xf32>
    %cst_48 = arith.constant dense<0.000000e+00> : vector<2x8xf32>
    %93 = vector.multi_reduction <add>, %92, %cst_48 [2] : vector<2x8x8xf32> to vector<2x8xf32>
    %94 = vector.shape_cast %93 : vector<2x8xf32> to vector<2x8x1xf32>
    %95 = tpu.reciprocal %94 {approx = true} : vector<2x8x1xf32> -> vector<2x8x1xf32>
    %96 = vector.broadcast %95 : vector<2x8x1xf32> to vector<2x8x8xf32>
    %97 = arith.mulf %92, %96 : vector<2x8x8xf32>
    %98 = arith.truncf %97 : vector<2x8x8xf32> to vector<2x8x8xbf16>
    %99 = vector.extract_strided_slice %62 {offsets = [0, 0, 4], sizes = [2, 8, 4], strides = [1, 1, 1]} : vector<2x8x32xbf16> to vector<2x8x4xbf16>
    "tpu.trace_start"() <{level = 10 : i32, message = "bqk,bkd->bqd"}> : () -> ()
    %cst_49 = arith.constant dense<0.000000e+00> : vector<2x8x4xf32>
    %100 = tpu.matmul %98, %99, %cst_49 {dimension_numbers = #tpu.dot_dimension_numbers<[2], [1], [1], [2], [0, 0, 0, 1, 1, 2], [0], [0]>} : vector<2x8x8xbf16>, vector<2x8x4xbf16>, vector<2x8x4xf32> -> vector<2x8x4xf32>
    "tpu.trace_stop"() : () -> ()
    %101 = vector.extract_strided_slice %60 {offsets = [0, 0, 8], sizes = [2, 8, 4], strides = [1, 1, 1]} : vector<2x8x32xbf16> to vector<2x8x4xbf16>
    %102 = vector.extract_strided_slice %61 {offsets = [0, 0, 8], sizes = [2, 8, 4], strides = [1, 1, 1]} : vector<2x8x32xbf16> to vector<2x8x4xbf16>
    "tpu.trace_start"() <{level = 10 : i32, message = "bqd,bkd->bqk"}> : () -> ()
    %cst_50 = arith.constant dense<0.000000e+00> : vector<2x8x8xf32>
    %103 = tpu.matmul %101, %102, %cst_50 {dimension_numbers = #tpu.dot_dimension_numbers<[2], [2], [1], [1], [0, 0, 0, 1, 1, 1], [0], [0]>} : vector<2x8x4xbf16>, vector<2x8x4xbf16>, vector<2x8x8xf32> -> vector<2x8x8xf32>
    "tpu.trace_stop"() : () -> ()
    %cst_51 = arith.constant 5.000000e-01 : f32
    %104 = vector.broadcast %cst_51 : f32 to vector<2x8x8xf32>
    %105 = arith.mulf %103, %104 : vector<2x8x8xf32>
    %106 = arith.addf %105, %9 : vector<2x8x8xf32>
    %cst_52 = arith.constant dense<0xFF800000> : vector<2x8xf32>
    %107 = vector.multi_reduction <maximumf>, %106, %cst_52 [2] : vector<2x8x8xf32> to vector<2x8xf32>
    %108 = vector.shape_cast %107 : vector<2x8xf32> to vector<2x8x1xf32>
    %109 = vector.broadcast %108 : vector<2x8x1xf32> to vector<2x8x8xf32>
    %110 = arith.subf %106, %109 : vector<2x8x8xf32>
    %111 = math.exp %110 : vector<2x8x8xf32>
    %cst_53 = arith.constant dense<0.000000e+00> : vector<2x8xf32>
    %112 = vector.multi_reduction <add>, %111, %cst_53 [2] : vector<2x8x8xf32> to vector<2x8xf32>
    %113 = vector.shape_cast %112 : vector<2x8xf32> to vector<2x8x1xf32>
    %114 = tpu.reciprocal %113 {approx = true} : vector<2x8x1xf32> -> vector<2x8x1xf32>
    %115 = vector.broadcast %114 : vector<2x8x1xf32> to vector<2x8x8xf32>
    %116 = arith.mulf %111, %115 : vector<2x8x8xf32>
    %117 = arith.truncf %116 : vector<2x8x8xf32> to vector<2x8x8xbf16>
    %118 = vector.extract_strided_slice %62 {offsets = [0, 0, 8], sizes = [2, 8, 4], strides = [1, 1, 1]} : vector<2x8x32xbf16> to vector<2x8x4xbf16>
    "tpu.trace_start"() <{level = 10 : i32, message = "bqk,bkd->bqd"}> : () -> ()
    %cst_54 = arith.constant dense<0.000000e+00> : vector<2x8x4xf32>
    %119 = tpu.matmul %117, %118, %cst_54 {dimension_numbers = #tpu.dot_dimension_numbers<[2], [1], [1], [2], [0, 0, 0, 1, 1, 2], [0], [0]>} : vector<2x8x8xbf16>, vector<2x8x4xbf16>, vector<2x8x4xf32> -> vector<2x8x4xf32>
    "tpu.trace_stop"() : () -> ()
    %120 = vector.extract_strided_slice %60 {offsets = [0, 0, 12], sizes = [2, 8, 4], strides = [1, 1, 1]} : vector<2x8x32xbf16> to vector<2x8x4xbf16>
    %121 = vector.extract_strided_slice %61 {offsets = [0, 0, 12], sizes = [2, 8, 4], strides = [1, 1, 1]} : vector<2x8x32xbf16> to vector<2x8x4xbf16>
    "tpu.trace_start"() <{level = 10 : i32, message = "bqd,bkd->bqk"}> : () -> ()
    %cst_55 = arith.constant dense<0.000000e+00> : vector<2x8x8xf32>
    %122 = tpu.matmul %120, %121, %cst_55 {dimension_numbers = #tpu.dot_dimension_numbers<[2], [2], [1], [1], [0, 0, 0, 1, 1, 1], [0], [0]>} : vector<2x8x4xbf16>, vector<2x8x4xbf16>, vector<2x8x8xf32> -> vector<2x8x8xf32>
    "tpu.trace_stop"() : () -> ()
    %cst_56 = arith.constant 5.000000e-01 : f32
    %123 = vector.broadcast %cst_56 : f32 to vector<2x8x8xf32>
    %124 = arith.mulf %122, %123 : vector<2x8x8xf32>
    %125 = arith.addf %124, %9 : vector<2x8x8xf32>
    %cst_57 = arith.constant dense<0xFF800000> : vector<2x8xf32>
    %126 = vector.multi_reduction <maximumf>, %125, %cst_57 [2] : vector<2x8x8xf32> to vector<2x8xf32>
    %127 = vector.shape_cast %126 : vector<2x8xf32> to vector<2x8x1xf32>
    %128 = vector.broadcast %127 : vector<2x8x1xf32> to vector<2x8x8xf32>
    %129 = arith.subf %125, %128 : vector<2x8x8xf32>
    %130 = math.exp %129 : vector<2x8x8xf32>
    %cst_58 = arith.constant dense<0.000000e+00> : vector<2x8xf32>
    %131 = vector.multi_reduction <add>, %130, %cst_58 [2] : vector<2x8x8xf32> to vector<2x8xf32>
    %132 = vector.shape_cast %131 : vector<2x8xf32> to vector<2x8x1xf32>
    %133 = tpu.reciprocal %132 {approx = true} : vector<2x8x1xf32> -> vector<2x8x1xf32>
    %134 = vector.broadcast %133 : vector<2x8x1xf32> to vector<2x8x8xf32>
    %135 = arith.mulf %130, %134 : vector<2x8x8xf32>
    %136 = arith.truncf %135 : vector<2x8x8xf32> to vector<2x8x8xbf16>
    %137 = vector.extract_strided_slice %62 {offsets = [0, 0, 12], sizes = [2, 8, 4], strides = [1, 1, 1]} : vector<2x8x32xbf16> to vector<2x8x4xbf16>
    "tpu.trace_start"() <{level = 10 : i32, message = "bqk,bkd->bqd"}> : () -> ()
    %cst_59 = arith.constant dense<0.000000e+00> : vector<2x8x4xf32>
    %138 = tpu.matmul %136, %137, %cst_59 {dimension_numbers = #tpu.dot_dimension_numbers<[2], [1], [1], [2], [0, 0, 0, 1, 1, 2], [0], [0]>} : vector<2x8x8xbf16>, vector<2x8x4xbf16>, vector<2x8x4xf32> -> vector<2x8x4xf32>
    "tpu.trace_stop"() : () -> ()
    %139 = vector.extract_strided_slice %60 {offsets = [0, 0, 16], sizes = [2, 8, 4], strides = [1, 1, 1]} : vector<2x8x32xbf16> to vector<2x8x4xbf16>
    %140 = vector.extract_strided_slice %61 {offsets = [0, 0, 16], sizes = [2, 8, 4], strides = [1, 1, 1]} : vector<2x8x32xbf16> to vector<2x8x4xbf16>
    "tpu.trace_start"() <{level = 10 : i32, message = "bqd,bkd->bqk"}> : () -> ()
    %cst_60 = arith.constant dense<0.000000e+00> : vector<2x8x8xf32>
    %141 = tpu.matmul %139, %140, %cst_60 {dimension_numbers = #tpu.dot_dimension_numbers<[2], [2], [1], [1], [0, 0, 0, 1, 1, 1], [0], [0]>} : vector<2x8x4xbf16>, vector<2x8x4xbf16>, vector<2x8x8xf32> -> vector<2x8x8xf32>
    "tpu.trace_stop"() : () -> ()
    %cst_61 = arith.constant 5.000000e-01 : f32
    %142 = vector.broadcast %cst_61 : f32 to vector<2x8x8xf32>
    %143 = arith.mulf %141, %142 : vector<2x8x8xf32>
    %144 = arith.addf %143, %9 : vector<2x8x8xf32>
    %cst_62 = arith.constant dense<0xFF800000> : vector<2x8xf32>
    %145 = vector.multi_reduction <maximumf>, %144, %cst_62 [2] : vector<2x8x8xf32> to vector<2x8xf32>
    %146 = vector.shape_cast %145 : vector<2x8xf32> to vector<2x8x1xf32>
    %147 = vector.broadcast %146 : vector<2x8x1xf32> to vector<2x8x8xf32>
    %148 = arith.subf %144, %147 : vector<2x8x8xf32>
    %149 = math.exp %148 : vector<2x8x8xf32>
    %cst_63 = arith.constant dense<0.000000e+00> : vector<2x8xf32>
    %150 = vector.multi_reduction <add>, %149, %cst_63 [2] : vector<2x8x8xf32> to vector<2x8xf32>
    %151 = vector.shape_cast %150 : vector<2x8xf32> to vector<2x8x1xf32>
    %152 = tpu.reciprocal %151 {approx = true} : vector<2x8x1xf32> -> vector<2x8x1xf32>
    %153 = vector.broadcast %152 : vector<2x8x1xf32> to vector<2x8x8xf32>
    %154 = arith.mulf %149, %153 : vector<2x8x8xf32>
    %155 = arith.truncf %154 : vector<2x8x8xf32> to vector<2x8x8xbf16>
    %156 = vector.extract_strided_slice %62 {offsets = [0, 0, 16], sizes = [2, 8, 4], strides = [1, 1, 1]} : vector<2x8x32xbf16> to vector<2x8x4xbf16>
    "tpu.trace_start"() <{level = 10 : i32, message = "bqk,bkd->bqd"}> : () -> ()
    %cst_64 = arith.constant dense<0.000000e+00> : vector<2x8x4xf32>
    %157 = tpu.matmul %155, %156, %cst_64 {dimension_numbers = #tpu.dot_dimension_numbers<[2], [1], [1], [2], [0, 0, 0, 1, 1, 2], [0], [0]>} : vector<2x8x8xbf16>, vector<2x8x4xbf16>, vector<2x8x4xf32> -> vector<2x8x4xf32>
    "tpu.trace_stop"() : () -> ()
    %158 = vector.extract_strided_slice %60 {offsets = [0, 0, 20], sizes = [2, 8, 4], strides = [1, 1, 1]} : vector<2x8x32xbf16> to vector<2x8x4xbf16>
    %159 = vector.extract_strided_slice %61 {offsets = [0, 0, 20], sizes = [2, 8, 4], strides = [1, 1, 1]} : vector<2x8x32xbf16> to vector<2x8x4xbf16>
    "tpu.trace_start"() <{level = 10 : i32, message = "bqd,bkd->bqk"}> : () -> ()
    %cst_65 = arith.constant dense<0.000000e+00> : vector<2x8x8xf32>
    %160 = tpu.matmul %158, %159, %cst_65 {dimension_numbers = #tpu.dot_dimension_numbers<[2], [2], [1], [1], [0, 0, 0, 1, 1, 1], [0], [0]>} : vector<2x8x4xbf16>, vector<2x8x4xbf16>, vector<2x8x8xf32> -> vector<2x8x8xf32>
    "tpu.trace_stop"() : () -> ()
    %cst_66 = arith.constant 5.000000e-01 : f32
    %161 = vector.broadcast %cst_66 : f32 to vector<2x8x8xf32>
    %162 = arith.mulf %160, %161 : vector<2x8x8xf32>
    %163 = arith.addf %162, %9 : vector<2x8x8xf32>
    %cst_67 = arith.constant dense<0xFF800000> : vector<2x8xf32>
    %164 = vector.multi_reduction <maximumf>, %163, %cst_67 [2] : vector<2x8x8xf32> to vector<2x8xf32>
    %165 = vector.shape_cast %164 : vector<2x8xf32> to vector<2x8x1xf32>
    %166 = vector.broadcast %165 : vector<2x8x1xf32> to vector<2x8x8xf32>
    %167 = arith.subf %163, %166 : vector<2x8x8xf32>
    %168 = math.exp %167 : vector<2x8x8xf32>
    %cst_68 = arith.constant dense<0.000000e+00> : vector<2x8xf32>
    %169 = vector.multi_reduction <add>, %168, %cst_68 [2] : vector<2x8x8xf32> to vector<2x8xf32>
    %170 = vector.shape_cast %169 : vector<2x8xf32> to vector<2x8x1xf32>
    %171 = tpu.reciprocal %170 {approx = true} : vector<2x8x1xf32> -> vector<2x8x1xf32>
    %172 = vector.broadcast %171 : vector<2x8x1xf32> to vector<2x8x8xf32>
    %173 = arith.mulf %168, %172 : vector<2x8x8xf32>
    %174 = arith.truncf %173 : vector<2x8x8xf32> to vector<2x8x8xbf16>
    %175 = vector.extract_strided_slice %62 {offsets = [0, 0, 20], sizes = [2, 8, 4], strides = [1, 1, 1]} : vector<2x8x32xbf16> to vector<2x8x4xbf16>
    "tpu.trace_start"() <{level = 10 : i32, message = "bqk,bkd->bqd"}> : () -> ()
    %cst_69 = arith.constant dense<0.000000e+00> : vector<2x8x4xf32>
    %176 = tpu.matmul %174, %175, %cst_69 {dimension_numbers = #tpu.dot_dimension_numbers<[2], [1], [1], [2], [0, 0, 0, 1, 1, 2], [0], [0]>} : vector<2x8x8xbf16>, vector<2x8x4xbf16>, vector<2x8x4xf32> -> vector<2x8x4xf32>
    "tpu.trace_stop"() : () -> ()
    %177 = vector.extract_strided_slice %60 {offsets = [0, 0, 24], sizes = [2, 8, 4], strides = [1, 1, 1]} : vector<2x8x32xbf16> to vector<2x8x4xbf16>
    %178 = vector.extract_strided_slice %61 {offsets = [0, 0, 24], sizes = [2, 8, 4], strides = [1, 1, 1]} : vector<2x8x32xbf16> to vector<2x8x4xbf16>
    "tpu.trace_start"() <{level = 10 : i32, message = "bqd,bkd->bqk"}> : () -> ()
    %cst_70 = arith.constant dense<0.000000e+00> : vector<2x8x8xf32>
    %179 = tpu.matmul %177, %178, %cst_70 {dimension_numbers = #tpu.dot_dimension_numbers<[2], [2], [1], [1], [0, 0, 0, 1, 1, 1], [0], [0]>} : vector<2x8x4xbf16>, vector<2x8x4xbf16>, vector<2x8x8xf32> -> vector<2x8x8xf32>
    "tpu.trace_stop"() : () -> ()
    %cst_71 = arith.constant 5.000000e-01 : f32
    %180 = vector.broadcast %cst_71 : f32 to vector<2x8x8xf32>
    %181 = arith.mulf %179, %180 : vector<2x8x8xf32>
    %182 = arith.addf %181, %9 : vector<2x8x8xf32>
    %cst_72 = arith.constant dense<0xFF800000> : vector<2x8xf32>
    %183 = vector.multi_reduction <maximumf>, %182, %cst_72 [2] : vector<2x8x8xf32> to vector<2x8xf32>
    %184 = vector.shape_cast %183 : vector<2x8xf32> to vector<2x8x1xf32>
    %185 = vector.broadcast %184 : vector<2x8x1xf32> to vector<2x8x8xf32>
    %186 = arith.subf %182, %185 : vector<2x8x8xf32>
    %187 = math.exp %186 : vector<2x8x8xf32>
    %cst_73 = arith.constant dense<0.000000e+00> : vector<2x8xf32>
    %188 = vector.multi_reduction <add>, %187, %cst_73 [2] : vector<2x8x8xf32> to vector<2x8xf32>
    %189 = vector.shape_cast %188 : vector<2x8xf32> to vector<2x8x1xf32>
    %190 = tpu.reciprocal %189 {approx = true} : vector<2x8x1xf32> -> vector<2x8x1xf32>
    %191 = vector.broadcast %190 : vector<2x8x1xf32> to vector<2x8x8xf32>
    %192 = arith.mulf %187, %191 : vector<2x8x8xf32>
    %193 = arith.truncf %192 : vector<2x8x8xf32> to vector<2x8x8xbf16>
    %194 = vector.extract_strided_slice %62 {offsets = [0, 0, 24], sizes = [2, 8, 4], strides = [1, 1, 1]} : vector<2x8x32xbf16> to vector<2x8x4xbf16>
    "tpu.trace_start"() <{level = 10 : i32, message = "bqk,bkd->bqd"}> : () -> ()
    %cst_74 = arith.constant dense<0.000000e+00> : vector<2x8x4xf32>
    %195 = tpu.matmul %193, %194, %cst_74 {dimension_numbers = #tpu.dot_dimension_numbers<[2], [1], [1], [2], [0, 0, 0, 1, 1, 2], [0], [0]>} : vector<2x8x8xbf16>, vector<2x8x4xbf16>, vector<2x8x4xf32> -> vector<2x8x4xf32>
    "tpu.trace_stop"() : () -> ()
    %196 = vector.extract_strided_slice %60 {offsets = [0, 0, 28], sizes = [2, 8, 4], strides = [1, 1, 1]} : vector<2x8x32xbf16> to vector<2x8x4xbf16>
    %197 = vector.extract_strided_slice %61 {offsets = [0, 0, 28], sizes = [2, 8, 4], strides = [1, 1, 1]} : vector<2x8x32xbf16> to vector<2x8x4xbf16>
    "tpu.trace_start"() <{level = 10 : i32, message = "bqd,bkd->bqk"}> : () -> ()
    %cst_75 = arith.constant dense<0.000000e+00> : vector<2x8x8xf32>
    %198 = tpu.matmul %196, %197, %cst_75 {dimension_numbers = #tpu.dot_dimension_numbers<[2], [2], [1], [1], [0, 0, 0, 1, 1, 1], [0], [0]>} : vector<2x8x4xbf16>, vector<2x8x4xbf16>, vector<2x8x8xf32> -> vector<2x8x8xf32>
    "tpu.trace_stop"() : () -> ()
    %cst_76 = arith.constant 5.000000e-01 : f32
    %199 = vector.broadcast %cst_76 : f32 to vector<2x8x8xf32>
    %200 = arith.mulf %198, %199 : vector<2x8x8xf32>
    %201 = arith.addf %200, %9 : vector<2x8x8xf32>
    %cst_77 = arith.constant dense<0xFF800000> : vector<2x8xf32>
    %202 = vector.multi_reduction <maximumf>, %201, %cst_77 [2] : vector<2x8x8xf32> to vector<2x8xf32>
    %203 = vector.shape_cast %202 : vector<2x8xf32> to vector<2x8x1xf32>
    %204 = vector.broadcast %203 : vector<2x8x1xf32> to vector<2x8x8xf32>
    %205 = arith.subf %201, %204 : vector<2x8x8xf32>
    %206 = math.exp %205 : vector<2x8x8xf32>
    %cst_78 = arith.constant dense<0.000000e+00> : vector<2x8xf32>
    %207 = vector.multi_reduction <add>, %206, %cst_78 [2] : vector<2x8x8xf32> to vector<2x8xf32>
    %208 = vector.shape_cast %207 : vector<2x8xf32> to vector<2x8x1xf32>
    %209 = tpu.reciprocal %208 {approx = true} : vector<2x8x1xf32> -> vector<2x8x1xf32>
    %210 = vector.broadcast %209 : vector<2x8x1xf32> to vector<2x8x8xf32>
    %211 = arith.mulf %206, %210 : vector<2x8x8xf32>
    %212 = arith.truncf %211 : vector<2x8x8xf32> to vector<2x8x8xbf16>
    %213 = vector.extract_strided_slice %62 {offsets = [0, 0, 28], sizes = [2, 8, 4], strides = [1, 1, 1]} : vector<2x8x32xbf16> to vector<2x8x4xbf16>
    "tpu.trace_start"() <{level = 10 : i32, message = "bqk,bkd->bqd"}> : () -> ()
    %cst_79 = arith.constant dense<0.000000e+00> : vector<2x8x4xf32>
    %214 = tpu.matmul %212, %213, %cst_79 {dimension_numbers = #tpu.dot_dimension_numbers<[2], [1], [1], [2], [0, 0, 0, 1, 1, 2], [0], [0]>} : vector<2x8x8xbf16>, vector<2x8x4xbf16>, vector<2x8x4xf32> -> vector<2x8x4xf32>
    "tpu.trace_stop"() : () -> ()
    %215 = tpu.concatenate %81, %100, %119, %138, %157, %176, %195, %214 in 2 : vector<2x8x4xf32>, vector<2x8x4xf32>, vector<2x8x4xf32>, vector<2x8x4xf32>, vector<2x8x4xf32>, vector<2x8x4xf32>, vector<2x8x4xf32>, vector<2x8x4xf32> -> vector<2x8x32xf32>
    %216 = vector.shape_cast %215 : vector<2x8x32xf32> to vector<16x32xf32>
    %217 = arith.truncf %216 : vector<16x32xf32> to vector<16x32xbf16>
    %c0_80 = arith.constant 0 : index
    %c0_81 = arith.constant 0 : index
    %218 = vector.load %arg17[%c0_80, %c0_81] : memref<32x32xbf16, #tpu.memory_space<vmem>>, vector<32x32xbf16>
    %cst_82 = arith.constant dense<0.000000e+00> : vector<16x32xf32>
    %219 = tpu.matmul %217, %218, %cst_82 {dimension_numbers = #tpu.dot_dimension_numbers<[1], [0], [0], [1], [0, 0, 1, 1], [], []>} : vector<16x32xbf16>, vector<32x32xbf16>, vector<16x32xf32> -> vector<16x32xf32>
    %c0_83 = arith.constant 0 : index
    %c0_84 = arith.constant 0 : index
    %220 = vector.load %arg18[%c0_83, %c0_84] : memref<1x32xf32, #tpu.memory_space<vmem>>, vector<1x32xf32>
    %221 = vector.broadcast %220 : vector<1x32xf32> to vector<16x32xf32>
    %222 = arith.addf %219, %221 : vector<16x32xf32>
    %223 = arith.addf %1, %222 : vector<16x32xf32>
    %cst_85 = arith.constant dense<0.000000e+00> : vector<16xf32>
    %224 = vector.multi_reduction <add>, %223, %cst_85 [1] : vector<16x32xf32> to vector<16xf32>
    %225 = vector.shape_cast %224 : vector<16xf32> to vector<16x1xf32>
    %cst_86 = arith.constant 3.200000e+01 : f32
    %226 = vector.broadcast %cst_86 : f32 to vector<16x1xf32>
    %227 = arith.divf %225, %226 : vector<16x1xf32>
    %228 = vector.broadcast %227 : vector<16x1xf32> to vector<16x32xf32>
    %229 = arith.subf %223, %228 : vector<16x32xf32>
    %230 = arith.mulf %229, %229 : vector<16x32xf32>
    %cst_87 = arith.constant dense<0.000000e+00> : vector<16xf32>
    %231 = vector.multi_reduction <add>, %230, %cst_87 [1] : vector<16x32xf32> to vector<16xf32>
    %232 = vector.shape_cast %231 : vector<16xf32> to vector<16x1xf32>
    %cst_88 = arith.constant 0.0322580636 : f32
    %233 = vector.broadcast %cst_88 : f32 to vector<16x1xf32>
    %234 = arith.mulf %232, %233 : vector<16x1xf32>
    %235 = math.sqrt %234 : vector<16x1xf32>
    %cst_89 = arith.constant 9.99999997E-7 : f32
    %236 = vector.broadcast %cst_89 : f32 to vector<16x1xf32>
    %237 = arith.addf %235, %236 : vector<16x1xf32>
    %238 = tpu.reciprocal %237 : vector<16x1xf32> -> vector<16x1xf32>
    %c0_90 = arith.constant 0 : index
    %c0_91 = arith.constant 0 : index
    %239 = vector.load %arg7[%c0_90, %c0_91] : memref<1x32xf32, #tpu.memory_space<vmem>>, vector<1x32xf32>
    %240 = vector.broadcast %239 : vector<1x32xf32> to vector<16x32xf32>
    %241 = vector.broadcast %238 : vector<16x1xf32> to vector<16x32xf32>
    %242 = arith.mulf %240, %241 : vector<16x32xf32>
    %243 = arith.mulf %242, %229 : vector<16x32xf32>
    %c0_92 = arith.constant 0 : index
    %c0_93 = arith.constant 0 : index
    %244 = vector.load %arg8[%c0_92, %c0_93] : memref<1x32xf32, #tpu.memory_space<vmem>>, vector<1x32xf32>
    %245 = vector.broadcast %244 : vector<1x32xf32> to vector<16x32xf32>
    %246 = arith.addf %243, %245 : vector<16x32xf32>
    %247 = arith.truncf %246 : vector<16x32xf32> to vector<16x32xbf16>
    %c0_94 = arith.constant 0 : index
    %c0_95 = arith.constant 0 : index
    %248 = vector.load %arg19[%c0_94, %c0_95] : memref<32x32xbf16, #tpu.memory_space<vmem>>, vector<32x32xbf16>
    %cst_96 = arith.constant dense<0.000000e+00> : vector<16x32xf32>
    %249 = tpu.matmul %247, %248, %cst_96 {dimension_numbers = #tpu.dot_dimension_numbers<[1], [0], [0], [1], [0, 0, 1, 1], [], []>} : vector<16x32xbf16>, vector<32x32xbf16>, vector<16x32xf32> -> vector<16x32xf32>
    %c0_97 = arith.constant 0 : index
    %c0_98 = arith.constant 0 : index
    %250 = vector.load %arg20[%c0_97, %c0_98] : memref<1x32xf32, #tpu.memory_space<vmem>>, vector<1x32xf32>
    %251 = vector.broadcast %250 : vector<1x32xf32> to vector<16x32xf32>
    %252 = arith.addf %249, %251 : vector<16x32xf32>
    %253 = arith.truncf %3 : vector<16x32xf32> to vector<16x32xbf16>
    %c0_99 = arith.constant 0 : index
    %c0_100 = arith.constant 0 : index
    %254 = vector.load %arg21[%c0_99, %c0_100] : memref<32x32xbf16, #tpu.memory_space<vmem>>, vector<32x32xbf16>
    %cst_101 = arith.constant dense<0.000000e+00> : vector<16x32xf32>
    %255 = tpu.matmul %253, %254, %cst_101 {dimension_numbers = #tpu.dot_dimension_numbers<[1], [0], [0], [1], [0, 0, 1, 1], [], []>} : vector<16x32xbf16>, vector<32x32xbf16>, vector<16x32xf32> -> vector<16x32xf32>
    %c0_102 = arith.constant 0 : index
    %c0_103 = arith.constant 0 : index
    %256 = vector.load %arg22[%c0_102, %c0_103] : memref<1x32xf32, #tpu.memory_space<vmem>>, vector<1x32xf32>
    %257 = vector.broadcast %256 : vector<1x32xf32> to vector<16x32xf32>
    %258 = arith.addf %255, %257 : vector<16x32xf32>
    %259 = arith.truncf %3 : vector<16x32xf32> to vector<16x32xbf16>
    %c0_104 = arith.constant 0 : index
    %c0_105 = arith.constant 0 : index
    %260 = vector.load %arg23[%c0_104, %c0_105] : memref<32x32xbf16, #tpu.memory_space<vmem>>, vector<32x32xbf16>
    %cst_106 = arith.constant dense<0.000000e+00> : vector<16x32xf32>
    %261 = tpu.matmul %259, %260, %cst_106 {dimension_numbers = #tpu.dot_dimension_numbers<[1], [0], [0], [1], [0, 0, 1, 1], [], []>} : vector<16x32xbf16>, vector<32x32xbf16>, vector<16x32xf32> -> vector<16x32xf32>
    %c0_107 = arith.constant 0 : index
    %c0_108 = arith.constant 0 : index
    %262 = vector.load %arg24[%c0_107, %c0_108] : memref<1x32xf32, #tpu.memory_space<vmem>>, vector<1x32xf32>
    %263 = vector.broadcast %262 : vector<1x32xf32> to vector<16x32xf32>
    %264 = arith.addf %261, %263 : vector<16x32xf32>
    %265 = arith.truncf %252 : vector<16x32xf32> to vector<16x32xbf16>
    %266 = arith.truncf %258 : vector<16x32xf32> to vector<16x32xbf16>
    %267 = arith.truncf %264 : vector<16x32xf32> to vector<16x32xbf16>
    %268 = vector.shape_cast %265 : vector<16x32xbf16> to vector<2x8x32xbf16>
    %269 = vector.shape_cast %266 : vector<16x32xbf16> to vector<2x8x32xbf16>
    %270 = vector.shape_cast %267 : vector<16x32xbf16> to vector<2x8x32xbf16>
    %271 = vector.extract_strided_slice %268 {offsets = [0, 0, 0], sizes = [2, 8, 4], strides = [1, 1, 1]} : vector<2x8x32xbf16> to vector<2x8x4xbf16>
    %272 = vector.extract_strided_slice %269 {offsets = [0, 0, 0], sizes = [2, 8, 4], strides = [1, 1, 1]} : vector<2x8x32xbf16> to vector<2x8x4xbf16>
    "tpu.trace_start"() <{level = 10 : i32, message = "bqd,bkd->bqk"}> : () -> ()
    %cst_109 = arith.constant dense<0.000000e+00> : vector<2x8x8xf32>
    %273 = tpu.matmul %271, %272, %cst_109 {dimension_numbers = #tpu.dot_dimension_numbers<[2], [2], [1], [1], [0, 0, 0, 1, 1, 1], [0], [0]>} : vector<2x8x4xbf16>, vector<2x8x4xbf16>, vector<2x8x8xf32> -> vector<2x8x8xf32>
    "tpu.trace_stop"() : () -> ()
    %cst_110 = arith.constant 5.000000e-01 : f32
    %274 = vector.broadcast %cst_110 : f32 to vector<2x8x8xf32>
    %275 = arith.mulf %273, %274 : vector<2x8x8xf32>
    %276 = vector.broadcast %15 : vector<2x1x8xf32> to vector<2x8x8xf32>
    %277 = arith.addf %275, %276 : vector<2x8x8xf32>
    %cst_111 = arith.constant dense<0xFF800000> : vector<2x8xf32>
    %278 = vector.multi_reduction <maximumf>, %277, %cst_111 [2] : vector<2x8x8xf32> to vector<2x8xf32>
    %279 = vector.shape_cast %278 : vector<2x8xf32> to vector<2x8x1xf32>
    %280 = vector.broadcast %279 : vector<2x8x1xf32> to vector<2x8x8xf32>
    %281 = arith.subf %277, %280 : vector<2x8x8xf32>
    %282 = math.exp %281 : vector<2x8x8xf32>
    %cst_112 = arith.constant dense<0.000000e+00> : vector<2x8xf32>
    %283 = vector.multi_reduction <add>, %282, %cst_112 [2] : vector<2x8x8xf32> to vector<2x8xf32>
    %284 = vector.shape_cast %283 : vector<2x8xf32> to vector<2x8x1xf32>
    %285 = tpu.reciprocal %284 {approx = true} : vector<2x8x1xf32> -> vector<2x8x1xf32>
    %286 = vector.broadcast %285 : vector<2x8x1xf32> to vector<2x8x8xf32>
    %287 = arith.mulf %282, %286 : vector<2x8x8xf32>
    %288 = arith.truncf %287 : vector<2x8x8xf32> to vector<2x8x8xbf16>
    %289 = vector.extract_strided_slice %270 {offsets = [0, 0, 0], sizes = [2, 8, 4], strides = [1, 1, 1]} : vector<2x8x32xbf16> to vector<2x8x4xbf16>
    "tpu.trace_start"() <{level = 10 : i32, message = "bqk,bkd->bqd"}> : () -> ()
    %cst_113 = arith.constant dense<0.000000e+00> : vector<2x8x4xf32>
    %290 = tpu.matmul %288, %289, %cst_113 {dimension_numbers = #tpu.dot_dimension_numbers<[2], [1], [1], [2], [0, 0, 0, 1, 1, 2], [0], [0]>} : vector<2x8x8xbf16>, vector<2x8x4xbf16>, vector<2x8x4xf32> -> vector<2x8x4xf32>
    "tpu.trace_stop"() : () -> ()
    %291 = vector.extract_strided_slice %268 {offsets = [0, 0, 4], sizes = [2, 8, 4], strides = [1, 1, 1]} : vector<2x8x32xbf16> to vector<2x8x4xbf16>
    %292 = vector.extract_strided_slice %269 {offsets = [0, 0, 4], sizes = [2, 8, 4], strides = [1, 1, 1]} : vector<2x8x32xbf16> to vector<2x8x4xbf16>
    "tpu.trace_start"() <{level = 10 : i32, message = "bqd,bkd->bqk"}> : () -> ()
    %cst_114 = arith.constant dense<0.000000e+00> : vector<2x8x8xf32>
    %293 = tpu.matmul %291, %292, %cst_114 {dimension_numbers = #tpu.dot_dimension_numbers<[2], [2], [1], [1], [0, 0, 0, 1, 1, 1], [0], [0]>} : vector<2x8x4xbf16>, vector<2x8x4xbf16>, vector<2x8x8xf32> -> vector<2x8x8xf32>
    "tpu.trace_stop"() : () -> ()
    %cst_115 = arith.constant 5.000000e-01 : f32
    %294 = vector.broadcast %cst_115 : f32 to vector<2x8x8xf32>
    %295 = arith.mulf %293, %294 : vector<2x8x8xf32>
    %296 = vector.broadcast %15 : vector<2x1x8xf32> to vector<2x8x8xf32>
    %297 = arith.addf %295, %296 : vector<2x8x8xf32>
    %cst_116 = arith.constant dense<0xFF800000> : vector<2x8xf32>
    %298 = vector.multi_reduction <maximumf>, %297, %cst_116 [2] : vector<2x8x8xf32> to vector<2x8xf32>
    %299 = vector.shape_cast %298 : vector<2x8xf32> to vector<2x8x1xf32>
    %300 = vector.broadcast %299 : vector<2x8x1xf32> to vector<2x8x8xf32>
    %301 = arith.subf %297, %300 : vector<2x8x8xf32>
    %302 = math.exp %301 : vector<2x8x8xf32>
    %cst_117 = arith.constant dense<0.000000e+00> : vector<2x8xf32>
    %303 = vector.multi_reduction <add>, %302, %cst_117 [2] : vector<2x8x8xf32> to vector<2x8xf32>
    %304 = vector.shape_cast %303 : vector<2x8xf32> to vector<2x8x1xf32>
    %305 = tpu.reciprocal %304 {approx = true} : vector<2x8x1xf32> -> vector<2x8x1xf32>
    %306 = vector.broadcast %305 : vector<2x8x1xf32> to vector<2x8x8xf32>
    %307 = arith.mulf %302, %306 : vector<2x8x8xf32>
    %308 = arith.truncf %307 : vector<2x8x8xf32> to vector<2x8x8xbf16>
    %309 = vector.extract_strided_slice %270 {offsets = [0, 0, 4], sizes = [2, 8, 4], strides = [1, 1, 1]} : vector<2x8x32xbf16> to vector<2x8x4xbf16>
    "tpu.trace_start"() <{level = 10 : i32, message = "bqk,bkd->bqd"}> : () -> ()
    %cst_118 = arith.constant dense<0.000000e+00> : vector<2x8x4xf32>
    %310 = tpu.matmul %308, %309, %cst_118 {dimension_numbers = #tpu.dot_dimension_numbers<[2], [1], [1], [2], [0, 0, 0, 1, 1, 2], [0], [0]>} : vector<2x8x8xbf16>, vector<2x8x4xbf16>, vector<2x8x4xf32> -> vector<2x8x4xf32>
    "tpu.trace_stop"() : () -> ()
    %311 = vector.extract_strided_slice %268 {offsets = [0, 0, 8], sizes = [2, 8, 4], strides = [1, 1, 1]} : vector<2x8x32xbf16> to vector<2x8x4xbf16>
    %312 = vector.extract_strided_slice %269 {offsets = [0, 0, 8], sizes = [2, 8, 4], strides = [1, 1, 1]} : vector<2x8x32xbf16> to vector<2x8x4xbf16>
    "tpu.trace_start"() <{level = 10 : i32, message = "bqd,bkd->bqk"}> : () -> ()
    %cst_119 = arith.constant dense<0.000000e+00> : vector<2x8x8xf32>
    %313 = tpu.matmul %311, %312, %cst_119 {dimension_numbers = #tpu.dot_dimension_numbers<[2], [2], [1], [1], [0, 0, 0, 1, 1, 1], [0], [0]>} : vector<2x8x4xbf16>, vector<2x8x4xbf16>, vector<2x8x8xf32> -> vector<2x8x8xf32>
    "tpu.trace_stop"() : () -> ()
    %cst_120 = arith.constant 5.000000e-01 : f32
    %314 = vector.broadcast %cst_120 : f32 to vector<2x8x8xf32>
    %315 = arith.mulf %313, %314 : vector<2x8x8xf32>
    %316 = vector.broadcast %15 : vector<2x1x8xf32> to vector<2x8x8xf32>
    %317 = arith.addf %315, %316 : vector<2x8x8xf32>
    %cst_121 = arith.constant dense<0xFF800000> : vector<2x8xf32>
    %318 = vector.multi_reduction <maximumf>, %317, %cst_121 [2] : vector<2x8x8xf32> to vector<2x8xf32>
    %319 = vector.shape_cast %318 : vector<2x8xf32> to vector<2x8x1xf32>
    %320 = vector.broadcast %319 : vector<2x8x1xf32> to vector<2x8x8xf32>
    %321 = arith.subf %317, %320 : vector<2x8x8xf32>
    %322 = math.exp %321 : vector<2x8x8xf32>
    %cst_122 = arith.constant dense<0.000000e+00> : vector<2x8xf32>
    %323 = vector.multi_reduction <add>, %322, %cst_122 [2] : vector<2x8x8xf32> to vector<2x8xf32>
    %324 = vector.shape_cast %323 : vector<2x8xf32> to vector<2x8x1xf32>
    %325 = tpu.reciprocal %324 {approx = true} : vector<2x8x1xf32> -> vector<2x8x1xf32>
    %326 = vector.broadcast %325 : vector<2x8x1xf32> to vector<2x8x8xf32>
    %327 = arith.mulf %322, %326 : vector<2x8x8xf32>
    %328 = arith.truncf %327 : vector<2x8x8xf32> to vector<2x8x8xbf16>
    %329 = vector.extract_strided_slice %270 {offsets = [0, 0, 8], sizes = [2, 8, 4], strides = [1, 1, 1]} : vector<2x8x32xbf16> to vector<2x8x4xbf16>
    "tpu.trace_start"() <{level = 10 : i32, message = "bqk,bkd->bqd"}> : () -> ()
    %cst_123 = arith.constant dense<0.000000e+00> : vector<2x8x4xf32>
    %330 = tpu.matmul %328, %329, %cst_123 {dimension_numbers = #tpu.dot_dimension_numbers<[2], [1], [1], [2], [0, 0, 0, 1, 1, 2], [0], [0]>} : vector<2x8x8xbf16>, vector<2x8x4xbf16>, vector<2x8x4xf32> -> vector<2x8x4xf32>
    "tpu.trace_stop"() : () -> ()
    %331 = vector.extract_strided_slice %268 {offsets = [0, 0, 12], sizes = [2, 8, 4], strides = [1, 1, 1]} : vector<2x8x32xbf16> to vector<2x8x4xbf16>
    %332 = vector.extract_strided_slice %269 {offsets = [0, 0, 12], sizes = [2, 8, 4], strides = [1, 1, 1]} : vector<2x8x32xbf16> to vector<2x8x4xbf16>
    "tpu.trace_start"() <{level = 10 : i32, message = "bqd,bkd->bqk"}> : () -> ()
    %cst_124 = arith.constant dense<0.000000e+00> : vector<2x8x8xf32>
    %333 = tpu.matmul %331, %332, %cst_124 {dimension_numbers = #tpu.dot_dimension_numbers<[2], [2], [1], [1], [0, 0, 0, 1, 1, 1], [0], [0]>} : vector<2x8x4xbf16>, vector<2x8x4xbf16>, vector<2x8x8xf32> -> vector<2x8x8xf32>
    "tpu.trace_stop"() : () -> ()
    %cst_125 = arith.constant 5.000000e-01 : f32
    %334 = vector.broadcast %cst_125 : f32 to vector<2x8x8xf32>
    %335 = arith.mulf %333, %334 : vector<2x8x8xf32>
    %336 = vector.broadcast %15 : vector<2x1x8xf32> to vector<2x8x8xf32>
    %337 = arith.addf %335, %336 : vector<2x8x8xf32>
    %cst_126 = arith.constant dense<0xFF800000> : vector<2x8xf32>
    %338 = vector.multi_reduction <maximumf>, %337, %cst_126 [2] : vector<2x8x8xf32> to vector<2x8xf32>
    %339 = vector.shape_cast %338 : vector<2x8xf32> to vector<2x8x1xf32>
    %340 = vector.broadcast %339 : vector<2x8x1xf32> to vector<2x8x8xf32>
    %341 = arith.subf %337, %340 : vector<2x8x8xf32>
    %342 = math.exp %341 : vector<2x8x8xf32>
    %cst_127 = arith.constant dense<0.000000e+00> : vector<2x8xf32>
    %343 = vector.multi_reduction <add>, %342, %cst_127 [2] : vector<2x8x8xf32> to vector<2x8xf32>
    %344 = vector.shape_cast %343 : vector<2x8xf32> to vector<2x8x1xf32>
    %345 = tpu.reciprocal %344 {approx = true} : vector<2x8x1xf32> -> vector<2x8x1xf32>
    %346 = vector.broadcast %345 : vector<2x8x1xf32> to vector<2x8x8xf32>
    %347 = arith.mulf %342, %346 : vector<2x8x8xf32>
    %348 = arith.truncf %347 : vector<2x8x8xf32> to vector<2x8x8xbf16>
    %349 = vector.extract_strided_slice %270 {offsets = [0, 0, 12], sizes = [2, 8, 4], strides = [1, 1, 1]} : vector<2x8x32xbf16> to vector<2x8x4xbf16>
    "tpu.trace_start"() <{level = 10 : i32, message = "bqk,bkd->bqd"}> : () -> ()
    %cst_128 = arith.constant dense<0.000000e+00> : vector<2x8x4xf32>
    %350 = tpu.matmul %348, %349, %cst_128 {dimension_numbers = #tpu.dot_dimension_numbers<[2], [1], [1], [2], [0, 0, 0, 1, 1, 2], [0], [0]>} : vector<2x8x8xbf16>, vector<2x8x4xbf16>, vector<2x8x4xf32> -> vector<2x8x4xf32>
    "tpu.trace_stop"() : () -> ()
    %351 = vector.extract_strided_slice %268 {offsets = [0, 0, 16], sizes = [2, 8, 4], strides = [1, 1, 1]} : vector<2x8x32xbf16> to vector<2x8x4xbf16>
    %352 = vector.extract_strided_slice %269 {offsets = [0, 0, 16], sizes = [2, 8, 4], strides = [1, 1, 1]} : vector<2x8x32xbf16> to vector<2x8x4xbf16>
    "tpu.trace_start"() <{level = 10 : i32, message = "bqd,bkd->bqk"}> : () -> ()
    %cst_129 = arith.constant dense<0.000000e+00> : vector<2x8x8xf32>
    %353 = tpu.matmul %351, %352, %cst_129 {dimension_numbers = #tpu.dot_dimension_numbers<[2], [2], [1], [1], [0, 0, 0, 1, 1, 1], [0], [0]>} : vector<2x8x4xbf16>, vector<2x8x4xbf16>, vector<2x8x8xf32> -> vector<2x8x8xf32>
    "tpu.trace_stop"() : () -> ()
    %cst_130 = arith.constant 5.000000e-01 : f32
    %354 = vector.broadcast %cst_130 : f32 to vector<2x8x8xf32>
    %355 = arith.mulf %353, %354 : vector<2x8x8xf32>
    %356 = vector.broadcast %15 : vector<2x1x8xf32> to vector<2x8x8xf32>
    %357 = arith.addf %355, %356 : vector<2x8x8xf32>
    %cst_131 = arith.constant dense<0xFF800000> : vector<2x8xf32>
    %358 = vector.multi_reduction <maximumf>, %357, %cst_131 [2] : vector<2x8x8xf32> to vector<2x8xf32>
    %359 = vector.shape_cast %358 : vector<2x8xf32> to vector<2x8x1xf32>
    %360 = vector.broadcast %359 : vector<2x8x1xf32> to vector<2x8x8xf32>
    %361 = arith.subf %357, %360 : vector<2x8x8xf32>
    %362 = math.exp %361 : vector<2x8x8xf32>
    %cst_132 = arith.constant dense<0.000000e+00> : vector<2x8xf32>
    %363 = vector.multi_reduction <add>, %362, %cst_132 [2] : vector<2x8x8xf32> to vector<2x8xf32>
    %364 = vector.shape_cast %363 : vector<2x8xf32> to vector<2x8x1xf32>
    %365 = tpu.reciprocal %364 {approx = true} : vector<2x8x1xf32> -> vector<2x8x1xf32>
    %366 = vector.broadcast %365 : vector<2x8x1xf32> to vector<2x8x8xf32>
    %367 = arith.mulf %362, %366 : vector<2x8x8xf32>
    %368 = arith.truncf %367 : vector<2x8x8xf32> to vector<2x8x8xbf16>
    %369 = vector.extract_strided_slice %270 {offsets = [0, 0, 16], sizes = [2, 8, 4], strides = [1, 1, 1]} : vector<2x8x32xbf16> to vector<2x8x4xbf16>
    "tpu.trace_start"() <{level = 10 : i32, message = "bqk,bkd->bqd"}> : () -> ()
    %cst_133 = arith.constant dense<0.000000e+00> : vector<2x8x4xf32>
    %370 = tpu.matmul %368, %369, %cst_133 {dimension_numbers = #tpu.dot_dimension_numbers<[2], [1], [1], [2], [0, 0, 0, 1, 1, 2], [0], [0]>} : vector<2x8x8xbf16>, vector<2x8x4xbf16>, vector<2x8x4xf32> -> vector<2x8x4xf32>
    "tpu.trace_stop"() : () -> ()
    %371 = vector.extract_strided_slice %268 {offsets = [0, 0, 20], sizes = [2, 8, 4], strides = [1, 1, 1]} : vector<2x8x32xbf16> to vector<2x8x4xbf16>
    %372 = vector.extract_strided_slice %269 {offsets = [0, 0, 20], sizes = [2, 8, 4], strides = [1, 1, 1]} : vector<2x8x32xbf16> to vector<2x8x4xbf16>
    "tpu.trace_start"() <{level = 10 : i32, message = "bqd,bkd->bqk"}> : () -> ()
    %cst_134 = arith.constant dense<0.000000e+00> : vector<2x8x8xf32>
    %373 = tpu.matmul %371, %372, %cst_134 {dimension_numbers = #tpu.dot_dimension_numbers<[2], [2], [1], [1], [0, 0, 0, 1, 1, 1], [0], [0]>} : vector<2x8x4xbf16>, vector<2x8x4xbf16>, vector<2x8x8xf32> -> vector<2x8x8xf32>
    "tpu.trace_stop"() : () -> ()
    %cst_135 = arith.constant 5.000000e-01 : f32
    %374 = vector.broadcast %cst_135 : f32 to vector<2x8x8xf32>
    %375 = arith.mulf %373, %374 : vector<2x8x8xf32>
    %376 = vector.broadcast %15 : vector<2x1x8xf32> to vector<2x8x8xf32>
    %377 = arith.addf %375, %376 : vector<2x8x8xf32>
    %cst_136 = arith.constant dense<0xFF800000> : vector<2x8xf32>
    %378 = vector.multi_reduction <maximumf>, %377, %cst_136 [2] : vector<2x8x8xf32> to vector<2x8xf32>
    %379 = vector.shape_cast %378 : vector<2x8xf32> to vector<2x8x1xf32>
    %380 = vector.broadcast %379 : vector<2x8x1xf32> to vector<2x8x8xf32>
    %381 = arith.subf %377, %380 : vector<2x8x8xf32>
    %382 = math.exp %381 : vector<2x8x8xf32>
    %cst_137 = arith.constant dense<0.000000e+00> : vector<2x8xf32>
    %383 = vector.multi_reduction <add>, %382, %cst_137 [2] : vector<2x8x8xf32> to vector<2x8xf32>
    %384 = vector.shape_cast %383 : vector<2x8xf32> to vector<2x8x1xf32>
    %385 = tpu.reciprocal %384 {approx = true} : vector<2x8x1xf32> -> vector<2x8x1xf32>
    %386 = vector.broadcast %385 : vector<2x8x1xf32> to vector<2x8x8xf32>
    %387 = arith.mulf %382, %386 : vector<2x8x8xf32>
    %388 = arith.truncf %387 : vector<2x8x8xf32> to vector<2x8x8xbf16>
    %389 = vector.extract_strided_slice %270 {offsets = [0, 0, 20], sizes = [2, 8, 4], strides = [1, 1, 1]} : vector<2x8x32xbf16> to vector<2x8x4xbf16>
    "tpu.trace_start"() <{level = 10 : i32, message = "bqk,bkd->bqd"}> : () -> ()
    %cst_138 = arith.constant dense<0.000000e+00> : vector<2x8x4xf32>
    %390 = tpu.matmul %388, %389, %cst_138 {dimension_numbers = #tpu.dot_dimension_numbers<[2], [1], [1], [2], [0, 0, 0, 1, 1, 2], [0], [0]>} : vector<2x8x8xbf16>, vector<2x8x4xbf16>, vector<2x8x4xf32> -> vector<2x8x4xf32>
    "tpu.trace_stop"() : () -> ()
    %391 = vector.extract_strided_slice %268 {offsets = [0, 0, 24], sizes = [2, 8, 4], strides = [1, 1, 1]} : vector<2x8x32xbf16> to vector<2x8x4xbf16>
    %392 = vector.extract_strided_slice %269 {offsets = [0, 0, 24], sizes = [2, 8, 4], strides = [1, 1, 1]} : vector<2x8x32xbf16> to vector<2x8x4xbf16>
    "tpu.trace_start"() <{level = 10 : i32, message = "bqd,bkd->bqk"}> : () -> ()
    %cst_139 = arith.constant dense<0.000000e+00> : vector<2x8x8xf32>
    %393 = tpu.matmul %391, %392, %cst_139 {dimension_numbers = #tpu.dot_dimension_numbers<[2], [2], [1], [1], [0, 0, 0, 1, 1, 1], [0], [0]>} : vector<2x8x4xbf16>, vector<2x8x4xbf16>, vector<2x8x8xf32> -> vector<2x8x8xf32>
    "tpu.trace_stop"() : () -> ()
    %cst_140 = arith.constant 5.000000e-01 : f32
    %394 = vector.broadcast %cst_140 : f32 to vector<2x8x8xf32>
    %395 = arith.mulf %393, %394 : vector<2x8x8xf32>
    %396 = vector.broadcast %15 : vector<2x1x8xf32> to vector<2x8x8xf32>
    %397 = arith.addf %395, %396 : vector<2x8x8xf32>
    %cst_141 = arith.constant dense<0xFF800000> : vector<2x8xf32>
    %398 = vector.multi_reduction <maximumf>, %397, %cst_141 [2] : vector<2x8x8xf32> to vector<2x8xf32>
    %399 = vector.shape_cast %398 : vector<2x8xf32> to vector<2x8x1xf32>
    %400 = vector.broadcast %399 : vector<2x8x1xf32> to vector<2x8x8xf32>
    %401 = arith.subf %397, %400 : vector<2x8x8xf32>
    %402 = math.exp %401 : vector<2x8x8xf32>
    %cst_142 = arith.constant dense<0.000000e+00> : vector<2x8xf32>
    %403 = vector.multi_reduction <add>, %402, %cst_142 [2] : vector<2x8x8xf32> to vector<2x8xf32>
    %404 = vector.shape_cast %403 : vector<2x8xf32> to vector<2x8x1xf32>
    %405 = tpu.reciprocal %404 {approx = true} : vector<2x8x1xf32> -> vector<2x8x1xf32>
    %406 = vector.broadcast %405 : vector<2x8x1xf32> to vector<2x8x8xf32>
    %407 = arith.mulf %402, %406 : vector<2x8x8xf32>
    %408 = arith.truncf %407 : vector<2x8x8xf32> to vector<2x8x8xbf16>
    %409 = vector.extract_strided_slice %270 {offsets = [0, 0, 24], sizes = [2, 8, 4], strides = [1, 1, 1]} : vector<2x8x32xbf16> to vector<2x8x4xbf16>
    "tpu.trace_start"() <{level = 10 : i32, message = "bqk,bkd->bqd"}> : () -> ()
    %cst_143 = arith.constant dense<0.000000e+00> : vector<2x8x4xf32>
    %410 = tpu.matmul %408, %409, %cst_143 {dimension_numbers = #tpu.dot_dimension_numbers<[2], [1], [1], [2], [0, 0, 0, 1, 1, 2], [0], [0]>} : vector<2x8x8xbf16>, vector<2x8x4xbf16>, vector<2x8x4xf32> -> vector<2x8x4xf32>
    "tpu.trace_stop"() : () -> ()
    %411 = vector.extract_strided_slice %268 {offsets = [0, 0, 28], sizes = [2, 8, 4], strides = [1, 1, 1]} : vector<2x8x32xbf16> to vector<2x8x4xbf16>
    %412 = vector.extract_strided_slice %269 {offsets = [0, 0, 28], sizes = [2, 8, 4], strides = [1, 1, 1]} : vector<2x8x32xbf16> to vector<2x8x4xbf16>
    "tpu.trace_start"() <{level = 10 : i32, message = "bqd,bkd->bqk"}> : () -> ()
    %cst_144 = arith.constant dense<0.000000e+00> : vector<2x8x8xf32>
    %413 = tpu.matmul %411, %412, %cst_144 {dimension_numbers = #tpu.dot_dimension_numbers<[2], [2], [1], [1], [0, 0, 0, 1, 1, 1], [0], [0]>} : vector<2x8x4xbf16>, vector<2x8x4xbf16>, vector<2x8x8xf32> -> vector<2x8x8xf32>
    "tpu.trace_stop"() : () -> ()
    %cst_145 = arith.constant 5.000000e-01 : f32
    %414 = vector.broadcast %cst_145 : f32 to vector<2x8x8xf32>
    %415 = arith.mulf %413, %414 : vector<2x8x8xf32>
    %416 = vector.broadcast %15 : vector<2x1x8xf32> to vector<2x8x8xf32>
    %417 = arith.addf %415, %416 : vector<2x8x8xf32>
    %cst_146 = arith.constant dense<0xFF800000> : vector<2x8xf32>
    %418 = vector.multi_reduction <maximumf>, %417, %cst_146 [2] : vector<2x8x8xf32> to vector<2x8xf32>
    %419 = vector.shape_cast %418 : vector<2x8xf32> to vector<2x8x1xf32>
    %420 = vector.broadcast %419 : vector<2x8x1xf32> to vector<2x8x8xf32>
    %421 = arith.subf %417, %420 : vector<2x8x8xf32>
    %422 = math.exp %421 : vector<2x8x8xf32>
    %cst_147 = arith.constant dense<0.000000e+00> : vector<2x8xf32>
    %423 = vector.multi_reduction <add>, %422, %cst_147 [2] : vector<2x8x8xf32> to vector<2x8xf32>
    %424 = vector.shape_cast %423 : vector<2x8xf32> to vector<2x8x1xf32>
    %425 = tpu.reciprocal %424 {approx = true} : vector<2x8x1xf32> -> vector<2x8x1xf32>
    %426 = vector.broadcast %425 : vector<2x8x1xf32> to vector<2x8x8xf32>
    %427 = arith.mulf %422, %426 : vector<2x8x8xf32>
    %428 = arith.truncf %427 : vector<2x8x8xf32> to vector<2x8x8xbf16>
    %429 = vector.extract_strided_slice %270 {offsets = [0, 0, 28], sizes = [2, 8, 4], strides = [1, 1, 1]} : vector<2x8x32xbf16> to vector<2x8x4xbf16>
    "tpu.trace_start"() <{level = 10 : i32, message = "bqk,bkd->bqd"}> : () -> ()
    %cst_148 = arith.constant dense<0.000000e+00> : vector<2x8x4xf32>
    %430 = tpu.matmul %428, %429, %cst_148 {dimension_numbers = #tpu.dot_dimension_numbers<[2], [1], [1], [2], [0, 0, 0, 1, 1, 2], [0], [0]>} : vector<2x8x8xbf16>, vector<2x8x4xbf16>, vector<2x8x4xf32> -> vector<2x8x4xf32>
    "tpu.trace_stop"() : () -> ()
    %431 = tpu.concatenate %290, %310, %330, %350, %370, %390, %410, %430 in 2 : vector<2x8x4xf32>, vector<2x8x4xf32>, vector<2x8x4xf32>, vector<2x8x4xf32>, vector<2x8x4xf32>, vector<2x8x4xf32>, vector<2x8x4xf32>, vector<2x8x4xf32> -> vector<2x8x32xf32>
    %432 = vector.shape_cast %431 : vector<2x8x32xf32> to vector<16x32xf32>
    %433 = arith.truncf %432 : vector<16x32xf32> to vector<16x32xbf16>
    %c0_149 = arith.constant 0 : index
    %c0_150 = arith.constant 0 : index
    %434 = vector.load %arg25[%c0_149, %c0_150] : memref<32x32xbf16, #tpu.memory_space<vmem>>, vector<32x32xbf16>
    %cst_151 = arith.constant dense<0.000000e+00> : vector<16x32xf32>
    %435 = tpu.matmul %433, %434, %cst_151 {dimension_numbers = #tpu.dot_dimension_numbers<[1], [0], [0], [1], [0, 0, 1, 1], [], []>} : vector<16x32xbf16>, vector<32x32xbf16>, vector<16x32xf32> -> vector<16x32xf32>
    %c0_152 = arith.constant 0 : index
    %c0_153 = arith.constant 0 : index
    %436 = vector.load %arg26[%c0_152, %c0_153] : memref<1x32xf32, #tpu.memory_space<vmem>>, vector<1x32xf32>
    %437 = vector.broadcast %436 : vector<1x32xf32> to vector<16x32xf32>
    %438 = arith.addf %435, %437 : vector<16x32xf32>
    %439 = arith.addf %223, %438 : vector<16x32xf32>
    %cst_154 = arith.constant dense<0.000000e+00> : vector<16xf32>
    %440 = vector.multi_reduction <add>, %439, %cst_154 [1] : vector<16x32xf32> to vector<16xf32>
    %441 = vector.shape_cast %440 : vector<16xf32> to vector<16x1xf32>
    %cst_155 = arith.constant 3.200000e+01 : f32
    %442 = vector.broadcast %cst_155 : f32 to vector<16x1xf32>
    %443 = arith.divf %441, %442 : vector<16x1xf32>
    %444 = vector.broadcast %443 : vector<16x1xf32> to vector<16x32xf32>
    %445 = arith.subf %439, %444 : vector<16x32xf32>
    %446 = arith.mulf %445, %445 : vector<16x32xf32>
    %cst_156 = arith.constant dense<0.000000e+00> : vector<16xf32>
    %447 = vector.multi_reduction <add>, %446, %cst_156 [1] : vector<16x32xf32> to vector<16xf32>
    %448 = vector.shape_cast %447 : vector<16xf32> to vector<16x1xf32>
    %cst_157 = arith.constant 0.0322580636 : f32
    %449 = vector.broadcast %cst_157 : f32 to vector<16x1xf32>
    %450 = arith.mulf %448, %449 : vector<16x1xf32>
    %451 = math.sqrt %450 : vector<16x1xf32>
    %cst_158 = arith.constant 9.99999997E-7 : f32
    %452 = vector.broadcast %cst_158 : f32 to vector<16x1xf32>
    %453 = arith.addf %451, %452 : vector<16x1xf32>
    %454 = tpu.reciprocal %453 : vector<16x1xf32> -> vector<16x1xf32>
    %c0_159 = arith.constant 0 : index
    %c0_160 = arith.constant 0 : index
    %455 = vector.load %arg9[%c0_159, %c0_160] : memref<1x32xf32, #tpu.memory_space<vmem>>, vector<1x32xf32>
    %456 = vector.broadcast %455 : vector<1x32xf32> to vector<16x32xf32>
    %457 = vector.broadcast %454 : vector<16x1xf32> to vector<16x32xf32>
    %458 = arith.mulf %456, %457 : vector<16x32xf32>
    %459 = arith.mulf %458, %445 : vector<16x32xf32>
    %c0_161 = arith.constant 0 : index
    %c0_162 = arith.constant 0 : index
    %460 = vector.load %arg10[%c0_161, %c0_162] : memref<1x32xf32, #tpu.memory_space<vmem>>, vector<1x32xf32>
    %461 = vector.broadcast %460 : vector<1x32xf32> to vector<16x32xf32>
    %462 = arith.addf %459, %461 : vector<16x32xf32>
    %463 = arith.truncf %462 : vector<16x32xf32> to vector<16x32xbf16>
    %c0_163 = arith.constant 0 : index
    %c0_164 = arith.constant 0 : index
    %464 = vector.load %arg27[%c0_163, %c0_164] : memref<32x2048xbf16, #tpu.memory_space<vmem>>, vector<32x2048xbf16>
    %cst_165 = arith.constant dense<0.000000e+00> : vector<16x2048xf32>
    %465 = tpu.matmul %463, %464, %cst_165 {dimension_numbers = #tpu.dot_dimension_numbers<[1], [0], [0], [1], [0, 0, 1, 1], [], []>} : vector<16x32xbf16>, vector<32x2048xbf16>, vector<16x2048xf32> -> vector<16x2048xf32>
    %c0_166 = arith.constant 0 : index
    %c0_167 = arith.constant 0 : index
    %466 = vector.load %arg28[%c0_166, %c0_167] : memref<1x2048xf32, #tpu.memory_space<vmem>>, vector<1x2048xf32>
    %467 = vector.broadcast %466 : vector<1x2048xf32> to vector<16x2048xf32>
    %468 = arith.addf %465, %467 : vector<16x2048xf32>
    %cst_168 = arith.constant 0.000000e+00 : f32
    %469 = vector.broadcast %cst_168 : f32 to vector<16x2048xf32>
    %470 = arith.maximumf %468, %469 : vector<16x2048xf32>
    %471 = arith.truncf %470 : vector<16x2048xf32> to vector<16x2048xbf16>
    %c0_169 = arith.constant 0 : index
    %c0_170 = arith.constant 0 : index
    %472 = vector.load %arg29[%c0_169, %c0_170] : memref<2048x32xbf16, #tpu.memory_space<vmem>>, vector<2048x32xbf16>
    %cst_171 = arith.constant dense<0.000000e+00> : vector<16x32xf32>
    %473 = tpu.matmul %471, %472, %cst_171 {dimension_numbers = #tpu.dot_dimension_numbers<[1], [0], [0], [1], [0, 0, 1, 1], [], []>} : vector<16x2048xbf16>, vector<2048x32xbf16>, vector<16x32xf32> -> vector<16x32xf32>
    %c0_172 = arith.constant 0 : index
    %c0_173 = arith.constant 0 : index
    %474 = vector.load %arg30[%c0_172, %c0_173] : memref<1x32xf32, #tpu.memory_space<vmem>>, vector<1x32xf32>
    %475 = vector.broadcast %474 : vector<1x32xf32> to vector<16x32xf32>
    %476 = arith.addf %473, %475 : vector<16x32xf32>
    %477 = arith.addf %439, %476 : vector<16x32xf32>
    %478 = vector.shape_cast %477 : vector<16x32xf32> to vector<2x8x32xf32>
    %c0_174 = arith.constant 0 : index
    %c0_175 = arith.constant 0 : index
    %c0_176 = arith.constant 0 : index
    %479 = vector.load %arg31[%c0_174, %c0_175, %c0_176] : memref<2x8x32xf32, #tpu.memory_space<vmem>>, vector<2x8x32xf32>
    tpu.vector_store %arg31[%c0_174, %c0_175, %c0_176], %478 {strides = array<i32>} : memref<2x8x32xf32, #tpu.memory_space<vmem>>, vector<2x8x32xf32>,
    return
  }
  func.func @transform_0(%arg0: i32) -> (i32, i32, i32) {
    %c0_i32 = arith.constant 0 : i32
    %c0_i32_0 = arith.constant 0 : i32
    %c0_i32_1 = arith.constant 0 : i32
    return %arg0, %c0_i32, %c0_i32_0 : i32, i32, i32
  }
  func.func @transform_1(%arg0: i32) -> (i32, i32, i32) {
    %c0_i32 = arith.constant 0 : i32
    %c0_i32_0 = arith.constant 0 : i32
    %c0_i32_1 = arith.constant 0 : i32
    return %arg0, %c0_i32, %c0_i32_0 : i32, i32, i32
  }
  func.func @transform_2(%arg0: i32) -> (i32, i32, i32) {
    %c0_i32 = arith.constant 0 : i32
    %c0_i32_0 = arith.constant 0 : i32
    %c0_i32_1 = arith.constant 0 : i32
    return %arg0, %c0_i32, %c0_i32_0 : i32, i32, i32
  }
  func.func @transform_3(%arg0: i32) -> (i32, i32, i32) {
    %c0_i32 = arith.constant 0 : i32
    %c0_i32_0 = arith.constant 0 : i32
    %c0_i32_1 = arith.constant 0 : i32
    return %arg0, %c0_i32, %c0_i32_0 : i32, i32, i32
  }
  func.func @transform_4(%arg0: i32) -> (i32, i32) {
    %c0_i32 = arith.constant 0 : i32
    %c0_i32_0 = arith.constant 0 : i32
    %c0_i32_1 = arith.constant 0 : i32
    return %c0_i32, %c0_i32_0 : i32, i32
  }
  func.func @transform_5(%arg0: i32) -> (i32, i32) {
    %c0_i32 = arith.constant 0 : i32
    %c0_i32_0 = arith.constant 0 : i32
    %c0_i32_1 = arith.constant 0 : i32
    return %c0_i32, %c0_i32_0 : i32, i32
  }
  func.func @transform_6(%arg0: i32) -> (i32, i32) {
    %c0_i32 = arith.constant 0 : i32
    %c0_i32_0 = arith.constant 0 : i32
    %c0_i32_1 = arith.constant 0 : i32
    return %c0_i32, %c0_i32_0 : i32, i32
  }
  func.func @transform_7(%arg0: i32) -> (i32, i32) {
    %c0_i32 = arith.constant 0 : i32
    %c0_i32_0 = arith.constant 0 : i32
    %c0_i32_1 = arith.constant 0 : i32
    return %c0_i32, %c0_i32_0 : i32, i32
  }
  func.func @transform_8(%arg0: i32) -> (i32, i32) {
    %c0_i32 = arith.constant 0 : i32
    %c0_i32_0 = arith.constant 0 : i32
    %c0_i32_1 = arith.constant 0 : i32
    return %c0_i32, %c0_i32_0 : i32, i32
  }
  func.func @transform_9(%arg0: i32) -> (i32, i32) {
    %c0_i32 = arith.constant 0 : i32
    %c0_i32_0 = arith.constant 0 : i32
    %c0_i32_1 = arith.constant 0 : i32
    return %c0_i32, %c0_i32_0 : i32, i32
  }
  func.func @transform_10(%arg0: i32) -> (i32, i32) {
    %c0_i32 = arith.constant 0 : i32
    %c0_i32_0 = arith.constant 0 : i32
    %c0_i32_1 = arith.constant 0 : i32
    return %c0_i32, %c0_i32_0 : i32, i32
  }
  func.func @transform_11(%arg0: i32) -> (i32, i32) {
    %c0_i32 = arith.constant 0 : i32
    %c0_i32_0 = arith.constant 0 : i32
    %c0_i32_1 = arith.constant 0 : i32
    return %c0_i32, %c0_i32_0 : i32, i32
  }
  func.func @transform_12(%arg0: i32) -> (i32, i32) {
    %c0_i32 = arith.constant 0 : i32
    %c0_i32_0 = arith.constant 0 : i32
    %c0_i32_1 = arith.constant 0 : i32
    return %c0_i32, %c0_i32_0 : i32, i32
  }
  func.func @transform_13(%arg0: i32) -> (i32, i32) {
    %c0_i32 = arith.constant 0 : i32
    %c0_i32_0 = arith.constant 0 : i32
    %c0_i32_1 = arith.constant 0 : i32
    return %c0_i32, %c0_i32_0 : i32, i32
  }
  func.func @transform_14(%arg0: i32) -> (i32, i32) {
    %c0_i32 = arith.constant 0 : i32
    %c0_i32_0 = arith.constant 0 : i32
    %c0_i32_1 = arith.constant 0 : i32
    return %c0_i32, %c0_i32_0 : i32, i32
  }
  func.func @transform_15(%arg0: i32) -> (i32, i32) {
    %c0_i32 = arith.constant 0 : i32
    %c0_i32_0 = arith.constant 0 : i32
    %c0_i32_1 = arith.constant 0 : i32
    return %c0_i32, %c0_i32_0 : i32, i32
  }
  func.func @transform_16(%arg0: i32) -> (i32, i32) {
    %c0_i32 = arith.constant 0 : i32
    %c0_i32_0 = arith.constant 0 : i32
    %c0_i32_1 = arith.constant 0 : i32
    return %c0_i32, %c0_i32_0 : i32, i32
  }
  func.func @transform_17(%arg0: i32) -> (i32, i32) {
    %c0_i32 = arith.constant 0 : i32
    %c0_i32_0 = arith.constant 0 : i32
    %c0_i32_1 = arith.constant 0 : i32
    return %c0_i32, %c0_i32_0 : i32, i32
  }
  func.func @transform_18(%arg0: i32) -> (i32, i32) {
    %c0_i32 = arith.constant 0 : i32
    %c0_i32_0 = arith.constant 0 : i32
    %c0_i32_1 = arith.constant 0 : i32
    return %c0_i32, %c0_i32_0 : i32, i32
  }
  func.func @transform_19(%arg0: i32) -> (i32, i32) {
    %c0_i32 = arith.constant 0 : i32
    %c0_i32_0 = arith.constant 0 : i32
    %c0_i32_1 = arith.constant 0 : i32
    return %c0_i32, %c0_i32_0 : i32, i32
  }
  func.func @transform_20(%arg0: i32) -> (i32, i32) {
    %c0_i32 = arith.constant 0 : i32
    %c0_i32_0 = arith.constant 0 : i32
    %c0_i32_1 = arith.constant 0 : i32
    return %c0_i32, %c0_i32_0 : i32, i32
  }
  func.func @transform_21(%arg0: i32) -> (i32, i32) {
    %c0_i32 = arith.constant 0 : i32
    %c0_i32_0 = arith.constant 0 : i32
    %c0_i32_1 = arith.constant 0 : i32
    return %c0_i32, %c0_i32_0 : i32, i32
  }
  func.func @transform_22(%arg0: i32) -> (i32, i32) {
    %c0_i32 = arith.constant 0 : i32
    %c0_i32_0 = arith.constant 0 : i32
    %c0_i32_1 = arith.constant 0 : i32
    return %c0_i32, %c0_i32_0 : i32, i32
  }
  func.func @transform_23(%arg0: i32) -> (i32, i32) {
    %c0_i32 = arith.constant 0 : i32
    %c0_i32_0 = arith.constant 0 : i32
    %c0_i32_1 = arith.constant 0 : i32
    return %c0_i32, %c0_i32_0 : i32, i32
  }
  func.func @transform_24(%arg0: i32) -> (i32, i32) {
    %c0_i32 = arith.constant 0 : i32
    %c0_i32_0 = arith.constant 0 : i32
    %c0_i32_1 = arith.constant 0 : i32
    return %c0_i32, %c0_i32_0 : i32, i32
  }
  func.func @transform_25(%arg0: i32) -> (i32, i32) {
    %c0_i32 = arith.constant 0 : i32
    %c0_i32_0 = arith.constant 0 : i32
    %c0_i32_1 = arith.constant 0 : i32
    return %c0_i32, %c0_i32_0 : i32, i32
  }
  func.func @transform_26(%arg0: i32) -> (i32, i32) {
    %c0_i32 = arith.constant 0 : i32
    %c0_i32_0 = arith.constant 0 : i32
    %c0_i32_1 = arith.constant 0 : i32
    return %c0_i32, %c0_i32_0 : i32, i32
  }
  func.func @transform_27(%arg0: i32) -> (i32, i32) {
    %c0_i32 = arith.constant 0 : i32
    %c0_i32_0 = arith.constant 0 : i32
    %c0_i32_1 = arith.constant 0 : i32
    return %c0_i32, %c0_i32_0 : i32, i32
  }
  func.func @transform_28(%arg0: i32) -> (i32, i32) {
    %c0_i32 = arith.constant 0 : i32
    %c0_i32_0 = arith.constant 0 : i32
    %c0_i32_1 = arith.constant 0 : i32
    return %c0_i32, %c0_i32_0 : i32, i32
  }
  func.func @transform_29(%arg0: i32) -> (i32, i32) {
    %c0_i32 = arith.constant 0 : i32
    %c0_i32_0 = arith.constant 0 : i32
    %c0_i32_1 = arith.constant 0 : i32
    return %c0_i32, %c0_i32_0 : i32, i32
  }
  func.func @transform_30(%arg0: i32) -> (i32, i32, i32) {
    %c0_i32 = arith.constant 0 : i32
    %c0_i32_0 = arith.constant 0 : i32
    %c0_i32_1 = arith.constant 0 : i32
    return %arg0, %c0_i32, %c0_i32_0 : i32, i32, i32
  }
}

module attributes {stable_mosaic.version = 11 : i64} {
  func.func @_decoder_layer_kernel(%arg0: i32, %arg1: memref<2x8x32xf32, #tpu.memory_space<vmem>>, %arg2: memref<2x8x32xf32, #tpu.memory_space<vmem>>, %arg3: memref<2x8x8xf32, #tpu.memory_space<vmem>>, %arg4: memref<2x1x8xf32, #tpu.memory_space<vmem>>, %arg5: memref<1x32xf32, #tpu.memory_space<vmem>>, %arg6: memref<1x32xf32, #tpu.memory_space<vmem>>, %arg7: memref<1x32xf32, #tpu.memory_space<vmem>>, %arg8: memref<1x32xf32, #tpu.memory_space<vmem>>, %arg9: memref<1x32xf32, #tpu.memory_space<vmem>>, %arg10: memref<1x32xf32, #tpu.memory_space<vmem>>, %arg11: memref<32x32xbf16, #tpu.memory_space<vmem>>, %arg12: memref<1x32xf32, #tpu.memory_space<vmem>>, %arg13: memref<32x32xbf16, #tpu.memory_space<vmem>>, %arg14: memref<1x32xf32, #tpu.memory_space<vmem>>, %arg15: memref<32x32xbf16, #tpu.memory_space<vmem>>, %arg16: memref<1x32xf32, #tpu.memory_space<vmem>>, %arg17: memref<32x32xbf16, #tpu.memory_space<vmem>>, %arg18: memref<1x32xf32, #tpu.memory_space<vmem>>, %arg19: memref<32x32xbf16, #tpu.memory_space<vmem>>, %arg20: memref<1x32xf32, #tpu.memory_space<vmem>>, %arg21: memref<32x32xbf16, #tpu.memory_space<vmem>>, %arg22: memref<1x32xf32, #tpu.memory_space<vmem>>, %arg23: memref<32x32xbf16, #tpu.memory_space<vmem>>, %arg24: memref<1x32xf32, #tpu.memory_space<vmem>>, %arg25: memref<32x32xbf16, #tpu.memory_space<vmem>>, %arg26: memref<1x32xf32, #tpu.memory_space<vmem>>, %arg27: memref<32x2048xbf16, #tpu.memory_space<vmem>>, %arg28: memref<1x2048xf32, #tpu.memory_space<vmem>>, %arg29: memref<2048x32xbf16, #tpu.memory_space<vmem>>, %arg30: memref<1x32xf32, #tpu.memory_space<vmem>>, %arg31: memref<2x8x32xf32, #tpu.memory_space<vmem>>) attributes {dimension_semantics = [#tpu.dimension_semantics<parallel>], iteration_bounds = array<i64: 1>, scalar_prefetch = 0 : i64, scratch_operands = 0 : i64, tpu.core_type = #tpu.core_type<tc>, window_params = [{transform_indices = @transform_0, window_bounds = array<i64: 2, 8, 32>}, {transform_indices = @transform_1, window_bounds = array<i64: 2, 8, 32>}, {transform_indices = @transform_2, window_bounds = array<i64: 2, 8, 8>}, {transform_indices = @transform_3, window_bounds = array<i64: 2, 1, 8>}, {pipeline_mode = #tpu.pipeline_mode<synchronous>, transform_indices = @transform_4, window_bounds = array<i64: 1, 32>}, {pipeline_mode = #tpu.pipeline_mode<synchronous>, transform_indices = @transform_5, window_bounds = array<i64: 1, 32>}, {pipeline_mode = #tpu.pipeline_mode<synchronous>, transform_indices = @transform_6, window_bounds = array<i64: 1, 32>}, {pipeline_mode = #tpu.pipeline_mode<synchronous>, transform_indices = @transform_7, window_bounds = array<i64: 1, 32>}, {pipeline_mode = #tpu.pipeline_mode<synchronous>, transform_indices = @transform_8, window_bounds = array<i64: 1, 32>}, {pipeline_mode = #tpu.pipeline_mode<synchronous>, transform_indices = @transform_9, window_bounds = array<i64: 1, 32>}, {pipeline_mode = #tpu.pipeline_mode<synchronous>, transform_indices = @transform_10, window_bounds = array<i64: 32, 32>}, {pipeline_mode = #tpu.pipeline_mode<synchronous>, transform_indices = @transform_11, window_bounds = array<i64: 1, 32>}, {pipeline_mode = #tpu.pipeline_mode<synchronous>, transform_indices = @transform_12, window_bounds = array<i64: 32, 32>}, {pipeline_mode = #tpu.pipeline_mode<synchronous>, transform_indices = @transform_13, window_bounds = array<i64: 1, 32>}, {pipeline_mode = #tpu.pipeline_mode<synchronous>, transform_indices = @transform_14, window_bounds = array<i64: 32, 32>}, {pipeline_mode = #tpu.pipeline_mode<synchronous>, transform_indices = @transform_15, window_bounds = array<i64: 1, 32>}, {pipeline_mode = #tpu.pipeline_mode<synchronous>, transform_indices = @transform_16, window_bounds = array<i64: 32, 32>}, {pipeline_mode = #tpu.pipeline_mode<synchronous>, transform_indices = @transform_17, window_bounds = array<i64: 1, 32>}, {pipeline_mode = #tpu.pipeline_mode<synchronous>, transform_indices = @transform_18, window_bounds = array<i64: 32, 32>}, {pipeline_mode = #tpu.pipeline_mode<synchronous>, transform_indices = @transform_19, window_bounds = array<i64: 1, 32>}, {pipeline_mode = #tpu.pipeline_mode<synchronous>, transform_indices = @transform_20, window_bounds = array<i64: 32, 32>}, {pipeline_mode = #tpu.pipeline_mode<synchronous>, transform_indices = @transform_21, window_bounds = array<i64: 1, 32>}, {pipeline_mode = #tpu.pipeline_mode<synchronous>, transform_indices = @transform_22, window_bounds = array<i64: 32, 32>}, {pipeline_mode = #tpu.pipeline_mode<synchronous>, transform_indices = @transform_23, window_bounds = array<i64: 1, 32>}, {pipeline_mode = #tpu.pipeline_mode<synchronous>, transform_indices = @transform_24, window_bounds = array<i64: 32, 32>}, {pipeline_mode = #tpu.pipeline_mode<synchronous>, transform_indices = @transform_25, window_bounds = array<i64: 1, 32>}, {pipeline_mode = #tpu.pipeline_mode<synchronous>, transform_indices = @transform_26, window_bounds = array<i64: 32, 2048>}, {pipeline_mode = #tpu.pipeline_mode<synchronous>, transform_indices = @transform_27, window_bounds = array<i64: 1, 2048>}, {pipeline_mode = #tpu.pipeline_mode<synchronous>, transform_indices = @transform_28, window_bounds = array<i64: 2048, 32>}, {pipeline_mode = #tpu.pipeline_mode<synchronous>, transform_indices = @transform_29, window_bounds = array<i64: 1, 32>}, {transform_indices = @transform_30, window_bounds = array<i64: 2, 8, 32>}]} {
    %c0 = arith.constant 0 : index
    %c0_0 = arith.constant 0 : index
    %c0_1 = arith.constant 0 : index
    %0 = vector.load %arg1[%c0, %c0_0, %c0_1] : memref<2x8x32xf32, #tpu.memory_space<vmem>>, vector<2x8x32xf32>
    %1 = vector.shape_cast %0 : vector<2x8x32xf32> to vector<16x32xf32>
    %c0_2 = arith.constant 0 : index
    %c0_3 = arith.constant 0 : index
    %c0_4 = arith.constant 0 : index
    %2 = vector.load %arg2[%c0_2, %c0_3, %c0_4] : memref<2x8x32xf32, #tpu.memory_space<vmem>>, vector<2x8x32xf32>
    %3 = vector.shape_cast %2 : vector<2x8x32xf32> to vector<16x32xf32>
    %c0_5 = arith.constant 0 : index
    %c0_6 = arith.constant 0 : index
    %c0_7 = arith.constant 0 : index
    %4 = vector.load %arg3[%c0_5, %c0_6, %c0_7] : memref<2x8x8xf32, #tpu.memory_space<vmem>>, vector<2x8x8xf32>
    %cst = arith.constant 0.000000e+00 : f32
    %5 = vector.broadcast %cst : f32 to vector<2x8x8xf32>
    %6 = arith.cmpf oeq, %4, %5 : vector<2x8x8xf32>
    %cst_8 = arith.constant -1.000000e+09 : f32
    %cst_9 = arith.constant 0.000000e+00 : f32
    %7 = vector.broadcast %cst_8 : f32 to vector<2x8x8xf32>
    %8 = vector.broadcast %cst_9 : f32 to vector<2x8x8xf32>
    %9 = arith.select %6, %7, %8 : vector<2x8x8xi1>, vector<2x8x8xf32>
    %c0_10 = arith.constant 0 : index
    %c0_11 = arith.constant 0 : index
    %c0_12 = arith.constant 0 : index
    %10 = vector.load %arg4[%c0_10, %c0_11, %c0_12] : memref<2x1x8xf32, #tpu.memory_space<vmem>>, vector<2x1x8xf32>
    %cst_13 = arith.constant 0.000000e+00 : f32
    %11 = vector.broadcast %cst_13 : f32 to vector<2x1x8xf32>
    %12 = arith.cmpf oeq, %10, %11 : vector<2x1x8xf32>
    %cst_14 = arith.constant -1.000000e+09 : f32
    %cst_15 = arith.constant 0.000000e+00 : f32
    %13 = vector.broadcast %cst_14 : f32 to vector<2x1x8xf32>
    %14 = vector.broadcast %cst_15 : f32 to vector<2x1x8xf32>
    %15 = arith.select %12, %13, %14 : vector<2x1x8xi1>, vector<2x1x8xf32>
    %cst_16 = arith.constant dense<0.000000e+00> : vector<16xf32>
    %16 = vector.multi_reduction <add>, %1, %cst_16 [1] : vector<16x32xf32> to vector<16xf32>
    %17 = vector.shape_cast %16 : vector<16xf32> to vector<16x1xf32>
    %cst_17 = arith.constant 3.200000e+01 : f32
    %18 = vector.broadcast %cst_17 : f32 to vector<16x1xf32>
    %19 = arith.divf %17, %18 : vector<16x1xf32>
    %20 = vector.broadcast %19 : vector<16x1xf32> to vector<16x32xf32>
    %21 = arith.subf %1, %20 : vector<16x32xf32>
    %22 = arith.mulf %21, %21 : vector<16x32xf32>
    %cst_18 = arith.constant dense<0.000000e+00> : vector<16xf32>
    %23 = vector.multi_reduction <add>, %22, %cst_18 [1] : vector<16x32xf32> to vector<16xf32>
    %24 = vector.shape_cast %23 : vector<16xf32> to vector<16x1xf32>
    %cst_19 = arith.constant 0.0322580636 : f32
    %25 = vector.broadcast %cst_19 : f32 to vector<16x1xf32>
    %26 = arith.mulf %24, %25 : vector<16x1xf32>
    %27 = math.sqrt %26 : vector<16x1xf32>
    %cst_20 = arith.constant 9.99999997E-7 : f32
    %28 = vector.broadcast %cst_20 : f32 to vector<16x1xf32>
    %29 = arith.addf %27, %28 : vector<16x1xf32>
    %30 = tpu.reciprocal %29 : vector<16x1xf32> -> vector<16x1xf32>
    %c0_21 = arith.constant 0 : index
    %c0_22 = arith.constant 0 : index
    %31 = vector.load %arg5[%c0_21, %c0_22] : memref<1x32xf32, #tpu.memory_space<vmem>>, vector<1x32xf32>
    %32 = vector.broadcast %31 : vector<1x32xf32> to vector<16x32xf32>
    %33 = vector.broadcast %30 : vector<16x1xf32> to vector<16x32xf32>
    %34 = arith.mulf %32, %33 : vector<16x32xf32>
    %35 = arith.mulf %34, %21 : vector<16x32xf32>
    %c0_23 = arith.constant 0 : index
    %c0_24 = arith.constant 0 : index
    %36 = vector.load %arg6[%c0_23, %c0_24] : memref<1x32xf32, #tpu.memory_space<vmem>>, vector<1x32xf32>
    %37 = vector.broadcast %36 : vector<1x32xf32> to vector<16x32xf32>
    %38 = arith.addf %35, %37 : vector<16x32xf32>
    %39 = arith.truncf %38 : vector<16x32xf32> to vector<16x32xbf16>
    %c0_25 = arith.constant 0 : index
    %c0_26 = arith.constant 0 : index
    %40 = vector.load %arg11[%c0_25, %c0_26] : memref<32x32xbf16, #tpu.memory_space<vmem>>, vector<32x32xbf16>
    %cst_27 = arith.constant dense<0.000000e+00> : vector<16x32xf32>
    %41 = tpu.matmul %39, %40, %cst_27 {dimension_numbers = #tpu.dot_dimension_numbers<[1], [0], [0], [1], [0, 0, 1, 1], [], []>} : vector<16x32xbf16>, vector<32x32xbf16>, vector<16x32xf32> -> vector<16x32xf32>
    %c0_28 = arith.constant 0 : index
    %c0_29 = arith.constant 0 : index
    %42 = vector.load %arg12[%c0_28, %c0_29] : memref<1x32xf32, #tpu.memory_space<vmem>>, vector<1x32xf32>
    %43 = vector.broadcast %42 : vector<1x32xf32> to vector<16x32xf32>
    %44 = arith.addf %41, %43 : vector<16x32xf32>
    %45 = arith.truncf %38 : vector<16x32xf32> to vector<16x32xbf16>
    %c0_30 = arith.constant 0 : index
    %c0_31 = arith.constant 0 : index
    %46 = vector.load %arg13[%c0_30, %c0_31] : memref<32x32xbf16, #tpu.memory_space<vmem>>, vector<32x32xbf16>
    %cst_32 = arith.constant dense<0.000000e+00> : vector<16x32xf32>
    %47 = tpu.matmul %45, %46, %cst_32 {dimension_numbers = #tpu.dot_dimension_numbers<[1], [0], [0], [1], [0, 0, 1, 1], [], []>} : vector<16x32xbf16>, vector<32x32xbf16>, vector<16x32xf32> -> vector<16x32xf32>
    %c0_33 = arith.constant 0 : index
    %c0_34 = arith.constant 0 : index
    %48 = vector.load %arg14[%c0_33, %c0_34] : memref<1x32xf32, #tpu.memory_space<vmem>>, vector<1x32xf32>
    %49 = vector.broadcast %48 : vector<1x32xf32> to vector<16x32xf32>
    %50 = arith.addf %47, %49 : vector<16x32xf32>
    %51 = arith.truncf %38 : vector<16x32xf32> to vector<16x32xbf16>
    %c0_35 = arith.constant 0 : index
    %c0_36 = arith.constant 0 : index
    %52 = vector.load %arg15[%c0_35, %c0_36] : memref<32x32xbf16, #tpu.memory_space<vmem>>, vector<32x32xbf16>
    %cst_37 = arith.constant dense<0.000000e+00> : vector<16x32xf32>
    %53 = tpu.matmul %51, %52, %cst_37 {dimension_numbers = #tpu.dot_dimension_numbers<[1], [0], [0], [1], [0, 0, 1, 1], [], []>} : vector<16x32xbf16>, vector<32x32xbf16>, vector<16x32xf32> -> vector<16x32xf32>
    %c0_38 = arith.constant 0 : index
    %c0_39 = arith.constant 0 : index
    %54 = vector.load %arg16[%c0_38, %c0_39] : memref<1x32xf32, #tpu.memory_space<vmem>>, vector<1x32xf32>
    %55 = vector.broadcast %54 : vector<1x32xf32> to vector<16x32xf32>
    %56 = arith.addf %53, %55 : vector<16x32xf32>
    %57 = arith.truncf %44 : vector<16x32xf32> to vector<16x32xbf16>
    %58 = arith.truncf %50 : vector<16x32xf32> to vector<16x32xbf16>
    %59 = arith.truncf %56 : vector<16x32xf32> to vector<16x32xbf16>
    %60 = vector.shape_cast %57 : vector<16x32xbf16> to vector<2x8x32xbf16>
    %61 = vector.shape_cast %58 : vector<16x32xbf16> to vector<2x8x32xbf16>
    %62 = vector.shape_cast %59 : vector<16x32xbf16> to vector<2x8x32xbf16>
    %63 = vector.extract_strided_slice %60 {offsets = [0, 0, 0], sizes = [2, 8, 4], strides = [1, 1, 1]} : vector<2x8x32xbf16> to vector<2x8x4xbf16>
    %64 = vector.extract_strided_slice %61 {offsets = [0, 0, 0], sizes = [2, 8, 4], strides = [1, 1, 1]} : vector<2x8x32xbf16> to vector<2x8x4xbf16>
    "tpu.trace_start"() <{level = 10 : i32, message = "bqd,bkd->bqk"}> : () -> ()
    %cst_40 = arith.constant dense<0.000000e+00> : vector<2x8x8xf32>
    %65 = tpu.matmul %63, %64, %cst_40 {dimension_numbers = #tpu.dot_dimension_numbers<[2], [2], [1], [1], [0, 0, 0, 1, 1, 1], [0], [0]>} : vector<2x8x4xbf16>, vector<2x8x4xbf16>, vector<2x8x8xf32> -> vector<2x8x8xf32>
    "tpu.trace_stop"() : () -> ()
    %cst_41 = arith.constant 5.000000e-01 : f32
    %66 = vector.broadcast %cst_41 : f32 to vector<2x8x8xf32>
    %67 = arith.mulf %65, %66 : vector<2x8x8xf32>
    %68 = arith.addf %67, %9 : vector<2x8x8xf32>
    %cst_42 = arith.constant dense<0xFF800000> : vector<2x8xf32>
    %69 = vector.multi_reduction <maximumf>, %68, %cst_42 [2] : vector<2x8x8xf32> to vector<2x8xf32>
    %70 = vector.shape_cast %69 : vector<2x8xf32> to vector<2x8x1xf32>
    %71 = vector.broadcast %70 : vector<2x8x1xf32> to vector<2x8x8xf32>
    %72 = arith.subf %68, %71 : vector<2x8x8xf32>
    %73 = math.exp %72 : vector<2x8x8xf32>
    %cst_43 = arith.constant dense<0.000000e+00> : vector<2x8xf32>
    %74 = vector.multi_reduction <add>, %73, %cst_43 [2] : vector<2x8x8xf32> to vector<2x8xf32>
    %75 = vector.shape_cast %74 : vector<2x8xf32> to vector<2x8x1xf32>
    %76 = tpu.reciprocal %75 {approx = true} : vector<2x8x1xf32> -> vector<2x8x1xf32>
    %77 = vector.broadcast %76 : vector<2x8x1xf32> to vector<2x8x8xf32>
    %78 = arith.mulf %73, %77 : vector<2x8x8xf32>
    %79 = arith.truncf %78 : vector<2x8x8xf32> to vector<2x8x8xbf16>
    %80 = vector.extract_strided_slice %62 {offsets = [0, 0, 0], sizes = [2, 8, 4], strides = [1, 1, 1]} : vector<2x8x32xbf16> to vector<2x8x4xbf16>
    "tpu.trace_start"() <{level = 10 : i32, message = "bqk,bkd->bqd"}> : () -> ()
    %cst_44 = arith.constant dense<0.000000e+00> : vector<2x8x4xf32>
    %81 = tpu.matmul %79, %80, %cst_44 {dimension_numbers = #tpu.dot_dimension_numbers<[2], [1], [1], [2], [0, 0, 0, 1, 1, 2], [0], [0]>} : vector<2x8x8xbf16>, vector<2x8x4xbf16>, vector<2x8x4xf32> -> vector<2x8x4xf32>
    "tpu.trace_stop"() : () -> ()
    %82 = vector.extract_strided_slice %60 {offsets = [0, 0, 4], sizes = [2, 8, 4], strides = [1, 1, 1]} : vector<2x8x32xbf16> to vector<2x8x4xbf16>
    %83 = vector.extract_strided_slice %61 {offsets = [0, 0, 4], sizes = [2, 8, 4], strides = [1, 1, 1]} : vector<2x8x32xbf16> to vector<2x8x4xbf16>
    "tpu.trace_start"() <{level = 10 : i32, message = "bqd,bkd->bqk"}> : () -> ()
    %cst_45 = arith.constant dense<0.000000e+00> : vector<2x8x8xf32>
    %84 = tpu.matmul %82, %83, %cst_45 {dimension_numbers = #tpu.dot_dimension_numbers<[2], [2], [1], [1], [0, 0, 0, 1, 1, 1], [0], [0]>} : vector<2x8x4xbf16>, vector<2x8x4xbf16>, vector<2x8x8xf32> -> vector<2x8x8xf32>
    "tpu.trace_stop"() : () -> ()
    %cst_46 = arith.constant 5.000000e-01 : f32
    %85 = vector.broadcast %cst_46 : f32 to vector<2x8x8xf32>
    %86 = arith.mulf %84, %85 : vector<2x8x8xf32>
    %87 = arith.addf %86, %9 : vector<2x8x8xf32>
    %cst_47 = arith.constant dense<0xFF800000> : vector<2x8xf32>
    %88 = vector.multi_reduction <maximumf>, %87, %cst_47 [2] : vector<2x8x8xf32> to vector<2x8xf32>
    %89 = vector.shape_cast %88 : vector<2x8xf32> to vector<2x8x1xf32>
    %90 = vector.broadcast %89 : vector<2x8x1xf32> to vector<2x8x8xf32>
    %91 = arith.subf %87, %90 : vector<2x8x8xf32>
    %92 = math.exp %91 : vector<2x8x8xf32>
    %cst_48 = arith.constant dense<0.000000e+00> : vector<2x8xf32>
    %93 = vector.multi_reduction <add>, %92, %cst_48 [2] : vector<2x8x8xf32> to vector<2x8xf32>
    %94 = vector.shape_cast %93 : vector<2x8xf32> to vector<2x8x1xf32>
    %95 = tpu.reciprocal %94 {approx = true} : vector<2x8x1xf32> -> vector<2x8x1xf32>
    %96 = vector.broadcast %95 : vector<2x8x1xf32> to vector<2x8x8xf32>
    %97 = arith.mulf %92, %96 : vector<2x8x8xf32>
    %98 = arith.truncf %97 : vector<2x8x8xf32> to vector<2x8x8xbf16>
    %99 = vector.extract_strided_slice %62 {offsets = [0, 0, 4], sizes = [2, 8, 4], strides = [1, 1, 1]} : vector<2x8x32xbf16> to vector<2x8x4xbf16>
    "tpu.trace_start"() <{level = 10 : i32, message = "bqk,bkd->bqd"}> : () -> ()
    %cst_49 = arith.constant dense<0.000000e+00> : vector<2x8x4xf32>
    %100 = tpu.matmul %98, %99, %cst_49 {dimension_numbers = #tpu.dot_dimension_numbers<[2], [1], [1], [2], [0, 0, 0, 1, 1, 2], [0], [0]>} : vector<2x8x8xbf16>, vector<2x8x4xbf16>, vector<2x8x4xf32> -> vector<2x8x4xf32>
    "tpu.trace_stop"() : () -> ()
    %101 = vector.extract_strided_slice %60 {offsets = [0, 0, 8], sizes = [2, 8, 4], strides = [1, 1, 1]} : vector<2x8x32xbf16> to vector<2x8x4xbf16>
    %102 = vector.extract_strided_slice %61 {offsets = [0, 0, 8], sizes = [2, 8, 4], strides = [1, 1, 1]} : vector<2x8x32xbf16> to vector<2x8x4xbf16>
    "tpu.trace_start"() <{level = 10 : i32, message = "bqd,bkd->bqk"}> : () -> ()
    %cst_50 = arith.constant dense<0.000000e+00> : vector<2x8x8xf32>
    %103 = tpu.matmul %101, %102, %cst_50 {dimension_numbers = #tpu.dot_dimension_numbers<[2], [2], [1], [1], [0, 0, 0, 1, 1, 1], [0], [0]>} : vector<2x8x4xbf16>, vector<2x8x4xbf16>, vector<2x8x8xf32> -> vector<2x8x8xf32>
    "tpu.trace_stop"() : () -> ()
    %cst_51 = arith.constant 5.000000e-01 : f32
    %104 = vector.broadcast %cst_51 : f32 to vector<2x8x8xf32>
    %105 = arith.mulf %103, %104 : vector<2x8x8xf32>
    %106 = arith.addf %105, %9 : vector<2x8x8xf32>
    %cst_52 = arith.constant dense<0xFF800000> : vector<2x8xf32>
    %107 = vector.multi_reduction <maximumf>, %106, %cst_52 [2] : vector<2x8x8xf32> to vector<2x8xf32>
    %108 = vector.shape_cast %107 : vector<2x8xf32> to vector<2x8x1xf32>
    %109 = vector.broadcast %108 : vector<2x8x1xf32> to vector<2x8x8xf32>
    %110 = arith.subf %106, %109 : vector<2x8x8xf32>
    %111 = math.exp %110 : vector<2x8x8xf32>
    %cst_53 = arith.constant dense<0.000000e+00> : vector<2x8xf32>
    %112 = vector.multi_reduction <add>, %111, %cst_53 [2] : vector<2x8x8xf32> to vector<2x8xf32>
    %113 = vector.shape_cast %112 : vector<2x8xf32> to vector<2x8x1xf32>
    %114 = tpu.reciprocal %113 {approx = true} : vector<2x8x1xf32> -> vector<2x8x1xf32>
    %115 = vector.broadcast %114 : vector<2x8x1xf32> to vector<2x8x8xf32>
    %116 = arith.mulf %111, %115 : vector<2x8x8xf32>
    %117 = arith.truncf %116 : vector<2x8x8xf32> to vector<2x8x8xbf16>
    %118 = vector.extract_strided_slice %62 {offsets = [0, 0, 8], sizes = [2, 8, 4], strides = [1, 1, 1]} : vector<2x8x32xbf16> to vector<2x8x4xbf16>
    "tpu.trace_start"() <{level = 10 : i32, message = "bqk,bkd->bqd"}> : () -> ()
    %cst_54 = arith.constant dense<0.000000e+00> : vector<2x8x4xf32>
    %119 = tpu.matmul %117, %118, %cst_54 {dimension_numbers = #tpu.dot_dimension_numbers<[2], [1], [1], [2], [0, 0, 0, 1, 1, 2], [0], [0]>} : vector<2x8x8xbf16>, vector<2x8x4xbf16>, vector<2x8x4xf32> -> vector<2x8x4xf32>
    "tpu.trace_stop"() : () -> ()
    %120 = vector.extract_strided_slice %60 {offsets = [0, 0, 12], sizes = [2, 8, 4], strides = [1, 1, 1]} : vector<2x8x32xbf16> to vector<2x8x4xbf16>
    %121 = vector.extract_strided_slice %61 {offsets = [0, 0, 12], sizes = [2, 8, 4], strides = [1, 1, 1]} : vector<2x8x32xbf16> to vector<2x8x4xbf16>
    "tpu.trace_start"() <{level = 10 : i32, message = "bqd,bkd->bqk"}> : () -> ()
    %cst_55 = arith.constant dense<0.000000e+00> : vector<2x8x8xf32>
    %122 = tpu.matmul %120, %121, %cst_55 {dimension_numbers = #tpu.dot_dimension_numbers<[2], [2], [1], [1], [0, 0, 0, 1, 1, 1], [0], [0]>} : vector<2x8x4xbf16>, vector<2x8x4xbf16>, vector<2x8x8xf32> -> vector<2x8x8xf32>
    "tpu.trace_stop"() : () -> ()
    %cst_56 = arith.constant 5.000000e-01 : f32
    %123 = vector.broadcast %cst_56 : f32 to vector<2x8x8xf32>
    %124 = arith.mulf %122, %123 : vector<2x8x8xf32>
    %125 = arith.addf %124, %9 : vector<2x8x8xf32>
    %cst_57 = arith.constant dense<0xFF800000> : vector<2x8xf32>
    %126 = vector.multi_reduction <maximumf>, %125, %cst_57 [2] : vector<2x8x8xf32> to vector<2x8xf32>
    %127 = vector.shape_cast %126 : vector<2x8xf32> to vector<2x8x1xf32>
    %128 = vector.broadcast %127 : vector<2x8x1xf32> to vector<2x8x8xf32>
    %129 = arith.subf %125, %128 : vector<2x8x8xf32>
    %130 = math.exp %129 : vector<2x8x8xf32>
    %cst_58 = arith.constant dense<0.000000e+00> : vector<2x8xf32>
    %131 = vector.multi_reduction <add>, %130, %cst_58 [2] : vector<2x8x8xf32> to vector<2x8xf32>
    %132 = vector.shape_cast %131 : vector<2x8xf32> to vector<2x8x1xf32>
    %133 = tpu.reciprocal %132 {approx = true} : vector<2x8x1xf32> -> vector<2x8x1xf32>
    %134 = vector.broadcast %133 : vector<2x8x1xf32> to vector<2x8x8xf32>
    %135 = arith.mulf %130, %134 : vector<2x8x8xf32>
    %136 = arith.truncf %135 : vector<2x8x8xf32> to vector<2x8x8xbf16>
    %137 = vector.extract_strided_slice %62 {offsets = [0, 0, 12], sizes = [2, 8, 4], strides = [1, 1, 1]} : vector<2x8x32xbf16> to vector<2x8x4xbf16>
    "tpu.trace_start"() <{level = 10 : i32, message = "bqk,bkd->bqd"}> : () -> ()
    %cst_59 = arith.constant dense<0.000000e+00> : vector<2x8x4xf32>
    %138 = tpu.matmul %136, %137, %cst_59 {dimension_numbers = #tpu.dot_dimension_numbers<[2], [1], [1], [2], [0, 0, 0, 1, 1, 2], [0], [0]>} : vector<2x8x8xbf16>, vector<2x8x4xbf16>, vector<2x8x4xf32> -> vector<2x8x4xf32>
    "tpu.trace_stop"() : () -> ()
    %139 = vector.extract_strided_slice %60 {offsets = [0, 0, 16], sizes = [2, 8, 4], strides = [1, 1, 1]} : vector<2x8x32xbf16> to vector<2x8x4xbf16>
    %140 = vector.extract_strided_slice %61 {offsets = [0, 0, 16], sizes = [2, 8, 4], strides = [1, 1, 1]} : vector<2x8x32xbf16> to vector<2x8x4xbf16>
    "tpu.trace_start"() <{level = 10 : i32, message = "bqd,bkd->bqk"}> : () -> ()
    %cst_60 = arith.constant dense<0.000000e+00> : vector<2x8x8xf32>
    %141 = tpu.matmul %139, %140, %cst_60 {dimension_numbers = #tpu.dot_dimension_numbers<[2], [2], [1], [1], [0, 0, 0, 1, 1, 1], [0], [0]>} : vector<2x8x4xbf16>, vector<2x8x4xbf16>, vector<2x8x8xf32> -> vector<2x8x8xf32>
    "tpu.trace_stop"() : () -> ()
    %cst_61 = arith.constant 5.000000e-01 : f32
    %142 = vector.broadcast %cst_61 : f32 to vector<2x8x8xf32>
    %143 = arith.mulf %141, %142 : vector<2x8x8xf32>
    %144 = arith.addf %143, %9 : vector<2x8x8xf32>
    %cst_62 = arith.constant dense<0xFF800000> : vector<2x8xf32>
    %145 = vector.multi_reduction <maximumf>, %144, %cst_62 [2] : vector<2x8x8xf32> to vector<2x8xf32>
    %146 = vector.shape_cast %145 : vector<2x8xf32> to vector<2x8x1xf32>
    %147 = vector.broadcast %146 : vector<2x8x1xf32> to vector<2x8x8xf32>
    %148 = arith.subf %144, %147 : vector<2x8x8xf32>
    %149 = math.exp %148 : vector<2x8x8xf32>
    %cst_63 = arith.constant dense<0.000000e+00> : vector<2x8xf32>
    %150 = vector.multi_reduction <add>, %149, %cst_63 [2] : vector<2x8x8xf32> to vector<2x8xf32>
    %151 = vector.shape_cast %150 : vector<2x8xf32> to vector<2x8x1xf32>
    %152 = tpu.reciprocal %151 {approx = true} : vector<2x8x1xf32> -> vector<2x8x1xf32>
    %153 = vector.broadcast %152 : vector<2x8x1xf32> to vector<2x8x8xf32>
    %154 = arith.mulf %149, %153 : vector<2x8x8xf32>
    %155 = arith.truncf %154 : vector<2x8x8xf32> to vector<2x8x8xbf16>
    %156 = vector.extract_strided_slice %62 {offsets = [0, 0, 16], sizes = [2, 8, 4], strides = [1, 1, 1]} : vector<2x8x32xbf16> to vector<2x8x4xbf16>
    "tpu.trace_start"() <{level = 10 : i32, message = "bqk,bkd->bqd"}> : () -> ()
    %cst_64 = arith.constant dense<0.000000e+00> : vector<2x8x4xf32>
    %157 = tpu.matmul %155, %156, %cst_64 {dimension_numbers = #tpu.dot_dimension_numbers<[2], [1], [1], [2], [0, 0, 0, 1, 1, 2], [0], [0]>} : vector<2x8x8xbf16>, vector<2x8x4xbf16>, vector<2x8x4xf32> -> vector<2x8x4xf32>
    "tpu.trace_stop"() : () -> ()
    %158 = vector.extract_strided_slice %60 {offsets = [0, 0, 20], sizes = [2, 8, 4], strides = [1, 1, 1]} : vector<2x8x32xbf16> to vector<2x8x4xbf16>
    %159 = vector.extract_strided_slice %61 {offsets = [0, 0, 20], sizes = [2, 8, 4], strides = [1, 1, 1]} : vector<2x8x32xbf16> to vector<2x8x4xbf16>
    "tpu.trace_start"() <{level = 10 : i32, message = "bqd,bkd->bqk"}> : () -> ()
    %cst_65 = arith.constant dense<0.000000e+00> : vector<2x8x8xf32>
    %160 = tpu.matmul %158, %159, %cst_65 {dimension_numbers = #tpu.dot_dimension_numbers<[2], [2], [1], [1], [0, 0, 0, 1, 1, 1], [0], [0]>} : vector<2x8x4xbf16>, vector<2x8x4xbf16>, vector<2x8x8xf32> -> vector<2x8x8xf32>
    "tpu.trace_stop"() : () -> ()
    %cst_66 = arith.constant 5.000000e-01 : f32
    %161 = vector.broadcast %cst_66 : f32 to vector<2x8x8xf32>
    %162 = arith.mulf %160, %161 : vector<2x8x8xf32>
    %163 = arith.addf %162, %9 : vector<2x8x8xf32>
    %cst_67 = arith.constant dense<0xFF800000> : vector<2x8xf32>
    %164 = vector.multi_reduction <maximumf>, %163, %cst_67 [2] : vector<2x8x8xf32> to vector<2x8xf32>
    %165 = vector.shape_cast %164 : vector<2x8xf32> to vector<2x8x1xf32>
    %166 = vector.broadcast %165 : vector<2x8x1xf32> to vector<2x8x8xf32>
    %167 = arith.subf %163, %166 : vector<2x8x8xf32>
    %168 = math.exp %167 : vector<2x8x8xf32>
    %cst_68 = arith.constant dense<0.000000e+00> : vector<2x8xf32>
    %169 = vector.multi_reduction <add>, %168, %cst_68 [2] : vector<2x8x8xf32> to vector<2x8xf32>
    %170 = vector.shape_cast %169 : vector<2x8xf32> to vector<2x8x1xf32>
    %171 = tpu.reciprocal %170 {approx = true} : vector<2x8x1xf32> -> vector<2x8x1xf32>
    %172 = vector.broadcast %171 : vector<2x8x1xf32> to vector<2x8x8xf32>
    %173 = arith.mulf %168, %172 : vector<2x8x8xf32>
    %174 = arith.truncf %173 : vector<2x8x8xf32> to vector<2x8x8xbf16>
    %175 = vector.extract_strided_slice %62 {offsets = [0, 0, 20], sizes = [2, 8, 4], strides = [1, 1, 1]} : vector<2x8x32xbf16> to vector<2x8x4xbf16>
    "tpu.trace_start"() <{level = 10 : i32, message = "bqk,bkd->bqd"}> : () -> ()
    %cst_69 = arith.constant dense<0.000000e+00> : vector<2x8x4xf32>
    %176 = tpu.matmul %174, %175, %cst_69 {dimension_numbers = #tpu.dot_dimension_numbers<[2], [1], [1], [2], [0, 0, 0, 1, 1, 2], [0], [0]>} : vector<2x8x8xbf16>, vector<2x8x4xbf16>, vector<2x8x4xf32> -> vector<2x8x4xf32>
    "tpu.trace_stop"() : () -> ()
    %177 = vector.extract_strided_slice %60 {offsets = [0, 0, 24], sizes = [2, 8, 4], strides = [1, 1, 1]} : vector<2x8x32xbf16> to vector<2x8x4xbf16>
    %178 = vector.extract_strided_slice %61 {offsets = [0, 0, 24], sizes = [2, 8, 4], strides = [1, 1, 1]} : vector<2x8x32xbf16> to vector<2x8x4xbf16>
    "tpu.trace_start"() <{level = 10 : i32, message = "bqd,bkd->bqk"}> : () -> ()
    %cst_70 = arith.constant dense<0.000000e+00> : vector<2x8x8xf32>
    %179 = tpu.matmul %177, %178, %cst_70 {dimension_numbers = #tpu.dot_dimension_numbers<[2], [2], [1], [1], [0, 0, 0, 1, 1, 1], [0], [0]>} : vector<2x8x4xbf16>, vector<2x8x4xbf16>, vector<2x8x8xf32> -> vector<2x8x8xf32>
    "tpu.trace_stop"() : () -> ()
    %cst_71 = arith.constant 5.000000e-01 : f32
    %180 = vector.broadcast %cst_71 : f32 to vector<2x8x8xf32>
    %181 = arith.mulf %179, %180 : vector<2x8x8xf32>
    %182 = arith.addf %181, %9 : vector<2x8x8xf32>
    %cst_72 = arith.constant dense<0xFF800000> : vector<2x8xf32>
    %183 = vector.multi_reduction <maximumf>, %182, %cst_72 [2] : vector<2x8x8xf32> to vector<2x8xf32>
    %184 = vector.shape_cast %183 : vector<2x8xf32> to vector<2x8x1xf32>
    %185 = vector.broadcast %184 : vector<2x8x1xf32> to vector<2x8x8xf32>
    %186 = arith.subf %182, %185 : vector<2x8x8xf32>
    %187 = math.exp %186 : vector<2x8x8xf32>
    %cst_73 = arith.constant dense<0.000000e+00> : vector<2x8xf32>
    %188 = vector.multi_reduction <add>, %187, %cst_73 [2] : vector<2x8x8xf32> to vector<2x8xf32>
    %189 = vector.shape_cast %188 : vector<2x8xf32> to vector<2x8x1xf32>
    %190 = tpu.reciprocal %189 {approx = true} : vector<2x8x1xf32> -> vector<2x8x1xf32>
    %191 = vector.broadcast %190 : vector<2x8x1xf32> to vector<2x8x8xf32>
    %192 = arith.mulf %187, %191 : vector<2x8x8xf32>
    %193 = arith.truncf %192 : vector<2x8x8xf32> to vector<2x8x8xbf16>
    %194 = vector.extract_strided_slice %62 {offsets = [0, 0, 24], sizes = [2, 8, 4], strides = [1, 1, 1]} : vector<2x8x32xbf16> to vector<2x8x4xbf16>
    "tpu.trace_start"() <{level = 10 : i32, message = "bqk,bkd->bqd"}> : () -> ()
    %cst_74 = arith.constant dense<0.000000e+00> : vector<2x8x4xf32>
    %195 = tpu.matmul %193, %194, %cst_74 {dimension_numbers = #tpu.dot_dimension_numbers<[2], [1], [1], [2], [0, 0, 0, 1, 1, 2], [0], [0]>} : vector<2x8x8xbf16>, vector<2x8x4xbf16>, vector<2x8x4xf32> -> vector<2x8x4xf32>
    "tpu.trace_stop"() : () -> ()
    %196 = vector.extract_strided_slice %60 {offsets = [0, 0, 28], sizes = [2, 8, 4], strides = [1, 1, 1]} : vector<2x8x32xbf16> to vector<2x8x4xbf16>
    %197 = vector.extract_strided_slice %61 {offsets = [0, 0, 28], sizes = [2, 8, 4], strides = [1, 1, 1]} : vector<2x8x32xbf16> to vector<2x8x4xbf16>
    "tpu.trace_start"() <{level = 10 : i32, message = "bqd,bkd->bqk"}> : () -> ()
    %cst_75 = arith.constant dense<0.000000e+00> : vector<2x8x8xf32>
    %198 = tpu.matmul %196, %197, %cst_75 {dimension_numbers = #tpu.dot_dimension_numbers<[2], [2], [1], [1], [0, 0, 0, 1, 1, 1], [0], [0]>} : vector<2x8x4xbf16>, vector<2x8x4xbf16>, vector<2x8x8xf32> -> vector<2x8x8xf32>
    "tpu.trace_stop"() : () -> ()
    %cst_76 = arith.constant 5.000000e-01 : f32
    %199 = vector.broadcast %cst_76 : f32 to vector<2x8x8xf32>
    %200 = arith.mulf %198, %199 : vector<2x8x8xf32>
    %201 = arith.addf %200, %9 : vector<2x8x8xf32>
    %cst_77 = arith.constant dense<0xFF800000> : vector<2x8xf32>
    %202 = vector.multi_reduction <maximumf>, %201, %cst_77 [2] : vector<2x8x8xf32> to vector<2x8xf32>
    %203 = vector.shape_cast %202 : vector<2x8xf32> to vector<2x8x1xf32>
    %204 = vector.broadcast %203 : vector<2x8x1xf32> to vector<2x8x8xf32>
    %205 = arith.subf %201, %204 : vector<2x8x8xf32>
    %206 = math.exp %205 : vector<2x8x8xf32>
    %cst_78 = arith.constant dense<0.000000e+00> : vector<2x8xf32>
    %207 = vector.multi_reduction <add>, %206, %cst_78 [2] : vector<2x8x8xf32> to vector<2x8xf32>
    %208 = vector.shape_cast %207 : vector<2x8xf32> to vector<2x8x1xf32>
    %209 = tpu.reciprocal %208 {approx = true} : vector<2x8x1xf32> -> vector<2x8x1xf32>
    %210 = vector.broadcast %209 : vector<2x8x1xf32> to vector<2x8x8xf32>
    %211 = arith.mulf %206, %210 : vector<2x8x8xf32>
    %212 = arith.truncf %211 : vector<2x8x8xf32> to vector<2x8x8xbf16>
    %213 = vector.extract_strided_slice %62 {offsets = [0, 0, 28], sizes = [2, 8, 4], strides = [1, 1, 1]} : vector<2x8x32xbf16> to vector<2x8x4xbf16>
    "tpu.trace_start"() <{level = 10 : i32, message = "bqk,bkd->bqd"}> : () -> ()
    %cst_79 = arith.constant dense<0.000000e+00> : vector<2x8x4xf32>
    %214 = tpu.matmul %212, %213, %cst_79 {dimension_numbers = #tpu.dot_dimension_numbers<[2], [1], [1], [2], [0, 0, 0, 1, 1, 2], [0], [0]>} : vector<2x8x8xbf16>, vector<2x8x4xbf16>, vector<2x8x4xf32> -> vector<2x8x4xf32>
    "tpu.trace_stop"() : () -> ()
    %215 = tpu.concatenate %81, %100, %119, %138, %157, %176, %195, %214 in 2 : vector<2x8x4xf32>, vector<2x8x4xf32>, vector<2x8x4xf32>, vector<2x8x4xf32>, vector<2x8x4xf32>, vector<2x8x4xf32>, vector<2x8x4xf32>, vector<2x8x4xf32> -> vector<2x8x32xf32>
    %216 = vector.shape_cast %215 : vector<2x8x32xf32> to vector<16x32xf32>
    %217 = arith.truncf %216 : vector<16x32xf32> to vector<16x32xbf16>
    %c0_80 = arith.constant 0 : index
    %c0_81 = arith.constant 0 : index
    %218 = vector.load %arg17[%c0_80, %c0_81] : memref<32x32xbf16, #tpu.memory_space<vmem>>, vector<32x32xbf16>
    %cst_82 = arith.constant dense<0.000000e+00> : vector<16x32xf32>
    %219 = tpu.matmul %217, %218, %cst_82 {dimension_numbers = #tpu.dot_dimension_numbers<[1], [0], [0], [1], [0, 0, 1, 1], [], []>} : vector<16x32xbf16>, vector<32x32xbf16>, vector<16x32xf32> -> vector<16x32xf32>
    %c0_83 = arith.constant 0 : index
    %c0_84 = arith.constant 0 : index
    %220 = vector.load %arg18[%c0_83, %c0_84] : memref<1x32xf32, #tpu.memory_space<vmem>>, vector<1x32xf32>
    %221 = vector.broadcast %220 : vector<1x32xf32> to vector<16x32xf32>
    %222 = arith.addf %219, %221 : vector<16x32xf32>
    %223 = arith.addf %1, %222 : vector<16x32xf32>
    %cst_85 = arith.constant dense<0.000000e+00> : vector<16xf32>
    %224 = vector.multi_reduction <add>, %223, %cst_85 [1] : vector<16x32xf32> to vector<16xf32>
    %225 = vector.shape_cast %224 : vector<16xf32> to vector<16x1xf32>
    %cst_86 = arith.constant 3.200000e+01 : f32
    %226 = vector.broadcast %cst_86 : f32 to vector<16x1xf32>
    %227 = arith.divf %225, %226 : vector<16x1xf32>
    %228 = vector.broadcast %227 : vector<16x1xf32> to vector<16x32xf32>
    %229 = arith.subf %223, %228 : vector<16x32xf32>
    %230 = arith.mulf %229, %229 : vector<16x32xf32>
    %cst_87 = arith.constant dense<0.000000e+00> : vector<16xf32>
    %231 = vector.multi_reduction <add>, %230, %cst_87 [1] : vector<16x32xf32> to vector<16xf32>
    %232 = vector.shape_cast %231 : vector<16xf32> to vector<16x1xf32>
    %cst_88 = arith.constant 0.0322580636 : f32
    %233 = vector.broadcast %cst_88 : f32 to vector<16x1xf32>
    %234 = arith.mulf %232, %233 : vector<16x1xf32>
    %235 = math.sqrt %234 : vector<16x1xf32>
    %cst_89 = arith.constant 9.99999997E-7 : f32
    %236 = vector.broadcast %cst_89 : f32 to vector<16x1xf32>
    %237 = arith.addf %235, %236 : vector<16x1xf32>
    %238 = tpu.reciprocal %237 : vector<16x1xf32> -> vector<16x1xf32>
    %c0_90 = arith.constant 0 : index
    %c0_91 = arith.constant 0 : index
    %239 = vector.load %arg7[%c0_90, %c0_91] : memref<1x32xf32, #tpu.memory_space<vmem>>, vector<1x32xf32>
    %240 = vector.broadcast %239 : vector<1x32xf32> to vector<16x32xf32>
    %241 = vector.broadcast %238 : vector<16x1xf32> to vector<16x32xf32>
    %242 = arith.mulf %240, %241 : vector<16x32xf32>
    %243 = arith.mulf %242, %229 : vector<16x32xf32>
    %c0_92 = arith.constant 0 : index
    %c0_93 = arith.constant 0 : index
    %244 = vector.load %arg8[%c0_92, %c0_93] : memref<1x32xf32, #tpu.memory_space<vmem>>, vector<1x32xf32>
    %245 = vector.broadcast %244 : vector<1x32xf32> to vector<16x32xf32>
    %246 = arith.addf %243, %245 : vector<16x32xf32>
    %247 = arith.truncf %246 : vector<16x32xf32> to vector<16x32xbf16>
    %c0_94 = arith.constant 0 : index
    %c0_95 = arith.constant 0 : index
    %248 = vector.load %arg19[%c0_94, %c0_95] : memref<32x32xbf16, #tpu.memory_space<vmem>>, vector<32x32xbf16>
    %cst_96 = arith.constant dense<0.000000e+00> : vector<16x32xf32>
    %249 = tpu.matmul %247, %248, %cst_96 {dimension_numbers = #tpu.dot_dimension_numbers<[1], [0], [0], [1], [0, 0, 1, 1], [], []>} : vector<16x32xbf16>, vector<32x32xbf16>, vector<16x32xf32> -> vector<16x32xf32>
    %c0_97 = arith.constant 0 : index
    %c0_98 = arith.constant 0 : index
    %250 = vector.load %arg20[%c0_97, %c0_98] : memref<1x32xf32, #tpu.memory_space<vmem>>, vector<1x32xf32>
    %251 = vector.broadcast %250 : vector<1x32xf32> to vector<16x32xf32>
    %252 = arith.addf %249, %251 : vector<16x32xf32>
    %253 = arith.truncf %3 : vector<16x32xf32> to vector<16x32xbf16>
    %c0_99 = arith.constant 0 : index
    %c0_100 = arith.constant 0 : index
    %254 = vector.load %arg21[%c0_99, %c0_100] : memref<32x32xbf16, #tpu.memory_space<vmem>>, vector<32x32xbf16>
    %cst_101 = arith.constant dense<0.000000e+00> : vector<16x32xf32>
    %255 = tpu.matmul %253, %254, %cst_101 {dimension_numbers = #tpu.dot_dimension_numbers<[1], [0], [0], [1], [0, 0, 1, 1], [], []>} : vector<16x32xbf16>, vector<32x32xbf16>, vector<16x32xf32> -> vector<16x32xf32>
    %c0_102 = arith.constant 0 : index
    %c0_103 = arith.constant 0 : index
    %256 = vector.load %arg22[%c0_102, %c0_103] : memref<1x32xf32, #tpu.memory_space<vmem>>, vector<1x32xf32>
    %257 = vector.broadcast %256 : vector<1x32xf32> to vector<16x32xf32>
    %258 = arith.addf %255, %257 : vector<16x32xf32>
    %259 = arith.truncf %3 : vector<16x32xf32> to vector<16x32xbf16>
    %c0_104 = arith.constant 0 : index
    %c0_105 = arith.constant 0 : index
    %260 = vector.load %arg23[%c0_104, %c0_105] : memref<32x32xbf16, #tpu.memory_space<vmem>>, vector<32x32xbf16>
    %cst_106 = arith.constant dense<0.000000e+00> : vector<16x32xf32>
    %261 = tpu.matmul %259, %260, %cst_106 {dimension_numbers = #tpu.dot_dimension_numbers<[1], [0], [0], [1], [0, 0, 1, 1], [], []>} : vector<16x32xbf16>, vector<32x32xbf16>, vector<16x32xf32> -> vector<16x32xf32>
    %c0_107 = arith.constant 0 : index
    %c0_108 = arith.constant 0 : index
    %262 = vector.load %arg24[%c0_107, %c0_108] : memref<1x32xf32, #tpu.memory_space<vmem>>, vector<1x32xf32>
    %263 = vector.broadcast %262 : vector<1x32xf32> to vector<16x32xf32>
    %264 = arith.addf %261, %263 : vector<16x32xf32>
    %265 = arith.truncf %252 : vector<16x32xf32> to vector<16x32xbf16>
    %266 = arith.truncf %258 : vector<16x32xf32> to vector<16x32xbf16>
    %267 = arith.truncf %264 : vector<16x32xf32> to vector<16x32xbf16>
    %268 = vector.shape_cast %265 : vector<16x32xbf16> to vector<2x8x32xbf16>
    %269 = vector.shape_cast %266 : vector<16x32xbf16> to vector<2x8x32xbf16>
    %270 = vector.shape_cast %267 : vector<16x32xbf16> to vector<2x8x32xbf16>
    %271 = vector.extract_strided_slice %268 {offsets = [0, 0, 0], sizes = [2, 8, 4], strides = [1, 1, 1]} : vector<2x8x32xbf16> to vector<2x8x4xbf16>
    %272 = vector.extract_strided_slice %269 {offsets = [0, 0, 0], sizes = [2, 8, 4], strides = [1, 1, 1]} : vector<2x8x32xbf16> to vector<2x8x4xbf16>
    "tpu.trace_start"() <{level = 10 : i32, message = "bqd,bkd->bqk"}> : () -> ()
    %cst_109 = arith.constant dense<0.000000e+00> : vector<2x8x8xf32>
    %273 = tpu.matmul %271, %272, %cst_109 {dimension_numbers = #tpu.dot_dimension_numbers<[2], [2], [1], [1], [0, 0, 0, 1, 1, 1], [0], [0]>} : vector<2x8x4xbf16>, vector<2x8x4xbf16>, vector<2x8x8xf32> -> vector<2x8x8xf32>
    "tpu.trace_stop"() : () -> ()
    %cst_110 = arith.constant 5.000000e-01 : f32
    %274 = vector.broadcast %cst_110 : f32 to vector<2x8x8xf32>
    %275 = arith.mulf %273, %274 : vector<2x8x8xf32>
    %276 = vector.broadcast %15 : vector<2x1x8xf32> to vector<2x8x8xf32>
    %277 = arith.addf %275, %276 : vector<2x8x8xf32>
    %cst_111 = arith.constant dense<0xFF800000> : vector<2x8xf32>
    %278 = vector.multi_reduction <maximumf>, %277, %cst_111 [2] : vector<2x8x8xf32> to vector<2x8xf32>
    %279 = vector.shape_cast %278 : vector<2x8xf32> to vector<2x8x1xf32>
    %280 = vector.broadcast %279 : vector<2x8x1xf32> to vector<2x8x8xf32>
    %281 = arith.subf %277, %280 : vector<2x8x8xf32>
    %282 = math.exp %281 : vector<2x8x8xf32>
    %cst_112 = arith.constant dense<0.000000e+00> : vector<2x8xf32>
    %283 = vector.multi_reduction <add>, %282, %cst_112 [2] : vector<2x8x8xf32> to vector<2x8xf32>
    %284 = vector.shape_cast %283 : vector<2x8xf32> to vector<2x8x1xf32>
    %285 = tpu.reciprocal %284 {approx = true} : vector<2x8x1xf32> -> vector<2x8x1xf32>
    %286 = vector.broadcast %285 : vector<2x8x1xf32> to vector<2x8x8xf32>
    %287 = arith.mulf %282, %286 : vector<2x8x8xf32>
    %288 = arith.truncf %287 : vector<2x8x8xf32> to vector<2x8x8xbf16>
    %289 = vector.extract_strided_slice %270 {offsets = [0, 0, 0], sizes = [2, 8, 4], strides = [1, 1, 1]} : vector<2x8x32xbf16> to vector<2x8x4xbf16>
    "tpu.trace_start"() <{level = 10 : i32, message = "bqk,bkd->bqd"}> : () -> ()
    %cst_113 = arith.constant dense<0.000000e+00> : vector<2x8x4xf32>
    %290 = tpu.matmul %288, %289, %cst_113 {dimension_numbers = #tpu.dot_dimension_numbers<[2], [1], [1], [2], [0, 0, 0, 1, 1, 2], [0], [0]>} : vector<2x8x8xbf16>, vector<2x8x4xbf16>, vector<2x8x4xf32> -> vector<2x8x4xf32>
    "tpu.trace_stop"() : () -> ()
    %291 = vector.extract_strided_slice %268 {offsets = [0, 0, 4], sizes = [2, 8, 4], strides = [1, 1, 1]} : vector<2x8x32xbf16> to vector<2x8x4xbf16>
    %292 = vector.extract_strided_slice %269 {offsets = [0, 0, 4], sizes = [2, 8, 4], strides = [1, 1, 1]} : vector<2x8x32xbf16> to vector<2x8x4xbf16>
    "tpu.trace_start"() <{level = 10 : i32, message = "bqd,bkd->bqk"}> : () -> ()
    %cst_114 = arith.constant dense<0.000000e+00> : vector<2x8x8xf32>
    %293 = tpu.matmul %291, %292, %cst_114 {dimension_numbers = #tpu.dot_dimension_numbers<[2], [2], [1], [1], [0, 0, 0, 1, 1, 1], [0], [0]>} : vector<2x8x4xbf16>, vector<2x8x4xbf16>, vector<2x8x8xf32> -> vector<2x8x8xf32>
    "tpu.trace_stop"() : () -> ()
    %cst_115 = arith.constant 5.000000e-01 : f32
    %294 = vector.broadcast %cst_115 : f32 to vector<2x8x8xf32>
    %295 = arith.mulf %293, %294 : vector<2x8x8xf32>
    %296 = vector.broadcast %15 : vector<2x1x8xf32> to vector<2x8x8xf32>
    %297 = arith.addf %295, %296 : vector<2x8x8xf32>
    %cst_116 = arith.constant dense<0xFF800000> : vector<2x8xf32>
    %298 = vector.multi_reduction <maximumf>, %297, %cst_116 [2] : vector<2x8x8xf32> to vector<2x8xf32>
    %299 = vector.shape_cast %298 : vector<2x8xf32> to vector<2x8x1xf32>
    %300 = vector.broadcast %299 : vector<2x8x1xf32> to vector<2x8x8xf32>
    %301 = arith.subf %297, %300 : vector<2x8x8xf32>
    %302 = math.exp %301 : vector<2x8x8xf32>
    %cst_117 = arith.constant dense<0.000000e+00> : vector<2x8xf32>
    %303 = vector.multi_reduction <add>, %302, %cst_117 [2] : vector<2x8x8xf32> to vector<2x8xf32>
    %304 = vector.shape_cast %303 : vector<2x8xf32> to vector<2x8x1xf32>
    %305 = tpu.reciprocal %304 {approx = true} : vector<2x8x1xf32> -> vector<2x8x1xf32>
    %306 = vector.broadcast %305 : vector<2x8x1xf32> to vector<2x8x8xf32>
    %307 = arith.mulf %302, %306 : vector<2x8x8xf32>
    %308 = arith.truncf %307 : vector<2x8x8xf32> to vector<2x8x8xbf16>
    %309 = vector.extract_strided_slice %270 {offsets = [0, 0, 4], sizes = [2, 8, 4], strides = [1, 1, 1]} : vector<2x8x32xbf16> to vector<2x8x4xbf16>
    "tpu.trace_start"() <{level = 10 : i32, message = "bqk,bkd->bqd"}> : () -> ()
    %cst_118 = arith.constant dense<0.000000e+00> : vector<2x8x4xf32>
    %310 = tpu.matmul %308, %309, %cst_118 {dimension_numbers = #tpu.dot_dimension_numbers<[2], [1], [1], [2], [0, 0, 0, 1, 1, 2], [0], [0]>} : vector<2x8x8xbf16>, vector<2x8x4xbf16>, vector<2x8x4xf32> -> vector<2x8x4xf32>
    "tpu.trace_stop"() : () -> ()
    %311 = vector.extract_strided_slice %268 {offsets = [0, 0, 8], sizes = [2, 8, 4], strides = [1, 1, 1]} : vector<2x8x32xbf16> to vector<2x8x4xbf16>
    %312 = vector.extract_strided_slice %269 {offsets = [0, 0, 8], sizes = [2, 8, 4], strides = [1, 1, 1]} : vector<2x8x32xbf16> to vector<2x8x4xbf16>
    "tpu.trace_start"() <{level = 10 : i32, message = "bqd,bkd->bqk"}> : () -> ()
    %cst_119 = arith.constant dense<0.000000e+00> : vector<2x8x8xf32>
    %313 = tpu.matmul %311, %312, %cst_119 {dimension_numbers = #tpu.dot_dimension_numbers<[2], [2], [1], [1], [0, 0, 0, 1, 1, 1], [0], [0]>} : vector<2x8x4xbf16>, vector<2x8x4xbf16>, vector<2x8x8xf32> -> vector<2x8x8xf32>
    "tpu.trace_stop"() : () -> ()
    %cst_120 = arith.constant 5.000000e-01 : f32
    %314 = vector.broadcast %cst_120 : f32 to vector<2x8x8xf32>
    %315 = arith.mulf %313, %314 : vector<2x8x8xf32>
    %316 = vector.broadcast %15 : vector<2x1x8xf32> to vector<2x8x8xf32>
    %317 = arith.addf %315, %316 : vector<2x8x8xf32>
    %cst_121 = arith.constant dense<0xFF800000> : vector<2x8xf32>
    %318 = vector.multi_reduction <maximumf>, %317, %cst_121 [2] : vector<2x8x8xf32> to vector<2x8xf32>
    %319 = vector.shape_cast %318 : vector<2x8xf32> to vector<2x8x1xf32>
    %320 = vector.broadcast %319 : vector<2x8x1xf32> to vector<2x8x8xf32>
    %321 = arith.subf %317, %320 : vector<2x8x8xf32>
    %322 = math.exp %321 : vector<2x8x8xf32>
    %cst_122 = arith.constant dense<0.000000e+00> : vector<2x8xf32>
    %323 = vector.multi_reduction <add>, %322, %cst_122 [2] : vector<2x8x8xf32> to vector<2x8xf32>
    %324 = vector.shape_cast %323 : vector<2x8xf32> to vector<2x8x1xf32>
    %325 = tpu.reciprocal %324 {approx = true} : vector<2x8x1xf32> -> vector<2x8x1xf32>
    %326 = vector.broadcast %325 : vector<2x8x1xf32> to vector<2x8x8xf32>
    %327 = arith.mulf %322, %326 : vector<2x8x8xf32>
    %328 = arith.truncf %327 : vector<2x8x8xf32> to vector<2x8x8xbf16>
    %329 = vector.extract_strided_slice %270 {offsets = [0, 0, 8], sizes = [2, 8, 4], strides = [1, 1, 1]} : vector<2x8x32xbf16> to vector<2x8x4xbf16>
    "tpu.trace_start"() <{level = 10 : i32, message = "bqk,bkd->bqd"}> : () -> ()
    %cst_123 = arith.constant dense<0.000000e+00> : vector<2x8x4xf32>
    %330 = tpu.matmul %328, %329, %cst_123 {dimension_numbers = #tpu.dot_dimension_numbers<[2], [1], [1], [2], [0, 0, 0, 1, 1, 2], [0], [0]>} : vector<2x8x8xbf16>, vector<2x8x4xbf16>, vector<2x8x4xf32> -> vector<2x8x4xf32>
    "tpu.trace_stop"() : () -> ()
    %331 = vector.extract_strided_slice %268 {offsets = [0, 0, 12], sizes = [2, 8, 4], strides = [1, 1, 1]} : vector<2x8x32xbf16> to vector<2x8x4xbf16>
    %332 = vector.extract_strided_slice %269 {offsets = [0, 0, 12], sizes = [2, 8, 4], strides = [1, 1, 1]} : vector<2x8x32xbf16> to vector<2x8x4xbf16>
    "tpu.trace_start"() <{level = 10 : i32, message = "bqd,bkd->bqk"}> : () -> ()
    %cst_124 = arith.constant dense<0.000000e+00> : vector<2x8x8xf32>
    %333 = tpu.matmul %331, %332, %cst_124 {dimension_numbers = #tpu.dot_dimension_numbers<[2], [2], [1], [1], [0, 0, 0, 1, 1, 1], [0], [0]>} : vector<2x8x4xbf16>, vector<2x8x4xbf16>, vector<2x8x8xf32> -> vector<2x8x8xf32>
    "tpu.trace_stop"() : () -> ()
    %cst_125 = arith.constant 5.000000e-01 : f32
    %334 = vector.broadcast %cst_125 : f32 to vector<2x8x8xf32>
    %335 = arith.mulf %333, %334 : vector<2x8x8xf32>
    %336 = vector.broadcast %15 : vector<2x1x8xf32> to vector<2x8x8xf32>
    %337 = arith.addf %335, %336 : vector<2x8x8xf32>
    %cst_126 = arith.constant dense<0xFF800000> : vector<2x8xf32>
    %338 = vector.multi_reduction <maximumf>, %337, %cst_126 [2] : vector<2x8x8xf32> to vector<2x8xf32>
    %339 = vector.shape_cast %338 : vector<2x8xf32> to vector<2x8x1xf32>
    %340 = vector.broadcast %339 : vector<2x8x1xf32> to vector<2x8x8xf32>
    %341 = arith.subf %337, %340 : vector<2x8x8xf32>
    %342 = math.exp %341 : vector<2x8x8xf32>
    %cst_127 = arith.constant dense<0.000000e+00> : vector<2x8xf32>
    %343 = vector.multi_reduction <add>, %342, %cst_127 [2] : vector<2x8x8xf32> to vector<2x8xf32>
    %344 = vector.shape_cast %343 : vector<2x8xf32> to vector<2x8x1xf32>
    %345 = tpu.reciprocal %344 {approx = true} : vector<2x8x1xf32> -> vector<2x8x1xf32>
    %346 = vector.broadcast %345 : vector<2x8x1xf32> to vector<2x8x8xf32>
    %347 = arith.mulf %342, %346 : vector<2x8x8xf32>
    %348 = arith.truncf %347 : vector<2x8x8xf32> to vector<2x8x8xbf16>
    %349 = vector.extract_strided_slice %270 {offsets = [0, 0, 12], sizes = [2, 8, 4], strides = [1, 1, 1]} : vector<2x8x32xbf16> to vector<2x8x4xbf16>
    "tpu.trace_start"() <{level = 10 : i32, message = "bqk,bkd->bqd"}> : () -> ()
    %cst_128 = arith.constant dense<0.000000e+00> : vector<2x8x4xf32>
    %350 = tpu.matmul %348, %349, %cst_128 {dimension_numbers = #tpu.dot_dimension_numbers<[2], [1], [1], [2], [0, 0, 0, 1, 1, 2], [0], [0]>} : vector<2x8x8xbf16>, vector<2x8x4xbf16>, vector<2x8x4xf32> -> vector<2x8x4xf32>
    "tpu.trace_stop"() : () -> ()
    %351 = vector.extract_strided_slice %268 {offsets = [0, 0, 16], sizes = [2, 8, 4], strides = [1, 1, 1]} : vector<2x8x32xbf16> to vector<2x8x4xbf16>
    %352 = vector.extract_strided_slice %269 {offsets = [0, 0, 16], sizes = [2, 8, 4], strides = [1, 1, 1]} : vector<2x8x32xbf16> to vector<2x8x4xbf16>
    "tpu.trace_start"() <{level = 10 : i32, message = "bqd,bkd->bqk"}> : () -> ()
    %cst_129 = arith.constant dense<0.000000e+00> : vector<2x8x8xf32>
    %353 = tpu.matmul %351, %352, %cst_129 {dimension_numbers = #tpu.dot_dimension_numbers<[2], [2], [1], [1], [0, 0, 0, 1, 1, 1], [0], [0]>} : vector<2x8x4xbf16>, vector<2x8x4xbf16>, vector<2x8x8xf32> -> vector<2x8x8xf32>
    "tpu.trace_stop"() : () -> ()
    %cst_130 = arith.constant 5.000000e-01 : f32
    %354 = vector.broadcast %cst_130 : f32 to vector<2x8x8xf32>
    %355 = arith.mulf %353, %354 : vector<2x8x8xf32>
    %356 = vector.broadcast %15 : vector<2x1x8xf32> to vector<2x8x8xf32>
    %357 = arith.addf %355, %356 : vector<2x8x8xf32>
    %cst_131 = arith.constant dense<0xFF800000> : vector<2x8xf32>
    %358 = vector.multi_reduction <maximumf>, %357, %cst_131 [2] : vector<2x8x8xf32> to vector<2x8xf32>
    %359 = vector.shape_cast %358 : vector<2x8xf32> to vector<2x8x1xf32>
    %360 = vector.broadcast %359 : vector<2x8x1xf32> to vector<2x8x8xf32>
    %361 = arith.subf %357, %360 : vector<2x8x8xf32>
    %362 = math.exp %361 : vector<2x8x8xf32>
    %cst_132 = arith.constant dense<0.000000e+00> : vector<2x8xf32>
    %363 = vector.multi_reduction <add>, %362, %cst_132 [2] : vector<2x8x8xf32> to vector<2x8xf32>
    %364 = vector.shape_cast %363 : vector<2x8xf32> to vector<2x8x1xf32>
    %365 = tpu.reciprocal %364 {approx = true} : vector<2x8x1xf32> -> vector<2x8x1xf32>
    %366 = vector.broadcast %365 : vector<2x8x1xf32> to vector<2x8x8xf32>
    %367 = arith.mulf %362, %366 : vector<2x8x8xf32>
    %368 = arith.truncf %367 : vector<2x8x8xf32> to vector<2x8x8xbf16>
    %369 = vector.extract_strided_slice %270 {offsets = [0, 0, 16], sizes = [2, 8, 4], strides = [1, 1, 1]} : vector<2x8x32xbf16> to vector<2x8x4xbf16>
    "tpu.trace_start"() <{level = 10 : i32, message = "bqk,bkd->bqd"}> : () -> ()
    %cst_133 = arith.constant dense<0.000000e+00> : vector<2x8x4xf32>
    %370 = tpu.matmul %368, %369, %cst_133 {dimension_numbers = #tpu.dot_dimension_numbers<[2], [1], [1], [2], [0, 0, 0, 1, 1, 2], [0], [0]>} : vector<2x8x8xbf16>, vector<2x8x4xbf16>, vector<2x8x4xf32> -> vector<2x8x4xf32>
    "tpu.trace_stop"() : () -> ()
    %371 = vector.extract_strided_slice %268 {offsets = [0, 0, 20], sizes = [2, 8, 4], strides = [1, 1, 1]} : vector<2x8x32xbf16> to vector<2x8x4xbf16>
    %372 = vector.extract_strided_slice %269 {offsets = [0, 0, 20], sizes = [2, 8, 4], strides = [1, 1, 1]} : vector<2x8x32xbf16> to vector<2x8x4xbf16>
    "tpu.trace_start"() <{level = 10 : i32, message = "bqd,bkd->bqk"}> : () -> ()
    %cst_134 = arith.constant dense<0.000000e+00> : vector<2x8x8xf32>
    %373 = tpu.matmul %371, %372, %cst_134 {dimension_numbers = #tpu.dot_dimension_numbers<[2], [2], [1], [1], [0, 0, 0, 1, 1, 1], [0], [0]>} : vector<2x8x4xbf16>, vector<2x8x4xbf16>, vector<2x8x8xf32> -> vector<2x8x8xf32>
    "tpu.trace_stop"() : () -> ()
    %cst_135 = arith.constant 5.000000e-01 : f32
    %374 = vector.broadcast %cst_135 : f32 to vector<2x8x8xf32>
    %375 = arith.mulf %373, %374 : vector<2x8x8xf32>
    %376 = vector.broadcast %15 : vector<2x1x8xf32> to vector<2x8x8xf32>
    %377 = arith.addf %375, %376 : vector<2x8x8xf32>
    %cst_136 = arith.constant dense<0xFF800000> : vector<2x8xf32>
    %378 = vector.multi_reduction <maximumf>, %377, %cst_136 [2] : vector<2x8x8xf32> to vector<2x8xf32>
    %379 = vector.shape_cast %378 : vector<2x8xf32> to vector<2x8x1xf32>
    %380 = vector.broadcast %379 : vector<2x8x1xf32> to vector<2x8x8xf32>
    %381 = arith.subf %377, %380 : vector<2x8x8xf32>
    %382 = math.exp %381 : vector<2x8x8xf32>
    %cst_137 = arith.constant dense<0.000000e+00> : vector<2x8xf32>
    %383 = vector.multi_reduction <add>, %382, %cst_137 [2] : vector<2x8x8xf32> to vector<2x8xf32>
    %384 = vector.shape_cast %383 : vector<2x8xf32> to vector<2x8x1xf32>
    %385 = tpu.reciprocal %384 {approx = true} : vector<2x8x1xf32> -> vector<2x8x1xf32>
    %386 = vector.broadcast %385 : vector<2x8x1xf32> to vector<2x8x8xf32>
    %387 = arith.mulf %382, %386 : vector<2x8x8xf32>
    %388 = arith.truncf %387 : vector<2x8x8xf32> to vector<2x8x8xbf16>
    %389 = vector.extract_strided_slice %270 {offsets = [0, 0, 20], sizes = [2, 8, 4], strides = [1, 1, 1]} : vector<2x8x32xbf16> to vector<2x8x4xbf16>
    "tpu.trace_start"() <{level = 10 : i32, message = "bqk,bkd->bqd"}> : () -> ()
    %cst_138 = arith.constant dense<0.000000e+00> : vector<2x8x4xf32>
    %390 = tpu.matmul %388, %389, %cst_138 {dimension_numbers = #tpu.dot_dimension_numbers<[2], [1], [1], [2], [0, 0, 0, 1, 1, 2], [0], [0]>} : vector<2x8x8xbf16>, vector<2x8x4xbf16>, vector<2x8x4xf32> -> vector<2x8x4xf32>
    "tpu.trace_stop"() : () -> ()
    %391 = vector.extract_strided_slice %268 {offsets = [0, 0, 24], sizes = [2, 8, 4], strides = [1, 1, 1]} : vector<2x8x32xbf16> to vector<2x8x4xbf16>
    %392 = vector.extract_strided_slice %269 {offsets = [0, 0, 24], sizes = [2, 8, 4], strides = [1, 1, 1]} : vector<2x8x32xbf16> to vector<2x8x4xbf16>
    "tpu.trace_start"() <{level = 10 : i32, message = "bqd,bkd->bqk"}> : () -> ()
    %cst_139 = arith.constant dense<0.000000e+00> : vector<2x8x8xf32>
    %393 = tpu.matmul %391, %392, %cst_139 {dimension_numbers = #tpu.dot_dimension_numbers<[2], [2], [1], [1], [0, 0, 0, 1, 1, 1], [0], [0]>} : vector<2x8x4xbf16>, vector<2x8x4xbf16>, vector<2x8x8xf32> -> vector<2x8x8xf32>
    "tpu.trace_stop"() : () -> ()
    %cst_140 = arith.constant 5.000000e-01 : f32
    %394 = vector.broadcast %cst_140 : f32 to vector<2x8x8xf32>
    %395 = arith.mulf %393, %394 : vector<2x8x8xf32>
    %396 = vector.broadcast %15 : vector<2x1x8xf32> to vector<2x8x8xf32>
    %397 = arith.addf %395, %396 : vector<2x8x8xf32>
    %cst_141 = arith.constant dense<0xFF800000> : vector<2x8xf32>
    %398 = vector.multi_reduction <maximumf>, %397, %cst_141 [2] : vector<2x8x8xf32> to vector<2x8xf32>
    %399 = vector.shape_cast %398 : vector<2x8xf32> to vector<2x8x1xf32>
    %400 = vector.broadcast %399 : vector<2x8x1xf32> to vector<2x8x8xf32>
    %401 = arith.subf %397, %400 : vector<2x8x8xf32>
    %402 = math.exp %401 : vector<2x8x8xf32>
    %cst_142 = arith.constant dense<0.000000e+00> : vector<2x8xf32>
    %403 = vector.multi_reduction <add>, %402, %cst_142 [2] : vector<2x8x8xf32> to vector<2x8xf32>
    %404 = vector.shape_cast %403 : vector<2x8xf32> to vector<2x8x1xf32>
    %405 = tpu.reciprocal %404 {approx = true} : vector<2x8x1xf32> -> vector<2x8x1xf32>
    %406 = vector.broadcast %405 : vector<2x8x1xf32> to vector<2x8x8xf32>
    %407 = arith.mulf %402, %406 : vector<2x8x8xf32>
    %408 = arith.truncf %407 : vector<2x8x8xf32> to vector<2x8x8xbf16>
    %409 = vector.extract_strided_slice %270 {offsets = [0, 0, 24], sizes = [2, 8, 4], strides = [1, 1, 1]} : vector<2x8x32xbf16> to vector<2x8x4xbf16>
    "tpu.trace_start"() <{level = 10 : i32, message = "bqk,bkd->bqd"}> : () -> ()
    %cst_143 = arith.constant dense<0.000000e+00> : vector<2x8x4xf32>
    %410 = tpu.matmul %408, %409, %cst_143 {dimension_numbers = #tpu.dot_dimension_numbers<[2], [1], [1], [2], [0, 0, 0, 1, 1, 2], [0], [0]>} : vector<2x8x8xbf16>, vector<2x8x4xbf16>, vector<2x8x4xf32> -> vector<2x8x4xf32>
    "tpu.trace_stop"() : () -> ()
    %411 = vector.extract_strided_slice %268 {offsets = [0, 0, 28], sizes = [2, 8, 4], strides = [1, 1, 1]} : vector<2x8x32xbf16> to vector<2x8x4xbf16>
    %412 = vector.extract_strided_slice %269 {offsets = [0, 0, 28], sizes = [2, 8, 4], strides = [1, 1, 1]} : vector<2x8x32xbf16> to vector<2x8x4xbf16>
    "tpu.trace_start"() <{level = 10 : i32, message = "bqd,bkd->bqk"}> : () -> ()
    %cst_144 = arith.constant dense<0.000000e+00> : vector<2x8x8xf32>
    %413 = tpu.matmul %411, %412, %cst_144 {dimension_numbers = #tpu.dot_dimension_numbers<[2], [2], [1], [1], [0, 0, 0, 1, 1, 1], [0], [0]>} : vector<2x8x4xbf16>, vector<2x8x4xbf16>, vector<2x8x8xf32> -> vector<2x8x8xf32>
    "tpu.trace_stop"() : () -> ()
    %cst_145 = arith.constant 5.000000e-01 : f32
    %414 = vector.broadcast %cst_145 : f32 to vector<2x8x8xf32>
    %415 = arith.mulf %413, %414 : vector<2x8x8xf32>
    %416 = vector.broadcast %15 : vector<2x1x8xf32> to vector<2x8x8xf32>
    %417 = arith.addf %415, %416 : vector<2x8x8xf32>
    %cst_146 = arith.constant dense<0xFF800000> : vector<2x8xf32>
    %418 = vector.multi_reduction <maximumf>, %417, %cst_146 [2] : vector<2x8x8xf32> to vector<2x8xf32>
    %419 = vector.shape_cast %418 : vector<2x8xf32> to vector<2x8x1xf32>
    %420 = vector.broadcast %419 : vector<2x8x1xf32> to vector<2x8x8xf32>
    %421 = arith.subf %417, %420 : vector<2x8x8xf32>
    %422 = math.exp %421 : vector<2x8x8xf32>
    %cst_147 = arith.constant dense<0.000000e+00> : vector<2x8xf32>
    %423 = vector.multi_reduction <add>, %422, %cst_147 [2] : vector<2x8x8xf32> to vector<2x8xf32>
    %424 = vector.shape_cast %423 : vector<2x8xf32> to vector<2x8x1xf32>
    %425 = tpu.reciprocal %424 {approx = true} : vector<2x8x1xf32> -> vector<2x8x1xf32>
    %426 = vector.broadcast %425 : vector<2x8x1xf32> to vector<2x8x8xf32>
    %427 = arith.mulf %422, %426 : vector<2x8x8xf32>
    %428 = arith.truncf %427 : vector<2x8x8xf32> to vector<2x8x8xbf16>
    %429 = vector.extract_strided_slice %270 {offsets = [0, 0, 28], sizes = [2, 8, 4], strides = [1, 1, 1]} : vector<2x8x32xbf16> to vector<2x8x4xbf16>
    "tpu.trace_start"() <{level = 10 : i32, message = "bqk,bkd->bqd"}> : () -> ()
    %cst_148 = arith.constant dense<0.000000e+00> : vector<2x8x4xf32>
    %430 = tpu.matmul %428, %429, %cst_148 {dimension_numbers = #tpu.dot_dimension_numbers<[2], [1], [1], [2], [0, 0, 0, 1, 1, 2], [0], [0]>} : vector<2x8x8xbf16>, vector<2x8x4xbf16>, vector<2x8x4xf32> -> vector<2x8x4xf32>
    "tpu.trace_stop"() : () -> ()
    %431 = tpu.concatenate %290, %310, %330, %350, %370, %390, %410, %430 in 2 : vector<2x8x4xf32>, vector<2x8x4xf32>, vector<2x8x4xf32>, vector<2x8x4xf32>, vector<2x8x4xf32>, vector<2x8x4xf32>, vector<2x8x4xf32>, vector<2x8x4xf32> -> vector<2x8x32xf32>
    %432 = vector.shape_cast %431 : vector<2x8x32xf32> to vector<16x32xf32>
    %433 = arith.truncf %432 : vector<16x32xf32> to vector<16x32xbf16>
    %c0_149 = arith.constant 0 : index
    %c0_150 = arith.constant 0 : index
    %434 = vector.load %arg25[%c0_149, %c0_150] : memref<32x32xbf16, #tpu.memory_space<vmem>>, vector<32x32xbf16>
    %cst_151 = arith.constant dense<0.000000e+00> : vector<16x32xf32>
    %435 = tpu.matmul %433, %434, %cst_151 {dimension_numbers = #tpu.dot_dimension_numbers<[1], [0], [0], [1], [0, 0, 1, 1], [], []>} : vector<16x32xbf16>, vector<32x32xbf16>, vector<16x32xf32> -> vector<16x32xf32>
    %c0_152 = arith.constant 0 : index
    %c0_153 = arith.constant 0 : index
    %436 = vector.load %arg26[%c0_152, %c0_153] : memref<1x32xf32, #tpu.memory_space<vmem>>, vector<1x32xf32>
    %437 = vector.broadcast %436 : vector<1x32xf32> to vector<16x32xf32>
    %438 = arith.addf %435, %437 : vector<16x32xf32>
    %439 = arith.addf %223, %438 : vector<16x32xf32>
    %cst_154 = arith.constant dense<0.000000e+00> : vector<16xf32>
    %440 = vector.multi_reduction <add>, %439, %cst_154 [1] : vector<16x32xf32> to vector<16xf32>
    %441 = vector.shape_cast %440 : vector<16xf32> to vector<16x1xf32>
    %cst_155 = arith.constant 3.200000e+01 : f32
    %442 = vector.broadcast %cst_155 : f32 to vector<16x1xf32>
    %443 = arith.divf %441, %442 : vector<16x1xf32>
    %444 = vector.broadcast %443 : vector<16x1xf32> to vector<16x32xf32>
    %445 = arith.subf %439, %444 : vector<16x32xf32>
    %446 = arith.mulf %445, %445 : vector<16x32xf32>
    %cst_156 = arith.constant dense<0.000000e+00> : vector<16xf32>
    %447 = vector.multi_reduction <add>, %446, %cst_156 [1] : vector<16x32xf32> to vector<16xf32>
    %448 = vector.shape_cast %447 : vector<16xf32> to vector<16x1xf32>
    %cst_157 = arith.constant 0.0322580636 : f32
    %449 = vector.broadcast %cst_157 : f32 to vector<16x1xf32>
    %450 = arith.mulf %448, %449 : vector<16x1xf32>
    %451 = math.sqrt %450 : vector<16x1xf32>
    %cst_158 = arith.constant 9.99999997E-7 : f32
    %452 = vector.broadcast %cst_158 : f32 to vector<16x1xf32>
    %453 = arith.addf %451, %452 : vector<16x1xf32>
    %454 = tpu.reciprocal %453 : vector<16x1xf32> -> vector<16x1xf32>
    %c0_159 = arith.constant 0 : index
    %c0_160 = arith.constant 0 : index
    %455 = vector.load %arg9[%c0_159, %c0_160] : memref<1x32xf32, #tpu.memory_space<vmem>>, vector<1x32xf32>
    %456 = vector.broadcast %455 : vector<1x32xf32> to vector<16x32xf32>
    %457 = vector.broadcast %454 : vector<16x1xf32> to vector<16x32xf32>
    %458 = arith.mulf %456, %457 : vector<16x32xf32>
    %459 = arith.mulf %458, %445 : vector<16x32xf32>
    %c0_161 = arith.constant 0 : index
    %c0_162 = arith.constant 0 : index
    %460 = vector.load %arg10[%c0_161, %c0_162] : memref<1x32xf32, #tpu.memory_space<vmem>>, vector<1x32xf32>
    %461 = vector.broadcast %460 : vector<1x32xf32> to vector<16x32xf32>
    %462 = arith.addf %459, %461 : vector<16x32xf32>
    %463 = arith.truncf %462 : vector<16x32xf32> to vector<16x32xbf16>
    %c0_163 = arith.constant 0 : index
    %c0_164 = arith.constant 0 : index
    %464 = vector.load %arg27[%c0_163, %c0_164] : memref<32x2048xbf16, #tpu.memory_space<vmem>>, vector<32x2048xbf16>
    %cst_165 = arith.constant dense<0.000000e+00> : vector<16x2048xf32>
    %465 = tpu.matmul %463, %464, %cst_165 {dimension_numbers = #tpu.dot_dimension_numbers<[1], [0], [0], [1], [0, 0, 1, 1], [], []>} : vector<16x32xbf16>, vector<32x2048xbf16>, vector<16x2048xf32> -> vector<16x2048xf32>
    %c0_166 = arith.constant 0 : index
    %c0_167 = arith.constant 0 : index
    %466 = vector.load %arg28[%c0_166, %c0_167] : memref<1x2048xf32, #tpu.memory_space<vmem>>, vector<1x2048xf32>
    %467 = vector.broadcast %466 : vector<1x2048xf32> to vector<16x2048xf32>
    %468 = arith.addf %465, %467 : vector<16x2048xf32>
    %cst_168 = arith.constant 0.000000e+00 : f32
    %469 = vector.broadcast %cst_168 : f32 to vector<16x2048xf32>
    %470 = arith.maximumf %468, %469 : vector<16x2048xf32>
    %471 = arith.truncf %470 : vector<16x2048xf32> to vector<16x2048xbf16>
    %c0_169 = arith.constant 0 : index
    %c0_170 = arith.constant 0 : index
    %472 = vector.load %arg29[%c0_169, %c0_170] : memref<2048x32xbf16, #tpu.memory_space<vmem>>, vector<2048x32xbf16>
    %cst_171 = arith.constant dense<0.000000e+00> : vector<16x32xf32>
    %473 = tpu.matmul %471, %472, %cst_171 {dimension_numbers = #tpu.dot_dimension_numbers<[1], [0], [0], [1], [0, 0, 1, 1], [], []>} : vector<16x2048xbf16>, vector<2048x32xbf16>, vector<16x32xf32> -> vector<16x32xf32>
    %c0_172 = arith.constant 0 : index
    %c0_173 = arith.constant 0 : index
    %474 = vector.load %arg30[%c0_172, %c0_173] : memref<1x32xf32, #tpu.memory_space<vmem>>, vector<1x32xf32>
    %475 = vector.broadcast %474 : vector<1x32xf32> to vector<16x32xf32>
    %476 = arith.addf %473, %475 : vector<16x32xf32>
    %477 = arith.addf %439, %476 : vector<16x32xf32>
    %478 = vector.shape_cast %477 : vector<16x32xf32> to vector<2x8x32xf32>
    %c0_174 = arith.constant 0 : index
    %c0_175 = arith.constant 0 : index
    %c0_176 = arith.constant 0 : index
    %479 = vector.load %arg31[%c0_174, %c0_175, %c0_176] : memref<2x8x32xf32, #tpu.memory_space<vmem>>, vector<2x8x32xf32>
    tpu.vector_store %arg31[%c0_174, %c0_175, %c0_176], %478 {strides = array<i32>} : memref<2x8x32xf32, #tpu.memory_space<vmem>>, vector<2x8x32xf32>,
    return
  }
  func.func @transform_0(%arg0: i32) -> (i32, i32, i32) {
    %c0_i32 = arith.constant 0 : i32
    %c0_i32_0 = arith.constant 0 : i32
    %c0_i32_1 = arith.constant 0 : i32
    return %arg0, %c0_i32, %c0_i32_0 : i32, i32, i32
  }
  func.func @transform_1(%arg0: i32) -> (i32, i32, i32) {
    %c0_i32 = arith.constant 0 : i32
    %c0_i32_0 = arith.constant 0 : i32
    %c0_i32_1 = arith.constant 0 : i32
    return %arg0, %c0_i32, %c0_i32_0 : i32, i32, i32
  }
  func.func @transform_2(%arg0: i32) -> (i32, i32, i32) {
    %c0_i32 = arith.constant 0 : i32
    %c0_i32_0 = arith.constant 0 : i32
    %c0_i32_1 = arith.constant 0 : i32
    return %arg0, %c0_i32, %c0_i32_0 : i32, i32, i32
  }
  func.func @transform_3(%arg0: i32) -> (i32, i32, i32) {
    %c0_i32 = arith.constant 0 : i32
    %c0_i32_0 = arith.constant 0 : i32
    %c0_i32_1 = arith.constant 0 : i32
    return %arg0, %c0_i32, %c0_i32_0 : i32, i32, i32
  }
  func.func @transform_4(%arg0: i32) -> (i32, i32) {
    %c0_i32 = arith.constant 0 : i32
    %c0_i32_0 = arith.constant 0 : i32
    %c0_i32_1 = arith.constant 0 : i32
    return %c0_i32, %c0_i32_0 : i32, i32
  }
  func.func @transform_5(%arg0: i32) -> (i32, i32) {
    %c0_i32 = arith.constant 0 : i32
    %c0_i32_0 = arith.constant 0 : i32
    %c0_i32_1 = arith.constant 0 : i32
    return %c0_i32, %c0_i32_0 : i32, i32
  }
  func.func @transform_6(%arg0: i32) -> (i32, i32) {
    %c0_i32 = arith.constant 0 : i32
    %c0_i32_0 = arith.constant 0 : i32
    %c0_i32_1 = arith.constant 0 : i32
    return %c0_i32, %c0_i32_0 : i32, i32
  }
  func.func @transform_7(%arg0: i32) -> (i32, i32) {
    %c0_i32 = arith.constant 0 : i32
    %c0_i32_0 = arith.constant 0 : i32
    %c0_i32_1 = arith.constant 0 : i32
    return %c0_i32, %c0_i32_0 : i32, i32
  }
  func.func @transform_8(%arg0: i32) -> (i32, i32) {
    %c0_i32 = arith.constant 0 : i32
    %c0_i32_0 = arith.constant 0 : i32
    %c0_i32_1 = arith.constant 0 : i32
    return %c0_i32, %c0_i32_0 : i32, i32
  }
  func.func @transform_9(%arg0: i32) -> (i32, i32) {
    %c0_i32 = arith.constant 0 : i32
    %c0_i32_0 = arith.constant 0 : i32
    %c0_i32_1 = arith.constant 0 : i32
    return %c0_i32, %c0_i32_0 : i32, i32
  }
  func.func @transform_10(%arg0: i32) -> (i32, i32) {
    %c0_i32 = arith.constant 0 : i32
    %c0_i32_0 = arith.constant 0 : i32
    %c0_i32_1 = arith.constant 0 : i32
    return %c0_i32, %c0_i32_0 : i32, i32
  }
  func.func @transform_11(%arg0: i32) -> (i32, i32) {
    %c0_i32 = arith.constant 0 : i32
    %c0_i32_0 = arith.constant 0 : i32
    %c0_i32_1 = arith.constant 0 : i32
    return %c0_i32, %c0_i32_0 : i32, i32
  }
  func.func @transform_12(%arg0: i32) -> (i32, i32) {
    %c0_i32 = arith.constant 0 : i32
    %c0_i32_0 = arith.constant 0 : i32
    %c0_i32_1 = arith.constant 0 : i32
    return %c0_i32, %c0_i32_0 : i32, i32
  }
  func.func @transform_13(%arg0: i32) -> (i32, i32) {
    %c0_i32 = arith.constant 0 : i32
    %c0_i32_0 = arith.constant 0 : i32
    %c0_i32_1 = arith.constant 0 : i32
    return %c0_i32, %c0_i32_0 : i32, i32
  }
  func.func @transform_14(%arg0: i32) -> (i32, i32) {
    %c0_i32 = arith.constant 0 : i32
    %c0_i32_0 = arith.constant 0 : i32
    %c0_i32_1 = arith.constant 0 : i32
    return %c0_i32, %c0_i32_0 : i32, i32
  }
  func.func @transform_15(%arg0: i32) -> (i32, i32) {
    %c0_i32 = arith.constant 0 : i32
    %c0_i32_0 = arith.constant 0 : i32
    %c0_i32_1 = arith.constant 0 : i32
    return %c0_i32, %c0_i32_0 : i32, i32
  }
  func.func @transform_16(%arg0: i32) -> (i32, i32) {
    %c0_i32 = arith.constant 0 : i32
    %c0_i32_0 = arith.constant 0 : i32
    %c0_i32_1 = arith.constant 0 : i32
    return %c0_i32, %c0_i32_0 : i32, i32
  }
  func.func @transform_17(%arg0: i32) -> (i32, i32) {
    %c0_i32 = arith.constant 0 : i32
    %c0_i32_0 = arith.constant 0 : i32
    %c0_i32_1 = arith.constant 0 : i32
    return %c0_i32, %c0_i32_0 : i32, i32
  }
  func.func @transform_18(%arg0: i32) -> (i32, i32) {
    %c0_i32 = arith.constant 0 : i32
    %c0_i32_0 = arith.constant 0 : i32
    %c0_i32_1 = arith.constant 0 : i32
    return %c0_i32, %c0_i32_0 : i32, i32
  }
  func.func @transform_19(%arg0: i32) -> (i32, i32) {
    %c0_i32 = arith.constant 0 : i32
    %c0_i32_0 = arith.constant 0 : i32
    %c0_i32_1 = arith.constant 0 : i32
    return %c0_i32, %c0_i32_0 : i32, i32
  }
  func.func @transform_20(%arg0: i32) -> (i32, i32) {
    %c0_i32 = arith.constant 0 : i32
    %c0_i32_0 = arith.constant 0 : i32
    %c0_i32_1 = arith.constant 0 : i32
    return %c0_i32, %c0_i32_0 : i32, i32
  }
  func.func @transform_21(%arg0: i32) -> (i32, i32) {
    %c0_i32 = arith.constant 0 : i32
    %c0_i32_0 = arith.constant 0 : i32
    %c0_i32_1 = arith.constant 0 : i32
    return %c0_i32, %c0_i32_0 : i32, i32
  }
  func.func @transform_22(%arg0: i32) -> (i32, i32) {
    %c0_i32 = arith.constant 0 : i32
    %c0_i32_0 = arith.constant 0 : i32
    %c0_i32_1 = arith.constant 0 : i32
    return %c0_i32, %c0_i32_0 : i32, i32
  }
  func.func @transform_23(%arg0: i32) -> (i32, i32) {
    %c0_i32 = arith.constant 0 : i32
    %c0_i32_0 = arith.constant 0 : i32
    %c0_i32_1 = arith.constant 0 : i32
    return %c0_i32, %c0_i32_0 : i32, i32
  }
  func.func @transform_24(%arg0: i32) -> (i32, i32) {
    %c0_i32 = arith.constant 0 : i32
    %c0_i32_0 = arith.constant 0 : i32
    %c0_i32_1 = arith.constant 0 : i32
    return %c0_i32, %c0_i32_0 : i32, i32
  }
  func.func @transform_25(%arg0: i32) -> (i32, i32) {
    %c0_i32 = arith.constant 0 : i32
    %c0_i32_0 = arith.constant 0 : i32
    %c0_i32_1 = arith.constant 0 : i32
    return %c0_i32, %c0_i32_0 : i32, i32
  }
  func.func @transform_26(%arg0: i32) -> (i32, i32) {
    %c0_i32 = arith.constant 0 : i32
    %c0_i32_0 = arith.constant 0 : i32
    %c0_i32_1 = arith.constant 0 : i32
    return %c0_i32, %c0_i32_0 : i32, i32
  }
  func.func @transform_27(%arg0: i32) -> (i32, i32) {
    %c0_i32 = arith.constant 0 : i32
    %c0_i32_0 = arith.constant 0 : i32
    %c0_i32_1 = arith.constant 0 : i32
    return %c0_i32, %c0_i32_0 : i32, i32
  }
  func.func @transform_28(%arg0: i32) -> (i32, i32) {
    %c0_i32 = arith.constant 0 : i32
    %c0_i32_0 = arith.constant 0 : i32
    %c0_i32_1 = arith.constant 0 : i32
    return %c0_i32, %c0_i32_0 : i32, i32
  }
  func.func @transform_29(%arg0: i32) -> (i32, i32) {
    %c0_i32 = arith.constant 0 : i32
    %c0_i32_0 = arith.constant 0 : i32
    %c0_i32_1 = arith.constant 0 : i32
    return %c0_i32, %c0_i32_0 : i32, i32
  }
  func.func @transform_30(%arg0: i32) -> (i32, i32, i32) {
    %c0_i32 = arith.constant 0 : i32
    %c0_i32_0 = arith.constant 0 : i32
    %c0_i32_1 = arith.constant 0 : i32
    return %arg0, %c0_i32, %c0_i32_0 : i32, i32, i32
  }
}

</mosaic_0001>

<bundles_post_ra>
// kernel: tpu_custom_call.1
= control target key start
LH: loop header
LB: loop body
LE: loop exit
PB: predicated region body
PF: predicated region fallthrough
CT: control target
= control target key end

     0   :  { %s8205_s6 = smov 1   ;;  %s8206_s10 = smov 2   ;;  %s9588_s0 = inlined_call_operand.smem [shape: u32[31], index: -1, kind: input, shape index: {}] }
   0x1   :  { %s8262_s5 = sld [smem:[%s9588_s0]]   ;;  %s8207_s14 = smov 3  }
   0x2   :  { %s8267_s9 = sld [smem:[%s9588_s0 + %s8205_s6]]   ;;  %s8208_s18 = smov 4  }
   0x3   :  { %s8272_s13 = sld [smem:[%s9588_s0 + %s8206_s10]]   ;;  %s8209_s22 = smov 5  }
   0x4   :  { %s8277_s17 = sld [smem:[%s9588_s0 + %s8207_s14]]   ;;  %s8210_s26 = smov 6  }
   0x5   :  { %s8282_s21 = sld [smem:[%s9588_s0 + %s8208_s18]]   ;;  %s8211_s30 = smov 7  }
   0x6   :  { %s8287_s25 = sld [smem:[%s9588_s0 + %s8209_s22]]   ;;  %s8212_s4 = smov 8  }
   0x7   :  { %s8292_s29 = sld [smem:[%s9588_s0 + %s8210_s26]]   ;;  %s8213_s10 = smov 9  }
   0x8   :  { %9594 = sst [smem:[#allocation5_spill]] %s8267_s9  ;;  %s8214_s15 = smov 10  }
   0x9   :  { %s8297_s3 = sld [smem:[%s9588_s0 + %s8211_s30]]   ;;  %s8215_s20 = smov 11  }
   0xa   :  { %9595 = sst [smem:[#allocation6_spill]] %s8277_s17  ;;  %s8216_s26 = smov 12  }
   0xb   :  { %s8302_s8 = sld [smem:[%s9588_s0 + %s8212_s4]]   ;;  %s8217_s1 = smov 13  }
   0xc   :  { %s8307_s14 = sld [smem:[%s9588_s0 + %s8213_s10]]   ;;  %s8218_s7 = smov 14  }
   0xd   :  { %9596 = sst [smem:[#allocation7_spill]] %s8292_s29  ;;  %s8220_s22 = smov 16  }
   0xe   :  { %s8312_s19 = sld [smem:[%s9588_s0 + %s8214_s15]]   ;;  %s8219_s15 = smov 15  }
   0xf   :  { %9597 = sst [smem:[#allocation8_spill]] %s8297_s3  ;;  %s8221_s28 = smov 17  }
  0x10   :  { %s8317_s24 = sld [smem:[%s9588_s0 + %s8215_s20]]  }
  0x11   :  { %9598 = sst [smem:[#allocation9_spill]] %s8302_s8 }
  0x12   :  { %9599 = sst [smem:[#allocation10_spill]] %s8307_s14 }
  0x13   :  { %s8322_s30 = sld [smem:[%s9588_s0 + %s8216_s26]]  }
  0x14   :  { %s8327_s6 = sld [smem:[%s9588_s0 + %s8217_s1]]  }
  0x15   :  { %s8332_s12 = sld [smem:[%s9588_s0 + %s8218_s7]]   ;;  %s8222_s7 = smov 18  }
  0x16   :  { %s8337_s20 = sld [smem:[%s9588_s0 + %s8219_s15]]   ;;  %s8223_s15 = smov 19  }
  0x17   :  { %s8342_s27 = sld [smem:[%s9588_s0 + %s8220_s22]]   ;;  %s8224_s22 = smov 20  }
  0x18   :  { %s8347_s4 = sld [smem:[%s9588_s0 + %s8221_s28]]   ;;  %s8225_s28 = smov 21  }
  0x19   :  { %s8352_s14 = sld [smem:[%s9588_s0 + %s8222_s7]]   ;;  %s8226_s7 = smov 22  }
  0x1a   :  { %s8357_s8 = sld [smem:[%s9588_s0 + %s8223_s15]]   ;;  %s8227_s15 = smov 23  }
  0x1b   :  { %s8362_s17 = sld [smem:[%s9588_s0 + %s8224_s22]]   ;;  %s8228_s22 = smov 24  }
  0x1c   :  { %s8367_s3 = sld [smem:[%s9588_s0 + %s8225_s28]]   ;;  %s8229_s28 = smov 25  }
  0x1d   :  { %s8372_s29 = sld [smem:[%s9588_s0 + %s8226_s7]]   ;;  %s8230_s7 = smov 26  }
  0x1e   :  { %s8382_s9 = sld [smem:[%s9588_s0 + %s8228_s22]]   ;;  %s8232_s22 = smov 28  }
  0x20   :  { %9600 = sst [smem:[#allocation11_spill]] %s8357_s8 }
  0x21   :  { %s8377_s8 = sld [smem:[%s9588_s0 + %s8227_s15]]   ;;  %s8231_s15 = smov 27  }
  0x22   :  { %9601 = sst [smem:[#allocation12_spill]] %s8367_s3 }
  0x23   :  { %9602 = sst [smem:[#allocation13_spill]] %s8372_s29 }
  0x24   :  { %9604 = sst [smem:[#allocation15_spill]] %s8382_s9 }
  0x25   :  { %s8387_s3 = sld [smem:[%s9588_s0 + %s8229_s28]]   ;;  %s8233_s28 = smov 29  }
  0x26   :  { %s8392_s29 = sld [smem:[%s9588_s0 + %s8230_s7]]   ;;  %s8234_s7 = smov 30  }
  0x27   :  { %9603 = sst [smem:[#allocation14_spill]] %s8377_s8 }
  0x28   :  { %s8397_s8 = sld [smem:[%s9588_s0 + %s8231_s15]]  }
  0x29   :  { %s8402_s9 = sld [smem:[%s9588_s0 + %s8232_s22]]  }
  0x2b   :  { %9605 = sst [smem:[#allocation16_spill]] %s8387_s3 }
  0x2c   :  { %9606 = sst [smem:[#allocation17_spill]] %s8392_s29 }
  0x2d   :  { %s8407_s3 = sld [smem:[%s9588_s0 + %s8233_s28]]  }
  0x2e   :  { %s8412_s29 = sld [smem:[%s9588_s0 + %s8234_s7]]  }
  0x2f   :  { %v128_v0 = vld [vmem:[%s8262_s5] sm:$0xff]  ;;  %vm144_vm0 = vcmask 261120   ;;  %v129_v1 = vld [vmem:[%s8262_s5 + $0x8] sm:$0xff] }
  0x30   :  { %v145_v2 = vsel %vm144_vm0, %v128_v0, 0.0  ;;  %v148_v3 = vsel %vm144_vm0, %v129_v1, 0.0 }
  0x31   :  { %146 = vadd.xlane.f32.xlu0 %v145_v2 }
  0x35   :  { %149 = vadd.xlane.f32.xlu0 %v148_v3 }
  0x36   :  { %66 = vsyncpa [#allocation3], 0  ;;  %v7883_v14 = vld [vmem:[%s8312_s19] sm:$0xff]   ;;  %v8235_v16 = vmov 0.0   ;;  %v7885_v17 = vld [vmem:[%s8312_s19 + $0x8] sm:$0xff]   ;;  %vm8236_vm1 = vmmov 0  }
  0x37   :  { %v7884_v15 = vld [vmem:[%s8322_s30] sm:$0xff]   ;;  %7316 = vmatprep.subr.bf16.mxu0 %v8235_v16  ;;  %7324 = vmatprep.subr.bf16.mxu1 %v8235_v16  ;;  %v7886_v18 = vld [vmem:[%s8322_s30 + $0x8] sm:$0xff]   ;;  %vm418_vm6 = vcmask 31744   ;;  %vm543_vm7 = vcmask 1043456   ;;  %vm515_vm10 = vcmask 64512   ;;  %s8237_s0 = smov 124  }
  0x38   :  { %7317 = vmatpush3.bf16.msra.mxu0 %v7883_v14  ;;  %7325 = vmatpush3.bf16.msra.mxu1 %v7884_v15  ;;  %v6693_v35 = vld [vmem:[%s8282_s21] ss:$0 sm:$0xff]  ;;  %v7888_v47 = vld [vmem:[%s8332_s12 + $0x8] sm:$0xff]   ;;  %s8239_s21 = smov 116   ;;  %s8241_s19 = smov 108   ;;  %vm2261_vm11 = vcmask 97280  }
  0x39   :  { %7318 = vmatprep.subr.bf16.mxu0 %v8235_v16  ;;  %7326 = vmatprep.subr.bf16.mxu1 %v8235_v16  ;;  %v6694_v41 = vld [vmem:[%s8287_s25] ss:$0 sm:$0xff]  ;;  %s8240_s25 = smov 112   ;;  %s8243_s30 = smov 100   ;;  %vm2264_vm12 = vcmask 130048   ;;  %vm2267_vm13 = vcmask 162816  }
  0x3a   :  { %7320 = vmatprep.mubr.msk.bf16.mxu0 %vm8236_vm1, %v8235_v16  ;;  %7328 = vmatprep.mubr.msk.bf16.mxu1 %vm8236_vm1, %v8235_v16  ;;  %v7887_v45 = vld [vmem:[%s8332_s12] sm:$0xff]   ;;  %s8245_s12 = smov 8   ;;  %s8247_s15 = smov 24   ;;  %vm2270_vm14 = vcmask 195584   ;;  %vm2273_vm15 = vcmask 228352  }
  0x3b   :  { %v6699_v48 = vld [vmem:[%s8327_s6] ss:$0 sm:$0xff]  ;;  %s8244_s6 = smov 4   ;;  %s8248_s16 = smov 12  }
  0x3c   :  { %7319 = vmatpush3.bf16.msra.mxu0 %v7885_v17  ;;  %7327 = vmatpush3.bf16.msra.mxu1 %v7886_v18  ;;  %v6695_v60 = vld [vmem:[%s8317_s24] ss:$0 sm:$0xff]  ;;  %v133_v17 = vld [vmem:[%s8272_s13 + $0x8] sm:$0xff]  ;;  %s8242_s24 = smov 104   ;;  %s8249_s18 = smov 20  }
  0x3d   :  { %7332 = vmatprep.subr.bf16.mxu0 %v8235_v16  ;;  %7340 = vmatprep.subr.bf16.mxu1 %v8235_v16  ;;  %v6703_v63 = vld [vmem:[%s8337_s20] ss:$0 sm:$0xff]  ;;  %vm135_vm9 = vcmp.eq.f32.partialorder %v133_v17, 0.0  ;;  %s8246_s20 = smov 16   ;;  %s8250_s22 = smov 28  }
  0x3e   :  { %v132_v15 = vld [vmem:[%s8272_s13] sm:$0xff]  ;;  %s8238_s13 = smov 120   ;;  %s9612_s23 = sld [smem:[#allocation11_spill]] }
  0x3f   :  { %vm134_vm8 = vcmp.eq.f32.partialorder %v132_v15, 0.0  ;;  %s9613_s26 = sld [smem:[#allocation14_spill]]  ;;  %s9615_s1 = sld [smem:[#allocation15_spill]] }
  0x40   :  { %s9614_s28 = sld [smem:[#allocation6_spill]]  ;;  %s9616_s2 = sld [smem:[#allocation16_spill]] }
  0x41   :  { %s9617_s7 = sld [smem:[#allocation17_spill]]  ;;  %s9619_s11 = sld [smem:[#allocation10_spill]] }
  0x42   :  { %s9618_s10 = sld [smem:[#allocation9_spill]] }
  0xbe   :  { %v147_v4 = vpop.xlane.xlu0 %146 }
  0xbf   :  { %v152_v5 = vmul.f32 0.03125, %v147_v4 }
  0xc1   :  { %v154_v6 = vsub.f32 %v128_v0, %v152_v5 }
  0xc2   :  { %v150_v7 = vpop.xlane.xlu0 %149 }
  0xc3   :  { %v153_v8 = vmul.f32 0.03125, %v150_v7  ;;  %v156_v9 = vmul.f32 %v154_v6, %v154_v6 }
  0xc5   :  { %v155_v10 = vsub.f32 %v129_v1, %v153_v8  ;;  %v158_v11 = vsel %vm144_vm0, %v156_v9, 0.0 }
  0xc6   :  { %159 = vadd.xlane.f32.xlu1 %v158_v11 }
  0xc7   :  { %v157_v12 = vmul.f32 %v155_v10, %v155_v10 }
  0xc9   :  { %v161_v13 = vsel %vm144_vm0, %v157_v12, 0.0 }
  0xca   :  { %162 = vadd.xlane.f32.xlu1 %v161_v13 }
 0x153   :  { %v160_v19 = vpop.xlane.xlu1 %159 }
 0x154   :  { %v164_v20 = vmul.f32 0.032258064, %v160_v19  ;;  %v8487_v19 = vsel %vm134_vm8, -1e+09, %v8235_v16 }
 0x156   :  { %8027 = vrsqrt.f32 %v164_v20  ;;  %vm168_vm2 = vcmp.eq.f32.partialorder %v164_v20, inf  ;;  %v171_v25 = vand.u32 2147483648, %v164_v20  ;;  %vm170_vm3 = vcmp.eq.f32.partialorder %v164_v20, 0.0 }
 0x157   :  { %v163_v21 = vpop.xlane.xlu1 %162 }
 0x158   :  { %v165_v22 = vmul.f32 0.032258064, %v163_v21 }
 0x15a   :  { %8029 = vrsqrt.f32 %v165_v22  ;;  %vm175_vm4 = vcmp.eq.f32.partialorder %v165_v22, inf  ;;  %v178_v31 = vand.u32 2147483648, %v165_v22  ;;  %vm177_vm5 = vcmp.eq.f32.partialorder %v165_v22, 0.0 }
 0x160   :  { %v8028_v23 = vpop.eup %8027 }
 0x161   :  { %v167_v24 = vmul.f32 %v8028_v23, %v164_v20 }
 0x163   :  { %v169_v26 = vsel %vm168_vm2, %v164_v20, %v167_v24  ;;  %v8490_v24 = vsel %vm135_vm9, -1e+09, %v8235_v16 }
 0x164   :  { %v8030_v27 = vpop.eup %8029  ;;  %v172_v28 = vsel %vm170_vm3, %v171_v25, %v169_v26 }
 0x165   :  { %v180_v29 = vadd.f32 1e-06, %v172_v28  ;;  %v174_v30 = vmul.f32 %v8030_v27, %v165_v22 }
 0x167   :  { %8031 = vrcp.f32 %v180_v29  ;;  %v176_v32 = vsel %vm175_vm4, %v165_v22, %v174_v30 }
 0x168   :  { %v179_v33 = vsel %vm177_vm5, %v178_v31, %v176_v32 }
 0x169   :  { %v181_v34 = vadd.f32 1e-06, %v179_v33 }
 0x16b   :  { %8033 = vrcp.f32 %v181_v34 }
 0x171   :  { %v8032_v36 = vpop.eup %8031 }
 0x172   :  { %v191_v37 = vmul.f32 %v8032_v36, %v6693_v35 }
 0x174   :  { %v193_v40 = vmul.f32 %v191_v37, %v154_v6 }
 0x175   :  { %v8034_v38 = vpop.eup %8033 }
 0x176   :  { %v192_v39 = vmul.f32 %v8034_v38, %v6693_v35  ;;  %v202_v43 = vadd.f32 %v6694_v41, %v193_v40 }
 0x178   :  { %v194_v42 = vmul.f32 %v192_v39, %v155_v10 }
 0x17a   :  { %v203_v44 = vadd.f32 %v6694_v41, %v194_v42 }
 0x17c   :  { %v204_v46 = vpack.c.bf16 %v203_v44, %v202_v43 }
 0x17e   :  { %7321 = vmatmul.mubr.msk.bf16.vlgmr.msra.gmra.mrb[0].mxu0 %vm144_vm0, %v204_v46  ;;  %7329 = vmatmul.mubr.msk.bf16.vlgmr.msra.gmra.mrb[0].mxu1 %vm144_vm0, %v204_v46 }
 0x17f   :  { %7333 = vmatpush3.bf16.msra.mxu0 %v7887_v45  ;;  %7336 = vmatprep.mubr.msk.bf16.mxu0 %vm8236_vm1, %v8235_v16 }
 0x180   :  { %7334 = vmatprep.subr.bf16.mxu0 %v8235_v16  ;;  %7342 = vmatprep.mubr.msk.bf16.mxu1 %vm8236_vm1, %v8235_v16 }
 0x183   :  { %7335 = vmatpush3.bf16.msra.mxu0 %v7888_v47 }
 0x184   :  { %7346 = vmatprep.subr.bf16.mxu0 %v8235_v16 }
 0x186   :  { %7337 = vmatmul.mubr.msk.bf16.vlgmr.msra.gmra.mrb[4].mxu0 %vm144_vm0, %v204_v46 }
 0x187   :  { %7348 = vmatprep.mubr.msk.bf16.mxu0 %vm8236_vm1, %v8235_v16 }
 0x251   :  { %v265_v49 = vpop.f32.mrb[0].mxu0  ;;  %v329_v50 = vpop.f32.mrb[0].mxu1 }
 0x252   :  { %v330_v51 = vadd.f32 %v6699_v48, %v329_v50  ;;  %v7322_v52 = vpop.f32.mrb[1].mxu0  ;;  %v7330_v53 = vpop.f32.mrb[1].mxu1  ;;  %v266_v0 = vadd.f32 %v6695_v60, %v265_v49 }
 0x253   :  { %v268_v54 = vpop.f32.mrb[2].mxu0  ;;  %v332_v55 = vpop.f32.mrb[2].mxu1 }
 0x254   :  { %v8450_v56 = vpack.c.bf16 %v330_v51, %v330_v51  ;;  %v333_v57 = vadd.f32 %v6699_v48, %v332_v55  ;;  %v7323_v58 = vpop.f32.mrb[3].mxu0  ;;  %v7331_v59 = vpop.f32.mrb[3].mxu1  ;;  %v269_v3 = vadd.f32 %v6695_v60, %v268_v54  ;;  %v8462_v7 = vpack.c.bf16 %v266_v0, %v266_v0 }
 0x256   :  { %v8453_v61 = vpack.c.bf16 %v333_v57, %v333_v57  ;;  %v423_v62 = vsel %vm418_vm6, %v8450_v56, 0  ;;  %v8466_v11 = vpack.c.bf16 %v269_v3, %v269_v3 }
 0x257   :  { %7341 = vmatpush3.bf16.xpose.msra.mxu1 %v423_v62 }
 0x258   :  { %v469_v1 = vsel %vm418_vm6, %v8453_v61, 0  ;;  %7352 = vmatprep.subr.bf16.mxu1 %v8235_v16 }
 0x259   :  { %v393_v2 = vpop.f32.mrb[4].mxu0  ;;  %7347 = vmatpush3.bf16.xpose.msra.mxu0 %v469_v1 }
 0x25a   :  { %v394_v4 = vadd.f32 %v6703_v63, %v393_v2  ;;  %v7338_v5 = vpop.f32.mrb[5].mxu0  ;;  %7358 = vmatprep.subr.bf16.mxu0 %v8235_v16 }
 0x25b   :  { %v396_v6 = vpop.f32.mrb[6].mxu0 }
 0x25c   :  { %v8464_v8 = vpack.c.bf16 %v394_v4, %v394_v4  ;;  %v397_v9 = vadd.f32 %v6703_v63, %v396_v6  ;;  %v7339_v10 = vpop.f32.mrb[7].mxu0 }
 0x25e   :  { %v8468_v12 = vpack.c.bf16 %v397_v9, %v397_v9  ;;  %7343 = vmatmul.mubr.msk.bf16.vlgmr.msra.gmra.mrb[4].mxu1 %vm418_vm6, %v8462_v7  ;;  %v545_v13 = vsel %vm543_vm7, %v8464_v8, 0 }
 0x25f   :  { %7353 = vmatpush3.bf16.msra.mxu1 %v545_v13  ;;  %7354 = vmatprep.mubr.msk.bf16.mxu1 %vm8236_vm1, %v8235_v16 }
 0x260   :  { %7349 = vmatmul.mubr.msk.bf16.vlgmr.msra.gmra.mrb[8].mxu0 %vm418_vm6, %v8466_v11  ;;  %v591_v14 = vsel %vm543_vm7, %v8468_v12, 0  ;;  %7364 = vmatprep.subr.bf16.mxu1 %v8235_v16 }
 0x261   :  { %7359 = vmatpush3.bf16.msra.mxu0 %v591_v14  ;;  %7360 = vmatprep.mubr.msk.bf16.mxu0 %vm8236_vm1, %v8235_v16 }
 0x262   :  { %7370 = vmatprep.subr.bf16.mxu0 %v8235_v16 }
 0x331   :  { %v459_v18 = vpop.f32.mrb[4].mxu1 }
 0x332   :  { %v511_v20 = vmul.f32 0.5, %v459_v18  ;;  %v7344_v21 = vpop.f32.mrb[5].mxu1 }
 0x333   :  { %v462_v22 = vpop.f32.mrb[6].mxu1  ;;  %v505_v23 = vpop.f32.mrb[8].mxu0 }
 0x334   :  { %v512_v25 = vmul.f32 0.5, %v505_v23  ;;  %v7345_v26 = vpop.f32.mrb[7].mxu1  ;;  %v7350_v27 = vpop.f32.mrb[9].mxu0  ;;  %v513_v28 = vadd.f32 %v511_v20, %v8487_v19 }
 0x335   :  { %v508_v29 = vpop.f32.mrb[10].mxu0 }
 0x336   :  { %v7351_v30 = vpop.f32.mrb[11].mxu0  ;;  %v516_v31 = vsel %vm515_vm10, %v513_v28, -inf  ;;  %v514_v32 = vadd.f32 %v512_v25, %v8490_v24 }
 0x337   :  { %517 = vmax.xlane.f32.xlu0 %v516_v31 }
 0x338   :  { %v519_v33 = vsel %vm515_vm10, %v514_v32, -inf }
 0x339   :  { %520 = vmax.xlane.f32.xlu1 %v519_v33 }
 0x34a   :  { %685 = vrot.lane.b32.xlu1 %v8453_v61, %s8237_s0 }
 0x3c4   :  { %v518_v34 = vpop.xlane.xlu0 %517 }
 0x3c5   :  { %v522_v35 = vsub.f32 %v513_v28, %v518_v34 }
 0x3c6   :  { %v521_v36 = vpop.xlane.xlu1 %520 }
 0x3c7   :  { %v524_v37 = vmul.f32 1.442695, %v522_v35  ;;  %v523_v38 = vsub.f32 %v514_v32, %v521_v36 }
 0x3c9   :  { %8035 = vpow2.f32 %v524_v37  ;;  %v526_v39 = vmul.f32 1.442695, %v523_v38 }
 0x3ca   :  { %v686_v44 = vpop.permute.xlu1 %685 }
 0x3cb   :  { %8037 = vpow2.f32 %v526_v39  ;;  %v691_v55 = vsel %vm418_vm6, %v686_v44, 0 }
 0x3d3   :  { %v8036_v40 = vpop.eup %8035 }
 0x3d4   :  { %v528_v41 = vsel %vm515_vm10, %v8036_v40, 0.0 }
 0x3d5   :  { %v8038_v42 = vpop.eup %8037  ;;  %529 = vadd.xlane.f32.xlu0 %v528_v41 }
 0x3d6   :  { %v531_v43 = vsel %vm515_vm10, %v8038_v42, 0.0 }
 0x3d7   :  { %532 = vadd.xlane.f32.xlu1 %v531_v43 }
 0x3e8   :  { %633 = vrot.lane.b32.xlu1 %v8462_v7, %s8237_s0 }
 0x3eb   :  { %635 = vrot.lane.b32.xlu0 %v8450_v56, %s8237_s0 }
 0x3ec   :  { %683 = vrot.lane.b32.xlu1 %v8466_v11, %s8237_s0 }
 0x462   :  { %v530_v45 = vpop.xlane.xlu0 %529 }
 0x463   :  { %8039 = vrcp.f32 %v530_v45 }
 0x464   :  { %v533_v46 = vpop.xlane.xlu1 %532 }
 0x465   :  { %8041 = vrcp.f32 %v533_v46 }
 0x466   :  { %v636_v50 = vpop.permute.xlu0 %635 }
 0x467   :  { %v641_v53 = vsel %vm418_vm6, %v636_v50, 0 }
 0x468   :  { %v634_v57 = vpop.permute.xlu1 %633 }
 0x46c   :  { %v684_v58 = vpop.permute.xlu1 %683 }
 0x46d   :  { %v8040_v47 = vpop.eup %8039 }
 0x46e   :  { %v536_v48 = vmul.f32 %v8040_v47, %v8036_v40 }
 0x46f   :  { %v8042_v49 = vpop.eup %8041 }
 0x470   :  { %v538_v51 = vpack.c.bf16 %v536_v48, %v536_v48  ;;  %v537_v52 = vmul.f32 %v8042_v49, %v8038_v42 }
 0x472   :  { %7355 = vmatmul.mubr.msk.bf16.vlgmr.msra.gmra.mrb[8].mxu1 %vm515_vm10, %v538_v51  ;;  %v539_v54 = vpack.c.bf16 %v537_v52, %v537_v52 }
 0x473   :  { %7365 = vmatpush3.bf16.xpose.msra.mxu1 %v641_v53  ;;  %7366 = vmatprep.mubr.msk.bf16.mxu1 %vm8236_vm1, %v8235_v16 }
 0x474   :  { %7361 = vmatmul.mubr.msk.bf16.vlgmr.msra.gmra.mrb[12].mxu0 %vm515_vm10, %v539_v54  ;;  %7376 = vmatprep.subr.bf16.mxu1 %v8235_v16 }
 0x475   :  { %7371 = vmatpush3.bf16.xpose.msra.mxu0 %v691_v55  ;;  %7372 = vmatprep.mubr.msk.bf16.mxu0 %vm8236_vm1, %v8235_v16 }
 0x476   :  { %7382 = vmatprep.subr.bf16.mxu0 %v8235_v16 }
 0x47a   :  { %7367 = vmatmul.mubr.msk.bf16.vlgmr.msra.gmra.mrb[12].mxu1 %vm418_vm6, %v634_v57 }
 0x47b   :  { %7378 = vmatprep.mubr.msk.bf16.mxu1 %vm8236_vm1, %v8235_v16 }
 0x47c   :  { %7373 = vmatmul.mubr.msk.bf16.vlgmr.msra.gmra.mrb[16].mxu0 %vm418_vm6, %v684_v58 }
 0x47d   :  { %7384 = vmatprep.mubr.msk.bf16.mxu0 %vm8236_vm1, %v8235_v16 }
 0x545   :  { %v8522_v59 = vpop.f32.mrb[8].mxu1 }
 0x546   :  { %v7356_v60 = vpop.f32.mrb[9].mxu1 }
 0x547   :  { %v584_v62 = vpop.f32.mrb[10].mxu1  ;;  %v8524_v63 = vpop.f32.mrb[12].mxu0 }
 0x548   :  { %v7357_v0 = vpop.f32.mrb[11].mxu1  ;;  %v7362_v1 = vpop.f32.mrb[13].mxu0 }
 0x549   :  { %v630_v2 = vpop.f32.mrb[14].mxu0 }
 0x54a   :  { %v7363_v3 = vpop.f32.mrb[15].mxu0 }
 0x54d   :  { %v677_v4 = vpop.f32.mrb[12].mxu1 }
 0x54e   :  { %v733_v5 = vmul.f32 0.5, %v677_v4  ;;  %v7368_v6 = vpop.f32.mrb[13].mxu1 }
 0x54f   :  { %v680_v9 = vpop.f32.mrb[14].mxu1  ;;  %v727_v10 = vpop.f32.mrb[16].mxu0 }
 0x550   :  { %v734_v13 = vmul.f32 0.5, %v727_v10  ;;  %v7369_v14 = vpop.f32.mrb[15].mxu1  ;;  %v7374_v15 = vpop.f32.mrb[17].mxu0  ;;  %v735_v17 = vadd.f32 %v733_v5, %v8487_v19 }
 0x551   :  { %v730_v18 = vpop.f32.mrb[18].mxu0 }
 0x552   :  { %v7375_v20 = vpop.f32.mrb[19].mxu0  ;;  %v737_v21 = vsel %vm515_vm10, %v735_v17, -inf  ;;  %v736_v22 = vadd.f32 %v734_v13, %v8490_v24 }
 0x553   :  { %738 = vmax.xlane.f32.xlu0 %v737_v21 }
 0x554   :  { %v740_v23 = vsel %vm515_vm10, %v736_v22, -inf }
 0x555   :  { %741 = vmax.xlane.f32.xlu1 %v740_v23 }
 0x566   :  { %809 = vrot.lane.b32.xlu1 %v8468_v12, %s8237_s0 }
 0x56a   :  { %859 = vrot.lane.b32.xlu1 %v8450_v56, %s8238_s13 }
 0x56e   :  { %909 = vrot.lane.b32.xlu1 %v8453_v61, %s8238_s13 }
 0x572   :  { %907 = vrot.lane.b32.xlu1 %v8466_v11, %s8238_s13 }
 0x5e0   :  { %v739_v25 = vpop.xlane.xlu0 %738 }
 0x5e1   :  { %v743_v26 = vsub.f32 %v735_v17, %v739_v25 }
 0x5e2   :  { %v742_v27 = vpop.xlane.xlu1 %741 }
 0x5e3   :  { %v745_v28 = vmul.f32 1.442695, %v743_v26  ;;  %v744_v29 = vsub.f32 %v736_v22, %v742_v27 }
 0x5e5   :  { %8043 = vpow2.f32 %v745_v28  ;;  %v747_v30 = vmul.f32 1.442695, %v744_v29 }
 0x5e6   :  { %v810_v31 = vpop.permute.xlu1 %809 }
 0x5e7   :  { %8045 = vpow2.f32 %v747_v30  ;;  %v815_v32 = vsel %vm543_vm7, %v810_v31, 0 }
 0x5e8   :  { %7383 = vmatpush3.bf16.msra.mxu0 %v815_v32 }
 0x5e9   :  { %7394 = vmatprep.subr.bf16.mxu0 %v8235_v16 }
 0x5ea   :  { %v860_v42 = vpop.permute.xlu1 %859 }
 0x5eb   :  { %v865_v48 = vsel %vm418_vm6, %v860_v42, 0 }
 0x5ee   :  { %v910_v47 = vpop.permute.xlu1 %909 }
 0x5ef   :  { %v8044_v33 = vpop.eup %8043  ;;  %v915_v50 = vsel %vm418_vm6, %v910_v47, 0 }
 0x5f0   :  { %v749_v34 = vsel %vm515_vm10, %v8044_v33, 0.0 }
 0x5f1   :  { %v8046_v35 = vpop.eup %8045  ;;  %750 = vadd.xlane.f32.xlu0 %v749_v34 }
 0x5f2   :  { %v752_v36 = vsel %vm515_vm10, %v8046_v35, 0.0  ;;  %v908_v52 = vpop.permute.xlu1 %907 }
 0x5f5   :  { %753 = vadd.xlane.f32.xlu0 %v752_v36 }
 0x60b   :  { %761 = vrot.lane.b32.xlu0 %v8464_v8, %s8237_s0 }
 0x60f   :  { %857 = vrot.lane.b32.xlu0 %v8462_v7, %s8238_s13 }
 0x67e   :  { %v751_v37 = vpop.xlane.xlu0 %750 }
 0x67f   :  { %8047 = vrcp.f32 %v751_v37 }
 0x682   :  { %v754_v38 = vpop.xlane.xlu0 %753 }
 0x683   :  { %8049 = vrcp.f32 %v754_v38 }
 0x686   :  { %v762_v39 = vpop.permute.xlu0 %761 }
 0x687   :  { %v767_v40 = vsel %vm543_vm7, %v762_v39, 0 }
 0x688   :  { %7377 = vmatpush3.bf16.msra.mxu1 %v767_v40 }
 0x689   :  { %v8048_v41 = vpop.eup %8047  ;;  %7388 = vmatprep.subr.bf16.mxu1 %v8235_v16 }
 0x68a   :  { %v757_v43 = vmul.f32 %v8048_v41, %v8044_v33  ;;  %v858_v51 = vpop.permute.xlu0 %857 }
 0x68c   :  { %v759_v44 = vpack.c.bf16 %v757_v43, %v757_v43 }
 0x68d   :  { %v8050_v45 = vpop.eup %8049 }
 0x68e   :  { %7379 = vmatmul.mubr.msk.bf16.vlgmr.msra.gmra.mrb[16].mxu1 %vm515_vm10, %v759_v44  ;;  %v758_v46 = vmul.f32 %v8050_v45, %v8046_v35 }
 0x68f   :  { %7390 = vmatprep.mubr.msk.bf16.mxu1 %vm8236_vm1, %v8235_v16 }
 0x690   :  { %v760_v49 = vpack.c.bf16 %v758_v46, %v758_v46 }
 0x691   :  { %7389 = vmatpush3.bf16.xpose.msra.mxu1 %v865_v48 }
 0x692   :  { %7385 = vmatmul.mubr.msk.bf16.vlgmr.msra.gmra.mrb[20].mxu0 %vm515_vm10, %v760_v49  ;;  %7400 = vmatprep.subr.bf16.mxu1 %v8235_v16 }
 0x693   :  { %7395 = vmatpush3.bf16.xpose.msra.mxu0 %v915_v50  ;;  %7396 = vmatprep.mubr.msk.bf16.mxu0 %vm8236_vm1, %v8235_v16 }
 0x694   :  { %7406 = vmatprep.subr.bf16.mxu0 %v8235_v16 }
 0x698   :  { %7391 = vmatmul.mubr.msk.bf16.vlgmr.msra.gmra.mrb[20].mxu1 %vm418_vm6, %v858_v51 }
 0x699   :  { %7402 = vmatprep.mubr.msk.bf16.mxu1 %vm8236_vm1, %v8235_v16 }
 0x69a   :  { %7397 = vmatmul.mubr.msk.bf16.vlgmr.msra.gmra.mrb[24].mxu0 %vm418_vm6, %v908_v52 }
 0x69b   :  { %7408 = vmatprep.mubr.msk.bf16.mxu0 %vm8236_vm1, %v8235_v16 }
 0x761   :  { %v8564_v53 = vpop.f32.mrb[16].mxu1 }
 0x762   :  { %v7380_v54 = vpop.f32.mrb[17].mxu1 }
 0x763   :  { %v806_v55 = vpop.f32.mrb[18].mxu1 }
 0x764   :  { %v7381_v57 = vpop.f32.mrb[19].mxu1 }
 0x765   :  { %v8566_v58 = vpop.f32.mrb[20].mxu0 }
 0x766   :  { %v7813_v60 = vpack.i.bf16 %v8566_v58, %v8564_v53  ;;  %v7386_v62 = vpop.f32.mrb[21].mxu0 }
 0x767   :  { %v854_v0 = vpop.f32.mrb[22].mxu0 }
 0x768   :  { %v7387_v1 = vpop.f32.mrb[23].mxu0 }
 0x76b   :  { %v901_v2 = vpop.f32.mrb[20].mxu1 }
 0x76c   :  { %v957_v3 = vmul.f32 0.5, %v901_v2  ;;  %v7392_v4 = vpop.f32.mrb[21].mxu1 }
 0x76d   :  { %v904_v5 = vpop.f32.mrb[22].mxu1  ;;  %v951_v6 = vpop.f32.mrb[24].mxu0 }
 0x76e   :  { %v958_v9 = vmul.f32 0.5, %v951_v6  ;;  %v7393_v10 = vpop.f32.mrb[23].mxu1  ;;  %v7398_v13 = vpop.f32.mrb[25].mxu0  ;;  %v959_v14 = vadd.f32 %v957_v3, %v8487_v19 }
 0x76f   :  { %v954_v15 = vpop.f32.mrb[26].mxu0 }
 0x770   :  { %v7399_v17 = vpop.f32.mrb[27].mxu0  ;;  %v961_v18 = vsel %vm515_vm10, %v959_v14, -inf  ;;  %v960_v20 = vadd.f32 %v958_v9, %v8490_v24 }
 0x771   :  { %962 = vmax.xlane.f32.xlu0 %v961_v18 }
 0x772   :  { %v964_v21 = vsel %vm515_vm10, %v960_v20, -inf }
 0x773   :  { %965 = vmax.xlane.f32.xlu1 %v964_v21 }
 0x784   :  { %1033 = vrot.lane.b32.xlu1 %v8468_v12, %s8238_s13 }
 0x788   :  { %1083 = vrot.lane.b32.xlu1 %v8450_v56, %s8239_s21 }
 0x78c   :  { %1133 = vrot.lane.b32.xlu1 %v8453_v61, %s8239_s21 }
 0x790   :  { %1131 = vrot.lane.b32.xlu1 %v8466_v11, %s8239_s21 }
 0x7fe   :  { %v963_v22 = vpop.xlane.xlu0 %962 }
 0x7ff   :  { %v967_v23 = vsub.f32 %v959_v14, %v963_v22 }
 0x800   :  { %v966_v25 = vpop.xlane.xlu1 %965 }
 0x801   :  { %v969_v26 = vmul.f32 1.442695, %v967_v23  ;;  %v968_v27 = vsub.f32 %v960_v20, %v966_v25 }
 0x803   :  { %8051 = vpow2.f32 %v969_v26  ;;  %v971_v28 = vmul.f32 1.442695, %v968_v27 }
 0x804   :  { %v1034_v29 = vpop.permute.xlu1 %1033 }
 0x805   :  { %8053 = vpow2.f32 %v971_v28  ;;  %v1039_v30 = vsel %vm543_vm7, %v1034_v29, 0 }
 0x806   :  { %7407 = vmatpush3.bf16.msra.mxu0 %v1039_v30 }
 0x807   :  { %7418 = vmatprep.subr.bf16.mxu0 %v8235_v16 }
 0x808   :  { %v1084_v40 = vpop.permute.xlu1 %1083 }
 0x809   :  { %v1089_v46 = vsel %vm418_vm6, %v1084_v40, 0 }
 0x80c   :  { %v1134_v45 = vpop.permute.xlu1 %1133 }
 0x80d   :  { %v8052_v31 = vpop.eup %8051  ;;  %v1139_v48 = vsel %vm418_vm6, %v1134_v45, 0 }
 0x80e   :  { %v973_v32 = vsel %vm515_vm10, %v8052_v31, 0.0 }
 0x80f   :  { %v8054_v33 = vpop.eup %8053  ;;  %974 = vadd.xlane.f32.xlu0 %v973_v32 }
 0x810   :  { %v976_v34 = vsel %vm515_vm10, %v8054_v33, 0.0  ;;  %v1132_v50 = vpop.permute.xlu1 %1131 }
 0x813   :  { %977 = vadd.xlane.f32.xlu0 %v976_v34 }
 0x829   :  { %985 = vrot.lane.b32.xlu0 %v8464_v8, %s8238_s13 }
 0x82d   :  { %1081 = vrot.lane.b32.xlu0 %v8462_v7, %s8239_s21 }
 0x89c   :  { %v975_v35 = vpop.xlane.xlu0 %974 }
 0x89d   :  { %8055 = vrcp.f32 %v975_v35 }
 0x8a0   :  { %v978_v36 = vpop.xlane.xlu0 %977 }
 0x8a1   :  { %8057 = vrcp.f32 %v978_v36 }
 0x8a4   :  { %v986_v37 = vpop.permute.xlu0 %985 }
 0x8a5   :  { %v991_v38 = vsel %vm543_vm7, %v986_v37, 0 }
 0x8a6   :  { %7401 = vmatpush3.bf16.msra.mxu1 %v991_v38 }
 0x8a7   :  { %v8056_v39 = vpop.eup %8055  ;;  %7412 = vmatprep.subr.bf16.mxu1 %v8235_v16 }
 0x8a8   :  { %v981_v41 = vmul.f32 %v8056_v39, %v8052_v31  ;;  %v1082_v49 = vpop.permute.xlu0 %1081 }
 0x8aa   :  { %v983_v42 = vpack.c.bf16 %v981_v41, %v981_v41 }
 0x8ab   :  { %v8058_v43 = vpop.eup %8057 }
 0x8ac   :  { %7403 = vmatmul.mubr.msk.bf16.vlgmr.msra.gmra.mrb[24].mxu1 %vm515_vm10, %v983_v42  ;;  %v982_v44 = vmul.f32 %v8058_v43, %v8054_v33 }
 0x8ad   :  { %7414 = vmatprep.mubr.msk.bf16.mxu1 %vm8236_vm1, %v8235_v16 }
 0x8ae   :  { %v984_v47 = vpack.c.bf16 %v982_v44, %v982_v44 }
 0x8af   :  { %7413 = vmatpush3.bf16.xpose.msra.mxu1 %v1089_v46 }
 0x8b0   :  { %7409 = vmatmul.mubr.msk.bf16.vlgmr.msra.gmra.mrb[28].mxu0 %vm515_vm10, %v984_v47  ;;  %7424 = vmatprep.subr.bf16.mxu1 %v8235_v16 }
 0x8b1   :  { %7419 = vmatpush3.bf16.xpose.msra.mxu0 %v1139_v48  ;;  %7420 = vmatprep.mubr.msk.bf16.mxu0 %vm8236_vm1, %v8235_v16 }
 0x8b2   :  { %7430 = vmatprep.subr.bf16.mxu0 %v8235_v16 }
 0x8b6   :  { %7415 = vmatmul.mubr.msk.bf16.vlgmr.msra.gmra.mrb[28].mxu1 %vm418_vm6, %v1082_v49 }
 0x8b7   :  { %7426 = vmatprep.mubr.msk.bf16.mxu1 %vm8236_vm1, %v8235_v16 }
 0x8b8   :  { %7421 = vmatmul.mubr.msk.bf16.vlgmr.msra.gmra.mrb[32].mxu0 %vm418_vm6, %v1132_v50 }
 0x8b9   :  { %7432 = vmatprep.mubr.msk.bf16.mxu0 %vm8236_vm1, %v8235_v16 }
 0x97f   :  { %v8608_v51 = vpop.f32.mrb[24].mxu1 }
 0x980   :  { %v7404_v52 = vpop.f32.mrb[25].mxu1 }
 0x981   :  { %v1030_v54 = vpop.f32.mrb[26].mxu1 }
 0x982   :  { %v7405_v55 = vpop.f32.mrb[27].mxu1 }
 0x983   :  { %v8610_v57 = vpop.f32.mrb[28].mxu0 }
 0x984   :  { %v7818_v62 = vpack.i.bf16 %v8610_v57, %v8608_v51  ;;  %v7410_v0 = vpop.f32.mrb[29].mxu0 }
 0x985   :  { %v1078_v1 = vpop.f32.mrb[30].mxu0 }
 0x986   :  { %v7411_v2 = vpop.f32.mrb[31].mxu0 }
 0x989   :  { %v1125_v3 = vpop.f32.mrb[28].mxu1 }
 0x98a   :  { %v1181_v4 = vmul.f32 0.5, %v1125_v3  ;;  %v7416_v5 = vpop.f32.mrb[29].mxu1 }
 0x98b   :  { %v1128_v6 = vpop.f32.mrb[30].mxu1  ;;  %v1175_v9 = vpop.f32.mrb[32].mxu0 }
 0x98c   :  { %v1182_v10 = vmul.f32 0.5, %v1175_v9  ;;  %v7417_v13 = vpop.f32.mrb[31].mxu1  ;;  %v7422_v14 = vpop.f32.mrb[33].mxu0  ;;  %v1183_v15 = vadd.f32 %v1181_v4, %v8487_v19 }
 0x98d   :  { %v1178_v17 = vpop.f32.mrb[34].mxu0 }
 0x98e   :  { %v7423_v18 = vpop.f32.mrb[35].mxu0  ;;  %v1185_v20 = vsel %vm515_vm10, %v1183_v15, -inf  ;;  %v1184_v21 = vadd.f32 %v1182_v10, %v8490_v24 }
 0x98f   :  { %1186 = vmax.xlane.f32.xlu0 %v1185_v20 }
 0x990   :  { %v1188_v22 = vsel %vm515_vm10, %v1184_v21, -inf }
 0x991   :  { %1189 = vmax.xlane.f32.xlu1 %v1188_v22 }
 0x9a2   :  { %1257 = vrot.lane.b32.xlu1 %v8468_v12, %s8239_s21 }
 0x9a6   :  { %1307 = vrot.lane.b32.xlu1 %v8450_v56, %s8240_s25 }
 0x9aa   :  { %1357 = vrot.lane.b32.xlu1 %v8453_v61, %s8240_s25 }
 0x9ae   :  { %1355 = vrot.lane.b32.xlu1 %v8466_v11, %s8240_s25 }
 0xa1c   :  { %v1187_v23 = vpop.xlane.xlu0 %1186 }
 0xa1d   :  { %v1191_v25 = vsub.f32 %v1183_v15, %v1187_v23 }
 0xa1e   :  { %v1190_v26 = vpop.xlane.xlu1 %1189 }
 0xa1f   :  { %v1193_v27 = vmul.f32 1.442695, %v1191_v25  ;;  %v1192_v28 = vsub.f32 %v1184_v21, %v1190_v26 }
 0xa21   :  { %8059 = vpow2.f32 %v1193_v27  ;;  %v1195_v29 = vmul.f32 1.442695, %v1192_v28 }
 0xa22   :  { %v1258_v30 = vpop.permute.xlu1 %1257 }
 0xa23   :  { %8061 = vpow2.f32 %v1195_v29  ;;  %v1263_v31 = vsel %vm543_vm7, %v1258_v30, 0 }
 0xa24   :  { %7431 = vmatpush3.bf16.msra.mxu0 %v1263_v31 }
 0xa25   :  { %7442 = vmatprep.subr.bf16.mxu0 %v8235_v16 }
 0xa26   :  { %v1308_v41 = vpop.permute.xlu1 %1307 }
 0xa27   :  { %v1313_v47 = vsel %vm418_vm6, %v1308_v41, 0 }
 0xa2a   :  { %v1358_v46 = vpop.permute.xlu1 %1357 }
 0xa2b   :  { %v8060_v32 = vpop.eup %8059  ;;  %v1363_v49 = vsel %vm418_vm6, %v1358_v46, 0 }
 0xa2c   :  { %v1197_v33 = vsel %vm515_vm10, %v8060_v32, 0.0 }
 0xa2d   :  { %v8062_v34 = vpop.eup %8061  ;;  %1198 = vadd.xlane.f32.xlu0 %v1197_v33 }
 0xa2e   :  { %v1200_v35 = vsel %vm515_vm10, %v8062_v34, 0.0  ;;  %v1356_v52 = vpop.permute.xlu1 %1355 }
 0xa31   :  { %1201 = vadd.xlane.f32.xlu0 %v1200_v35 }
 0xa47   :  { %1209 = vrot.lane.b32.xlu0 %v8464_v8, %s8239_s21 }
 0xa4b   :  { %1305 = vrot.lane.b32.xlu0 %v8462_v7, %s8240_s25 }
 0xaba   :  { %v1199_v36 = vpop.xlane.xlu0 %1198 }
 0xabb   :  { %8063 = vrcp.f32 %v1199_v36 }
 0xabe   :  { %v1202_v37 = vpop.xlane.xlu0 %1201 }
 0xabf   :  { %8065 = vrcp.f32 %v1202_v37 }
 0xac2   :  { %v1210_v38 = vpop.permute.xlu0 %1209 }
 0xac3   :  { %v1215_v39 = vsel %vm543_vm7, %v1210_v38, 0 }
 0xac4   :  { %7425 = vmatpush3.bf16.msra.mxu1 %v1215_v39 }
 0xac5   :  { %v8064_v40 = vpop.eup %8063  ;;  %7436 = vmatprep.subr.bf16.mxu1 %v8235_v16 }
 0xac6   :  { %v1205_v42 = vmul.f32 %v8064_v40, %v8060_v32  ;;  %v1306_v50 = vpop.permute.xlu0 %1305 }
 0xac8   :  { %v1207_v43 = vpack.c.bf16 %v1205_v42, %v1205_v42 }
 0xac9   :  { %v8066_v44 = vpop.eup %8065 }
 0xaca   :  { %7427 = vmatmul.mubr.msk.bf16.vlgmr.msra.gmra.mrb[32].mxu1 %vm515_vm10, %v1207_v43  ;;  %v1206_v45 = vmul.f32 %v8066_v44, %v8062_v34 }
 0xacb   :  { %7438 = vmatprep.mubr.msk.bf16.mxu1 %vm8236_vm1, %v8235_v16 }
 0xacc   :  { %v1208_v48 = vpack.c.bf16 %v1206_v45, %v1206_v45 }
 0xacd   :  { %7437 = vmatpush3.bf16.xpose.msra.mxu1 %v1313_v47 }
 0xace   :  { %7433 = vmatmul.mubr.msk.bf16.vlgmr.msra.gmra.mrb[36].mxu0 %vm515_vm10, %v1208_v48  ;;  %7448 = vmatprep.subr.bf16.mxu1 %v8235_v16 }
 0xacf   :  { %7443 = vmatpush3.bf16.xpose.msra.mxu0 %v1363_v49  ;;  %7444 = vmatprep.mubr.msk.bf16.mxu0 %vm8236_vm1, %v8235_v16 }
 0xad0   :  { %7454 = vmatprep.subr.bf16.mxu0 %v8235_v16 }
 0xad4   :  { %7439 = vmatmul.mubr.msk.bf16.vlgmr.msra.gmra.mrb[36].mxu1 %vm418_vm6, %v1306_v50 }
 0xad5   :  { %7450 = vmatprep.mubr.msk.bf16.mxu1 %vm8236_vm1, %v8235_v16 }
 0xad6   :  { %7445 = vmatmul.mubr.msk.bf16.vlgmr.msra.gmra.mrb[40].mxu0 %vm418_vm6, %v1356_v52 }
 0xad7   :  { %7456 = vmatprep.mubr.msk.bf16.mxu0 %vm8236_vm1, %v8235_v16 }
 0xb9d   :  { %v8652_v54 = vpop.f32.mrb[32].mxu1 }
 0xb9e   :  { %v7428_v55 = vpop.f32.mrb[33].mxu1 }
 0xb9f   :  { %v1254_v0 = vpop.f32.mrb[34].mxu1 }
 0xba0   :  { %v7429_v1 = vpop.f32.mrb[35].mxu1 }
 0xba1   :  { %v8654_v2 = vpop.f32.mrb[36].mxu0 }
 0xba2   :  { %v7823_v3 = vpack.i.bf16 %v8654_v2, %v8652_v54  ;;  %v7434_v4 = vpop.f32.mrb[37].mxu0 }
 0xba3   :  { %v1302_v5 = vpop.f32.mrb[38].mxu0 }
 0xba4   :  { %v7435_v6 = vpop.f32.mrb[39].mxu0 }
 0xba7   :  { %v1349_v9 = vpop.f32.mrb[36].mxu1 }
 0xba8   :  { %v1405_v10 = vmul.f32 0.5, %v1349_v9  ;;  %v7440_v13 = vpop.f32.mrb[37].mxu1 }
 0xba9   :  { %v1352_v14 = vpop.f32.mrb[38].mxu1  ;;  %v1399_v15 = vpop.f32.mrb[40].mxu0 }
 0xbaa   :  { %v1406_v17 = vmul.f32 0.5, %v1399_v15  ;;  %v7441_v18 = vpop.f32.mrb[39].mxu1  ;;  %v7446_v20 = vpop.f32.mrb[41].mxu0  ;;  %v1407_v21 = vadd.f32 %v1405_v10, %v8487_v19 }
 0xbab   :  { %v1402_v22 = vpop.f32.mrb[42].mxu0 }
 0xbac   :  { %v7447_v23 = vpop.f32.mrb[43].mxu0  ;;  %v1409_v25 = vsel %vm515_vm10, %v1407_v21, -inf  ;;  %v1408_v26 = vadd.f32 %v1406_v17, %v8490_v24 }
 0xbad   :  { %1410 = vmax.xlane.f32.xlu0 %v1409_v25 }
 0xbae   :  { %v1412_v27 = vsel %vm515_vm10, %v1408_v26, -inf }
 0xbaf   :  { %1413 = vmax.xlane.f32.xlu1 %v1412_v27 }
 0xbc0   :  { %1481 = vrot.lane.b32.xlu1 %v8468_v12, %s8240_s25 }
 0xbc4   :  { %1531 = vrot.lane.b32.xlu1 %v8450_v56, %s8241_s19 }
 0xbc8   :  { %1581 = vrot.lane.b32.xlu1 %v8453_v61, %s8241_s19 }
 0xbcc   :  { %1579 = vrot.lane.b32.xlu1 %v8466_v11, %s8241_s19 }
 0xc3a   :  { %v1411_v28 = vpop.xlane.xlu0 %1410 }
 0xc3b   :  { %v1415_v29 = vsub.f32 %v1407_v21, %v1411_v28 }
 0xc3c   :  { %v1414_v30 = vpop.xlane.xlu1 %1413 }
 0xc3d   :  { %v1417_v31 = vmul.f32 1.442695, %v1415_v29  ;;  %v1416_v32 = vsub.f32 %v1408_v26, %v1414_v30 }
 0xc3f   :  { %8067 = vpow2.f32 %v1417_v31  ;;  %v1419_v33 = vmul.f32 1.442695, %v1416_v32 }
 0xc40   :  { %v1482_v34 = vpop.permute.xlu1 %1481 }
 0xc41   :  { %8069 = vpow2.f32 %v1419_v33  ;;  %v1487_v35 = vsel %vm543_vm7, %v1482_v34, 0 }
 0xc42   :  { %7455 = vmatpush3.bf16.msra.mxu0 %v1487_v35 }
 0xc43   :  { %7466 = vmatprep.subr.bf16.mxu0 %v8235_v16 }
 0xc44   :  { %v1532_v45 = vpop.permute.xlu1 %1531 }
 0xc45   :  { %v1537_v52 = vsel %vm418_vm6, %v1532_v45, 0 }
 0xc48   :  { %v1582_v50 = vpop.permute.xlu1 %1581 }
 0xc49   :  { %v8068_v36 = vpop.eup %8067  ;;  %v1587_v0 = vsel %vm418_vm6, %v1582_v50, 0 }
 0xc4a   :  { %v1421_v37 = vsel %vm515_vm10, %v8068_v36, 0.0 }
 0xc4b   :  { %v8070_v38 = vpop.eup %8069  ;;  %1422 = vadd.xlane.f32.xlu0 %v1421_v37 }
 0xc4c   :  { %v1424_v39 = vsel %vm515_vm10, %v8070_v38, 0.0  ;;  %v1580_v4 = vpop.permute.xlu1 %1579 }
 0xc4f   :  { %1425 = vadd.xlane.f32.xlu0 %v1424_v39 }
 0xc65   :  { %1433 = vrot.lane.b32.xlu0 %v8464_v8, %s8240_s25 }
 0xc69   :  { %1529 = vrot.lane.b32.xlu0 %v8462_v7, %s8241_s19 }
 0xcd8   :  { %v1423_v40 = vpop.xlane.xlu0 %1422 }
 0xcd9   :  { %8071 = vrcp.f32 %v1423_v40 }
 0xcdc   :  { %v1426_v41 = vpop.xlane.xlu0 %1425 }
 0xcdd   :  { %8073 = vrcp.f32 %v1426_v41 }
 0xce0   :  { %v1434_v42 = vpop.permute.xlu0 %1433 }
 0xce1   :  { %v1439_v43 = vsel %vm543_vm7, %v1434_v42, 0 }
 0xce2   :  { %7449 = vmatpush3.bf16.msra.mxu1 %v1439_v43 }
 0xce3   :  { %v8072_v44 = vpop.eup %8071  ;;  %7460 = vmatprep.subr.bf16.mxu1 %v8235_v16 }
 0xce4   :  { %v1429_v46 = vmul.f32 %v8072_v44, %v8068_v36  ;;  %v1530_v1 = vpop.permute.xlu0 %1529 }
 0xce6   :  { %v1431_v47 = vpack.c.bf16 %v1429_v46, %v1429_v46 }
 0xce7   :  { %v8074_v48 = vpop.eup %8073 }
 0xce8   :  { %7451 = vmatmul.mubr.msk.bf16.vlgmr.msra.gmra.mrb[40].mxu1 %vm515_vm10, %v1431_v47  ;;  %v1430_v49 = vmul.f32 %v8074_v48, %v8070_v38 }
 0xce9   :  { %7462 = vmatprep.mubr.msk.bf16.mxu1 %vm8236_vm1, %v8235_v16 }
 0xcea   :  { %v1432_v55 = vpack.c.bf16 %v1430_v49, %v1430_v49 }
 0xceb   :  { %7461 = vmatpush3.bf16.xpose.msra.mxu1 %v1537_v52 }
 0xcec   :  { %7457 = vmatmul.mubr.msk.bf16.vlgmr.msra.gmra.mrb[44].mxu0 %vm515_vm10, %v1432_v55  ;;  %7472 = vmatprep.subr.bf16.mxu1 %v8235_v16 }
 0xced   :  { %7467 = vmatpush3.bf16.xpose.msra.mxu0 %v1587_v0  ;;  %7468 = vmatprep.mubr.msk.bf16.mxu0 %vm8236_vm1, %v8235_v16 }
 0xcee   :  { %7478 = vmatprep.subr.bf16.mxu0 %v8235_v16 }
 0xcf2   :  { %7463 = vmatmul.mubr.msk.bf16.vlgmr.msra.gmra.mrb[44].mxu1 %vm418_vm6, %v1530_v1 }
 0xcf3   :  { %7474 = vmatprep.mubr.msk.bf16.mxu1 %vm8236_vm1, %v8235_v16 }
 0xcf4   :  { %7469 = vmatmul.mubr.msk.bf16.vlgmr.msra.gmra.mrb[48].mxu0 %vm418_vm6, %v1580_v4 }
 0xcf5   :  { %7480 = vmatprep.mubr.msk.bf16.mxu0 %vm8236_vm1, %v8235_v16 }
 0xdbb   :  { %v8696_v5 = vpop.f32.mrb[40].mxu1 }
 0xdbc   :  { %v7452_v6 = vpop.f32.mrb[41].mxu1 }
 0xdbd   :  { %v1478_v9 = vpop.f32.mrb[42].mxu1 }
 0xdbe   :  { %v7453_v10 = vpop.f32.mrb[43].mxu1 }
 0xdbf   :  { %v8698_v13 = vpop.f32.mrb[44].mxu0 }
 0xdc0   :  { %v7828_v14 = vpack.i.bf16 %v8698_v13, %v8696_v5  ;;  %v7458_v15 = vpop.f32.mrb[45].mxu0 }
 0xdc1   :  { %v1526_v17 = vpop.f32.mrb[46].mxu0 }
 0xdc2   :  { %v7459_v18 = vpop.f32.mrb[47].mxu0 }
 0xdc5   :  { %v1573_v20 = vpop.f32.mrb[44].mxu1 }
 0xdc6   :  { %v1629_v21 = vmul.f32 0.5, %v1573_v20  ;;  %v7464_v22 = vpop.f32.mrb[45].mxu1 }
 0xdc7   :  { %v1576_v23 = vpop.f32.mrb[46].mxu1  ;;  %v1623_v25 = vpop.f32.mrb[48].mxu0 }
 0xdc8   :  { %v1630_v26 = vmul.f32 0.5, %v1623_v25  ;;  %v7465_v27 = vpop.f32.mrb[47].mxu1  ;;  %v7470_v28 = vpop.f32.mrb[49].mxu0  ;;  %v1631_v29 = vadd.f32 %v1629_v21, %v8487_v19 }
 0xdc9   :  { %v1626_v30 = vpop.f32.mrb[50].mxu0 }
 0xdca   :  { %v7471_v31 = vpop.f32.mrb[51].mxu0  ;;  %v1633_v32 = vsel %vm515_vm10, %v1631_v29, -inf  ;;  %v1632_v33 = vadd.f32 %v1630_v26, %v8490_v24 }
 0xdcb   :  { %1634 = vmax.xlane.f32.xlu0 %v1633_v32 }
 0xdcc   :  { %v1636_v34 = vsel %vm515_vm10, %v1632_v33, -inf }
 0xdcd   :  { %1637 = vmax.xlane.f32.xlu1 %v1636_v34 }
 0xdde   :  { %1705 = vrot.lane.b32.xlu1 %v8468_v12, %s8241_s19 }
 0xde2   :  { %1755 = vrot.lane.b32.xlu1 %v8450_v56, %s8242_s24 }
 0xde6   :  { %1805 = vrot.lane.b32.xlu1 %v8453_v61, %s8242_s24 }
 0xdea   :  { %1803 = vrot.lane.b32.xlu1 %v8466_v11, %s8242_s24 }
 0xe58   :  { %v1635_v35 = vpop.xlane.xlu0 %1634 }
 0xe59   :  { %v1639_v36 = vsub.f32 %v1631_v29, %v1635_v35 }
 0xe5a   :  { %v1638_v37 = vpop.xlane.xlu1 %1637 }
 0xe5b   :  { %v1641_v38 = vmul.f32 1.442695, %v1639_v36  ;;  %v1640_v39 = vsub.f32 %v1632_v33, %v1638_v37 }
 0xe5d   :  { %8075 = vpow2.f32 %v1641_v38  ;;  %v1643_v40 = vmul.f32 1.442695, %v1640_v39 }
 0xe5e   :  { %v1706_v41 = vpop.permute.xlu1 %1705 }
 0xe5f   :  { %8077 = vpow2.f32 %v1643_v40  ;;  %v1711_v42 = vsel %vm543_vm7, %v1706_v41, 0 }
 0xe60   :  { %7479 = vmatpush3.bf16.msra.mxu0 %v1711_v42 }
 0xe61   :  { %7490 = vmatprep.subr.bf16.mxu0 %v8235_v16 }
 0xe62   :  { %v1756_v55 = vpop.permute.xlu1 %1755 }
 0xe63   :  { %v1761_v10 = vsel %vm418_vm6, %v1756_v55, 0 }
 0xe66   :  { %v1806_v9 = vpop.permute.xlu1 %1805 }
 0xe67   :  { %v8076_v43 = vpop.eup %8075  ;;  %v1811_v17 = vsel %vm418_vm6, %v1806_v9, 0 }
 0xe68   :  { %v1645_v44 = vsel %vm515_vm10, %v8076_v43, 0.0 }
 0xe69   :  { %v8078_v45 = vpop.eup %8077  ;;  %1646 = vadd.xlane.f32.xlu0 %v1645_v44 }
 0xe6a   :  { %v1648_v46 = vsel %vm515_vm10, %v8078_v45, 0.0  ;;  %v1804_v20 = vpop.permute.xlu1 %1803 }
 0xe6d   :  { %1649 = vadd.xlane.f32.xlu0 %v1648_v46 }
 0xe83   :  { %1657 = vrot.lane.b32.xlu0 %v8464_v8, %s8241_s19 }
 0xe87   :  { %1753 = vrot.lane.b32.xlu0 %v8462_v7, %s8242_s24 }
 0xef6   :  { %v1647_v47 = vpop.xlane.xlu0 %1646 }
 0xef7   :  { %8079 = vrcp.f32 %v1647_v47 }
 0xefa   :  { %v1650_v48 = vpop.xlane.xlu0 %1649 }
 0xefb   :  { %8081 = vrcp.f32 %v1650_v48 }
 0xefe   :  { %v1658_v49 = vpop.permute.xlu0 %1657 }
 0xeff   :  { %v1663_v50 = vsel %vm543_vm7, %v1658_v49, 0 }
 0xf00   :  { %7473 = vmatpush3.bf16.msra.mxu1 %v1663_v50 }
 0xf01   :  { %v8080_v52 = vpop.eup %8079  ;;  %7484 = vmatprep.subr.bf16.mxu1 %v8235_v16 }
 0xf02   :  { %v1653_v0 = vmul.f32 %v8080_v52, %v8076_v43  ;;  %v1754_v18 = vpop.permute.xlu0 %1753 }
 0xf04   :  { %v1655_v1 = vpack.c.bf16 %v1653_v0, %v1653_v0 }
 0xf05   :  { %v8082_v4 = vpop.eup %8081 }
 0xf06   :  { %7475 = vmatmul.mubr.msk.bf16.vlgmr.msra.gmra.mrb[48].mxu1 %vm515_vm10, %v1655_v1  ;;  %v1654_v6 = vmul.f32 %v8082_v4, %v8078_v45 }
 0xf07   :  { %7486 = vmatprep.mubr.msk.bf16.mxu1 %vm8236_vm1, %v8235_v16 }
 0xf08   :  { %v1656_v15 = vpack.c.bf16 %v1654_v6, %v1654_v6 }
 0xf09   :  { %7485 = vmatpush3.bf16.xpose.msra.mxu1 %v1761_v10 }
 0xf0a   :  { %7481 = vmatmul.mubr.msk.bf16.vlgmr.msra.gmra.mrb[52].mxu0 %vm515_vm10, %v1656_v15  ;;  %7496 = vmatprep.subr.bf16.mxu1 %v8235_v16 }
 0xf0b   :  { %7491 = vmatpush3.bf16.xpose.msra.mxu0 %v1811_v17  ;;  %7492 = vmatprep.mubr.msk.bf16.mxu0 %vm8236_vm1, %v8235_v16 }
 0xf0c   :  { %7502 = vmatprep.subr.bf16.mxu0 %v8235_v16 }
 0xf10   :  { %7487 = vmatmul.mubr.msk.bf16.vlgmr.msra.gmra.mrb[52].mxu1 %vm418_vm6, %v1754_v18 }
 0xf11   :  { %7498 = vmatprep.mubr.msk.bf16.mxu1 %vm8236_vm1, %v8235_v16 }
 0xf12   :  { %7493 = vmatmul.mubr.msk.bf16.vlgmr.msra.gmra.mrb[56].mxu0 %vm418_vm6, %v1804_v20 }
 0xf13   :  { %7504 = vmatprep.mubr.msk.bf16.mxu0 %vm8236_vm1, %v8235_v16 }
 0xfd9   :  { %v8740_v21 = vpop.f32.mrb[48].mxu1 }
 0xfda   :  { %v7476_v22 = vpop.f32.mrb[49].mxu1 }
 0xfdb   :  { %v1702_v23 = vpop.f32.mrb[50].mxu1 }
 0xfdc   :  { %v7477_v25 = vpop.f32.mrb[51].mxu1 }
 0xfdd   :  { %v8742_v26 = vpop.f32.mrb[52].mxu0 }
 0xfde   :  { %v7833_v27 = vpack.i.bf16 %v8742_v26, %v8740_v21  ;;  %v7482_v28 = vpop.f32.mrb[53].mxu0 }
 0xfdf   :  { %v1750_v29 = vpop.f32.mrb[54].mxu0 }
 0xfe0   :  { %v7483_v30 = vpop.f32.mrb[55].mxu0 }
 0xfe3   :  { %v1797_v31 = vpop.f32.mrb[52].mxu1 }
 0xfe4   :  { %v1853_v32 = vmul.f32 0.5, %v1797_v31  ;;  %v7488_v33 = vpop.f32.mrb[53].mxu1 }
 0xfe5   :  { %v1800_v34 = vpop.f32.mrb[54].mxu1  ;;  %v1847_v35 = vpop.f32.mrb[56].mxu0 }
 0xfe6   :  { %v1854_v36 = vmul.f32 0.5, %v1847_v35  ;;  %v7489_v37 = vpop.f32.mrb[55].mxu1  ;;  %v7494_v38 = vpop.f32.mrb[57].mxu0  ;;  %v1855_v39 = vadd.f32 %v1853_v32, %v8487_v19 }
 0xfe7   :  { %v1850_v40 = vpop.f32.mrb[58].mxu0 }
 0xfe8   :  { %v7495_v41 = vpop.f32.mrb[59].mxu0  ;;  %v1857_v42 = vsel %vm515_vm10, %v1855_v39, -inf  ;;  %v1856_v43 = vadd.f32 %v1854_v36, %v8490_v24 }
 0xfe9   :  { %1858 = vmax.xlane.f32.xlu0 %v1857_v42 }
 0xfea   :  { %v1860_v44 = vsel %vm515_vm10, %v1856_v43, -inf }
 0xfeb   :  { %1861 = vmax.xlane.f32.xlu1 %v1860_v44 }
 0xffc   :  { %1929 = vrot.lane.b32.xlu1 %v8468_v12, %s8242_s24 }
0x1000   :  { %1979 = vrot.lane.b32.xlu1 %v8450_v56, %s8243_s30 }
0x1004   :  { %2029 = vrot.lane.b32.xlu1 %v8453_v61, %s8243_s30 }
0x1008   :  { %2027 = vrot.lane.b32.xlu1 %v8466_v11, %s8243_s30 }
0x1076   :  { %v1859_v45 = vpop.xlane.xlu0 %1858 }
0x1077   :  { %v1863_v46 = vsub.f32 %v1855_v39, %v1859_v45 }
0x1078   :  { %v1862_v47 = vpop.xlane.xlu1 %1861 }
0x1079   :  { %v1865_v48 = vmul.f32 1.442695, %v1863_v46  ;;  %v1864_v49 = vsub.f32 %v1856_v43, %v1862_v47 }
0x107b   :  { %8083 = vpow2.f32 %v1865_v48  ;;  %v1867_v50 = vmul.f32 1.442695, %v1864_v49 }
0x107c   :  { %v1930_v52 = vpop.permute.xlu1 %1929 }
0x107d   :  { %8085 = vpow2.f32 %v1867_v50  ;;  %v1935_v55 = vsel %vm543_vm7, %v1930_v52, 0 }
0x107e   :  { %7503 = vmatpush3.bf16.msra.mxu0 %v1935_v55 }
0x107f   :  { %7514 = vmatprep.subr.bf16.mxu0 %v8235_v16 }
0x1080   :  { %v1980_v15 = vpop.permute.xlu1 %1979 }
0x1084   :  { %v2030_v23 = vpop.permute.xlu1 %2029 }
0x1085   :  { %v8084_v56 = vpop.eup %8083  ;;  %v2035_v28 = vsel %vm418_vm6, %v2030_v23, 0 }
0x1086   :  { %v1869_v61 = vsel %vm515_vm10, %v8084_v56, 0.0 }
0x1087   :  { %v8086_v0 = vpop.eup %8085  ;;  %1870 = vadd.xlane.f32.xlu0 %v1869_v61 }
0x1088   :  { %v1872_v11 = vsel %vm515_vm10, %v8086_v0, 0.0  ;;  %v2028_v30 = vpop.permute.xlu1 %2027 }
0x108b   :  { %1873 = vadd.xlane.f32.xlu0 %v1872_v11 }
0x10a1   :  { %1881 = vrot.lane.b32.xlu0 %v8464_v8, %s8242_s24 }
0x10a5   :  { %1977 = vrot.lane.b32.xlu0 %v8462_v7, %s8243_s30  ;;  %v1985_v7 = vsel %vm418_vm6, %v1980_v15, 0 }
0x1114   :  { %v1871_v1 = vpop.xlane.xlu0 %1870 }
0x1115   :  { %8087 = vrcp.f32 %v1871_v1 }
0x1118   :  { %v1874_v4 = vpop.xlane.xlu0 %1873 }
0x1119   :  { %8089 = vrcp.f32 %v1874_v4  ;;  %v7890_v4 = vld [vmem:[%s8342_s27 + $0x8] sm:$0xff]  }
0x111c   :  { %v1882_v6 = vpop.permute.xlu0 %1881 }
0x111d   :  { %v1887_v9 = vsel %vm543_vm7, %v1882_v6, 0 }
0x111e   :  { %7497 = vmatpush3.bf16.msra.mxu1 %v1887_v9 }
0x111f   :  { %v8088_v10 = vpop.eup %8087  ;;  %7508 = vmatprep.subr.bf16.mxu1 %v8235_v16 }
0x1120   :  { %v1877_v17 = vmul.f32 %v8088_v10, %v8084_v56  ;;  %v1978_v29 = vpop.permute.xlu0 %1977 }
0x1122   :  { %v1879_v18 = vpack.c.bf16 %v1877_v17, %v1877_v17 }
0x1123   :  { %v8090_v20 = vpop.eup %8089 }
0x1124   :  { %7499 = vmatmul.mubr.msk.bf16.vlgmr.msra.gmra.mrb[56].mxu1 %vm515_vm10, %v1879_v18  ;;  %v1878_v22 = vmul.f32 %v8090_v20, %v8086_v0 }
0x1125   :  { %7510 = vmatprep.mubr.msk.bf16.mxu1 %vm8236_vm1, %v8235_v16 }
0x1126   :  { %v1880_v25 = vpack.c.bf16 %v1878_v22, %v1878_v22 }
0x1127   :  { %7509 = vmatpush3.bf16.xpose.msra.mxu1 %v1985_v7 }
0x1128   :  { %7505 = vmatmul.mubr.msk.bf16.vlgmr.msra.gmra.mrb[60].mxu0 %vm515_vm10, %v1880_v25  ;;  %7520 = vmatprep.subr.bf16.mxu1 %v8235_v16 }
0x1129   :  { %7515 = vmatpush3.bf16.xpose.msra.mxu0 %v2035_v28  ;;  %7516 = vmatprep.mubr.msk.bf16.mxu0 %vm8236_vm1, %v8235_v16 }
0x112a   :  { %7526 = vmatprep.subr.bf16.mxu0 %v8235_v16 }
0x112e   :  { %7511 = vmatmul.mubr.msk.bf16.vlgmr.msra.gmra.mrb[60].mxu1 %vm418_vm6, %v1978_v29 }
0x112f   :  { %7522 = vmatprep.mubr.msk.bf16.mxu1 %vm8236_vm1, %v8235_v16 }
0x1130   :  { %7517 = vmatmul.mubr.msk.bf16.vlgmr.msra.gmra.mrb[64].mxu0 %vm418_vm6, %v2028_v30 }
0x1131   :  { %7528 = vmatprep.mubr.msk.bf16.mxu0 %vm8236_vm1, %v8235_v16 }
0x11f7   :  { %v1923_v31 = vpop.f32.mrb[56].mxu1 }
0x11f8   :  { %v7500_v32 = vpop.f32.mrb[57].mxu1 }
0x11f9   :  { %v1926_v33 = vpop.f32.mrb[58].mxu1 }
0x11fa   :  { %v7501_v34 = vpop.f32.mrb[59].mxu1 }
0x11fb   :  { %v1971_v35 = vpop.f32.mrb[60].mxu0 }
0x11fc   :  { %v7838_v36 = vpack.i.bf16 %v1971_v35, %v1923_v31  ;;  %v7506_v37 = vpop.f32.mrb[61].mxu0 }
0x11fd   :  { %v1974_v38 = vpop.f32.mrb[62].mxu0 }
0x11fe   :  { %v7507_v39 = vpop.f32.mrb[63].mxu0 }
0x1201   :  { %v2021_v40 = vpop.f32.mrb[60].mxu1 }
0x1202   :  { %v2077_v41 = vmul.f32 0.5, %v2021_v40  ;;  %v7512_v42 = vpop.f32.mrb[61].mxu1 }
0x1203   :  { %v2024_v43 = vpop.f32.mrb[62].mxu1  ;;  %v2071_v44 = vpop.f32.mrb[64].mxu0 }
0x1204   :  { %v2078_v45 = vmul.f32 0.5, %v2071_v44  ;;  %v7513_v46 = vpop.f32.mrb[63].mxu1  ;;  %v7518_v47 = vpop.f32.mrb[65].mxu0  ;;  %v2079_v48 = vadd.f32 %v2077_v41, %v8487_v19 }
0x1205   :  { %v2074_v49 = vpop.f32.mrb[66].mxu0 }
0x1206   :  { %v7519_v50 = vpop.f32.mrb[67].mxu0  ;;  %v2081_v52 = vsel %vm515_vm10, %v2079_v48, -inf  ;;  %v2080_v55 = vadd.f32 %v2078_v45, %v8490_v24 }
0x1207   :  { %2082 = vmax.xlane.f32.xlu0 %v2081_v52 }
0x1208   :  { %v2084_v56 = vsel %vm515_vm10, %v2080_v55, -inf }
0x1209   :  { %2085 = vmax.xlane.f32.xlu1 %v2084_v56 }
0x121a   :  { %2153 = vrot.lane.b32.xlu1 %v8468_v12, %s8243_s30 }
0x121e   :  { %7814 = vrot.lane.b32.xlu1 %v7813_v60, %s8244_s6 }
0x1222   :  { %7819 = vrot.lane.b32.xlu1 %v7818_v62, %s8245_s12 }
0x1226   :  { %7829 = vrot.lane.b32.xlu1 %v7828_v14, %s8246_s20 }
0x122a   :  { %7839 = vrot.lane.b32.xlu1 %v7838_v36, %s8247_s15 }
0x1294   :  { %v2083_v12 = vpop.xlane.xlu0 %2082 }
0x1295   :  { %v2087_v19 = vsub.f32 %v2079_v48, %v2083_v12 }
0x1296   :  { %v2086_v24 = vpop.xlane.xlu1 %2085 }
0x1297   :  { %v2089_v53 = vmul.f32 1.442695, %v2087_v19  ;;  %v2088_v58 = vsub.f32 %v2080_v55, %v2086_v24 }
0x1299   :  { %8091 = vpow2.f32 %v2089_v53  ;;  %v2091_v60 = vmul.f32 1.442695, %v2088_v58 }
0x129a   :  { %v2154_v61 = vpop.permute.xlu1 %2153 }
0x129b   :  { %8093 = vpow2.f32 %v2091_v60  ;;  %v2159_v51 = vsel %vm543_vm7, %v2154_v61, 0  ;;  %v6745_v61 = vld [vmem:[%s8347_s4] ss:$0 sm:$0xff]  ;;  %s9611_s4 = sld [smem:[#allocation12_spill]] }
0x129c   :  { %7527 = vmatpush3.bf16.msra.mxu0 %v2159_v51 }
0x129d   :  { %7540 = vmatprep.subr.bf16.mxu0 %v8235_v16 }
0x129e   :  { %v7815_v7 = vpop.permute.xlu1 %7814 }
0x129f   :  { %v7817_v29 = vunpack.i.h.bf16 %v7815_v7  ;;  %v7816_v30 = vunpack.i.l.bf16 %v7815_v7 }
0x12a1   :  { %v2258_v37 = vsel %vm418_vm6, %v8524_v63, %v7817_v29  ;;  %v2257_v38 = vsel %vm418_vm6, %v8522_v59, %v7816_v30 }
0x12a2   :  { %v7820_v25 = vpop.permute.xlu1 %7819 }
0x12a3   :  { %v8092_v57 = vpop.eup %8091  ;;  %v7822_v31 = vunpack.i.h.bf16 %v7820_v25  ;;  %v7821_v32 = vunpack.i.l.bf16 %v7820_v25  ;;  %v7894_v25 = vld [vmem:[%s8352_s14 + $0x8] sm:$0xff]  }
0x12a4   :  { %v2093_v62 = vsel %vm515_vm10, %v8092_v57, 0.0 }
0x12a5   :  { %v8094_v5 = vpop.eup %8093  ;;  %2094 = vadd.xlane.f32.xlu0 %v2093_v62  ;;  %v2259_v39 = vsel %vm515_vm10, %v2257_v38, %v7821_v32  ;;  %v2260_v40 = vsel %vm515_vm10, %v2258_v37, %v7822_v31 }
0x12a6   :  { %v2096_v13 = vsel %vm515_vm10, %v8094_v5, 0.0  ;;  %v7830_v33 = vpop.permute.xlu1 %7829 }
0x12a7   :  { %v7832_v45 = vunpack.i.h.bf16 %v7830_v33  ;;  %v7831_v46 = vunpack.i.l.bf16 %v7830_v33 }
0x12a9   :  { %2097 = vadd.xlane.f32.xlu0 %v2096_v13  ;;  %v8179_v13 = vld [vmem:[%s8262_s5] sm:$0xff] }
0x12aa   :  { %v7840_v47 = vpop.permute.xlu1 %7839 }
0x12ab   :  { %v7842_v50 = vunpack.i.h.bf16 %v7840_v47  ;;  %v7841_v52 = vunpack.i.l.bf16 %v7840_v47 }
0x12bf   :  { %2105 = vrot.lane.b32.xlu0 %v8464_v8, %s8243_s30 }
0x12c3   :  { %7824 = vrot.lane.b32.xlu0 %v7823_v3, %s8248_s16 }
0x12c7   :  { %7834 = vrot.lane.b32.xlu0 %v7833_v27, %s8249_s18  ;;  %v7889_v27 = vld [vmem:[%s8342_s27] sm:$0xff]   ;;  %s9607_s27 = sld [smem:[#allocation5_spill]] }
0x12cd   :  { %v131_v7 = vld [vmem:[%s9607_s27 + $0x8] sm:$0xff] }
0x1332   :  { %v2095_v14 = vpop.xlane.xlu0 %2094 }
0x1333   :  { %8095 = vrcp.f32 %v2095_v14 }
0x1336   :  { %v2098_v0 = vpop.xlane.xlu0 %2097 }
0x1337   :  { %8097 = vrcp.f32 %v2098_v0 }
0x133a   :  { %v2106_v11 = vpop.permute.xlu0 %2105 }
0x133b   :  { %v2111_v8 = vsel %vm543_vm7, %v2106_v11, 0 }
0x133c   :  { %7521 = vmatpush3.bf16.msra.mxu1 %v2111_v8  ;;  %v8180_v8 = vld [vmem:[%s8262_s5 + $0x8] sm:$0xff]  ;;  %s9608_s5 = sld [smem:[#allocation7_spill]] }
0x133d   :  { %v8096_v1 = vpop.eup %8095  ;;  %7532 = vmatprep.subr.bf16.mxu1 %v8235_v16 }
0x133e   :  { %v2101_v54 = vmul.f32 %v8096_v1, %v8092_v57  ;;  %v7825_v28 = vpop.permute.xlu0 %7824 }
0x133f   :  { %v7827_v34 = vunpack.i.h.bf16 %v7825_v28  ;;  %v7826_v35 = vunpack.i.l.bf16 %v7825_v28 }
0x1340   :  { %v2103_v2 = vpack.c.bf16 %v2101_v54, %v2101_v54 }
0x1341   :  { %v8098_v3 = vpop.eup %8097  ;;  %v2262_v41 = vsel %vm2261_vm11, %v2259_v39, %v7826_v35  ;;  %v2263_v42 = vsel %vm2261_vm11, %v2260_v40, %v7827_v34 }
0x1342   :  { %7523 = vmatmul.mubr.msk.bf16.vlgmr.msra.gmra.mrb[64].mxu1 %vm515_vm10, %v2103_v2  ;;  %v2102_v21 = vmul.f32 %v8098_v3, %v8094_v5  ;;  %v7835_v36 = vpop.permute.xlu0 %7834  ;;  %v2265_v63 = vsel %vm2264_vm12, %v2262_v41, %v7831_v46  ;;  %v2266_v48 = vsel %vm2264_vm12, %v2263_v42, %v7832_v45  ;;  %v6749_v45 = vld [vmem:[%s9608_s5] ss:$0 sm:$0xff] }
0x1343   :  { %7536 = vmatprep.mubr.msk.bf16.mxu1 %vm8236_vm1, %v8235_v16  ;;  %7533 = vmatpush3.bf16.msra.mxu1 %v7889_v27  ;;  %v7837_v43 = vunpack.i.h.bf16 %v7835_v36  ;;  %v7836_v44 = vunpack.i.l.bf16 %v7835_v36 }
0x1344   :  { %v2104_v26 = vpack.c.bf16 %v2102_v21, %v2102_v21  ;;  %7534 = vmatprep.subr.bf16.mxu1 %v8235_v16 }
0x1345   :  { %v2268_v59 = vsel %vm2267_vm13, %v2265_v63, %v7836_v44  ;;  %v2269_v49 = vsel %vm2267_vm13, %v2266_v48, %v7837_v43 }
0x1346   :  { %7529 = vmatmul.mubr.msk.bf16.vlgmr.msra.gmra.mrb[68].mxu0 %vm515_vm10, %v2104_v26  ;;  %v2271_v19 = vsel %vm2270_vm14, %v2268_v59, %v7841_v52  ;;  %v2272_v24 = vsel %vm2270_vm14, %v2269_v49, %v7842_v50 }
0x1347   :  { %7544 = vmatprep.mubr.msk.bf16.mxu0 %vm8236_vm1, %v8235_v16  ;;  %7535 = vmatpush3.bf16.msra.mxu1 %v7890_v4 }
0x1348   :  { %7548 = vmatprep.subr.bf16.mxu1 %v8235_v16 }
0x1415   :  { %v2147_v6 = vpop.f32.mrb[64].mxu1 }
0x1416   :  { %v7524_v9 = vpop.f32.mrb[65].mxu1 }
0x1417   :  { %v2150_v10 = vpop.f32.mrb[66].mxu1 }
0x1418   :  { %v7525_v15 = vpop.f32.mrb[67].mxu1 }
0x1419   :  { %v2195_v17 = vpop.f32.mrb[68].mxu0 }
0x141a   :  { %v7843_v18 = vpack.i.bf16 %v2195_v17, %v2147_v6  ;;  %v7530_v20 = vpop.f32.mrb[69].mxu0 }
0x141b   :  { %v2198_v22 = vpop.f32.mrb[70].mxu0  ;;  %v7893_v20 = vld [vmem:[%s8352_s14] sm:$0xff]   ;;  %s9610_s14 = sld [smem:[#allocation13_spill]] }
0x141c   :  { %7844 = vrot.lane.b32.xlu0 %v7843_v18, %s8250_s22  ;;  %v7531_v23 = vpop.f32.mrb[71].mxu0  ;;  %v7891_v18 = vld [vmem:[%s8362_s17] sm:$0xff]   ;;  %v7892_v22 = vld [vmem:[%s8362_s17 + $0x8] sm:$0xff]   ;;  %7541 = vmatpush3.bf16.msra.mxu0 %v7893_v20  ;;  %s9609_s17 = sld [smem:[#allocation8_spill]] }
0x141d   :  { %v130_v23 = vld [vmem:[%s9607_s27] sm:$0xff]  ;;  %7542 = vmatprep.subr.bf16.mxu0 %v8235_v16 }
0x141e   :  { %v2472_v28 = vpack.c.bf16 %v131_v7, %v130_v23 }
0x1420   :  { %7543 = vmatpush3.bf16.msra.mxu0 %v7894_v25 }
0x1421   :  { %7556 = vmatprep.subr.bf16.mxu0 %v8235_v16 }
0x1422   :  { %v6750_v49 = vld [vmem:[%s9609_s17] ss:$0 sm:$0xff] }
0x148e   :  { %v7845_v55 = vpop.permute.xlu0 %7844 }
0x148f   :  { %v7847_v56 = vunpack.i.h.bf16 %v7845_v55  ;;  %v7846_v12 = vunpack.i.l.bf16 %v7845_v55 }
0x1491   :  { %v2275_v53 = vsel %vm2273_vm15, %v2272_v24, %v7847_v56  ;;  %v2274_v58 = vsel %vm2273_vm15, %v2271_v19, %v7846_v12  ;;  %v7895_v56 = vld [vmem:[%s9610_s14] sm:$0xff]   ;;  %v7896_v19 = vld [vmem:[%s9610_s14 + $0x8] sm:$0xff]  }
0x1492   :  { %v2276_v60 = vpack.c.bf16 %v2275_v53, %v2274_v58  ;;  %v6755_v24 = vld [vmem:[%s9611_s4] ss:$0 sm:$0xff] }
0x1494   :  { %7537 = vmatmul.mubr.msk.bf16.vlgmr.msra.gmra.mrb[68].mxu1 %vm144_vm0, %v2276_v60 }
0x1495   :  { %7552 = vmatprep.mubr.msk.bf16.mxu1 %vm8236_vm1, %v8235_v16  ;;  %7549 = vmatpush3.bf16.msra.mxu1 %v7891_v18 }
0x1496   :  { %7550 = vmatprep.subr.bf16.mxu1 %v8235_v16 }
0x1499   :  { %7551 = vmatpush3.bf16.msra.mxu1 %v7892_v22 }
0x149a   :  { %7564 = vmatprep.subr.bf16.mxu1 %v8235_v16 }
0x149c   :  { %7553 = vmatmul.mubr.msk.bf16.vlgmr.msra.gmra.mrb[72].mxu1 %vm144_vm0, %v2472_v28 }
0x149d   :  { %7566 = vmatprep.mubr.msk.bf16.mxu1 %vm8236_vm1, %v8235_v16 }
0x1567   :  { %v2337_v51 = vpop.f32.mrb[68].mxu1 }
0x1568   :  { %v2338_v57 = vadd.f32 %v6745_v61, %v2337_v51  ;;  %v7538_v62 = vpop.f32.mrb[69].mxu1 }
0x1569   :  { %v2340_v5 = vpop.f32.mrb[70].mxu1 }
0x156a   :  { %v8851_v14 = vadd.f32 %v8179_v13, %v2338_v57  ;;  %v2341_v0 = vadd.f32 %v6745_v61, %v2340_v5  ;;  %v7539_v11 = vpop.f32.mrb[71].mxu1 }
0x156b   :  { %v6751_v11 = vld [vmem:[%s9612_s23] ss:$0 sm:$0xff] }
0x156c   :  { %v8854_v1 = vadd.f32 %v8180_v8, %v2341_v0  ;;  %v2346_v54 = vsel %vm144_vm0, %v8851_v14, 0.0 }
0x156d   :  { %2347 = vadd.xlane.f32.xlu1 %v2346_v54 }
0x156e   :  { %v2349_v2 = vsel %vm144_vm0, %v8854_v1, 0.0 }
0x156f   :  { %2350 = vadd.xlane.f32.xlu0 %v2349_v2  ;;  %v2533_v53 = vpop.f32.mrb[72].mxu1 }
0x1570   :  { %v2534_v58 = vadd.f32 %v6755_v24, %v2533_v53  ;;  %v7554_v60 = vpop.f32.mrb[73].mxu1 }
0x1571   :  { %v2536_v61 = vpop.f32.mrb[74].mxu1 }
0x1572   :  { %v8890_v51 = vpack.c.bf16 %v2534_v58, %v2534_v58  ;;  %v2537_v57 = vadd.f32 %v6755_v24, %v2536_v61  ;;  %v7555_v62 = vpop.f32.mrb[75].mxu1 }
0x1574   :  { %v8892_v5 = vpack.c.bf16 %v2537_v57, %v2537_v57  ;;  %v2626_v13 = vsel %vm418_vm6, %v8890_v51, 0 }
0x1575   :  { %7565 = vmatpush3.bf16.xpose.msra.mxu1 %v2626_v13 }
0x1576   :  { %v2672_v0 = vsel %vm418_vm6, %v8892_v5, 0  ;;  %7576 = vmatprep.subr.bf16.mxu1 %v8235_v16 }
0x15fa   :  { %v2348_v3 = vpop.xlane.xlu1 %2347 }
0x15fb   :  { %v2352_v21 = vmul.f32 0.03125, %v2348_v3 }
0x15fc   :  { %v2351_v26 = vpop.xlane.xlu0 %2350 }
0x15fd   :  { %v2354_v27 = vsub.f32 %v8851_v14, %v2352_v21  ;;  %v2353_v4 = vmul.f32 0.03125, %v2351_v26 }
0x15ff   :  { %v2355_v6 = vsub.f32 %v8854_v1, %v2353_v4  ;;  %v2356_v9 = vmul.f32 %v2354_v27, %v2354_v27 }
0x1601   :  { %v2358_v10 = vsel %vm144_vm0, %v2356_v9, 0.0  ;;  %v2357_v15 = vmul.f32 %v2355_v6, %v2355_v6 }
0x1602   :  { %2359 = vadd.xlane.f32.xlu0 %v2358_v10 }
0x1603   :  { %v2361_v17 = vsel %vm144_vm0, %v2357_v15, 0.0 }
0x1606   :  { %2362 = vadd.xlane.f32.xlu0 %v2361_v17  ;;  %v6759_v17 = vld [vmem:[%s9613_s26] ss:$0 sm:$0xff] }
0x168f   :  { %v2360_v29 = vpop.xlane.xlu0 %2359 }
0x1690   :  { %v2364_v30 = vmul.f32 0.032258064, %v2360_v29  ;;  %v138_v29 = vld [vmem:[%s9614_s28] sm:$0x1] }
0x1691   :  { %vm140_vm8 = vcmp.eq.f32.partialorder %v138_v29, 0.0 }
0x1692   :  { %8099 = vrsqrt.f32 %v2364_v30  ;;  %vm2368_vm2 = vcmp.eq.f32.partialorder %v2364_v30, inf  ;;  %v2371_v35 = vand.u32 2147483648, %v2364_v30  ;;  %vm2370_vm3 = vcmp.eq.f32.partialorder %v2364_v30, 0.0 }
0x1693   :  { %v2363_v31 = vpop.xlane.xlu0 %2362 }
0x1694   :  { %v2365_v32 = vmul.f32 0.032258064, %v2363_v31  ;;  %v139_v31 = vld [vmem:[%s9614_s28 + $0x1] sm:$0x1] }
0x1695   :  { %vm141_vm9 = vcmp.eq.f32.partialorder %v139_v31, 0.0 }
0x1696   :  { %8101 = vrsqrt.f32 %v2365_v32  ;;  %vm2375_vm4 = vcmp.eq.f32.partialorder %v2365_v32, inf  ;;  %v2378_v41 = vand.u32 2147483648, %v2365_v32  ;;  %vm2377_vm5 = vcmp.eq.f32.partialorder %v2365_v32, 0.0 }
0x169c   :  { %v8100_v33 = vpop.eup %8099 }
0x169d   :  { %v2367_v34 = vmul.f32 %v8100_v33, %v2364_v30  ;;  %v142_v33 = vsel %vm140_vm8, -1e+09, %v8235_v16 }
0x169f   :  { %v2369_v36 = vsel %vm2368_vm2, %v2364_v30, %v2367_v34  ;;  %v143_v34 = vsel %vm141_vm9, -1e+09, %v8235_v16 }
0x16a0   :  { %v8102_v37 = vpop.eup %8101  ;;  %v2372_v38 = vsel %vm2370_vm3, %v2371_v35, %v2369_v36 }
0x16a1   :  { %v2380_v39 = vadd.f32 1e-06, %v2372_v38  ;;  %v2374_v40 = vmul.f32 %v8102_v37, %v2365_v32 }
0x16a3   :  { %8103 = vrcp.f32 %v2380_v39  ;;  %v2376_v42 = vsel %vm2375_vm4, %v2365_v32, %v2374_v40 }
0x16a4   :  { %v2379_v43 = vsel %vm2377_vm5, %v2378_v41, %v2376_v42 }
0x16a5   :  { %v2381_v44 = vadd.f32 1e-06, %v2379_v43 }
0x16a7   :  { %8105 = vrcp.f32 %v2381_v44 }
0x16ad   :  { %v8104_v46 = vpop.eup %8103 }
0x16ae   :  { %v2391_v47 = vmul.f32 %v8104_v46, %v6749_v45 }
0x16b0   :  { %v2393_v59 = vmul.f32 %v2391_v47, %v2354_v27 }
0x16b1   :  { %v8106_v63 = vpop.eup %8105 }
0x16b2   :  { %v2392_v48 = vmul.f32 %v8106_v63, %v6749_v45  ;;  %v2402_v52 = vadd.f32 %v6750_v49, %v2393_v59 }
0x16b4   :  { %v2394_v50 = vmul.f32 %v2392_v48, %v2355_v6 }
0x16b6   :  { %v2403_v55 = vadd.f32 %v6750_v49, %v2394_v50 }
0x16b8   :  { %v2404_v12 = vpack.c.bf16 %v2403_v55, %v2402_v52 }
0x16ba   :  { %7545 = vmatmul.mubr.msk.bf16.vlgmr.msra.gmra.mrb[72].mxu0 %vm144_vm0, %v2404_v12 }
0x16bb   :  { %7557 = vmatpush3.bf16.msra.mxu0 %v7895_v56  ;;  %7560 = vmatprep.mubr.msk.bf16.mxu0 %vm8236_vm1, %v8235_v16 }
0x16bc   :  { %7558 = vmatprep.subr.bf16.mxu0 %v8235_v16 }
0x16bf   :  { %7559 = vmatpush3.bf16.msra.mxu0 %v7896_v19 }
0x16c0   :  { %7570 = vmatprep.subr.bf16.mxu0 %v8235_v16 }
0x16c2   :  { %7561 = vmatmul.mubr.msk.bf16.vlgmr.msra.gmra.mrb[76].mxu0 %vm144_vm0, %v2472_v28  ;;  %v2718_v28 = vlaneseq }
0x16c3   :  { %7572 = vmatprep.mubr.msk.bf16.mxu0 %vm8236_vm1, %v8235_v16 }
0x16c4   :  { %v8925_v30 = vshrl.u32 %v2718_v28, 7 }
0x16c6   :  { %v8929_v32 = vsub.s32 0, %v8925_v30 }
0x16c8   :  { %7571 = vmatpush3.bf16.xpose.msra.mxu0 %v2672_v0  ;;  %v8934_v35 = vrot.slane %v142_v33, %v8929_v32  ;;  %v8937_v39 = vrot.slane %v143_v34, %v8929_v32 }
0x16c9   :  { %7582 = vmatprep.subr.bf16.mxu0 %v8235_v16 }
0x178d   :  { %v2465_v8 = vpop.f32.mrb[72].mxu0 }
0x178e   :  { %v2466_v54 = vadd.f32 %v6751_v11, %v2465_v8  ;;  %v7546_v2 = vpop.f32.mrb[73].mxu0 }
0x178f   :  { %v2468_v3 = vpop.f32.mrb[74].mxu0 }
0x1790   :  { %v8901_v21 = vpack.c.bf16 %v2466_v54, %v2466_v54  ;;  %v2469_v26 = vadd.f32 %v6751_v11, %v2468_v3  ;;  %v7547_v27 = vpop.f32.mrb[75].mxu0 }
0x1792   :  { %v8903_v4 = vpack.c.bf16 %v2469_v26, %v2469_v26  ;;  %7567 = vmatmul.mubr.msk.bf16.vlgmr.msra.gmra.mrb[76].mxu1 %vm418_vm6, %v8901_v21 }
0x1793   :  { %7578 = vmatprep.mubr.msk.bf16.mxu1 %vm8236_vm1, %v8235_v16 }
0x1794   :  { %7573 = vmatmul.mubr.msk.bf16.vlgmr.msra.gmra.mrb[80].mxu0 %vm418_vm6, %v8903_v4 }
0x1795   :  { %v2597_v6 = vpop.f32.mrb[76].mxu0  ;;  %7584 = vmatprep.mubr.msk.bf16.mxu0 %vm8236_vm1, %v8235_v16 }
0x1796   :  { %v7562_v9 = vpop.f32.mrb[77].mxu0  ;;  %v2598_v18 = vadd.f32 %v6759_v17, %v2597_v6 }
0x1797   :  { %v2600_v10 = vpop.f32.mrb[78].mxu0 }
0x1798   :  { %v7563_v15 = vpop.f32.mrb[79].mxu0  ;;  %v2601_v20 = vadd.f32 %v6759_v17, %v2600_v10  ;;  %v8914_v22 = vpack.c.bf16 %v2598_v18, %v2598_v18 }
0x179a   :  { %v8916_v23 = vpack.c.bf16 %v2601_v20, %v2601_v20  ;;  %v2758_v7 = vsel %vm543_vm7, %v8914_v22, 0 }
0x179b   :  { %7577 = vmatpush3.bf16.msra.mxu1 %v2758_v7 }
0x179c   :  { %v2804_v25 = vsel %vm543_vm7, %v8916_v23, 0  ;;  %7588 = vmatprep.subr.bf16.mxu1 %v8235_v16 }
0x179d   :  { %7583 = vmatpush3.bf16.msra.mxu0 %v2804_v25 }
0x179e   :  { %7594 = vmatprep.subr.bf16.mxu0 %v8235_v16 }
0x1865   :  { %v2662_v36 = vpop.f32.mrb[76].mxu1 }
0x1866   :  { %v2714_v37 = vmul.f32 0.5, %v2662_v36  ;;  %v7568_v38 = vpop.f32.mrb[77].mxu1 }
0x1867   :  { %v2665_v40 = vpop.f32.mrb[78].mxu1  ;;  %v2708_v41 = vpop.f32.mrb[80].mxu0 }
0x1868   :  { %v2715_v42 = vmul.f32 0.5, %v2708_v41  ;;  %v7569_v43 = vpop.f32.mrb[79].mxu1  ;;  %v7574_v44 = vpop.f32.mrb[81].mxu0  ;;  %v2728_v45 = vadd.f32 %v8934_v35, %v2714_v37 }
0x1869   :  { %v2711_v46 = vpop.f32.mrb[82].mxu0 }
0x186a   :  { %v7575_v47 = vpop.f32.mrb[83].mxu0  ;;  %v2730_v63 = vsel %vm515_vm10, %v2728_v45, -inf  ;;  %v2729_v48 = vadd.f32 %v8937_v39, %v2715_v42 }
0x186b   :  { %2731 = vmax.xlane.f32.xlu1 %v2730_v63 }
0x186c   :  { %v2733_v59 = vsel %vm515_vm10, %v2729_v48, -inf }
0x186d   :  { %2734 = vmax.xlane.f32.xlu0 %v2733_v59 }
0x187c   :  { %2848 = vrot.lane.b32.xlu1 %v8890_v51, %s8237_s0 }
0x18f8   :  { %v2732_v49 = vpop.xlane.xlu1 %2731 }
0x18f9   :  { %v2736_v50 = vsub.f32 %v2728_v45, %v2732_v49 }
0x18fa   :  { %v2735_v52 = vpop.xlane.xlu0 %2734 }
0x18fb   :  { %v2738_v55 = vmul.f32 1.442695, %v2736_v50  ;;  %v2737_v56 = vsub.f32 %v2729_v48, %v2735_v52 }
0x18fc   :  { %v2849_v60 = vpop.permute.xlu1 %2848 }
0x18fd   :  { %8107 = vpow2.f32 %v2738_v55  ;;  %v2740_v12 = vmul.f32 1.442695, %v2737_v56  ;;  %v2854_v2 = vsel %vm418_vm6, %v2849_v60, 0 }
0x18ff   :  { %8109 = vpow2.f32 %v2740_v12 }
0x1907   :  { %v8108_v19 = vpop.eup %8107 }
0x1908   :  { %v2742_v24 = vsel %vm515_vm10, %v8108_v19, 0.0 }
0x1909   :  { %v8110_v53 = vpop.eup %8109  ;;  %2743 = vadd.xlane.f32.xlu1 %v2742_v24 }
0x190a   :  { %v2745_v58 = vsel %vm515_vm10, %v8110_v53, 0.0 }
0x190b   :  { %2746 = vadd.xlane.f32.xlu0 %v2745_v58 }
0x191a   :  { %2846 = vrot.lane.b32.xlu1 %v8901_v21, %s8237_s0 }
0x191e   :  { %2896 = vrot.lane.b32.xlu1 %v8903_v4, %s8237_s0 }
0x1921   :  { %2898 = vrot.lane.b32.xlu0 %v8892_v5, %s8237_s0 }
0x1996   :  { %v2744_v61 = vpop.xlane.xlu1 %2743 }
0x1997   :  { %8111 = vrcp.f32 %v2744_v61 }
0x1998   :  { %v2747_v57 = vpop.xlane.xlu0 %2746 }
0x1999   :  { %8113 = vrcp.f32 %v2747_v57 }
0x199a   :  { %v2847_v27 = vpop.permute.xlu1 %2846 }
0x199c   :  { %v2899_v54 = vpop.permute.xlu0 %2898 }
0x199d   :  { %v2904_v26 = vsel %vm418_vm6, %v2899_v54, 0 }
0x199e   :  { %v2897_v6 = vpop.permute.xlu1 %2896 }
0x19a1   :  { %v8112_v62 = vpop.eup %8111 }
0x19a2   :  { %v2750_v13 = vmul.f32 %v8112_v62, %v8108_v19 }
0x19a3   :  { %v8114_v0 = vpop.eup %8113 }
0x19a4   :  { %v2751_v11 = vmul.f32 %v8114_v0, %v8110_v53  ;;  %v2752_v8 = vpack.c.bf16 %v2750_v13, %v2750_v13 }
0x19a6   :  { %7579 = vmatmul.mubr.msk.bf16.vlgmr.msra.gmra.mrb[80].mxu1 %vm515_vm10, %v2752_v8  ;;  %v2753_v3 = vpack.c.bf16 %v2751_v11, %v2751_v11 }
0x19a7   :  { %7589 = vmatpush3.bf16.xpose.msra.mxu1 %v2854_v2  ;;  %7590 = vmatprep.mubr.msk.bf16.mxu1 %vm8236_vm1, %v8235_v16 }
0x19a8   :  { %7585 = vmatmul.mubr.msk.bf16.vlgmr.msra.gmra.mrb[84].mxu0 %vm515_vm10, %v2753_v3  ;;  %7600 = vmatprep.subr.bf16.mxu1 %v8235_v16 }
0x19a9   :  { %7595 = vmatpush3.bf16.xpose.msra.mxu0 %v2904_v26  ;;  %7596 = vmatprep.mubr.msk.bf16.mxu0 %vm8236_vm1, %v8235_v16 }
0x19aa   :  { %7606 = vmatprep.subr.bf16.mxu0 %v8235_v16 }
0x19ae   :  { %7591 = vmatmul.mubr.msk.bf16.vlgmr.msra.gmra.mrb[84].mxu1 %vm418_vm6, %v2847_v27 }
0x19af   :  { %7602 = vmatprep.mubr.msk.bf16.mxu1 %vm8236_vm1, %v8235_v16 }
0x19b0   :  { %7597 = vmatmul.mubr.msk.bf16.vlgmr.msra.gmra.mrb[88].mxu0 %vm418_vm6, %v2897_v6 }
0x19b1   :  { %7608 = vmatprep.mubr.msk.bf16.mxu0 %vm8236_vm1, %v8235_v16 }
0x1a79   :  { %v8969_v9 = vpop.f32.mrb[80].mxu1 }
0x1a7a   :  { %v7580_v10 = vpop.f32.mrb[81].mxu1 }
0x1a7b   :  { %v2797_v15 = vpop.f32.mrb[82].mxu1  ;;  %v8971_v17 = vpop.f32.mrb[84].mxu0 }
0x1a7c   :  { %v7581_v18 = vpop.f32.mrb[83].mxu1  ;;  %v7586_v20 = vpop.f32.mrb[85].mxu0 }
0x1a7d   :  { %v2843_v7 = vpop.f32.mrb[86].mxu0 }
0x1a7e   :  { %v7587_v25 = vpop.f32.mrb[87].mxu0 }
0x1a81   :  { %v2890_v28 = vpop.f32.mrb[84].mxu1 }
0x1a82   :  { %v2946_v29 = vmul.f32 0.5, %v2890_v28  ;;  %v7592_v31 = vpop.f32.mrb[85].mxu1 }
0x1a83   :  { %v2893_v33 = vpop.f32.mrb[86].mxu1  ;;  %v2940_v34 = vpop.f32.mrb[88].mxu0 }
0x1a84   :  { %v2948_v36 = vadd.f32 %v2946_v29, %v8934_v35  ;;  %v2947_v37 = vmul.f32 0.5, %v2940_v34  ;;  %v7593_v38 = vpop.f32.mrb[87].mxu1  ;;  %v7598_v40 = vpop.f32.mrb[89].mxu0 }
0x1a85   :  { %v2943_v41 = vpop.f32.mrb[90].mxu0 }
0x1a86   :  { %v7599_v42 = vpop.f32.mrb[91].mxu0  ;;  %v2950_v43 = vsel %vm515_vm10, %v2948_v36, -inf  ;;  %v2949_v44 = vadd.f32 %v2947_v37, %v8937_v39 }
0x1a87   :  { %2951 = vmax.xlane.f32.xlu1 %v2950_v43 }
0x1a88   :  { %v2953_v45 = vsel %vm515_vm10, %v2949_v44, -inf }
0x1a89   :  { %2954 = vmax.xlane.f32.xlu0 %v2953_v45 }
0x1a98   :  { %2974 = vrot.lane.b32.xlu1 %v8914_v22, %s8237_s0 }
0x1a9c   :  { %3072 = vrot.lane.b32.xlu1 %v8890_v51, %s8238_s13 }
0x1aa0   :  { %3122 = vrot.lane.b32.xlu1 %v8892_v5, %s8238_s13 }
0x1aa4   :  { %3070 = vrot.lane.b32.xlu1 %v8901_v21, %s8238_s13 }
0x1b14   :  { %v2952_v46 = vpop.xlane.xlu1 %2951 }
0x1b15   :  { %v2956_v47 = vsub.f32 %v2948_v36, %v2952_v46 }
0x1b16   :  { %v2955_v63 = vpop.xlane.xlu0 %2954 }
0x1b17   :  { %v2958_v48 = vmul.f32 1.442695, %v2956_v47  ;;  %v2957_v59 = vsub.f32 %v2949_v44, %v2955_v63 }
0x1b18   :  { %v2975_v49 = vpop.permute.xlu1 %2974 }
0x1b19   :  { %8115 = vpow2.f32 %v2958_v48  ;;  %v2960_v50 = vmul.f32 1.442695, %v2957_v59  ;;  %v2980_v52 = vsel %vm543_vm7, %v2975_v49, 0 }
0x1b1a   :  { %7601 = vmatpush3.bf16.msra.mxu1 %v2980_v52 }
0x1b1b   :  { %8117 = vpow2.f32 %v2960_v50  ;;  %7612 = vmatprep.subr.bf16.mxu1 %v8235_v16 }
0x1b1c   :  { %v3073_v57 = vpop.permute.xlu1 %3072 }
0x1b1d   :  { %v3078_v11 = vsel %vm418_vm6, %v3073_v57, 0 }
0x1b20   :  { %v3123_v54 = vpop.permute.xlu1 %3122 }
0x1b21   :  { %v3128_v3 = vsel %vm418_vm6, %v3123_v54, 0 }
0x1b23   :  { %v8116_v55 = vpop.eup %8115 }
0x1b24   :  { %v2962_v56 = vsel %vm515_vm10, %v8116_v55, 0.0  ;;  %v3071_v26 = vpop.permute.xlu1 %3070 }
0x1b25   :  { %v8118_v12 = vpop.eup %8117  ;;  %2963 = vadd.xlane.f32.xlu0 %v2962_v56 }
0x1b26   :  { %v2965_v19 = vsel %vm515_vm10, %v8118_v12, 0.0 }
0x1b29   :  { %2966 = vadd.xlane.f32.xlu0 %v2965_v19 }
0x1b3f   :  { %3022 = vrot.lane.b32.xlu0 %v8916_v23, %s8237_s0 }
0x1b43   :  { %3120 = vrot.lane.b32.xlu0 %v8903_v4, %s8238_s13 }
0x1bb2   :  { %v2964_v24 = vpop.xlane.xlu0 %2963 }
0x1bb3   :  { %8119 = vrcp.f32 %v2964_v24 }
0x1bb6   :  { %v2967_v53 = vpop.xlane.xlu0 %2966 }
0x1bb7   :  { %8121 = vrcp.f32 %v2967_v53 }
0x1bba   :  { %v3023_v58 = vpop.permute.xlu0 %3022 }
0x1bbb   :  { %v3028_v60 = vsel %vm543_vm7, %v3023_v58, 0 }
0x1bbc   :  { %7607 = vmatpush3.bf16.msra.mxu0 %v3028_v60 }
0x1bbd   :  { %v8120_v61 = vpop.eup %8119  ;;  %7618 = vmatprep.subr.bf16.mxu0 %v8235_v16 }
0x1bbe   :  { %v2970_v62 = vmul.f32 %v8120_v61, %v8116_v55  ;;  %v3121_v27 = vpop.permute.xlu0 %3120 }
0x1bc0   :  { %v2972_v13 = vpack.c.bf16 %v2970_v62, %v2970_v62 }
0x1bc1   :  { %v8122_v0 = vpop.eup %8121 }
0x1bc2   :  { %v2971_v8 = vmul.f32 %v8122_v0, %v8118_v12  ;;  %7603 = vmatmul.mubr.msk.bf16.vlgmr.msra.gmra.mrb[88].mxu1 %vm515_vm10, %v2972_v13 }
0x1bc3   :  { %7613 = vmatpush3.bf16.xpose.msra.mxu1 %v3078_v11  ;;  %7614 = vmatprep.mubr.msk.bf16.mxu1 %vm8236_vm1, %v8235_v16 }
0x1bc4   :  { %v2973_v2 = vpack.c.bf16 %v2971_v8, %v2971_v8  ;;  %7624 = vmatprep.subr.bf16.mxu1 %v8235_v16 }
0x1bc6   :  { %7609 = vmatmul.mubr.msk.bf16.vlgmr.msra.gmra.mrb[92].mxu0 %vm515_vm10, %v2973_v2 }
0x1bc7   :  { %7619 = vmatpush3.bf16.xpose.msra.mxu0 %v3128_v3  ;;  %7620 = vmatprep.mubr.msk.bf16.mxu0 %vm8236_vm1, %v8235_v16 }
0x1bc8   :  { %7630 = vmatprep.subr.bf16.mxu0 %v8235_v16 }
0x1bca   :  { %7615 = vmatmul.mubr.msk.bf16.vlgmr.msra.gmra.mrb[92].mxu1 %vm418_vm6, %v3071_v26 }
0x1bcb   :  { %7626 = vmatprep.mubr.msk.bf16.mxu1 %vm8236_vm1, %v8235_v16 }
0x1bce   :  { %7621 = vmatmul.mubr.msk.bf16.vlgmr.msra.gmra.mrb[96].mxu0 %vm418_vm6, %v3121_v27 }
0x1bcf   :  { %7632 = vmatprep.mubr.msk.bf16.mxu0 %vm8236_vm1, %v8235_v16 }
0x1c95   :  { %v9011_v6 = vpop.f32.mrb[88].mxu1 }
0x1c96   :  { %v7604_v10 = vpop.f32.mrb[89].mxu1 }
0x1c97   :  { %v3019_v15 = vpop.f32.mrb[90].mxu1 }
0x1c98   :  { %v7605_v18 = vpop.f32.mrb[91].mxu1 }
0x1c99   :  { %v9013_v20 = vpop.f32.mrb[92].mxu0 }
0x1c9a   :  { %v7848_v7 = vpack.i.bf16 %v9013_v20, %v9011_v6  ;;  %v7610_v25 = vpop.f32.mrb[93].mxu0 }
0x1c9b   :  { %v3067_v28 = vpop.f32.mrb[94].mxu0 }
0x1c9c   :  { %v7611_v29 = vpop.f32.mrb[95].mxu0 }
0x1c9d   :  { %v3114_v31 = vpop.f32.mrb[92].mxu1 }
0x1c9e   :  { %v3170_v33 = vmul.f32 0.5, %v3114_v31  ;;  %v7616_v34 = vpop.f32.mrb[93].mxu1 }
0x1c9f   :  { %v3117_v36 = vpop.f32.mrb[94].mxu1 }
0x1ca0   :  { %v3172_v37 = vadd.f32 %v3170_v33, %v8934_v35  ;;  %v7617_v38 = vpop.f32.mrb[95].mxu1 }
0x1ca1   :  { %v3164_v40 = vpop.f32.mrb[96].mxu0 }
0x1ca2   :  { %v3171_v41 = vmul.f32 0.5, %v3164_v40  ;;  %v7622_v42 = vpop.f32.mrb[97].mxu0  ;;  %v3174_v43 = vsel %vm515_vm10, %v3172_v37, -inf }
0x1ca3   :  { %3175 = vmax.xlane.f32.xlu1 %v3174_v43  ;;  %v3167_v44 = vpop.f32.mrb[98].mxu0 }
0x1ca4   :  { %v3173_v45 = vadd.f32 %v3171_v41, %v8937_v39  ;;  %v7623_v46 = vpop.f32.mrb[99].mxu0 }
0x1ca6   :  { %v3177_v47 = vsel %vm515_vm10, %v3173_v45, -inf }
0x1ca7   :  { %3178 = vmax.xlane.f32.xlu0 %v3177_v47 }
0x1cb4   :  { %3198 = vrot.lane.b32.xlu1 %v8914_v22, %s8238_s13 }
0x1cb8   :  { %3296 = vrot.lane.b32.xlu1 %v8890_v51, %s8239_s21 }
0x1cbc   :  { %3346 = vrot.lane.b32.xlu1 %v8892_v5, %s8239_s21 }
0x1cc0   :  { %3294 = vrot.lane.b32.xlu1 %v8901_v21, %s8239_s21 }
0x1d30   :  { %v3176_v63 = vpop.xlane.xlu1 %3175 }
0x1d31   :  { %v3180_v48 = vsub.f32 %v3172_v37, %v3176_v63 }
0x1d33   :  { %v3182_v59 = vmul.f32 1.442695, %v3180_v48 }
0x1d34   :  { %v3199_v49 = vpop.permute.xlu1 %3198  ;;  %v3179_v50 = vpop.xlane.xlu0 %3178 }
0x1d35   :  { %8123 = vpow2.f32 %v3182_v59  ;;  %v3204_v52 = vsel %vm543_vm7, %v3199_v49, 0  ;;  %v3181_v55 = vsub.f32 %v3173_v45, %v3179_v50 }
0x1d36   :  { %7625 = vmatpush3.bf16.msra.mxu1 %v3204_v52 }
0x1d37   :  { %v3184_v56 = vmul.f32 1.442695, %v3181_v55  ;;  %7636 = vmatprep.subr.bf16.mxu1 %v8235_v16 }
0x1d38   :  { %v3297_v13 = vpop.permute.xlu1 %3296 }
0x1d39   :  { %8125 = vpow2.f32 %v3184_v56  ;;  %v3302_v54 = vsel %vm418_vm6, %v3297_v13, 0 }
0x1d3c   :  { %v3347_v3 = vpop.permute.xlu1 %3346 }
0x1d3d   :  { %v3352_v27 = vsel %vm418_vm6, %v3347_v3, 0 }
0x1d3f   :  { %v8124_v12 = vpop.eup %8123 }
0x1d40   :  { %v3186_v19 = vsel %vm515_vm10, %v8124_v12, 0.0  ;;  %v3295_v10 = vpop.permute.xlu1 %3294 }
0x1d41   :  { %3187 = vadd.xlane.f32.xlu0 %v3186_v19 }
0x1d43   :  { %v8126_v24 = vpop.eup %8125 }
0x1d44   :  { %v3189_v53 = vsel %vm515_vm10, %v8126_v24, 0.0 }
0x1d45   :  { %3190 = vadd.xlane.f32.xlu0 %v3189_v53 }
0x1d5b   :  { %3246 = vrot.lane.b32.xlu0 %v8916_v23, %s8238_s13 }
0x1d5f   :  { %3344 = vrot.lane.b32.xlu0 %v8903_v4, %s8239_s21 }
0x1dce   :  { %v3188_v58 = vpop.xlane.xlu0 %3187 }
0x1dcf   :  { %8127 = vrcp.f32 %v3188_v58 }
0x1dd2   :  { %v3191_v60 = vpop.xlane.xlu0 %3190 }
0x1dd3   :  { %8129 = vrcp.f32 %v3191_v60 }
0x1dd6   :  { %v3247_v61 = vpop.permute.xlu0 %3246 }
0x1dd7   :  { %v3252_v57 = vsel %vm543_vm7, %v3247_v61, 0 }
0x1dd8   :  { %7631 = vmatpush3.bf16.msra.mxu0 %v3252_v57 }
0x1dd9   :  { %v8128_v62 = vpop.eup %8127  ;;  %7642 = vmatprep.subr.bf16.mxu0 %v8235_v16 }
0x1dda   :  { %v3194_v0 = vmul.f32 %v8128_v62, %v8124_v12  ;;  %v3345_v15 = vpop.permute.xlu0 %3344 }
0x1ddc   :  { %v3196_v11 = vpack.c.bf16 %v3194_v0, %v3194_v0 }
0x1ddd   :  { %v8130_v8 = vpop.eup %8129 }
0x1dde   :  { %v3195_v2 = vmul.f32 %v8130_v8, %v8126_v24  ;;  %7627 = vmatmul.mubr.msk.bf16.vlgmr.msra.gmra.mrb[96].mxu1 %vm515_vm10, %v3196_v11 }
0x1ddf   :  { %7637 = vmatpush3.bf16.xpose.msra.mxu1 %v3302_v54  ;;  %7638 = vmatprep.mubr.msk.bf16.mxu1 %vm8236_vm1, %v8235_v16 }
0x1de0   :  { %v3197_v26 = vpack.c.bf16 %v3195_v2, %v3195_v2  ;;  %7648 = vmatprep.subr.bf16.mxu1 %v8235_v16 }
0x1de2   :  { %7633 = vmatmul.mubr.msk.bf16.vlgmr.msra.gmra.mrb[100].mxu0 %vm515_vm10, %v3197_v26 }
0x1de3   :  { %7643 = vmatpush3.bf16.xpose.msra.mxu0 %v3352_v27  ;;  %7644 = vmatprep.mubr.msk.bf16.mxu0 %vm8236_vm1, %v8235_v16 }
0x1de4   :  { %7654 = vmatprep.subr.bf16.mxu0 %v8235_v16 }
0x1de6   :  { %7639 = vmatmul.mubr.msk.bf16.vlgmr.msra.gmra.mrb[100].mxu1 %vm418_vm6, %v3295_v10 }
0x1de7   :  { %7650 = vmatprep.mubr.msk.bf16.mxu1 %vm8236_vm1, %v8235_v16 }
0x1dea   :  { %7645 = vmatmul.mubr.msk.bf16.vlgmr.msra.gmra.mrb[104].mxu0 %vm418_vm6, %v3345_v15 }
0x1deb   :  { %7656 = vmatprep.mubr.msk.bf16.mxu0 %vm8236_vm1, %v8235_v16 }
0x1eb1   :  { %v9055_v18 = vpop.f32.mrb[96].mxu1 }
0x1eb2   :  { %v7628_v25 = vpop.f32.mrb[97].mxu1 }
0x1eb3   :  { %v3243_v28 = vpop.f32.mrb[98].mxu1 }
0x1eb4   :  { %v7629_v29 = vpop.f32.mrb[99].mxu1 }
0x1eb5   :  { %v9057_v31 = vpop.f32.mrb[100].mxu0 }
0x1eb6   :  { %v7853_v33 = vpack.i.bf16 %v9057_v31, %v9055_v18  ;;  %v7634_v34 = vpop.f32.mrb[101].mxu0 }
0x1eb7   :  { %v3291_v36 = vpop.f32.mrb[102].mxu0 }
0x1eb8   :  { %v7635_v37 = vpop.f32.mrb[103].mxu0 }
0x1eb9   :  { %v3338_v38 = vpop.f32.mrb[100].mxu1 }
0x1eba   :  { %v3394_v40 = vmul.f32 0.5, %v3338_v38  ;;  %v7640_v41 = vpop.f32.mrb[101].mxu1 }
0x1ebb   :  { %v3341_v42 = vpop.f32.mrb[102].mxu1 }
0x1ebc   :  { %v3396_v43 = vadd.f32 %v3394_v40, %v8934_v35  ;;  %v7641_v44 = vpop.f32.mrb[103].mxu1 }
0x1ebd   :  { %v3388_v45 = vpop.f32.mrb[104].mxu0 }
0x1ebe   :  { %v3395_v46 = vmul.f32 0.5, %v3388_v45  ;;  %v7646_v47 = vpop.f32.mrb[105].mxu0  ;;  %v3398_v63 = vsel %vm515_vm10, %v3396_v43, -inf }
0x1ebf   :  { %3399 = vmax.xlane.f32.xlu1 %v3398_v63  ;;  %v3391_v48 = vpop.f32.mrb[106].mxu0 }
0x1ec0   :  { %v3397_v59 = vadd.f32 %v3395_v46, %v8937_v39  ;;  %v7647_v49 = vpop.f32.mrb[107].mxu0 }
0x1ec2   :  { %v3401_v50 = vsel %vm515_vm10, %v3397_v59, -inf }
0x1ec3   :  { %3402 = vmax.xlane.f32.xlu0 %v3401_v50 }
0x1ed0   :  { %3422 = vrot.lane.b32.xlu1 %v8914_v22, %s8239_s21 }
0x1ed4   :  { %3520 = vrot.lane.b32.xlu1 %v8890_v51, %s8240_s25 }
0x1ed8   :  { %3570 = vrot.lane.b32.xlu1 %v8892_v5, %s8240_s25 }
0x1edc   :  { %3518 = vrot.lane.b32.xlu1 %v8901_v21, %s8240_s25 }
0x1f4c   :  { %v3400_v52 = vpop.xlane.xlu1 %3399 }
0x1f4d   :  { %v3404_v55 = vsub.f32 %v3396_v43, %v3400_v52 }
0x1f4f   :  { %v3406_v56 = vmul.f32 1.442695, %v3404_v55 }
0x1f50   :  { %v3423_v12 = vpop.permute.xlu1 %3422  ;;  %v3403_v19 = vpop.xlane.xlu0 %3402 }
0x1f51   :  { %8131 = vpow2.f32 %v3406_v56  ;;  %v3428_v24 = vsel %vm543_vm7, %v3423_v12, 0  ;;  %v3405_v53 = vsub.f32 %v3397_v59, %v3403_v19 }
0x1f52   :  { %7649 = vmatpush3.bf16.msra.mxu1 %v3428_v24 }
0x1f53   :  { %v3408_v58 = vmul.f32 1.442695, %v3405_v53  ;;  %7660 = vmatprep.subr.bf16.mxu1 %v8235_v16 }
0x1f54   :  { %v3521_v2 = vpop.permute.xlu1 %3520 }
0x1f55   :  { %8133 = vpow2.f32 %v3408_v58  ;;  %v3526_v10 = vsel %vm418_vm6, %v3521_v2, 0 }
0x1f58   :  { %v3571_v25 = vpop.permute.xlu1 %3570 }
0x1f59   :  { %v3576_v29 = vsel %vm418_vm6, %v3571_v25, 0 }
0x1f5b   :  { %v8132_v60 = vpop.eup %8131 }
0x1f5c   :  { %v3410_v61 = vsel %vm515_vm10, %v8132_v60, 0.0  ;;  %v3519_v34 = vpop.permute.xlu1 %3518 }
0x1f5d   :  { %3411 = vadd.xlane.f32.xlu0 %v3410_v61 }
0x1f5f   :  { %v8134_v57 = vpop.eup %8133 }
0x1f60   :  { %v3413_v62 = vsel %vm515_vm10, %v8134_v57, 0.0 }
0x1f61   :  { %3414 = vadd.xlane.f32.xlu0 %v3413_v62 }
0x1f77   :  { %3470 = vrot.lane.b32.xlu0 %v8916_v23, %s8239_s21 }
0x1f7b   :  { %3568 = vrot.lane.b32.xlu0 %v8903_v4, %s8240_s25 }
0x1fea   :  { %v3412_v13 = vpop.xlane.xlu0 %3411 }
0x1feb   :  { %8135 = vrcp.f32 %v3412_v13 }
0x1fee   :  { %v3415_v0 = vpop.xlane.xlu0 %3414 }
0x1fef   :  { %8137 = vrcp.f32 %v3415_v0 }
0x1ff2   :  { %v3471_v11 = vpop.permute.xlu0 %3470 }
0x1ff3   :  { %v3476_v8 = vsel %vm543_vm7, %v3471_v11, 0 }
0x1ff4   :  { %7655 = vmatpush3.bf16.msra.mxu0 %v3476_v8 }
0x1ff5   :  { %v8136_v54 = vpop.eup %8135  ;;  %7666 = vmatprep.subr.bf16.mxu0 %v8235_v16 }
0x1ff6   :  { %v3418_v3 = vmul.f32 %v8136_v54, %v8132_v60  ;;  %v3569_v36 = vpop.permute.xlu0 %3568 }
0x1ff8   :  { %v3420_v26 = vpack.c.bf16 %v3418_v3, %v3418_v3 }
0x1ff9   :  { %v8138_v27 = vpop.eup %8137 }
0x1ffa   :  { %v3419_v15 = vmul.f32 %v8138_v27, %v8134_v57  ;;  %7651 = vmatmul.mubr.msk.bf16.vlgmr.msra.gmra.mrb[104].mxu1 %vm515_vm10, %v3420_v26 }
0x1ffb   :  { %7661 = vmatpush3.bf16.xpose.msra.mxu1 %v3526_v10  ;;  %7662 = vmatprep.mubr.msk.bf16.mxu1 %vm8236_vm1, %v8235_v16 }
0x1ffc   :  { %v3421_v28 = vpack.c.bf16 %v3419_v15, %v3419_v15  ;;  %7672 = vmatprep.subr.bf16.mxu1 %v8235_v16 }
0x1ffe   :  { %7657 = vmatmul.mubr.msk.bf16.vlgmr.msra.gmra.mrb[108].mxu0 %vm515_vm10, %v3421_v28 }
0x1fff   :  { %7667 = vmatpush3.bf16.xpose.msra.mxu0 %v3576_v29  ;;  %7668 = vmatprep.mubr.msk.bf16.mxu0 %vm8236_vm1, %v8235_v16 }
0x2000   :  { %7678 = vmatprep.subr.bf16.mxu0 %v8235_v16 }
0x2002   :  { %7663 = vmatmul.mubr.msk.bf16.vlgmr.msra.gmra.mrb[108].mxu1 %vm418_vm6, %v3519_v34 }
0x2003   :  { %7674 = vmatprep.mubr.msk.bf16.mxu1 %vm8236_vm1, %v8235_v16 }
0x2006   :  { %7669 = vmatmul.mubr.msk.bf16.vlgmr.msra.gmra.mrb[112].mxu0 %vm418_vm6, %v3569_v36 }
0x2007   :  { %7680 = vmatprep.mubr.msk.bf16.mxu0 %vm8236_vm1, %v8235_v16 }
0x20cd   :  { %v9099_v37 = vpop.f32.mrb[104].mxu1 }
0x20ce   :  { %v7652_v38 = vpop.f32.mrb[105].mxu1 }
0x20cf   :  { %v3467_v40 = vpop.f32.mrb[106].mxu1 }
0x20d0   :  { %v7653_v41 = vpop.f32.mrb[107].mxu1 }
0x20d1   :  { %v9101_v42 = vpop.f32.mrb[108].mxu0 }
0x20d2   :  { %v7858_v43 = vpack.i.bf16 %v9101_v42, %v9099_v37  ;;  %v7658_v44 = vpop.f32.mrb[109].mxu0 }
0x20d3   :  { %v3515_v45 = vpop.f32.mrb[110].mxu0 }
0x20d4   :  { %v7659_v46 = vpop.f32.mrb[111].mxu0 }
0x20d5   :  { %v3562_v47 = vpop.f32.mrb[108].mxu1 }
0x20d6   :  { %v3618_v63 = vmul.f32 0.5, %v3562_v47  ;;  %v7664_v48 = vpop.f32.mrb[109].mxu1 }
0x20d7   :  { %v3565_v59 = vpop.f32.mrb[110].mxu1 }
0x20d8   :  { %v3620_v49 = vadd.f32 %v3618_v63, %v8934_v35  ;;  %v7665_v50 = vpop.f32.mrb[111].mxu1 }
0x20d9   :  { %v3612_v52 = vpop.f32.mrb[112].mxu0 }
0x20da   :  { %v3619_v55 = vmul.f32 0.5, %v3612_v52  ;;  %v7670_v56 = vpop.f32.mrb[113].mxu0  ;;  %v3622_v12 = vsel %vm515_vm10, %v3620_v49, -inf }
0x20db   :  { %3623 = vmax.xlane.f32.xlu1 %v3622_v12  ;;  %v3615_v19 = vpop.f32.mrb[114].mxu0 }
0x20dc   :  { %v3621_v24 = vadd.f32 %v3619_v55, %v8937_v39  ;;  %v7671_v53 = vpop.f32.mrb[115].mxu0 }
0x20de   :  { %v3625_v58 = vsel %vm515_vm10, %v3621_v24, -inf }
0x20df   :  { %3626 = vmax.xlane.f32.xlu0 %v3625_v58 }
0x20ec   :  { %3646 = vrot.lane.b32.xlu1 %v8914_v22, %s8240_s25 }
0x20f0   :  { %3744 = vrot.lane.b32.xlu1 %v8890_v51, %s8241_s19 }
0x20f4   :  { %3794 = vrot.lane.b32.xlu1 %v8892_v5, %s8241_s19 }
0x20f8   :  { %3742 = vrot.lane.b32.xlu1 %v8901_v21, %s8241_s19 }
0x2168   :  { %v3624_v60 = vpop.xlane.xlu1 %3623 }
0x2169   :  { %v3628_v61 = vsub.f32 %v3620_v49, %v3624_v60 }
0x216b   :  { %v3630_v57 = vmul.f32 1.442695, %v3628_v61 }
0x216c   :  { %v3647_v62 = vpop.permute.xlu1 %3646  ;;  %v3627_v13 = vpop.xlane.xlu0 %3626 }
0x216d   :  { %8139 = vpow2.f32 %v3630_v57  ;;  %v3652_v0 = vsel %vm543_vm7, %v3647_v62, 0  ;;  %v3629_v11 = vsub.f32 %v3621_v24, %v3627_v13 }
0x216e   :  { %7673 = vmatpush3.bf16.msra.mxu1 %v3652_v0 }
0x216f   :  { %v3632_v8 = vmul.f32 1.442695, %v3629_v11  ;;  %7684 = vmatprep.subr.bf16.mxu1 %v8235_v16 }
0x2170   :  { %v3745_v29 = vpop.permute.xlu1 %3744 }
0x2171   :  { %8141 = vpow2.f32 %v3632_v8  ;;  %v3750_v40 = vsel %vm418_vm6, %v3745_v29, 0 }
0x2174   :  { %v3795_v44 = vpop.permute.xlu1 %3794 }
0x2175   :  { %v3800_v46 = vsel %vm418_vm6, %v3795_v44, 0 }
0x2177   :  { %v8140_v54 = vpop.eup %8139 }
0x2178   :  { %v3634_v2 = vsel %vm515_vm10, %v8140_v54, 0.0  ;;  %v3743_v47 = vpop.permute.xlu1 %3742 }
0x2179   :  { %3635 = vadd.xlane.f32.xlu0 %v3634_v2 }
0x217b   :  { %v8142_v3 = vpop.eup %8141 }
0x217c   :  { %v3637_v26 = vsel %vm515_vm10, %v8142_v3, 0.0 }
0x217d   :  { %3638 = vadd.xlane.f32.xlu0 %v3637_v26 }
0x2193   :  { %3694 = vrot.lane.b32.xlu0 %v8916_v23, %s8240_s25 }
0x2197   :  { %3792 = vrot.lane.b32.xlu0 %v8903_v4, %s8241_s19 }
0x2206   :  { %v3636_v27 = vpop.xlane.xlu0 %3635 }
0x2207   :  { %8143 = vrcp.f32 %v3636_v27 }
0x220a   :  { %v3639_v10 = vpop.xlane.xlu0 %3638 }
0x220b   :  { %8145 = vrcp.f32 %v3639_v10 }
0x220e   :  { %v3695_v15 = vpop.permute.xlu0 %3694 }
0x220f   :  { %v3700_v25 = vsel %vm543_vm7, %v3695_v15, 0 }
0x2210   :  { %7679 = vmatpush3.bf16.msra.mxu0 %v3700_v25 }
0x2211   :  { %v8144_v28 = vpop.eup %8143  ;;  %7690 = vmatprep.subr.bf16.mxu0 %v8235_v16 }
0x2212   :  { %v3642_v34 = vmul.f32 %v8144_v28, %v8140_v54  ;;  %v3793_v63 = vpop.permute.xlu0 %3792 }
0x2214   :  { %v3644_v36 = vpack.c.bf16 %v3642_v34, %v3642_v34 }
0x2215   :  { %v8146_v38 = vpop.eup %8145 }
0x2216   :  { %v3643_v41 = vmul.f32 %v8146_v38, %v8142_v3  ;;  %7675 = vmatmul.mubr.msk.bf16.vlgmr.msra.gmra.mrb[112].mxu1 %vm515_vm10, %v3644_v36 }
0x2217   :  { %7685 = vmatpush3.bf16.xpose.msra.mxu1 %v3750_v40  ;;  %7686 = vmatprep.mubr.msk.bf16.mxu1 %vm8236_vm1, %v8235_v16 }
0x2218   :  { %v3645_v45 = vpack.c.bf16 %v3643_v41, %v3643_v41  ;;  %7696 = vmatprep.subr.bf16.mxu1 %v8235_v16 }
0x221a   :  { %7681 = vmatmul.mubr.msk.bf16.vlgmr.msra.gmra.mrb[116].mxu0 %vm515_vm10, %v3645_v45 }
0x221b   :  { %7691 = vmatpush3.bf16.xpose.msra.mxu0 %v3800_v46  ;;  %7692 = vmatprep.mubr.msk.bf16.mxu0 %vm8236_vm1, %v8235_v16 }
0x221c   :  { %7702 = vmatprep.subr.bf16.mxu0 %v8235_v16 }
0x221e   :  { %7687 = vmatmul.mubr.msk.bf16.vlgmr.msra.gmra.mrb[116].mxu1 %vm418_vm6, %v3743_v47 }
0x221f   :  { %7698 = vmatprep.mubr.msk.bf16.mxu1 %vm8236_vm1, %v8235_v16 }
0x2222   :  { %7693 = vmatmul.mubr.msk.bf16.vlgmr.msra.gmra.mrb[120].mxu0 %vm418_vm6, %v3793_v63 }
0x2223   :  { %7704 = vmatprep.mubr.msk.bf16.mxu0 %vm8236_vm1, %v8235_v16 }
0x22e9   :  { %v9143_v48 = vpop.f32.mrb[112].mxu1 }
0x22ea   :  { %v7676_v59 = vpop.f32.mrb[113].mxu1 }
0x22eb   :  { %v3691_v49 = vpop.f32.mrb[114].mxu1 }
0x22ec   :  { %v7677_v50 = vpop.f32.mrb[115].mxu1 }
0x22ed   :  { %v9145_v52 = vpop.f32.mrb[116].mxu0 }
0x22ee   :  { %v7863_v55 = vpack.i.bf16 %v9145_v52, %v9143_v48  ;;  %v7682_v56 = vpop.f32.mrb[117].mxu0  ;;  %v7897_v52 = vld [vmem:[%s9615_s1] sm:$0xff]  }
0x22ef   :  { %v3739_v12 = vpop.f32.mrb[118].mxu0 }
0x22f0   :  { %v7683_v19 = vpop.f32.mrb[119].mxu0 }
0x22f1   :  { %v3786_v24 = vpop.f32.mrb[116].mxu1 }
0x22f2   :  { %v3842_v53 = vmul.f32 0.5, %v3786_v24  ;;  %v7688_v58 = vpop.f32.mrb[117].mxu1 }
0x22f3   :  { %v3789_v60 = vpop.f32.mrb[118].mxu1 }
0x22f4   :  { %v3844_v61 = vadd.f32 %v3842_v53, %v8934_v35  ;;  %v7689_v57 = vpop.f32.mrb[119].mxu1 }
0x22f5   :  { %v3836_v62 = vpop.f32.mrb[120].mxu0 }
0x22f6   :  { %v3843_v13 = vmul.f32 0.5, %v3836_v62  ;;  %v7694_v0 = vpop.f32.mrb[121].mxu0  ;;  %v3846_v11 = vsel %vm515_vm10, %v3844_v61, -inf }
0x22f7   :  { %3847 = vmax.xlane.f32.xlu1 %v3846_v11  ;;  %v3839_v8 = vpop.f32.mrb[122].mxu0 }
0x22f8   :  { %v3845_v54 = vadd.f32 %v3843_v13, %v8937_v39  ;;  %v7695_v2 = vpop.f32.mrb[123].mxu0 }
0x22fa   :  { %v3849_v3 = vsel %vm515_vm10, %v3845_v54, -inf }
0x22fb   :  { %3850 = vmax.xlane.f32.xlu0 %v3849_v3 }
0x2308   :  { %3870 = vrot.lane.b32.xlu1 %v8914_v22, %s8241_s19 }
0x230c   :  { %3968 = vrot.lane.b32.xlu1 %v8890_v51, %s8242_s24 }
0x2310   :  { %4018 = vrot.lane.b32.xlu1 %v8892_v5, %s8242_s24 }
0x2314   :  { %3966 = vrot.lane.b32.xlu1 %v8901_v21, %s8242_s24 }
0x2384   :  { %v3848_v26 = vpop.xlane.xlu1 %3847 }
0x2385   :  { %v3852_v27 = vsub.f32 %v3844_v61, %v3848_v26 }
0x2387   :  { %v3854_v10 = vmul.f32 1.442695, %v3852_v27 }
0x2388   :  { %v3871_v15 = vpop.permute.xlu1 %3870  ;;  %v3851_v25 = vpop.xlane.xlu0 %3850 }
0x2389   :  { %8147 = vpow2.f32 %v3854_v10  ;;  %v3876_v28 = vsel %vm543_vm7, %v3871_v15, 0  ;;  %v3853_v29 = vsub.f32 %v3845_v54, %v3851_v25 }
0x238a   :  { %7697 = vmatpush3.bf16.msra.mxu1 %v3876_v28 }
0x238b   :  { %v3856_v34 = vmul.f32 1.442695, %v3853_v29  ;;  %7708 = vmatprep.subr.bf16.mxu1 %v8235_v16 }
0x238c   :  { %v3969_v59 = vpop.permute.xlu1 %3968 }
0x238d   :  { %8149 = vpow2.f32 %v3856_v34  ;;  %v3974_v12 = vsel %vm418_vm6, %v3969_v59, 0 }
0x2390   :  { %v4019_v24 = vpop.permute.xlu1 %4018 }
0x2391   :  { %v4024_v58 = vsel %vm418_vm6, %v4019_v24, 0 }
0x2393   :  { %v8148_v36 = vpop.eup %8147 }
0x2394   :  { %v3858_v38 = vsel %vm515_vm10, %v8148_v36, 0.0  ;;  %v3967_v60 = vpop.permute.xlu1 %3966 }
0x2395   :  { %3859 = vadd.xlane.f32.xlu0 %v3858_v38 }
0x2397   :  { %v8150_v40 = vpop.eup %8149 }
0x2398   :  { %v3861_v41 = vsel %vm515_vm10, %v8150_v40, 0.0 }
0x2399   :  { %3862 = vadd.xlane.f32.xlu0 %v3861_v41 }
0x23af   :  { %3918 = vrot.lane.b32.xlu0 %v8916_v23, %s8241_s19 }
0x23b3   :  { %4016 = vrot.lane.b32.xlu0 %v8903_v4, %s8242_s24 }
0x2422   :  { %v3860_v44 = vpop.xlane.xlu0 %3859 }
0x2423   :  { %8151 = vrcp.f32 %v3860_v44 }
0x2426   :  { %v3863_v45 = vpop.xlane.xlu0 %3862 }
0x2427   :  { %8153 = vrcp.f32 %v3863_v45 }
0x242a   :  { %v3919_v46 = vpop.permute.xlu0 %3918 }
0x242b   :  { %v3924_v47 = vsel %vm543_vm7, %v3919_v46, 0 }
0x242c   :  { %7703 = vmatpush3.bf16.msra.mxu0 %v3924_v47 }
0x242d   :  { %v8152_v63 = vpop.eup %8151  ;;  %7714 = vmatprep.subr.bf16.mxu0 %v8235_v16 }
0x242e   :  { %v3866_v49 = vmul.f32 %v8152_v63, %v8148_v36  ;;  %v4017_v61 = vpop.permute.xlu0 %4016 }
0x2430   :  { %v3868_v50 = vpack.c.bf16 %v3866_v49, %v3866_v49 }
0x2431   :  { %v8154_v56 = vpop.eup %8153 }
0x2432   :  { %v3867_v19 = vmul.f32 %v8154_v56, %v8150_v40  ;;  %7699 = vmatmul.mubr.msk.bf16.vlgmr.msra.gmra.mrb[120].mxu1 %vm515_vm10, %v3868_v50 }
0x2433   :  { %7709 = vmatpush3.bf16.xpose.msra.mxu1 %v3974_v12  ;;  %7710 = vmatprep.mubr.msk.bf16.mxu1 %vm8236_vm1, %v8235_v16 }
0x2434   :  { %v3869_v53 = vpack.c.bf16 %v3867_v19, %v3867_v19  ;;  %7720 = vmatprep.subr.bf16.mxu1 %v8235_v16 }
0x2436   :  { %7705 = vmatmul.mubr.msk.bf16.vlgmr.msra.gmra.mrb[124].mxu0 %vm515_vm10, %v3869_v53 }
0x2437   :  { %7715 = vmatpush3.bf16.xpose.msra.mxu0 %v4024_v58  ;;  %7716 = vmatprep.mubr.msk.bf16.mxu0 %vm8236_vm1, %v8235_v16 }
0x2438   :  { %7726 = vmatprep.subr.bf16.mxu0 %v8235_v16 }
0x243a   :  { %7711 = vmatmul.mubr.msk.bf16.vlgmr.msra.gmra.mrb[124].mxu1 %vm418_vm6, %v3967_v60 }
0x243b   :  { %7722 = vmatprep.mubr.msk.bf16.mxu1 %vm8236_vm1, %v8235_v16 }
0x243e   :  { %7717 = vmatmul.mubr.msk.bf16.vlgmr.msra.gmra.mrb[128].mxu0 %vm418_vm6, %v4017_v61 }
0x243f   :  { %7728 = vmatprep.mubr.msk.bf16.mxu0 %vm8236_vm1, %v8235_v16 }
0x2505   :  { %v9187_v57 = vpop.f32.mrb[120].mxu1 }
0x2506   :  { %v7700_v62 = vpop.f32.mrb[121].mxu1 }
0x2507   :  { %v3915_v13 = vpop.f32.mrb[122].mxu1 }
0x2508   :  { %v7701_v0 = vpop.f32.mrb[123].mxu1 }
0x2509   :  { %v9189_v11 = vpop.f32.mrb[124].mxu0 }
0x250a   :  { %v7868_v8 = vpack.i.bf16 %v9189_v11, %v9187_v57  ;;  %v7706_v54 = vpop.f32.mrb[125].mxu0 }
0x250b   :  { %v3963_v2 = vpop.f32.mrb[126].mxu0 }
0x250c   :  { %v7707_v3 = vpop.f32.mrb[127].mxu0 }
0x250d   :  { %v4010_v26 = vpop.f32.mrb[124].mxu1 }
0x250e   :  { %v4066_v27 = vmul.f32 0.5, %v4010_v26  ;;  %v7712_v10 = vpop.f32.mrb[125].mxu1 }
0x250f   :  { %v4013_v15 = vpop.f32.mrb[126].mxu1 }
0x2510   :  { %v4068_v25 = vadd.f32 %v4066_v27, %v8934_v35  ;;  %v7713_v28 = vpop.f32.mrb[127].mxu1 }
0x2511   :  { %v4060_v29 = vpop.f32.mrb[128].mxu0 }
0x2512   :  { %v4067_v34 = vmul.f32 0.5, %v4060_v29  ;;  %v7718_v36 = vpop.f32.mrb[129].mxu0  ;;  %v4070_v38 = vsel %vm515_vm10, %v4068_v25, -inf }
0x2513   :  { %4071 = vmax.xlane.f32.xlu1 %v4070_v38  ;;  %v4063_v40 = vpop.f32.mrb[130].mxu0 }
0x2514   :  { %v4069_v41 = vadd.f32 %v4067_v34, %v8937_v39  ;;  %v7719_v44 = vpop.f32.mrb[131].mxu0 }
0x2516   :  { %v4073_v45 = vsel %vm515_vm10, %v4069_v41, -inf }
0x2517   :  { %4074 = vmax.xlane.f32.xlu0 %v4073_v45 }
0x2524   :  { %4094 = vrot.lane.b32.xlu1 %v8914_v22, %s8242_s24 }
0x2528   :  { %4192 = vrot.lane.b32.xlu1 %v8890_v51, %s8243_s30 }
0x252c   :  { %4242 = vrot.lane.b32.xlu1 %v8892_v5, %s8243_s30 }
0x2530   :  { %4190 = vrot.lane.b32.xlu1 %v8901_v21, %s8243_s30 }
0x25a0   :  { %v4072_v46 = vpop.xlane.xlu1 %4071 }
0x25a1   :  { %v4076_v47 = vsub.f32 %v4068_v25, %v4072_v46 }
0x25a3   :  { %v4078_v63 = vmul.f32 1.442695, %v4076_v47 }
0x25a4   :  { %v4095_v59 = vpop.permute.xlu1 %4094  ;;  %v4075_v49 = vpop.xlane.xlu0 %4074 }
0x25a5   :  { %8155 = vpow2.f32 %v4078_v63  ;;  %v4100_v50 = vsel %vm543_vm7, %v4095_v59, 0  ;;  %v4077_v56 = vsub.f32 %v4069_v41, %v4075_v49 }
0x25a6   :  { %7721 = vmatpush3.bf16.msra.mxu1 %v4100_v50 }
0x25a7   :  { %v4080_v12 = vmul.f32 1.442695, %v4077_v56  ;;  %7732 = vmatprep.subr.bf16.mxu1 %v8235_v16 }
0x25a8   :  { %v4193_v62 = vpop.permute.xlu1 %4192 }
0x25a9   :  { %8157 = vpow2.f32 %v4080_v12  ;;  %v4198_v2 = vsel %vm418_vm6, %v4193_v62, 0 }
0x25af   :  { %v8156_v51 = vpop.eup %8155 }
0x25b0   :  { %v4082_v5 = vsel %vm515_vm10, %v8156_v51, 0.0 }
0x25b1   :  { %4083 = vadd.xlane.f32.xlu0 %v4082_v5 }
0x25b3   :  { %v8158_v19 = vpop.eup %8157 }
0x25b4   :  { %v4085_v21 = vsel %vm515_vm10, %v8158_v19, 0.0 }
0x25b5   :  { %4086 = vadd.xlane.f32.xlu0 %v4085_v21 }
0x25cb   :  { %4142 = vrot.lane.b32.xlu0 %v8916_v23, %s8242_s24 }
0x25cf   :  { %4240 = vrot.lane.b32.xlu0 %v8903_v4, %s8243_s30  ;;  %v4243_v4 = vpop.permute.xlu1 %4242 }
0x25d0   :  { %v4248_v27 = vsel %vm418_vm6, %v4243_v4, 0 }
0x25d3   :  { %v4191_v10 = vpop.permute.xlu1 %4190 }
0x263e   :  { %v4084_v24 = vpop.xlane.xlu0 %4083 }
0x263f   :  { %8159 = vrcp.f32 %v4084_v24 }
0x2642   :  { %v4087_v53 = vpop.xlane.xlu0 %4086 }
0x2643   :  { %8161 = vrcp.f32 %v4087_v53 }
0x2646   :  { %v4143_v58 = vpop.permute.xlu0 %4142 }
0x2647   :  { %v4148_v60 = vsel %vm543_vm7, %v4143_v58, 0 }
0x2648   :  { %7727 = vmatpush3.bf16.msra.mxu0 %v4148_v60 }
0x2649   :  { %v8160_v61 = vpop.eup %8159  ;;  %7738 = vmatprep.subr.bf16.mxu0 %v8235_v16 }
0x264a   :  { %v4090_v13 = vmul.f32 %v8160_v61, %v8156_v51  ;;  %v4241_v15 = vpop.permute.xlu0 %4240 }
0x264c   :  { %v4092_v0 = vpack.c.bf16 %v4090_v13, %v4090_v13 }
0x264d   :  { %v8162_v54 = vpop.eup %8161 }
0x264e   :  { %v4091_v3 = vmul.f32 %v8162_v54, %v8158_v19  ;;  %7723 = vmatmul.mubr.msk.bf16.vlgmr.msra.gmra.mrb[128].mxu1 %vm515_vm10, %v4092_v0 }
0x264f   :  { %7733 = vmatpush3.bf16.xpose.msra.mxu1 %v4198_v2  ;;  %7734 = vmatprep.mubr.msk.bf16.mxu1 %vm8236_vm1, %v8235_v16 }
0x2650   :  { %v4093_v26 = vpack.c.bf16 %v4091_v3, %v4091_v3  ;;  %7744 = vmatprep.subr.bf16.mxu1 %v8235_v16 }
0x2652   :  { %7729 = vmatmul.mubr.msk.bf16.vlgmr.msra.gmra.mrb[132].mxu0 %vm515_vm10, %v4093_v26 }
0x2653   :  { %7739 = vmatpush3.bf16.xpose.msra.mxu0 %v4248_v27  ;;  %7740 = vmatprep.mubr.msk.bf16.mxu0 %vm8236_vm1, %v8235_v16 }
0x2654   :  { %7750 = vmatprep.subr.bf16.mxu0 %v8235_v16 }
0x2656   :  { %7735 = vmatmul.mubr.msk.bf16.vlgmr.msra.gmra.mrb[132].mxu1 %vm418_vm6, %v4191_v10 }
0x2657   :  { %7746 = vmatprep.mubr.msk.bf16.mxu1 %vm8236_vm1, %v8235_v16 }
0x265a   :  { %7741 = vmatmul.mubr.msk.bf16.vlgmr.msra.gmra.mrb[136].mxu0 %vm418_vm6, %v4241_v15 }
0x265b   :  { %7752 = vmatprep.mubr.msk.bf16.mxu0 %vm8236_vm1, %v8235_v16 }
0x2721   :  { %v4136_v25 = vpop.f32.mrb[128].mxu1 }
0x2722   :  { %v7724_v28 = vpop.f32.mrb[129].mxu1 }
0x2723   :  { %v4139_v29 = vpop.f32.mrb[130].mxu1 }
0x2724   :  { %v7725_v34 = vpop.f32.mrb[131].mxu1 }
0x2725   :  { %v4184_v36 = vpop.f32.mrb[132].mxu0 }
0x2726   :  { %v7873_v38 = vpack.i.bf16 %v4184_v36, %v4136_v25  ;;  %v7730_v40 = vpop.f32.mrb[133].mxu0 }
0x2727   :  { %v4187_v41 = vpop.f32.mrb[134].mxu0 }
0x2728   :  { %v7731_v44 = vpop.f32.mrb[135].mxu0 }
0x2729   :  { %v4234_v45 = vpop.f32.mrb[132].mxu1 }
0x272a   :  { %v4290_v46 = vmul.f32 0.5, %v4234_v45  ;;  %v7736_v47 = vpop.f32.mrb[133].mxu1 }
0x272b   :  { %v4237_v63 = vpop.f32.mrb[134].mxu1 }
0x272c   :  { %v4292_v59 = vadd.f32 %v4290_v46, %v8934_v35  ;;  %v7737_v49 = vpop.f32.mrb[135].mxu1 }
0x272d   :  { %v4284_v50 = vpop.f32.mrb[136].mxu0 }
0x272e   :  { %v4291_v56 = vmul.f32 0.5, %v4284_v50  ;;  %v7742_v12 = vpop.f32.mrb[137].mxu0  ;;  %v4294_v51 = vsel %vm515_vm10, %v4292_v59, -inf }
0x272f   :  { %4295 = vmax.xlane.f32.xlu1 %v4294_v51  ;;  %v4287_v5 = vpop.f32.mrb[138].mxu0 }
0x2730   :  { %v4293_v19 = vadd.f32 %v4291_v56, %v8937_v39  ;;  %v7743_v21 = vpop.f32.mrb[139].mxu0 }
0x2732   :  { %v4297_v24 = vsel %vm515_vm10, %v4293_v19, -inf }
0x2733   :  { %4298 = vmax.xlane.f32.xlu0 %v4297_v24 }
0x2740   :  { %4318 = vrot.lane.b32.xlu1 %v8914_v22, %s8243_s30 }
0x2744   :  { %7849 = vrot.lane.b32.xlu1 %v7848_v7, %s8244_s6 }
0x2748   :  { %7854 = vrot.lane.b32.xlu1 %v7853_v33, %s8245_s12 }
0x274c   :  { %7859 = vrot.lane.b32.xlu1 %v7858_v43, %s8248_s16 }
0x2750   :  { %7869 = vrot.lane.b32.xlu1 %v7868_v8, %s8249_s18 }
0x27bc   :  { %v4296_v22 = vpop.xlane.xlu1 %4295 }
0x27bd   :  { %v4300_v35 = vsub.f32 %v4292_v59, %v4296_v22 }
0x27bf   :  { %v4302_v39 = vmul.f32 1.442695, %v4300_v35 }
0x27c0   :  { %v4319_v6 = vpop.permute.xlu1 %4318  ;;  %v4299_v20 = vpop.xlane.xlu0 %4298 }
0x27c1   :  { %8163 = vpow2.f32 %v4302_v39  ;;  %v4324_v7 = vsel %vm543_vm7, %v4319_v6, 0  ;;  %v4301_v18 = vsub.f32 %v4293_v19, %v4299_v20 }
0x27c2   :  { %7745 = vmatpush3.bf16.msra.mxu1 %v4324_v7 }
0x27c3   :  { %v4304_v31 = vmul.f32 1.442695, %v4301_v18  ;;  %7756 = vmatprep.subr.bf16.mxu1 %v8235_v16 }
0x27c4   :  { %v7850_v15 = vpop.permute.xlu1 %7849 }
0x27c5   :  { %8165 = vpow2.f32 %v4304_v31  ;;  %v7852_v34 = vunpack.i.h.bf16 %v7850_v15  ;;  %v7851_v36 = vunpack.i.l.bf16 %v7850_v15 }
0x27c7   :  { %v4471_v46 = vsel %vm418_vm6, %v8971_v17, %v7852_v34  ;;  %v4470_v47 = vsel %vm418_vm6, %v8969_v9, %v7851_v36  ;;  %v4637_v34 = vld [vmem:[%s9617_s7 + $0xc0] sm:$0xff]  ;;  %v4630_v36 = vld [vmem:[%s9617_s7 + $0x88] sm:$0xff] }
0x27c8   :  { %v7855_v25 = vpop.permute.xlu1 %7854 }
0x27cb   :  { %v8164_v33 = vpop.eup %8163 }
0x27cc   :  { %v4306_v37 = vsel %vm515_vm10, %v8164_v33, 0.0  ;;  %v7860_v29 = vpop.permute.xlu1 %7859 }
0x27cd   :  { %4307 = vadd.xlane.f32.xlu0 %v4306_v37  ;;  %v7862_v40 = vunpack.i.h.bf16 %v7860_v29  ;;  %v7861_v41 = vunpack.i.l.bf16 %v7860_v29  ;;  %v6801_v37 = vld [vmem:[%s9616_s2] ss:$0 sm:$0xff] }
0x27ce   :  { %v4629_v29 = vld [vmem:[%s9617_s7 + $0x80] sm:$0xff] }
0x27cf   :  { %v8166_v42 = vpop.eup %8165 }
0x27d0   :  { %v4309_v43 = vsel %vm515_vm10, %v8166_v42, 0.0  ;;  %v7870_v50 = vpop.permute.xlu1 %7869 }
0x27d1   :  { %4310 = vadd.xlane.f32.xlu0 %v4309_v43  ;;  %v7872_v21 = vunpack.i.h.bf16 %v7870_v50  ;;  %v7871_v24 = vunpack.i.l.bf16 %v7870_v50 }
0x27e7   :  { %4366 = vrot.lane.b32.xlu0 %v8916_v23, %s8243_s30 }
0x27eb   :  { %7864 = vrot.lane.b32.xlu0 %v7863_v55, %s8246_s20  ;;  %v7898_v55 = vld [vmem:[%s9615_s1 + $0x8] sm:$0xff]  }
0x27ef   :  { %7874 = vrot.lane.b32.xlu0 %v7873_v38, %s8247_s15  ;;  %v7856_v38 = vunpack.i.l.bf16 %v7855_v25 }
0x27f1   :  { %v4472_v59 = vsel %vm515_vm10, %v4470_v47, %v7856_v38  ;;  %v6824_v38 = vcombine.high %v4629_v29, %v4637_v34  ;;  %v4623_v47 = vld [vmem:[%s9617_s7 + $0x50] sm:$0xff] }
0x27f2   :  { %v4474_v56 = vsel %vm2261_vm11, %v4472_v59, %v7861_v41  ;;  %v8251_v41 = vmov 0  }
0x285a   :  { %v4308_v57 = vpop.xlane.xlu0 %4307 }
0x285b   :  { %8167 = vrcp.f32 %v4308_v57 }
0x285e   :  { %v4311_v11 = vpop.xlane.xlu0 %4310 }
0x285f   :  { %8169 = vrcp.f32 %v4311_v11 }
0x2862   :  { %v4367_v8 = vpop.permute.xlu0 %4366 }
0x2863   :  { %v4372_v53 = vsel %vm543_vm7, %v4367_v8, 0 }
0x2864   :  { %7751 = vmatpush3.bf16.msra.mxu0 %v4372_v53 }
0x2865   :  { %v8168_v58 = vpop.eup %8167 }
0x2866   :  { %v4314_v60 = vmul.f32 %v8168_v58, %v8164_v33  ;;  %v7865_v28 = vpop.permute.xlu0 %7864 }
0x2867   :  { %v7867_v44 = vunpack.i.h.bf16 %v7865_v28  ;;  %v7866_v45 = vunpack.i.l.bf16 %v7865_v28 }
0x2868   :  { %v4316_v23 = vpack.c.bf16 %v4314_v60, %v4314_v60 }
0x2869   :  { %v8170_v61 = vpop.eup %8169  ;;  %v4476_v5 = vsel %vm2264_vm12, %v4474_v56, %v7866_v45 }
0x286a   :  { %v4315_v62 = vmul.f32 %v8170_v61, %v8166_v42  ;;  %7747 = vmatmul.mubr.msk.bf16.vlgmr.msra.gmra.mrb[136].mxu1 %vm515_vm10, %v4316_v23  ;;  %v7875_v63 = vpop.permute.xlu0 %7874  ;;  %v4478_v22 = vsel %vm2267_vm13, %v4476_v5, %v7871_v24 }
0x286b   :  { %7760 = vmatprep.mubr.msk.bf16.mxu1 %vm8236_vm1, %v8235_v16  ;;  %7757 = vmatpush3.bf16.msra.mxu1 %v7897_v52  ;;  %v7877_v19 = vunpack.i.h.bf16 %v7875_v63  ;;  %v7876_v17 = vunpack.i.l.bf16 %v7875_v63  ;;  %v4616_v63 = vld [vmem:[%s9617_s7 + $0x18] sm:$0xff] }
0x286c   :  { %v4317_v48 = vpack.c.bf16 %v4315_v62, %v4315_v62  ;;  %7758 = vmatprep.subr.bf16.mxu1 %v8235_v16  ;;  %v7857_v16 = vunpack.i.h.bf16 %v7855_v25 }
0x286d   :  { %v4480_v20 = vsel %vm2270_vm14, %v4478_v22, %v7876_v17 }
0x286e   :  { %7753 = vmatmul.mubr.msk.bf16.vlgmr.msra.gmra.mrb[140].mxu0 %vm515_vm10, %v4317_v48  ;;  %v4473_v49 = vsel %vm515_vm10, %v4471_v46, %v7857_v16  ;;  %v6823_v16 = vcombine.low %v4629_v29, %v4637_v34  ;;  %v4615_v46 = vld [vmem:[%s9617_s7 + $0x10] sm:$0xff]  ;;  %v4634_v29 = vld [vmem:[%s9617_s7 + $0xa8] sm:$0xff] }
0x286f   :  { %7759 = vmatpush3.bf16.msra.mxu1 %v7898_v55  ;;  %v4475_v12 = vsel %vm2261_vm11, %v4473_v49, %v7862_v40  ;;  %v4638_v40 = vld [vmem:[%s9617_s7 + $0xc8] sm:$0xff]  ;;  %4924 = vmatprep.mubr.bf16.mxu0 %v8251_v41  ;;  %v6812_v59 = vcombine.high %v4615_v46, %v4623_v47  ;;  %v4624_v49 = vld [vmem:[%s9617_s7 + $0x58] sm:$0xff]  ;;  %v6811_v50 = vcombine.low %v4615_v46, %v4623_v47 }
0x2870   :  { %v4477_v51 = vsel %vm2264_vm12, %v4475_v12, %v7867_v44  ;;  %v6825_v44 = vcombine.low %v4630_v36, %v4638_v40  ;;  %v6826_v45 = vcombine.high %v4630_v36, %v4638_v40  ;;  %v6813_v56 = vcombine.low %v4616_v63, %v4624_v49  ;;  %v4642_v34 = vld [vmem:[%s9617_s7 + $0xe8] sm:$0xff]  ;;  %v4620_v46 = vld [vmem:[%s9617_s7 + $0x38] sm:$0xff] }
0x2871   :  { %v4479_v35 = vsel %vm2267_vm13, %v4477_v51, %v7872_v21  ;;  %v6814_v12 = vcombine.high %v4616_v63, %v4624_v49  ;;  %v6834_v40 = vcombine.high %v4634_v29, %v4642_v34  ;;  %v4628_v47 = vld [vmem:[%s9617_s7 + $0x78] sm:$0xff] }
0x2872   :  { %v4481_v7 = vsel %vm2270_vm14, %v4479_v35, %v7877_v19 }
0x293d   :  { %v4360_v13 = vpop.f32.mrb[136].mxu1 }
0x293e   :  { %v7748_v0 = vpop.f32.mrb[137].mxu1 }
0x293f   :  { %v4363_v54 = vpop.f32.mrb[138].mxu1 }
0x2940   :  { %v7749_v2 = vpop.f32.mrb[139].mxu1 }
0x2941   :  { %v4408_v3 = vpop.f32.mrb[140].mxu0 }
0x2942   :  { %v7878_v4 = vpack.i.bf16 %v4408_v3, %v4360_v13  ;;  %v7754_v26 = vpop.f32.mrb[141].mxu0  ;;  %v4613_v3 = vld [vmem:[%s9617_s7] sm:$0xff] }
0x2943   :  { %v4411_v27 = vpop.f32.mrb[142].mxu0  ;;  %v4614_v26 = vld [vmem:[%s9617_s7 + $0x8] sm:$0xff] }
0x2944   :  { %7879 = vrot.lane.b32.xlu1 %v7878_v4, %s8250_s22  ;;  %v7755_v10 = vpop.f32.mrb[143].mxu0  ;;  %v4621_v4 = vld [vmem:[%s9617_s7 + $0x40] sm:$0xff] }
0x2945   :  { %v6808_v27 = vcombine.high %v4613_v3, %v4621_v4  ;;  %v4622_v10 = vld [vmem:[%s9617_s7 + $0x48] sm:$0xff]  ;;  %v6807_v15 = vcombine.low %v4613_v3, %v4621_v4  ;;  %v4617_v3 = vld [vmem:[%s9617_s7 + $0x20] sm:$0xff] }
0x2946   :  { %v6809_v25 = vcombine.low %v4614_v26, %v4622_v10  ;;  %v6810_v28 = vcombine.high %v4614_v26, %v4622_v10  ;;  %v4625_v4 = vld [vmem:[%s9617_s7 + $0x60] sm:$0xff]  ;;  %v4626_v26 = vld [vmem:[%s9617_s7 + $0x68] sm:$0xff] }
0x2947   :  { %4892 = vmatprep.subr.bf16.mxu0 %v6808_v27  ;;  %v6816_v10 = vcombine.high %v4617_v3, %v4625_v4  ;;  %v6815_v36 = vcombine.low %v4617_v3, %v4625_v4  ;;  %v7925_v3 = vld [vmem:[%s8402_s9 + $0x30] sm:$0xff]  }
0x2948   :  { %4935 = vmatprep.subr.bf16.mxu1 %v6810_v28  ;;  %4893 = vmatpush1.bf16.msra.mxu0 %v6807_v15  ;;  %v4641_v28 = vld [vmem:[%s9617_s7 + $0xe0] sm:$0xff]  ;;  %v7926_v4 = vld [vmem:[%s8402_s9 + $0xb0] sm:$0xff]  }
0x2949   :  { %4894 = vmatprep.subr.bf16.mxu0 %v6824_v38 }
0x294c   :  { %4895 = vmatpush1.bf16.msra.mxu0 %v6823_v16 }
0x294d   :  { %4978 = vmatprep.subr.bf16.mxu0 %v6812_v59  ;;  %v6833_v59 = vcombine.low %v4634_v29, %v4642_v34  ;;  %v4659_v34 = vsub.s32 2, %v8925_v30 }
0x29b6   :  { %v7880_v9 = vpop.permute.xlu1 %7879 }
0x29b7   :  { %v7882_v39 = vunpack.i.h.bf16 %v7880_v9  ;;  %v7881_v6 = vunpack.i.l.bf16 %v7880_v9 }
0x29b9   :  { %v4483_v18 = vsel %vm2273_vm15, %v4481_v7, %v7882_v39  ;;  %v4482_v31 = vsel %vm2273_vm15, %v4480_v20, %v7881_v6 }
0x29ba   :  { %v4484_v33 = vpack.c.bf16 %v4483_v18, %v4482_v31 }
0x29bc   :  { %7761 = vmatmul.mubr.msk.bf16.vlgmr.msra.gmra.mrb[140].mxu1 %vm144_vm0, %v4484_v33 }
0x29bd   :  { %4936 = vmatpush1.bf16.msra.mxu1 %v6809_v25  ;;  %4967 = vmatprep.mubr.bf16.mxu1 %v8251_v41  ;;  %v4633_v25 = vld [vmem:[%s9617_s7 + $0xa0] sm:$0xff] }
0x29be   :  { %4937 = vmatprep.subr.bf16.mxu1 %v6826_v45  ;;  %v6832_v38 = vcombine.high %v4633_v25, %v4641_v28  ;;  %v4627_v45 = vld [vmem:[%s9617_s7 + $0x70] sm:$0xff]  ;;  %v6831_v63 = vcombine.low %v4633_v25, %v4641_v28  ;;  %v4675_v25 = vsub.s32 6, %v8925_v30  ;;  %v9411_v28 = vld [vmem:[%s8397_s8 + $0x8] sm:$0xff] }
0x29c0   :  { %v9414_v29 = vrot.slane %v9411_v28, %v4675_v25 }
0x29c1   :  { %4938 = vmatpush1.bf16.msra.mxu1 %v6825_v44  ;;  %v4619_v44 = vld [vmem:[%s9617_s7 + $0x30] sm:$0xff] }
0x29c2   :  { %5021 = vmatprep.subr.bf16.mxu1 %v6814_v12  ;;  %v6820_v49 = vcombine.high %v4619_v44, %v4627_v45  ;;  %v4643_v12 = vld [vmem:[%s9617_s7 + $0xf0] sm:$0xff] }
0x2a8f   :  { %v4545_v42 = vpop.f32.mrb[140].mxu1 }
0x2a90   :  { %v4546_v43 = vadd.f32 %v6801_v37, %v4545_v42  ;;  %v7762_v57 = vpop.f32.mrb[141].mxu1 }
0x2a91   :  { %v4548_v11 = vpop.f32.mrb[142].mxu1 }
0x2a92   :  { %v9292_v8 = vadd.f32 %v4546_v43, %v8851_v14  ;;  %v4549_v53 = vadd.f32 %v6801_v37, %v4548_v11  ;;  %v7763_v58 = vpop.f32.mrb[143].mxu1  ;;  %v6805_v37 = vld [vmem:[%s9618_s10] ss:$0 sm:$0xff] }
0x2a93   :  { %v6806_v58 = vld [vmem:[%s9619_s11] ss:$0 sm:$0xff] }
0x2a94   :  { %v9295_v60 = vadd.f32 %v4549_v53, %v8854_v1  ;;  %v4554_v23 = vsel %vm144_vm0, %v9292_v8, 0.0 }
0x2a95   :  { %4555 = vadd.xlane.f32.xlu0 %v4554_v23 }
0x2a96   :  { %v4557_v61 = vsel %vm144_vm0, %v9295_v60, 0.0 }
0x2a97   :  { %4558 = vadd.xlane.f32.xlu1 %v4557_v61  ;;  %v4631_v61 = vld [vmem:[%s9617_s7 + $0x90] sm:$0xff] }
0x2b22   :  { %v4556_v62 = vpop.xlane.xlu0 %4555 }
0x2b23   :  { %v4560_v14 = vmul.f32 0.03125, %v4556_v62  ;;  %v4639_v62 = vld [vmem:[%s9617_s7 + $0xd0] sm:$0xff] }
0x2b24   :  { %v4559_v48 = vpop.xlane.xlu1 %4558 }
0x2b25   :  { %v9302_v52 = vsub.f32 %v9292_v8, %v4560_v14  ;;  %v4561_v1 = vmul.f32 0.03125, %v4559_v48  ;;  %v4632_v14 = vld [vmem:[%s9617_s7 + $0x98] sm:$0xff] }
0x2b26   :  { %v4640_v48 = vld [vmem:[%s9617_s7 + $0xd8] sm:$0xff] }
0x2b27   :  { %v9305_v55 = vsub.f32 %v9295_v60, %v4561_v1  ;;  %v4564_v13 = vmul.f32 %v9302_v52, %v9302_v52  ;;  %v6829_v27 = vcombine.low %v4632_v14, %v4640_v48 }
0x2b29   :  { %v4566_v0 = vsel %vm144_vm0, %v4564_v13, 0.0  ;;  %v4565_v54 = vmul.f32 %v9305_v55, %v9305_v55 }
0x2b2a   :  { %4567 = vadd.xlane.f32.xlu0 %v4566_v0 }
0x2b2b   :  { %v4569_v2 = vsel %vm144_vm0, %v4565_v54, 0.0  ;;  %v6828_v54 = vcombine.high %v4631_v61, %v4639_v62 }
0x2b2e   :  { %4570 = vadd.xlane.f32.xlu0 %v4569_v2  ;;  %v6830_v2 = vcombine.high %v4632_v14, %v4640_v48  ;;  %v7918_v14 = vld [vmem:[%s8402_s9 + $0xa0] sm:$0xff]   ;;  %v7919_v48 = vld [vmem:[%s8402_s9 + $0x68] sm:$0xff]  }
0x2bb7   :  { %v4568_v51 = vpop.xlane.xlu0 %4567 }
0x2bb8   :  { %v4572_v5 = vmul.f32 0.032258064, %v4568_v51  ;;  %v4636_v51 = vld [vmem:[%s9617_s7 + $0xb8] sm:$0xff] }
0x2bba   :  { %8171 = vrsqrt.f32 %v4572_v5  ;;  %vm4576_vm1 = vcmp.eq.f32.partialorder %v4572_v5, inf  ;;  %v4579_v9 = vand.u32 2147483648, %v4572_v5  ;;  %vm4578_vm6 = vcmp.eq.f32.partialorder %v4572_v5, 0.0 }
0x2bbb   :  { %v4571_v19 = vpop.xlane.xlu0 %4570 }
0x2bbc   :  { %v4573_v17 = vmul.f32 0.032258064, %v4571_v19  ;;  %v6819_v19 = vcombine.low %v4619_v44, %v4627_v45 }
0x2bbe   :  { %8173 = vrsqrt.f32 %v4573_v17  ;;  %vm4583_vm7 = vcmp.eq.f32.partialorder %v4573_v17, inf  ;;  %v4586_v7 = vand.u32 2147483648, %v4573_v17  ;;  %vm4585_vm10 = vcmp.eq.f32.partialorder %v4573_v17, 0.0 }
0x2bc4   :  { %v8172_v21 = vpop.eup %8171 }
0x2bc5   :  { %v4575_v24 = vmul.f32 %v8172_v21, %v4572_v5 }
0x2bc7   :  { %v4577_v22 = vsel %vm4576_vm1, %v4572_v5, %v4575_v24  ;;  %v4644_v5 = vld [vmem:[%s9617_s7 + $0xf8] sm:$0xff] }
0x2bc8   :  { %v8174_v35 = vpop.eup %8173  ;;  %v4580_v39 = vsel %vm4578_vm6, %v4579_v9, %v4577_v22  ;;  %v6838_v24 = vcombine.high %v4636_v51, %v4644_v5  ;;  %v6837_v22 = vcombine.low %v4636_v51, %v4644_v5 }
0x2bc9   :  { %v4588_v6 = vadd.f32 1e-06, %v4580_v39  ;;  %v4582_v20 = vmul.f32 %v8174_v35, %v4573_v17  ;;  %v7899_v35 = vld [vmem:[%s8402_s9 + $0x40] sm:$0xff]  }
0x2bca   :  { %v7900_v39 = vld [vmem:[%s8402_s9 + $0xc0] sm:$0xff]  }
0x2bcb   :  { %8175 = vrcp.f32 %v4588_v6  ;;  %v4584_v18 = vsel %vm4583_vm7, %v4573_v17, %v4582_v20  ;;  %v6821_v17 = vcombine.low %v4620_v46, %v4628_v47  ;;  %v7901_v6 = vld [vmem:[%s8402_s9] sm:$0xff]  }
0x2bcc   :  { %v4587_v31 = vsel %vm4585_vm10, %v4586_v7, %v4584_v18  ;;  %v7902_v20 = vld [vmem:[%s8402_s9 + $0x80] sm:$0xff]   ;;  %v7903_v7 = vld [vmem:[%s8402_s9 + $0x48] sm:$0xff]  }
0x2bcd   :  { %v4589_v33 = vadd.f32 1e-06, %v4587_v31  ;;  %v7904_v18 = vld [vmem:[%s8402_s9 + $0xc8] sm:$0xff]  }
0x2bce   :  { %v7906_v31 = vld [vmem:[%s8402_s9 + $0x88] sm:$0xff]  }
0x2bcf   :  { %8177 = vrcp.f32 %v4589_v33  ;;  %v7907_v33 = vld [vmem:[%s8402_s9 + $0x50] sm:$0xff]  }
0x2bd5   :  { %v8176_v42 = vpop.eup %8175 }
0x2bd6   :  { %v4599_v43 = vmul.f32 %v8176_v42, %v6805_v37  ;;  %v7909_v42 = vld [vmem:[%s8402_s9 + $0x10] sm:$0xff]  }
0x2bd8   :  { %v4601_v11 = vmul.f32 %v4599_v43, %v9302_v52  ;;  %v4618_v52 = vld [vmem:[%s9617_s7 + $0x28] sm:$0xff]  ;;  %v7910_v43 = vld [vmem:[%s8402_s9 + $0x90] sm:$0xff]  }
0x2bd9   :  { %v8178_v57 = vpop.eup %8177  ;;  %v6818_v15 = vcombine.high %v4618_v52, %v4626_v26  ;;  %v6817_v16 = vcombine.low %v4618_v52, %v4626_v26  ;;  %v7927_v52 = vld [vmem:[%s8402_s9 + $0x78] sm:$0xff]  }
0x2bda   :  { %v4600_v53 = vmul.f32 %v8178_v57, %v6805_v37  ;;  %v4610_v1 = vadd.f32 %v6806_v58, %v4601_v11  ;;  %v7908_v37 = vld [vmem:[%s8402_s9 + $0xd0] sm:$0xff]   ;;  %v7911_v57 = vld [vmem:[%s8402_s9 + $0x58] sm:$0xff]  }
0x2bdb   :  { %v7912_v11 = vld [vmem:[%s8402_s9 + $0xd8] sm:$0xff]  }
0x2bdc   :  { %v4602_v23 = vmul.f32 %v4600_v53, %v9305_v55  ;;  %v6827_v55 = vcombine.low %v4631_v61, %v4639_v62  ;;  %v7913_v53 = vld [vmem:[%s8402_s9 + $0x18] sm:$0xff]   ;;  %v7916_v61 = vld [vmem:[%s8402_s9 + $0xe0] sm:$0xff]  }
0x2bdd   :  { %v7917_v62 = vld [vmem:[%s8402_s9 + $0x20] sm:$0xff]   ;;  %v7928_v26 = vld [vmem:[%s8402_s9 + $0xf8] sm:$0xff]  }
0x2bde   :  { %v4611_v13 = vadd.f32 %v6806_v58, %v4602_v23  ;;  %v7914_v58 = vld [vmem:[%s8402_s9 + $0x98] sm:$0xff]   ;;  %v7915_v23 = vld [vmem:[%s8402_s9 + $0x60] sm:$0xff]  }
0x2be0   :  { %v9335_v0 = vpack.c.bf16 %v4611_v13, %v4610_v1  ;;  %v7920_v1 = vld [vmem:[%s8402_s9 + $0xe8] sm:$0xff]  }
0x2be1   :  { %v7921_v13 = vld [vmem:[%s8402_s9 + $0x28] sm:$0xff]  }
0x2be2   :  { %6839 = vmatmul.mubr.msk.bf16.vlgmr.msra.gmra.mrb[144].mxu0 %vm144_vm0, %v9335_v0  ;;  %6840 = vmatmul.mubr.msk.bf16.vlgmr.msra.gmra.mrb[144].mxu1 %vm144_vm0, %v9335_v0 }
0x2be3   :  { %4979 = vmatpush1.bf16.msra.mxu0 %v6811_v50  ;;  %5022 = vmatpush1.bf16.msra.mxu1 %v6813_v56  ;;  %v6822_v50 = vcombine.high %v4620_v46, %v4628_v47  ;;  %v4635_v56 = vld [vmem:[%s9617_s7 + $0xb0] sm:$0xff]  ;;  %v4667_v47 = vsub.s32 4, %v8925_v30 }
0x2be4   :  { %4980 = vmatprep.subr.bf16.mxu0 %v6828_v54  ;;  %5023 = vmatprep.subr.bf16.mxu1 %v6830_v2  ;;  %v6836_v21 = vcombine.high %v4635_v56, %v4643_v12  ;;  %v6835_v9 = vcombine.low %v4635_v56, %v4643_v12  ;;  %v7923_v54 = vld [vmem:[%s8402_s9 + $0x70] sm:$0xff]  }
0x2be5   :  { %5010 = vmatprep.mubr.bf16.mxu0 %v8251_v41  ;;  %5053 = vmatprep.mubr.bf16.mxu1 %v8251_v41  ;;  %v7924_v2 = vld [vmem:[%s8402_s9 + $0xf0] sm:$0xff]  }
0x2be7   :  { %4981 = vmatpush1.bf16.msra.mxu0 %v6827_v55  ;;  %5024 = vmatpush1.bf16.msra.mxu1 %v6829_v27  ;;  %v7929_v55 = vld [vmem:[%s8402_s9 + $0x38] sm:$0xff]  }
0x2be8   :  { %5064 = vmatprep.subr.bf16.mxu0 %v6816_v10  ;;  %5107 = vmatprep.subr.bf16.mxu1 %v6818_v15  ;;  %v7930_v27 = vld [vmem:[%s8402_s9 + $0xb8] sm:$0xff]   ;;  %v7931_v10 = vld [vmem:[%s8402_s9 + $0x140] sm:$0xff]  }
0x2be9   :  { %v7932_v15 = vld [vmem:[%s8402_s9 + $0x1c0] sm:$0xff]  }
0x2bea   :  { %6841 = vmatmul.mubr.msk.bf16.vlgmr.msra.gmra.mrb[148].mxu0 %vm144_vm0, %v9335_v0  ;;  %6842 = vmatmul.mubr.msk.bf16.vlgmr.msra.gmra.mrb[148].mxu1 %vm144_vm0, %v9335_v0 }
0x2beb   :  { %5065 = vmatpush1.bf16.msra.mxu0 %v6815_v36  ;;  %5108 = vmatpush1.bf16.msra.mxu1 %v6817_v16  ;;  %v4645_v36 = vld [vmem:[%s8397_s8] sm:$0xff]  ;;  %v4655_v16 = vsub.s32 1, %v8925_v30 }
0x2bec   :  { %5066 = vmatprep.subr.bf16.mxu0 %v6832_v38  ;;  %5109 = vmatprep.subr.bf16.mxu1 %v6834_v40  ;;  %v4663_v38 = vsub.s32 3, %v8925_v30  ;;  %v4652_v40 = vrot.slane %v4645_v36, %v8929_v32  ;;  %v4660_v44 = vrot.slane %v4645_v36, %v4659_v34 }
0x2bed   :  { %5096 = vmatprep.mubr.bf16.mxu0 %v8251_v41  ;;  %5139 = vmatprep.mubr.bf16.mxu1 %v8251_v41  ;;  %v4656_v45 = vrot.slane %v4645_v36, %v4655_v16 }
0x2bee   :  { %v4664_v46 = vrot.slane %v4645_v36, %v4663_v38 }
0x2bef   :  { %5067 = vmatpush1.bf16.msra.mxu0 %v6831_v63  ;;  %5110 = vmatpush1.bf16.msra.mxu1 %v6833_v59 }
0x2bf0   :  { %5150 = vmatprep.subr.bf16.mxu0 %v6820_v49  ;;  %5193 = vmatprep.subr.bf16.mxu1 %v6822_v50  ;;  %v4671_v49 = vsub.s32 5, %v8925_v30  ;;  %v4679_v50 = vsub.s32 7, %v8925_v30 }
0x2bf2   :  { %6843 = vmatmul.mubr.msk.bf16.vlgmr.msra.gmra.mrb[152].mxu0 %vm144_vm0, %v9335_v0  ;;  %6844 = vmatmul.mubr.msk.bf16.vlgmr.msra.gmra.mrb[152].mxu1 %vm144_vm0, %v9335_v0 }
0x2bf3   :  { %5151 = vmatpush1.bf16.msra.mxu0 %v6819_v19  ;;  %5194 = vmatpush1.bf16.msra.mxu1 %v6821_v17 }
0x2bf4   :  { %5152 = vmatprep.subr.bf16.mxu0 %v6836_v21  ;;  %5195 = vmatprep.subr.bf16.mxu1 %v6838_v24 }
0x2bf5   :  { %5182 = vmatprep.mubr.bf16.mxu0 %v8251_v41  ;;  %5225 = vmatprep.mubr.bf16.mxu1 %v8251_v41  ;;  %v7905_v41 = vld [vmem:[%s8402_s9 + $0x8] sm:$0xff]  }
0x2bf7   :  { %5153 = vmatpush1.bf16.msra.mxu0 %v6835_v9  ;;  %5196 = vmatpush1.bf16.msra.mxu1 %v6837_v22 }
0x2bf8   :  { %7140 = vmatprep.subr.bf16.mxu0 %v7899_v35  ;;  %7162 = vmatprep.subr.bf16.mxu1 %v7900_v39 }
0x2bfa   :  { %6845 = vmatmul.mubr.msk.bf16.vlgmr.msra.gmra.mrb[156].mxu0 %vm144_vm0, %v9335_v0  ;;  %6846 = vmatmul.mubr.msk.bf16.vlgmr.msra.gmra.mrb[156].mxu1 %vm144_vm0, %v9335_v0  ;;  %v7922_v0 = vld [vmem:[%s8402_s9 + $0xa8] sm:$0xff]  }
0x2bfb   :  { %7141 = vmatpush3.bf16.msra.mxu0 %v7901_v6  ;;  %7163 = vmatpush3.bf16.msra.mxu1 %v7902_v20  ;;  %v4668_v6 = vrot.slane %v4645_v36, %v4667_v47  ;;  %v4676_v20 = vrot.slane %v4645_v36, %v4675_v25 }
0x2bfc   :  { %7142 = vmatprep.subr.bf16.mxu0 %v7903_v7  ;;  %7164 = vmatprep.subr.bf16.mxu1 %v7904_v18 }
0x2bff   :  { %7143 = vmatpush3.bf16.msra.mxu0 %v7905_v41  ;;  %7165 = vmatpush3.bf16.msra.mxu1 %v7906_v31  ;;  %v4672_v41 = vrot.slane %v4645_v36, %v4671_v49  ;;  %v4680_v31 = vrot.slane %v4645_v36, %v4679_v50  ;;  %v4692_v36 = vrot.slane %v9411_v28, %v4659_v34 }
0x2c00   :  { %7144 = vmatprep.subr.bf16.mxu0 %v7907_v33  ;;  %7166 = vmatprep.subr.bf16.mxu1 %v7908_v37  ;;  %v4696_v34 = vrot.slane %v9411_v28, %v4663_v38 }
0x2c03   :  { %7145 = vmatpush3.bf16.msra.mxu0 %v7909_v42  ;;  %7167 = vmatpush3.bf16.msra.mxu1 %v7910_v43 }
0x2c04   :  { %7146 = vmatprep.subr.bf16.mxu0 %v7911_v57  ;;  %7168 = vmatprep.subr.bf16.mxu1 %v7912_v11 }
0x2c07   :  { %7147 = vmatpush3.bf16.msra.mxu0 %v7913_v53  ;;  %7169 = vmatpush3.bf16.msra.mxu1 %v7914_v58 }
0x2c08   :  { %7148 = vmatprep.subr.bf16.mxu0 %v7915_v23  ;;  %7170 = vmatprep.subr.bf16.mxu1 %v7916_v61 }
0x2c0b   :  { %7149 = vmatpush3.bf16.msra.mxu0 %v7917_v62  ;;  %7171 = vmatpush3.bf16.msra.mxu1 %v7918_v14 }
0x2c0c   :  { %7150 = vmatprep.subr.bf16.mxu0 %v7919_v48  ;;  %7172 = vmatprep.subr.bf16.mxu1 %v7920_v1 }
0x2c0f   :  { %7151 = vmatpush3.bf16.msra.mxu0 %v7921_v13  ;;  %7173 = vmatpush3.bf16.msra.mxu1 %v7922_v0  ;;  %v7933_v13 = vld [vmem:[%s8402_s9 + $0x100] sm:$0xff]  }
0x2c10   :  { %7152 = vmatprep.subr.bf16.mxu0 %v7923_v54  ;;  %7174 = vmatprep.subr.bf16.mxu1 %v7924_v2  ;;  %v7934_v0 = vld [vmem:[%s8402_s9 + $0x180] sm:$0xff]  }
0x2c13   :  { %7153 = vmatpush3.bf16.msra.mxu0 %v7925_v3  ;;  %7175 = vmatpush3.bf16.msra.mxu1 %v7926_v4 }
0x2c14   :  { %7154 = vmatprep.subr.bf16.mxu0 %v7927_v52  ;;  %7176 = vmatprep.subr.bf16.mxu1 %v7928_v26  ;;  %v7935_v52 = vld [vmem:[%s8402_s9 + $0x148] sm:$0xff]  }
0x2c15   :  { %v7936_v26 = vld [vmem:[%s8402_s9 + $0x1c8] sm:$0xff]  }
0x2c17   :  { %7155 = vmatpush3.bf16.msra.mxu0 %v7929_v55  ;;  %7177 = vmatpush3.bf16.msra.mxu1 %v7930_v27  ;;  %v4684_v55 = vrot.slane %v9411_v28, %v8929_v32  ;;  %v4688_v32 = vrot.slane %v9411_v28, %v4655_v16  ;;  %v7940_v16 = vld [vmem:[%s8402_s9 + $0x1d0] sm:$0xff]  }
0x2c18   :  { %7184 = vmatprep.subr.bf16.mxu0 %v7931_v10  ;;  %7206 = vmatprep.subr.bf16.mxu1 %v7932_v15 }
0x2cb5   :  { %v4926_v63 = vpop.f32.mrb[144].mxu0  ;;  %v4969_v59 = vpop.f32.mrb[144].mxu1 }
0x2cb6   :  { %v4927_v56 = vadd.f32 %v4926_v63, %v4652_v40  ;;  %v4970_v12 = vadd.f32 %v4969_v59, %v4660_v44  ;;  %v4928_v51 = vpop.f32.mrb[145].mxu0  ;;  %v4971_v5 = vpop.f32.mrb[145].mxu1 }
0x2cb7   :  { %v4929_v19 = vadd.f32 %v4928_v51, %v4656_v45  ;;  %v4972_v17 = vadd.f32 %v4971_v5, %v4664_v46  ;;  %v4930_v21 = vpop.f32.mrb[146].mxu0  ;;  %v4973_v24 = vpop.f32.mrb[146].mxu1 }
0x2cb8   :  { %v4931_v9 = vadd.f32 %v4930_v21, %v4652_v40  ;;  %v4974_v22 = vadd.f32 %v4973_v24, %v4660_v44  ;;  %v4932_v35 = vpop.f32.mrb[147].mxu0  ;;  %v4975_v39 = vpop.f32.mrb[147].mxu1  ;;  %v5236_v33 = vmax.f32 %v4927_v56, 0.0  ;;  %v5238_v37 = vmax.f32 %v4970_v12, 0.0  ;;  %v7937_v56 = vld [vmem:[%s8402_s9 + $0x108] sm:$0xff]   ;;  %v7939_v21 = vld [vmem:[%s8402_s9 + $0x150] sm:$0xff]  }
0x2cb9   :  { %v4933_v7 = vadd.f32 %v4932_v35, %v4656_v45  ;;  %v4976_v18 = vadd.f32 %v4975_v39, %v4664_v46  ;;  %v5237_v57 = vmax.f32 %v4929_v19, 0.0  ;;  %v5239_v11 = vmax.f32 %v4972_v17, 0.0  ;;  %v7938_v12 = vld [vmem:[%s8402_s9 + $0x188] sm:$0xff]  }
0x2cba   :  { %v5252_v42 = vmax.f32 %v4931_v9, 0.0  ;;  %v5254_v43 = vmax.f32 %v4974_v22, 0.0 }
0x2cbb   :  { %v5253_v53 = vmax.f32 %v4933_v7, 0.0  ;;  %v5255_v58 = vmax.f32 %v4976_v18, 0.0 }
0x2cbc   :  { %v5268_v23 = vpack.c.bf16 %v5252_v42, %v5236_v33  ;;  %v5270_v61 = vpack.c.bf16 %v5254_v43, %v5238_v37 }
0x2cbd   :  { %v5269_v62 = vpack.c.bf16 %v5253_v53, %v5237_v57  ;;  %v5271_v14 = vpack.c.bf16 %v5255_v58, %v5239_v11  ;;  %v5012_v48 = vpop.f32.mrb[148].mxu0  ;;  %v5055_v1 = vpop.f32.mrb[148].mxu1  ;;  %v7943_v57 = vld [vmem:[%s8402_s9 + $0x158] sm:$0xff]  }
0x2cbe   :  { %v5013_v54 = vadd.f32 %v5012_v48, %v4668_v6  ;;  %v5056_v2 = vadd.f32 %v5055_v1, %v4676_v20  ;;  %v5014_v3 = vpop.f32.mrb[149].mxu0  ;;  %v5057_v4 = vpop.f32.mrb[149].mxu1  ;;  %v7944_v11 = vld [vmem:[%s8402_s9 + $0x1d8] sm:$0xff]  }
0x2cbf   :  { %v5015_v27 = vadd.f32 %v5014_v3, %v4672_v41  ;;  %v5058_v10 = vadd.f32 %v5057_v4, %v4680_v31  ;;  %v5016_v15 = vpop.f32.mrb[150].mxu0  ;;  %v5059_v25 = vpop.f32.mrb[150].mxu1  ;;  %6347 = vmatprep.mubr.bf16.mxu0 %v5269_v62  ;;  %6388 = vmatprep.mubr.bf16.mxu1 %v5271_v14  ;;  %v7945_v3 = vld [vmem:[%s8402_s9 + $0x118] sm:$0xff]  }
0x2cc0   :  { %v5017_v40 = vadd.f32 %v5016_v15, %v4668_v6  ;;  %v5060_v44 = vadd.f32 %v5059_v25, %v4676_v20  ;;  %v5018_v45 = vpop.f32.mrb[151].mxu0  ;;  %v5061_v46 = vpop.f32.mrb[151].mxu1  ;;  %6348 = vmatmul.mubr.bf16.vlgmr.msra.gmra.mrb[160].mxu0 %v5268_v23  ;;  %6389 = vmatmul.mubr.bf16.vlgmr.msra.gmra.mrb[160].mxu1 %v5270_v61  ;;  %v5240_v51 = vmax.f32 %v5013_v54, 0.0  ;;  %v5242_v5 = vmax.f32 %v5056_v2, 0.0  ;;  %v7946_v4 = vld [vmem:[%s8402_s9 + $0x198] sm:$0xff]  }
0x2cc1   :  { %v5019_v63 = vadd.f32 %v5018_v45, %v4672_v41  ;;  %v5062_v59 = vadd.f32 %v5061_v46, %v4680_v31  ;;  %7185 = vmatpush3.bf16.msra.mxu0 %v7933_v13  ;;  %7207 = vmatpush3.bf16.msra.mxu1 %v7934_v0  ;;  %v5241_v24 = vmax.f32 %v5015_v27, 0.0  ;;  %v5243_v9 = vmax.f32 %v5058_v10, 0.0  ;;  %v7941_v41 = vld [vmem:[%s8402_s9 + $0x110] sm:$0xff]  }
0x2cc2   :  { %v5256_v19 = vmax.f32 %v5017_v40, 0.0  ;;  %v5258_v17 = vmax.f32 %v5060_v44, 0.0  ;;  %7186 = vmatprep.subr.bf16.mxu0 %v7935_v52  ;;  %7208 = vmatprep.subr.bf16.mxu1 %v7936_v26  ;;  %v7942_v31 = vld [vmem:[%s8402_s9 + $0x190] sm:$0xff]   ;;  %v4700_v13 = vrot.slane %v9411_v28, %v4667_v47  ;;  %v4704_v0 = vrot.slane %v9411_v28, %v4671_v49  ;;  %v7947_v47 = vld [vmem:[%s8402_s9 + $0x160] sm:$0xff]  }
0x2cc3   :  { %v5257_v22 = vmax.f32 %v5019_v63, 0.0  ;;  %v5259_v35 = vmax.f32 %v5062_v59, 0.0  ;;  %v4712_v52 = vrot.slane %v9411_v28, %v4679_v50  ;;  %v7948_v49 = vld [vmem:[%s8402_s9 + $0x1e0] sm:$0xff]  }
0x2cc4   :  { %v9451_v39 = vpack.c.bf16 %v5256_v19, %v5240_v51  ;;  %v9453_v6 = vpack.c.bf16 %v5258_v17, %v5242_v5  ;;  %v7950_v63 = vld [vmem:[%s8402_s9 + $0x1a0] sm:$0xff]   ;;  %v7951_v51 = vld [vmem:[%s8402_s9 + $0x168] sm:$0xff]  }
0x2cc5   :  { %v5273_v38 = vpack.c.bf16 %v5257_v22, %v5241_v24  ;;  %v5275_v20 = vpack.c.bf16 %v5259_v35, %v5243_v9  ;;  %7187 = vmatpush3.bf16.msra.mxu0 %v7937_v56  ;;  %7209 = vmatpush3.bf16.msra.mxu1 %v7938_v12  ;;  %v5098_v7 = vpop.f32.mrb[152].mxu0  ;;  %v5141_v18 = vpop.f32.mrb[152].mxu1  ;;  %v7952_v5 = vld [vmem:[%s8402_s9 + $0x1e8] sm:$0xff]  }
0x2cc6   :  { %v5099_v33 = vadd.f32 %v5098_v7, %v4684_v55  ;;  %v5142_v37 = vadd.f32 %v5141_v18, %v4692_v36  ;;  %v5100_v42 = vpop.f32.mrb[153].mxu0  ;;  %v5143_v43 = vpop.f32.mrb[153].mxu1  ;;  %7188 = vmatprep.subr.bf16.mxu0 %v7939_v21  ;;  %7210 = vmatprep.subr.bf16.mxu1 %v7940_v16  ;;  %v7953_v7 = vld [vmem:[%s8402_s9 + $0x128] sm:$0xff]  }
0x2cc7   :  { %v5101_v53 = vadd.f32 %v5100_v42, %v4688_v32  ;;  %v5144_v58 = vadd.f32 %v5143_v43, %v4696_v34  ;;  %v5102_v23 = vpop.f32.mrb[154].mxu0  ;;  %v5145_v61 = vpop.f32.mrb[154].mxu1  ;;  %6429 = vmatprep.mubr.bf16.mxu0 %v5273_v38  ;;  %6470 = vmatprep.mubr.bf16.mxu1 %v5275_v20  ;;  %v7954_v18 = vld [vmem:[%s8402_s9 + $0x1a8] sm:$0xff]   ;;  %v7955_v42 = vld [vmem:[%s8402_s9 + $0x170] sm:$0xff]  }
0x2cc8   :  { %v5103_v62 = vadd.f32 %v5102_v23, %v4684_v55  ;;  %v5146_v14 = vadd.f32 %v5145_v61, %v4692_v36  ;;  %v5104_v48 = vpop.f32.mrb[155].mxu0  ;;  %v5147_v1 = vpop.f32.mrb[155].mxu1  ;;  %v5244_v26 = vmax.f32 %v5099_v33, 0.0  ;;  %v5246_v55 = vmax.f32 %v5142_v37, 0.0 }
0x2cc9   :  { %v5105_v54 = vadd.f32 %v5104_v48, %v4688_v32  ;;  %v5148_v2 = vadd.f32 %v5147_v1, %v4696_v34  ;;  %7189 = vmatpush3.bf16.msra.mxu0 %v7941_v41  ;;  %7211 = vmatpush3.bf16.msra.mxu1 %v7942_v31  ;;  %v5245_v15 = vmax.f32 %v5101_v53, 0.0  ;;  %v5247_v25 = vmax.f32 %v5144_v58, 0.0  ;;  %v7949_v32 = vld [vmem:[%s8402_s9 + $0x120] sm:$0xff]   ;;  %v7958_v48 = vld [vmem:[%s8402_s9 + $0x1b0] sm:$0xff]   ;;  %v7959_v1 = vld [vmem:[%s8402_s9 + $0x178] sm:$0xff]  }
0x2cca   :  { %v5260_v27 = vmax.f32 %v5103_v62, 0.0  ;;  %v5262_v10 = vmax.f32 %v5146_v14, 0.0  ;;  %7190 = vmatprep.subr.bf16.mxu0 %v7943_v57  ;;  %7212 = vmatprep.subr.bf16.mxu1 %v7944_v11  ;;  %v7957_v14 = vld [vmem:[%s8402_s9 + $0x130] sm:$0xff]  }
0x2ccb   :  { %v5261_v36 = vmax.f32 %v5105_v54, 0.0  ;;  %v5263_v40 = vmax.f32 %v5148_v2, 0.0  ;;  %v7962_v54 = vld [vmem:[%s8402_s9 + $0x1b8] sm:$0xff]   ;;  %v7963_v2 = vld [vmem:[%s8402_s9 + $0x240] sm:$0xff]  }
0x2ccc   :  { %v9472_v44 = vpack.c.bf16 %v5260_v27, %v5244_v26  ;;  %v9474_v30 = vpack.c.bf16 %v5262_v10, %v5246_v55  ;;  %v7967_v26 = vld [vmem:[%s8402_s9 + $0x248] sm:$0xff]  }
0x2ccd   :  { %v9476_v28 = vpack.c.bf16 %v5261_v36, %v5245_v15  ;;  %v9478_v50 = vpack.c.bf16 %v5263_v40, %v5247_v25  ;;  %7191 = vmatpush3.bf16.msra.mxu0 %v7945_v3  ;;  %7213 = vmatpush3.bf16.msra.mxu1 %v7946_v4  ;;  %v5184_v45 = vpop.f32.mrb[156].mxu0  ;;  %v5227_v46 = vpop.f32.mrb[156].mxu1  ;;  %v7964_v3 = vld [vmem:[%s8402_s9 + $0x2c0] sm:$0xff]   ;;  %v7968_v55 = vld [vmem:[%s8402_s9 + $0x2c8] sm:$0xff]   ;;  %v7975_v15 = vld [vmem:[%s8402_s9 + $0x258] sm:$0xff]  }
0x2cce   :  { %v5185_v59 = vadd.f32 %v5184_v45, %v4700_v13  ;;  %v5228_v56 = vadd.f32 %v5227_v46, %v9414_v29  ;;  %v5186_v12 = vpop.f32.mrb[157].mxu0  ;;  %v5229_v34 = vpop.f32.mrb[157].mxu1  ;;  %7192 = vmatprep.subr.bf16.mxu0 %v7947_v47  ;;  %7214 = vmatprep.subr.bf16.mxu1 %v7948_v49  ;;  %v7965_v4 = vld [vmem:[%s8402_s9 + $0x200] sm:$0xff]   ;;  %v7969_v27 = vld [vmem:[%s8402_s9 + $0x208] sm:$0xff]   ;;  %v7971_v47 = vld [vmem:[%s8402_s9 + $0x250] sm:$0xff]  }
0x2ccf   :  { %v5187_v19 = vadd.f32 %v5186_v12, %v4704_v0  ;;  %v5230_v17 = vadd.f32 %v5229_v34, %v4712_v52  ;;  %v5188_v21 = vpop.f32.mrb[158].mxu0  ;;  %v5231_v16 = vpop.f32.mrb[158].mxu1  ;;  %v7970_v10 = vld [vmem:[%s8402_s9 + $0x288] sm:$0xff]   ;;  %v7974_v49 = vld [vmem:[%s8402_s9 + $0x290] sm:$0xff]   ;;  %v7976_v25 = vld [vmem:[%s8402_s9 + $0x2d8] sm:$0xff]  }
0x2cd0   :  { %v5189_v24 = vadd.f32 %v5188_v21, %v4700_v13  ;;  %v5232_v9 = vadd.f32 %v5231_v16, %v9414_v29  ;;  %v5190_v22 = vpop.f32.mrb[159].mxu0  ;;  %v5233_v35 = vpop.f32.mrb[159].mxu1  ;;  %v5248_v41 = vmax.f32 %v5185_v59, 0.0  ;;  %v5250_v31 = vmax.f32 %v5228_v56, 0.0  ;;  %v7956_v29 = vld [vmem:[%s8402_s9 + $0x1f0] sm:$0xff]   ;;  %v7960_v13 = vld [vmem:[%s8402_s9 + $0x1f8] sm:$0xff]  }
0x2cd1   :  { %v5191_v38 = vadd.f32 %v5190_v22, %v4704_v0  ;;  %v5234_v20 = vadd.f32 %v5233_v35, %v4712_v52  ;;  %7193 = vmatpush3.bf16.msra.mxu0 %v7949_v32  ;;  %7215 = vmatpush3.bf16.msra.mxu1 %v7950_v63  ;;  %v5249_v43 = vmax.f32 %v5187_v19, 0.0  ;;  %v5251_v57 = vmax.f32 %v5230_v17, 0.0  ;;  %v7961_v0 = vld [vmem:[%s8402_s9 + $0x138] sm:$0xff]   ;;  %v7966_v52 = vld [vmem:[%s8402_s9 + $0x280] sm:$0xff]   ;;  %v7983_v32 = vld [vmem:[%s8402_s9 + $0x268] sm:$0xff]  }
0x2cd2   :  { %v5264_v33 = vmax.f32 %v5189_v24, 0.0  ;;  %v5266_v37 = vmax.f32 %v5232_v9, 0.0  ;;  %7194 = vmatprep.subr.bf16.mxu0 %v7951_v51  ;;  %7216 = vmatprep.subr.bf16.mxu1 %v7952_v5  ;;  %v7977_v36 = vld [vmem:[%s8402_s9 + $0x218] sm:$0xff]   ;;  %v7981_v45 = vld [vmem:[%s8402_s9 + $0x220] sm:$0xff]   ;;  %v7984_v63 = vld [vmem:[%s8402_s9 + $0x2e8] sm:$0xff]  }
0x2cd3   :  { %v5265_v11 = vmax.f32 %v5191_v38, 0.0  ;;  %v5267_v53 = vmax.f32 %v5234_v20, 0.0  ;;  %v7978_v40 = vld [vmem:[%s8402_s9 + $0x298] sm:$0xff]   ;;  %v7982_v46 = vld [vmem:[%s8402_s9 + $0x2a0] sm:$0xff]   ;;  %v7985_v59 = vld [vmem:[%s8402_s9 + $0x228] sm:$0xff]  }
0x2cd4   :  { %v9490_v58 = vpack.c.bf16 %v5264_v33, %v5248_v41  ;;  %v9492_v23 = vpack.c.bf16 %v5266_v37, %v5250_v31  ;;  %v7986_v56 = vld [vmem:[%s8402_s9 + $0x2a8] sm:$0xff]   ;;  %v7987_v12 = vld [vmem:[%s8402_s9 + $0x270] sm:$0xff]   ;;  %v7991_v19 = vld [vmem:[%s8402_s9 + $0x278] sm:$0xff]  }
0x2cd5   :  { %v9494_v61 = vpack.c.bf16 %v5265_v11, %v5249_v43  ;;  %v9496_v62 = vpack.c.bf16 %v5267_v53, %v5251_v57  ;;  %7195 = vmatpush3.bf16.msra.mxu0 %v7953_v7  ;;  %7217 = vmatpush3.bf16.msra.mxu1 %v7954_v18  ;;  %v7988_v34 = vld [vmem:[%s8402_s9 + $0x2f0] sm:$0xff]   ;;  %v7992_v17 = vld [vmem:[%s8402_s9 + $0x2f8] sm:$0xff]   ;;  %v7995_v24 = vld [vmem:[%s8402_s9 + $0x340] sm:$0xff]  }
0x2cd6   :  { %7196 = vmatprep.subr.bf16.mxu0 %v7955_v42  ;;  %7218 = vmatprep.subr.bf16.mxu1 %v7956_v29  ;;  %v7989_v51 = vld [vmem:[%s8402_s9 + $0x230] sm:$0xff]   ;;  %v7993_v21 = vld [vmem:[%s8402_s9 + $0x238] sm:$0xff]   ;;  %v7996_v9 = vld [vmem:[%s8402_s9 + $0x3c0] sm:$0xff]  }
0x2cd7   :  { %v7990_v5 = vld [vmem:[%s8402_s9 + $0x2b0] sm:$0xff]   ;;  %v7994_v16 = vld [vmem:[%s8402_s9 + $0x2b8] sm:$0xff]   ;;  %v7997_v22 = vld [vmem:[%s8402_s9 + $0x300] sm:$0xff]  }
0x2cd8   :  { %v7998_v35 = vld [vmem:[%s8402_s9 + $0x380] sm:$0xff]   ;;  %v7999_v38 = vld [vmem:[%s8402_s9 + $0x348] sm:$0xff]   ;;  %v8003_v41 = vld [vmem:[%s8402_s9 + $0x350] sm:$0xff]  }
0x2cd9   :  { %7197 = vmatpush3.bf16.msra.mxu0 %v7957_v14  ;;  %7219 = vmatpush3.bf16.msra.mxu1 %v7958_v48  ;;  %v8000_v20 = vld [vmem:[%s8402_s9 + $0x3c8] sm:$0xff]   ;;  %v8006_v31 = vld [vmem:[%s8402_s9 + $0x390] sm:$0xff]   ;;  %v8007_v33 = vld [vmem:[%s8402_s9 + $0x358] sm:$0xff]  }
0x2cda   :  { %7198 = vmatprep.subr.bf16.mxu0 %v7959_v1  ;;  %7220 = vmatprep.subr.bf16.mxu1 %v7960_v13  ;;  %v8001_v7 = vld [vmem:[%s8402_s9 + $0x308] sm:$0xff]   ;;  %v8008_v37 = vld [vmem:[%s8402_s9 + $0x3d8] sm:$0xff]   ;;  %v8011_v43 = vld [vmem:[%s8402_s9 + $0x360] sm:$0xff]  }
0x2cdb   :  { %v8002_v18 = vld [vmem:[%s8402_s9 + $0x388] sm:$0xff]   ;;  %v8009_v42 = vld [vmem:[%s8402_s9 + $0x318] sm:$0xff]   ;;  %v8012_v57 = vld [vmem:[%s8402_s9 + $0x3e0] sm:$0xff]  }
0x2cdc   :  { %v8010_v29 = vld [vmem:[%s8402_s9 + $0x398] sm:$0xff]   ;;  %v8013_v11 = vld [vmem:[%s8402_s9 + $0x320] sm:$0xff]   ;;  %v8017_v14 = vld [vmem:[%s8402_s9 + $0x328] sm:$0xff]  }
0x2cdd   :  { %7199 = vmatpush3.bf16.msra.mxu0 %v7961_v0  ;;  %7221 = vmatpush3.bf16.msra.mxu1 %v7962_v54  ;;  %v8014_v53 = vld [vmem:[%s8402_s9 + $0x3a0] sm:$0xff]   ;;  %v8018_v48 = vld [vmem:[%s8402_s9 + $0x3a8] sm:$0xff]   ;;  %v8019_v1 = vld [vmem:[%s8402_s9 + $0x370] sm:$0xff]  }
0x2cde   :  { %7228 = vmatprep.subr.bf16.mxu0 %v7963_v2  ;;  %7250 = vmatprep.subr.bf16.mxu1 %v7964_v3  ;;  %v8020_v13 = vld [vmem:[%s8402_s9 + $0x3f0] sm:$0xff]   ;;  %v8023_v2 = vld [vmem:[%s8402_s9 + $0x378] sm:$0xff]  }
0x2cdf   :  { %v8021_v0 = vld [vmem:[%s8402_s9 + $0x330] sm:$0xff]   ;;  %v8024_v3 = vld [vmem:[%s8402_s9 + $0x3f8] sm:$0xff]  }
0x2ce0   :  { %6430 = vmatmul.mubr.bf16.vlgmr.msra.gmra.mrb[164].mxu0 %v9451_v39  ;;  %6471 = vmatmul.mubr.bf16.vlgmr.msra.gmra.mrb[164].mxu1 %v9453_v6  ;;  %v7972_v39 = vld [vmem:[%s8402_s9 + $0x2d0] sm:$0xff]  }
0x2ce1   :  { %7229 = vmatpush3.bf16.msra.mxu0 %v7965_v4  ;;  %6511 = vmatprep.mubr.bf16.mxu0 %v9476_v28  ;;  %v7973_v6 = vld [vmem:[%s8402_s9 + $0x210] sm:$0xff]   ;;  %v7979_v28 = vld [vmem:[%s8402_s9 + $0x260] sm:$0xff]   ;;  %v8025_v4 = vld [vmem:[%s8402_s9 + $0x338] sm:$0xff]  }
0x2ce2   :  { %7251 = vmatpush3.bf16.msra.mxu1 %v7966_v52  ;;  %6552 = vmatprep.mubr.bf16.mxu1 %v9478_v50  ;;  %v7980_v50 = vld [vmem:[%s8402_s9 + $0x2e0] sm:$0xff]   ;;  %v8022_v54 = vld [vmem:[%s8402_s9 + $0x3b0] sm:$0xff]   ;;  %v8026_v52 = vld [vmem:[%s8402_s9 + $0x3b8] sm:$0xff]  }
0x2ce3   :  { %7230 = vmatprep.subr.bf16.mxu0 %v7967_v26  ;;  %7252 = vmatprep.subr.bf16.mxu1 %v7968_v55 }
0x2ce5   :  { %7231 = vmatpush3.bf16.msra.mxu0 %v7969_v27  ;;  %v6847_v27 = vld [vmem:[%s8407_s3] ss:$0 sm:$0xff] }
0x2ce6   :  { %7253 = vmatpush3.bf16.msra.mxu1 %v7970_v10  ;;  %7232 = vmatprep.subr.bf16.mxu0 %v7971_v47 }
0x2ce7   :  { %7254 = vmatprep.subr.bf16.mxu1 %v7972_v39 }
0x2ce9   :  { %7233 = vmatpush3.bf16.msra.mxu0 %v7973_v6 }
0x2cea   :  { %7255 = vmatpush3.bf16.msra.mxu1 %v7974_v49  ;;  %7234 = vmatprep.subr.bf16.mxu0 %v7975_v15 }
0x2ceb   :  { %7256 = vmatprep.subr.bf16.mxu1 %v7976_v25 }
0x2ced   :  { %7235 = vmatpush3.bf16.msra.mxu0 %v7977_v36 }
0x2cee   :  { %7257 = vmatpush3.bf16.msra.mxu1 %v7978_v40  ;;  %7236 = vmatprep.subr.bf16.mxu0 %v7979_v28 }
0x2cef   :  { %7258 = vmatprep.subr.bf16.mxu1 %v7980_v50 }
0x2cf1   :  { %7237 = vmatpush3.bf16.msra.mxu0 %v7981_v45 }
0x2cf2   :  { %7259 = vmatpush3.bf16.msra.mxu1 %v7982_v46  ;;  %7238 = vmatprep.subr.bf16.mxu0 %v7983_v32 }
0x2cf3   :  { %7260 = vmatprep.subr.bf16.mxu1 %v7984_v63 }
0x2cf5   :  { %7239 = vmatpush3.bf16.msra.mxu0 %v7985_v59 }
0x2cf6   :  { %7261 = vmatpush3.bf16.msra.mxu1 %v7986_v56  ;;  %7240 = vmatprep.subr.bf16.mxu0 %v7987_v12 }
0x2cf7   :  { %7262 = vmatprep.subr.bf16.mxu1 %v7988_v34 }
0x2cf9   :  { %7241 = vmatpush3.bf16.msra.mxu0 %v7989_v51 }
0x2cfa   :  { %7263 = vmatpush3.bf16.msra.mxu1 %v7990_v5  ;;  %7242 = vmatprep.subr.bf16.mxu0 %v7991_v19 }
0x2cfb   :  { %7264 = vmatprep.subr.bf16.mxu1 %v7992_v17 }
0x2cfd   :  { %7243 = vmatpush3.bf16.msra.mxu0 %v7993_v21 }
0x2cfe   :  { %7265 = vmatpush3.bf16.msra.mxu1 %v7994_v16  ;;  %7272 = vmatprep.subr.bf16.mxu0 %v7995_v24 }
0x2cff   :  { %7294 = vmatprep.subr.bf16.mxu1 %v7996_v9 }
0x2d00   :  { %6512 = vmatmul.mubr.bf16.vlgmr.msra.gmra.mrb[168].mxu0 %v9472_v44  ;;  %v8004_v44 = vld [vmem:[%s8402_s9 + $0x3d0] sm:$0xff]  }
0x2d01   :  { %6553 = vmatmul.mubr.bf16.vlgmr.msra.gmra.mrb[168].mxu1 %v9474_v30  ;;  %7273 = vmatpush3.bf16.msra.mxu0 %v7997_v22  ;;  %v8005_v30 = vld [vmem:[%s8402_s9 + $0x310] sm:$0xff]  }
0x2d02   :  { %6593 = vmatprep.mubr.bf16.mxu0 %v9494_v61  ;;  %7295 = vmatpush3.bf16.msra.mxu1 %v7998_v35  ;;  %v8015_v61 = vld [vmem:[%s8402_s9 + $0x368] sm:$0xff]  }
0x2d03   :  { %6634 = vmatprep.mubr.bf16.mxu1 %v9496_v62  ;;  %7274 = vmatprep.subr.bf16.mxu0 %v7999_v38  ;;  %v8016_v62 = vld [vmem:[%s8402_s9 + $0x3e8] sm:$0xff]   ;;  %s8252_s9 = smov [#allocation2]  }
0x2d04   :  { %7296 = vmatprep.subr.bf16.mxu1 %v8000_v20  ;;  %s6652_s3 = sshll.u32 %s8252_s9, 4  ;;  %s6653_s3 = int_to_ptr.vmem [resolvable:$true] %s6652_s3 }
0x2d05   :  { %7275 = vmatpush3.bf16.msra.mxu0 %v8001_v7  ;;  %s8181_s8 = scalar_lea.vmem %s6653_s3, 256  ;;  %p8186_p1 = scmp.lt.s32.totalorder %s6653_s3, %s6653_s3 }
0x2d06   :  { %7297 = vmatpush3.bf16.msra.mxu1 %v8002_v18  ;;  %7276 = vmatprep.subr.bf16.mxu0 %v8003_v41  ;;  %p8182_p0 = scmp.ne.s32.totalorder %s6653_s3, %s8181_s8  ;;  %p8187_p2 = scmp.lt.s32.totalorder %s8181_s8, %s8181_s8 }
0x2d07   :  { %7298 = vmatprep.subr.bf16.mxu1 %v8004_v44 }
0x2d08   :  { %p8188_p3 = por %p8187_p2, %p8186_p1 }
0x2d09   :  { %7277 = vmatpush3.bf16.msra.mxu0 %v8005_v30 }
0x2d0a   :  { %7299 = vmatpush3.bf16.msra.mxu1 %v8006_v31  ;;  %7278 = vmatprep.subr.bf16.mxu0 %v8007_v33  ;;  %p8189_p4 = pnand %p8188_p3, %p8182_p0 }
0x2d0b   :  { %7300 = vmatprep.subr.bf16.mxu1 %v8008_v37 }
0x2d0d   :  { %7279 = vmatpush3.bf16.msra.mxu0 %v8009_v42 }
0x2d0e   :  { %7301 = vmatpush3.bf16.msra.mxu1 %v8010_v29  ;;  %7280 = vmatprep.subr.bf16.mxu0 %v8011_v43 }
0x2d0f   :  { %7302 = vmatprep.subr.bf16.mxu1 %v8012_v57 }
0x2d11   :  { %7281 = vmatpush3.bf16.msra.mxu0 %v8013_v11 }
0x2d12   :  { %7303 = vmatpush3.bf16.msra.mxu1 %v8014_v53  ;;  %7282 = vmatprep.subr.bf16.mxu0 %v8015_v61 }
0x2d13   :  { %7304 = vmatprep.subr.bf16.mxu1 %v8016_v62 }
0x2d15   :  { %7283 = vmatpush3.bf16.msra.mxu0 %v8017_v14 }
0x2d16   :  { %7305 = vmatpush3.bf16.msra.mxu1 %v8018_v48  ;;  %7284 = vmatprep.subr.bf16.mxu0 %v8019_v1 }
0x2d17   :  { %7306 = vmatprep.subr.bf16.mxu1 %v8020_v13 }
0x2d19   :  { %7285 = vmatpush3.bf16.msra.mxu0 %v8021_v0 }
0x2d1a   :  { %7307 = vmatpush3.bf16.msra.mxu1 %v8022_v54  ;;  %7286 = vmatprep.subr.bf16.mxu0 %v8023_v2 }
0x2d1b   :  { %7308 = vmatprep.subr.bf16.mxu1 %v8024_v3 }
0x2d1d   :  { %7287 = vmatpush3.bf16.msra.mxu0 %v8025_v4 }
0x2d1e   :  { %7309 = vmatpush3.bf16.msra.mxu1 %v8026_v52 }
0x2d20   :  { %6594 = vmatmul.mubr.bf16.vlgmr.msra.gmra.mrb[172].mxu0 %v9490_v58 }
0x2d21   :  { %6635 = vmatmul.mubr.bf16.vlgmr.msra.gmra.mrb[172].mxu1 %v9492_v23 }
0x2d93   :  { %v7156_v26 = vpop.f32.mrb[160].mxu0  ;;  %v7178_v55 = vpop.f32.mrb[160].mxu1 }
0x2d94   :  { %v7157_v10 = vpop.f32.mrb[161].mxu0  ;;  %v7179_v47 = vpop.f32.mrb[161].mxu1 }
0x2d95   :  { %v7158_v39 = vadd.f32 %v7157_v10, %v7156_v26  ;;  %v7180_v6 = vadd.f32 %v7179_v47, %v7178_v55  ;;  %v7159_v49 = vpop.f32.mrb[162].mxu0  ;;  %v7181_v15 = vpop.f32.mrb[162].mxu1 }
0x2d96   :  { %v7160_v25 = vpop.f32.mrb[163].mxu0  ;;  %v7182_v36 = vpop.f32.mrb[163].mxu1 }
0x2d97   :  { %v6350_v40 = vadd.f32 %v7158_v39, %v6847_v27  ;;  %v7161_v28 = vadd.f32 %v7160_v25, %v7159_v49  ;;  %v7183_v50 = vadd.f32 %v7182_v36, %v7181_v15 }
0x2d99   :  { %v6391_v45 = vadd.f32 %v7180_v6, %v6350_v40  ;;  %v6353_v46 = vadd.f32 %v7161_v28, %v6847_v27 }
0x2d9b   :  { %v6394_v32 = vadd.f32 %v7183_v50, %v6353_v46 }
0x2db3   :  { %v7200_v58 = vpop.f32.mrb[164].mxu0  ;;  %v7222_v63 = vpop.f32.mrb[164].mxu1 }
0x2db4   :  { %v7201_v23 = vpop.f32.mrb[165].mxu0  ;;  %v7223_v59 = vpop.f32.mrb[165].mxu1 }
0x2db5   :  { %v7202_v56 = vadd.f32 %v7201_v23, %v7200_v58  ;;  %v7224_v12 = vadd.f32 %v7223_v59, %v7222_v63  ;;  %v7203_v34 = vpop.f32.mrb[166].mxu0  ;;  %v7225_v51 = vpop.f32.mrb[166].mxu1 }
0x2db6   :  { %v7204_v5 = vpop.f32.mrb[167].mxu0  ;;  %v7226_v19 = vpop.f32.mrb[167].mxu1 }
0x2db7   :  { %v6432_v17 = vadd.f32 %v7202_v56, %v6391_v45  ;;  %v7205_v21 = vadd.f32 %v7204_v5, %v7203_v34  ;;  %v7227_v16 = vadd.f32 %v7226_v19, %v7225_v51 }
0x2db9   :  { %v6473_v24 = vadd.f32 %v7224_v12, %v6432_v17  ;;  %v6435_v9 = vadd.f32 %v7205_v21, %v6394_v32 }
0x2dbb   :  { %v6476_v22 = vadd.f32 %v7227_v16, %v6435_v9 }
0x2dd3   :  { %v7244_v35 = vpop.f32.mrb[168].mxu0 }
0x2dd4   :  { %v7266_v38 = vpop.f32.mrb[168].mxu1  ;;  %v7245_v20 = vpop.f32.mrb[169].mxu0 }
0x2dd5   :  { %v7246_v7 = vadd.f32 %v7245_v20, %v7244_v35  ;;  %v7267_v18 = vpop.f32.mrb[169].mxu1  ;;  %v7247_v41 = vpop.f32.mrb[170].mxu0 }
0x2dd6   :  { %v7268_v44 = vadd.f32 %v7267_v18, %v7266_v38  ;;  %v7269_v30 = vpop.f32.mrb[170].mxu1  ;;  %v7248_v31 = vpop.f32.mrb[171].mxu0 }
0x2dd7   :  { %v6514_v33 = vadd.f32 %v7246_v7, %v6473_v24  ;;  %v7249_v37 = vadd.f32 %v7248_v31, %v7247_v41  ;;  %v7270_v42 = vpop.f32.mrb[171].mxu1 }
0x2dd8   :  { %v7271_v29 = vadd.f32 %v7270_v42, %v7269_v30 }
0x2dd9   :  { %v6555_v43 = vadd.f32 %v7268_v44, %v6514_v33  ;;  %v6517_v57 = vadd.f32 %v7249_v37, %v6476_v22 }
0x2ddb   :  { %v6558_v11 = vadd.f32 %v7271_v29, %v6517_v57 }
0x2df3   :  { %v7288_v53 = vpop.f32.mrb[172].mxu0 }
0x2df4   :  { %v7310_v61 = vpop.f32.mrb[172].mxu1  ;;  %v7289_v62 = vpop.f32.mrb[173].mxu0 }
0x2df5   :  { %v7290_v14 = vadd.f32 %v7289_v62, %v7288_v53  ;;  %v7311_v48 = vpop.f32.mrb[173].mxu1  ;;  %v7291_v1 = vpop.f32.mrb[174].mxu0 }
0x2df6   :  { %v7312_v13 = vadd.f32 %v7311_v48, %v7310_v61  ;;  %v7313_v0 = vpop.f32.mrb[174].mxu1  ;;  %v7292_v54 = vpop.f32.mrb[175].mxu0 }
0x2df7   :  { %v6596_v2 = vadd.f32 %v7290_v14, %v6555_v43  ;;  %v7293_v3 = vadd.f32 %v7292_v54, %v7291_v1  ;;  %v7314_v4 = vpop.f32.mrb[175].mxu1 }
0x2df8   :  { %v7315_v52 = vadd.f32 %v7314_v4, %v7313_v0 }
0x2df9   :  { %v6637_v26 = vadd.f32 %v7312_v13, %v6596_v2  ;;  %v6599_v55 = vadd.f32 %v7293_v3, %v6558_v11 }
0x2dfb   :  { %v6643_v27 = vadd.f32 %v6637_v26, %v9292_v8  ;;  %v6640_v10 = vadd.f32 %v7315_v52, %v6599_v55 }
0x2dfd   :  { %6645 = vst.msk [vmem:[#allocation2] sm:$0xff] %vm144_vm0, %v6643_v27  ;;  %v6644_v47 = vadd.f32 %v6640_v10, %v9295_v60 }
0x2dff   :  { %6646 = vst.msk [vmem:[#allocation2 + $0x8] sm:$0xff] %vm144_vm0, %v6644_v47 }
0x2e00   :  { %8192 = shalt.err (!%p8189_p4)
}
0x2e01   :  { %s8193_s0 = scalar_lea.hbm %s8412_s29, 256 }
0x2e02   :  { %p8194_p5 = scmp.ne.s32.totalorder %s8412_s29, %s8193_s0  ;;  %p8197_p6 = scmp.lt.u32.totalorder %s8193_s0, %s8412_s29 }
0x2e04   :  { %p8199_p7 = pnand %p8197_p6, %p8194_p5 }
0x2e06   :  { %8202 = shalt.err (!%p8199_p7)
}
0x2e07   :  { %s8253_s13 = smov 128  }
0x2e08   :  { %6658 = dma.vmem_to_hbm [thread:$0]  %s6653_s3, 256, %s8412_s29, [#allocation3], %s8253_s13, %s8253_s13, %s8245_s12  }
0x2e09   :  { %8203 = dma.done.wait [#allocation3], 256  }
0x2e0a   :  { %8204 = vsyncadd [#allocation3], 4294967040 }
0x2e0b   :  { %6662 = vsyncpa [#allocation3], 1 }

// kernel: tpu_custom_call.1
= control target key start
LH: loop header
LB: loop body
LE: loop exit
PB: predicated region body
PF: predicated region fallthrough
CT: control target
= control target key end

     0   :  { %s8205_s6 = smov 1   ;;  %s8206_s10 = smov 2   ;;  %s9588_s0 = inlined_call_operand.smem [shape: u32[31], index: -1, kind: input, shape index: {}] }
   0x1   :  { %s8262_s5 = sld [smem:[%s9588_s0]]   ;;  %s8207_s14 = smov 3  }
   0x2   :  { %s8267_s9 = sld [smem:[%s9588_s0 + %s8205_s6]]   ;;  %s8208_s18 = smov 4  }
   0x3   :  { %s8272_s13 = sld [smem:[%s9588_s0 + %s8206_s10]]   ;;  %s8209_s22 = smov 5  }
   0x4   :  { %s8277_s17 = sld [smem:[%s9588_s0 + %s8207_s14]]   ;;  %s8210_s26 = smov 6  }
   0x5   :  { %s8282_s21 = sld [smem:[%s9588_s0 + %s8208_s18]]   ;;  %s8211_s30 = smov 7  }
   0x6   :  { %s8287_s25 = sld [smem:[%s9588_s0 + %s8209_s22]]   ;;  %s8212_s4 = smov 8  }
   0x7   :  { %s8292_s29 = sld [smem:[%s9588_s0 + %s8210_s26]]   ;;  %s8213_s10 = smov 9  }
   0x8   :  { %9594 = sst [smem:[#allocation5_spill]] %s8267_s9  ;;  %s8214_s15 = smov 10  }
   0x9   :  { %s8297_s3 = sld [smem:[%s9588_s0 + %s8211_s30]]   ;;  %s8215_s20 = smov 11  }
   0xa   :  { %9595 = sst [smem:[#allocation6_spill]] %s8277_s17  ;;  %s8216_s26 = smov 12  }
   0xb   :  { %s8302_s8 = sld [smem:[%s9588_s0 + %s8212_s4]]   ;;  %s8217_s1 = smov 13  }
   0xc   :  { %s8307_s14 = sld [smem:[%s9588_s0 + %s8213_s10]]   ;;  %s8218_s7 = smov 14  }
   0xd   :  { %9596 = sst [smem:[#allocation7_spill]] %s8292_s29  ;;  %s8220_s22 = smov 16  }
   0xe   :  { %s8312_s19 = sld [smem:[%s9588_s0 + %s8214_s15]]   ;;  %s8219_s15 = smov 15  }
   0xf   :  { %9597 = sst [smem:[#allocation8_spill]] %s8297_s3  ;;  %s8221_s28 = smov 17  }
  0x10   :  { %s8317_s24 = sld [smem:[%s9588_s0 + %s8215_s20]]  }
  0x11   :  { %9598 = sst [smem:[#allocation9_spill]] %s8302_s8 }
  0x12   :  { %9599 = sst [smem:[#allocation10_spill]] %s8307_s14 }
  0x13   :  { %s8322_s30 = sld [smem:[%s9588_s0 + %s8216_s26]]  }
  0x14   :  { %s8327_s6 = sld [smem:[%s9588_s0 + %s8217_s1]]  }
  0x15   :  { %s8332_s12 = sld [smem:[%s9588_s0 + %s8218_s7]]   ;;  %s8222_s7 = smov 18  }
  0x16   :  { %s8337_s20 = sld [smem:[%s9588_s0 + %s8219_s15]]   ;;  %s8223_s15 = smov 19  }
  0x17   :  { %s8342_s27 = sld [smem:[%s9588_s0 + %s8220_s22]]   ;;  %s8224_s22 = smov 20  }
  0x18   :  { %s8347_s4 = sld [smem:[%s9588_s0 + %s8221_s28]]   ;;  %s8225_s28 = smov 21  }
  0x19   :  { %s8352_s14 = sld [smem:[%s9588_s0 + %s8222_s7]]   ;;  %s8226_s7 = smov 22  }
  0x1a   :  { %s8357_s8 = sld [smem:[%s9588_s0 + %s8223_s15]]   ;;  %s8227_s15 = smov 23  }
  0x1b   :  { %s8362_s17 = sld [smem:[%s9588_s0 + %s8224_s22]]   ;;  %s8228_s22 = smov 24  }
  0x1c   :  { %s8367_s3 = sld [smem:[%s9588_s0 + %s8225_s28]]   ;;  %s8229_s28 = smov 25  }
  0x1d   :  { %s8372_s29 = sld [smem:[%s9588_s0 + %s8226_s7]]   ;;  %s8230_s7 = smov 26  }
  0x1e   :  { %s8382_s9 = sld [smem:[%s9588_s0 + %s8228_s22]]   ;;  %s8232_s22 = smov 28  }
  0x20   :  { %9600 = sst [smem:[#allocation11_spill]] %s8357_s8 }
  0x21   :  { %s8377_s8 = sld [smem:[%s9588_s0 + %s8227_s15]]   ;;  %s8231_s15 = smov 27  }
  0x22   :  { %9601 = sst [smem:[#allocation12_spill]] %s8367_s3 }
  0x23   :  { %9602 = sst [smem:[#allocation13_spill]] %s8372_s29 }
  0x24   :  { %9604 = sst [smem:[#allocation15_spill]] %s8382_s9 }
  0x25   :  { %s8387_s3 = sld [smem:[%s9588_s0 + %s8229_s28]]   ;;  %s8233_s28 = smov 29  }
  0x26   :  { %s8392_s29 = sld [smem:[%s9588_s0 + %s8230_s7]]   ;;  %s8234_s7 = smov 30  }
  0x27   :  { %9603 = sst [smem:[#allocation14_spill]] %s8377_s8 }
  0x28   :  { %s8397_s8 = sld [smem:[%s9588_s0 + %s8231_s15]]  }
  0x29   :  { %s8402_s9 = sld [smem:[%s9588_s0 + %s8232_s22]]  }
  0x2b   :  { %9605 = sst [smem:[#allocation16_spill]] %s8387_s3 }
  0x2c   :  { %9606 = sst [smem:[#allocation17_spill]] %s8392_s29 }
  0x2d   :  { %s8407_s3 = sld [smem:[%s9588_s0 + %s8233_s28]]  }
  0x2e   :  { %s8412_s29 = sld [smem:[%s9588_s0 + %s8234_s7]]  }
  0x2f   :  { %v128_v0 = vld [vmem:[%s8262_s5] sm:$0xff]  ;;  %vm144_vm0 = vcmask 261120   ;;  %v129_v1 = vld [vmem:[%s8262_s5 + $0x8] sm:$0xff] }
  0x30   :  { %v145_v2 = vsel %vm144_vm0, %v128_v0, 0.0  ;;  %v148_v3 = vsel %vm144_vm0, %v129_v1, 0.0 }
  0x31   :  { %146 = vadd.xlane.f32.xlu0 %v145_v2 }
  0x35   :  { %149 = vadd.xlane.f32.xlu0 %v148_v3 }
  0x36   :  { %66 = vsyncpa [#allocation3], 0  ;;  %v7883_v14 = vld [vmem:[%s8312_s19] sm:$0xff]   ;;  %v8235_v16 = vmov 0.0   ;;  %v7885_v17 = vld [vmem:[%s8312_s19 + $0x8] sm:$0xff]   ;;  %vm8236_vm1 = vmmov 0  }
  0x37   :  { %v7884_v15 = vld [vmem:[%s8322_s30] sm:$0xff]   ;;  %7316 = vmatprep.subr.bf16.mxu0 %v8235_v16  ;;  %7324 = vmatprep.subr.bf16.mxu1 %v8235_v16  ;;  %v7886_v18 = vld [vmem:[%s8322_s30 + $0x8] sm:$0xff]   ;;  %vm418_vm6 = vcmask 31744   ;;  %vm543_vm7 = vcmask 1043456   ;;  %vm515_vm10 = vcmask 64512   ;;  %s8237_s0 = smov 124  }
  0x38   :  { %7317 = vmatpush3.bf16.msra.mxu0 %v7883_v14  ;;  %7325 = vmatpush3.bf16.msra.mxu1 %v7884_v15  ;;  %v6693_v35 = vld [vmem:[%s8282_s21] ss:$0 sm:$0xff]  ;;  %v7888_v47 = vld [vmem:[%s8332_s12 + $0x8] sm:$0xff]   ;;  %s8239_s21 = smov 116   ;;  %s8241_s19 = smov 108   ;;  %vm2261_vm11 = vcmask 97280  }
  0x39   :  { %7318 = vmatprep.subr.bf16.mxu0 %v8235_v16  ;;  %7326 = vmatprep.subr.bf16.mxu1 %v8235_v16  ;;  %v6694_v41 = vld [vmem:[%s8287_s25] ss:$0 sm:$0xff]  ;;  %s8240_s25 = smov 112   ;;  %s8243_s30 = smov 100   ;;  %vm2264_vm12 = vcmask 130048   ;;  %vm2267_vm13 = vcmask 162816  }
  0x3a   :  { %7320 = vmatprep.mubr.msk.bf16.mxu0 %vm8236_vm1, %v8235_v16  ;;  %7328 = vmatprep.mubr.msk.bf16.mxu1 %vm8236_vm1, %v8235_v16  ;;  %v7887_v45 = vld [vmem:[%s8332_s12] sm:$0xff]   ;;  %s8245_s12 = smov 8   ;;  %s8247_s15 = smov 24   ;;  %vm2270_vm14 = vcmask 195584   ;;  %vm2273_vm15 = vcmask 228352  }
  0x3b   :  { %v6699_v48 = vld [vmem:[%s8327_s6] ss:$0 sm:$0xff]  ;;  %s8244_s6 = smov 4   ;;  %s8248_s16 = smov 12  }
  0x3c   :  { %7319 = vmatpush3.bf16.msra.mxu0 %v7885_v17  ;;  %7327 = vmatpush3.bf16.msra.mxu1 %v7886_v18  ;;  %v6695_v60 = vld [vmem:[%s8317_s24] ss:$0 sm:$0xff]  ;;  %v133_v17 = vld [vmem:[%s8272_s13 + $0x8] sm:$0xff]  ;;  %s8242_s24 = smov 104   ;;  %s8249_s18 = smov 20  }
  0x3d   :  { %7332 = vmatprep.subr.bf16.mxu0 %v8235_v16  ;;  %7340 = vmatprep.subr.bf16.mxu1 %v8235_v16  ;;  %v6703_v63 = vld [vmem:[%s8337_s20] ss:$0 sm:$0xff]  ;;  %vm135_vm9 = vcmp.eq.f32.partialorder %v133_v17, 0.0  ;;  %s8246_s20 = smov 16   ;;  %s8250_s22 = smov 28  }
  0x3e   :  { %v132_v15 = vld [vmem:[%s8272_s13] sm:$0xff]  ;;  %s8238_s13 = smov 120   ;;  %s9612_s23 = sld [smem:[#allocation11_spill]] }
  0x3f   :  { %vm134_vm8 = vcmp.eq.f32.partialorder %v132_v15, 0.0  ;;  %s9613_s26 = sld [smem:[#allocation14_spill]]  ;;  %s9615_s1 = sld [smem:[#allocation15_spill]] }
  0x40   :  { %s9614_s28 = sld [smem:[#allocation6_spill]]  ;;  %s9616_s2 = sld [smem:[#allocation16_spill]] }
  0x41   :  { %s9617_s7 = sld [smem:[#allocation17_spill]]  ;;  %s9619_s11 = sld [smem:[#allocation10_spill]] }
  0x42   :  { %s9618_s10 = sld [smem:[#allocation9_spill]] }
  0xbe   :  { %v147_v4 = vpop.xlane.xlu0 %146 }
  0xbf   :  { %v152_v5 = vmul.f32 0.03125, %v147_v4 }
  0xc1   :  { %v154_v6 = vsub.f32 %v128_v0, %v152_v5 }
  0xc2   :  { %v150_v7 = vpop.xlane.xlu0 %149 }
  0xc3   :  { %v153_v8 = vmul.f32 0.03125, %v150_v7  ;;  %v156_v9 = vmul.f32 %v154_v6, %v154_v6 }
  0xc5   :  { %v155_v10 = vsub.f32 %v129_v1, %v153_v8  ;;  %v158_v11 = vsel %vm144_vm0, %v156_v9, 0.0 }
  0xc6   :  { %159 = vadd.xlane.f32.xlu1 %v158_v11 }
  0xc7   :  { %v157_v12 = vmul.f32 %v155_v10, %v155_v10 }
  0xc9   :  { %v161_v13 = vsel %vm144_vm0, %v157_v12, 0.0 }
  0xca   :  { %162 = vadd.xlane.f32.xlu1 %v161_v13 }
 0x153   :  { %v160_v19 = vpop.xlane.xlu1 %159 }
 0x154   :  { %v164_v20 = vmul.f32 0.032258064, %v160_v19  ;;  %v8487_v19 = vsel %vm134_vm8, -1e+09, %v8235_v16 }
 0x156   :  { %8027 = vrsqrt.f32 %v164_v20  ;;  %vm168_vm2 = vcmp.eq.f32.partialorder %v164_v20, inf  ;;  %v171_v25 = vand.u32 2147483648, %v164_v20  ;;  %vm170_vm3 = vcmp.eq.f32.partialorder %v164_v20, 0.0 }
 0x157   :  { %v163_v21 = vpop.xlane.xlu1 %162 }
 0x158   :  { %v165_v22 = vmul.f32 0.032258064, %v163_v21 }
 0x15a   :  { %8029 = vrsqrt.f32 %v165_v22  ;;  %vm175_vm4 = vcmp.eq.f32.partialorder %v165_v22, inf  ;;  %v178_v31 = vand.u32 2147483648, %v165_v22  ;;  %vm177_vm5 = vcmp.eq.f32.partialorder %v165_v22, 0.0 }
 0x160   :  { %v8028_v23 = vpop.eup %8027 }
 0x161   :  { %v167_v24 = vmul.f32 %v8028_v23, %v164_v20 }
 0x163   :  { %v169_v26 = vsel %vm168_vm2, %v164_v20, %v167_v24  ;;  %v8490_v24 = vsel %vm135_vm9, -1e+09, %v8235_v16 }
 0x164   :  { %v8030_v27 = vpop.eup %8029  ;;  %v172_v28 = vsel %vm170_vm3, %v171_v25, %v169_v26 }
 0x165   :  { %v180_v29 = vadd.f32 1e-06, %v172_v28  ;;  %v174_v30 = vmul.f32 %v8030_v27, %v165_v22 }
 0x167   :  { %8031 = vrcp.f32 %v180_v29  ;;  %v176_v32 = vsel %vm175_vm4, %v165_v22, %v174_v30 }
 0x168   :  { %v179_v33 = vsel %vm177_vm5, %v178_v31, %v176_v32 }
 0x169   :  { %v181_v34 = vadd.f32 1e-06, %v179_v33 }
 0x16b   :  { %8033 = vrcp.f32 %v181_v34 }
 0x171   :  { %v8032_v36 = vpop.eup %8031 }
 0x172   :  { %v191_v37 = vmul.f32 %v8032_v36, %v6693_v35 }
 0x174   :  { %v193_v40 = vmul.f32 %v191_v37, %v154_v6 }
 0x175   :  { %v8034_v38 = vpop.eup %8033 }
 0x176   :  { %v192_v39 = vmul.f32 %v8034_v38, %v6693_v35  ;;  %v202_v43 = vadd.f32 %v6694_v41, %v193_v40 }
 0x178   :  { %v194_v42 = vmul.f32 %v192_v39, %v155_v10 }
 0x17a   :  { %v203_v44 = vadd.f32 %v6694_v41, %v194_v42 }
 0x17c   :  { %v204_v46 = vpack.c.bf16 %v203_v44, %v202_v43 }
 0x17e   :  { %7321 = vmatmul.mubr.msk.bf16.vlgmr.msra.gmra.mrb[0].mxu0 %vm144_vm0, %v204_v46  ;;  %7329 = vmatmul.mubr.msk.bf16.vlgmr.msra.gmra.mrb[0].mxu1 %vm144_vm0, %v204_v46 }
 0x17f   :  { %7333 = vmatpush3.bf16.msra.mxu0 %v7887_v45  ;;  %7336 = vmatprep.mubr.msk.bf16.mxu0 %vm8236_vm1, %v8235_v16 }
 0x180   :  { %7334 = vmatprep.subr.bf16.mxu0 %v8235_v16  ;;  %7342 = vmatprep.mubr.msk.bf16.mxu1 %vm8236_vm1, %v8235_v16 }
 0x183   :  { %7335 = vmatpush3.bf16.msra.mxu0 %v7888_v47 }
 0x184   :  { %7346 = vmatprep.subr.bf16.mxu0 %v8235_v16 }
 0x186   :  { %7337 = vmatmul.mubr.msk.bf16.vlgmr.msra.gmra.mrb[4].mxu0 %vm144_vm0, %v204_v46 }
 0x187   :  { %7348 = vmatprep.mubr.msk.bf16.mxu0 %vm8236_vm1, %v8235_v16 }
 0x251   :  { %v265_v49 = vpop.f32.mrb[0].mxu0  ;;  %v329_v50 = vpop.f32.mrb[0].mxu1 }
 0x252   :  { %v330_v51 = vadd.f32 %v6699_v48, %v329_v50  ;;  %v7322_v52 = vpop.f32.mrb[1].mxu0  ;;  %v7330_v53 = vpop.f32.mrb[1].mxu1  ;;  %v266_v0 = vadd.f32 %v6695_v60, %v265_v49 }
 0x253   :  { %v268_v54 = vpop.f32.mrb[2].mxu0  ;;  %v332_v55 = vpop.f32.mrb[2].mxu1 }
 0x254   :  { %v8450_v56 = vpack.c.bf16 %v330_v51, %v330_v51  ;;  %v333_v57 = vadd.f32 %v6699_v48, %v332_v55  ;;  %v7323_v58 = vpop.f32.mrb[3].mxu0  ;;  %v7331_v59 = vpop.f32.mrb[3].mxu1  ;;  %v269_v3 = vadd.f32 %v6695_v60, %v268_v54  ;;  %v8462_v7 = vpack.c.bf16 %v266_v0, %v266_v0 }
 0x256   :  { %v8453_v61 = vpack.c.bf16 %v333_v57, %v333_v57  ;;  %v423_v62 = vsel %vm418_vm6, %v8450_v56, 0  ;;  %v8466_v11 = vpack.c.bf16 %v269_v3, %v269_v3 }
 0x257   :  { %7341 = vmatpush3.bf16.xpose.msra.mxu1 %v423_v62 }
 0x258   :  { %v469_v1 = vsel %vm418_vm6, %v8453_v61, 0  ;;  %7352 = vmatprep.subr.bf16.mxu1 %v8235_v16 }
 0x259   :  { %v393_v2 = vpop.f32.mrb[4].mxu0  ;;  %7347 = vmatpush3.bf16.xpose.msra.mxu0 %v469_v1 }
 0x25a   :  { %v394_v4 = vadd.f32 %v6703_v63, %v393_v2  ;;  %v7338_v5 = vpop.f32.mrb[5].mxu0  ;;  %7358 = vmatprep.subr.bf16.mxu0 %v8235_v16 }
 0x25b   :  { %v396_v6 = vpop.f32.mrb[6].mxu0 }
 0x25c   :  { %v8464_v8 = vpack.c.bf16 %v394_v4, %v394_v4  ;;  %v397_v9 = vadd.f32 %v6703_v63, %v396_v6  ;;  %v7339_v10 = vpop.f32.mrb[7].mxu0 }
 0x25e   :  { %v8468_v12 = vpack.c.bf16 %v397_v9, %v397_v9  ;;  %7343 = vmatmul.mubr.msk.bf16.vlgmr.msra.gmra.mrb[4].mxu1 %vm418_vm6, %v8462_v7  ;;  %v545_v13 = vsel %vm543_vm7, %v8464_v8, 0 }
 0x25f   :  { %7353 = vmatpush3.bf16.msra.mxu1 %v545_v13  ;;  %7354 = vmatprep.mubr.msk.bf16.mxu1 %vm8236_vm1, %v8235_v16 }
 0x260   :  { %7349 = vmatmul.mubr.msk.bf16.vlgmr.msra.gmra.mrb[8].mxu0 %vm418_vm6, %v8466_v11  ;;  %v591_v14 = vsel %vm543_vm7, %v8468_v12, 0  ;;  %7364 = vmatprep.subr.bf16.mxu1 %v8235_v16 }
 0x261   :  { %7359 = vmatpush3.bf16.msra.mxu0 %v591_v14  ;;  %7360 = vmatprep.mubr.msk.bf16.mxu0 %vm8236_vm1, %v8235_v16 }
 0x262   :  { %7370 = vmatprep.subr.bf16.mxu0 %v8235_v16 }
 0x331   :  { %v459_v18 = vpop.f32.mrb[4].mxu1 }
 0x332   :  { %v511_v20 = vmul.f32 0.5, %v459_v18  ;;  %v7344_v21 = vpop.f32.mrb[5].mxu1 }
 0x333   :  { %v462_v22 = vpop.f32.mrb[6].mxu1  ;;  %v505_v23 = vpop.f32.mrb[8].mxu0 }
 0x334   :  { %v512_v25 = vmul.f32 0.5, %v505_v23  ;;  %v7345_v26 = vpop.f32.mrb[7].mxu1  ;;  %v7350_v27 = vpop.f32.mrb[9].mxu0  ;;  %v513_v28 = vadd.f32 %v511_v20, %v8487_v19 }
 0x335   :  { %v508_v29 = vpop.f32.mrb[10].mxu0 }
 0x336   :  { %v7351_v30 = vpop.f32.mrb[11].mxu0  ;;  %v516_v31 = vsel %vm515_vm10, %v513_v28, -inf  ;;  %v514_v32 = vadd.f32 %v512_v25, %v8490_v24 }
 0x337   :  { %517 = vmax.xlane.f32.xlu0 %v516_v31 }
 0x338   :  { %v519_v33 = vsel %vm515_vm10, %v514_v32, -inf }
 0x339   :  { %520 = vmax.xlane.f32.xlu1 %v519_v33 }
 0x34a   :  { %685 = vrot.lane.b32.xlu1 %v8453_v61, %s8237_s0 }
 0x3c4   :  { %v518_v34 = vpop.xlane.xlu0 %517 }
 0x3c5   :  { %v522_v35 = vsub.f32 %v513_v28, %v518_v34 }
 0x3c6   :  { %v521_v36 = vpop.xlane.xlu1 %520 }
 0x3c7   :  { %v524_v37 = vmul.f32 1.442695, %v522_v35  ;;  %v523_v38 = vsub.f32 %v514_v32, %v521_v36 }
 0x3c9   :  { %8035 = vpow2.f32 %v524_v37  ;;  %v526_v39 = vmul.f32 1.442695, %v523_v38 }
 0x3ca   :  { %v686_v44 = vpop.permute.xlu1 %685 }
 0x3cb   :  { %8037 = vpow2.f32 %v526_v39  ;;  %v691_v55 = vsel %vm418_vm6, %v686_v44, 0 }
 0x3d3   :  { %v8036_v40 = vpop.eup %8035 }
 0x3d4   :  { %v528_v41 = vsel %vm515_vm10, %v8036_v40, 0.0 }
 0x3d5   :  { %v8038_v42 = vpop.eup %8037  ;;  %529 = vadd.xlane.f32.xlu0 %v528_v41 }
 0x3d6   :  { %v531_v43 = vsel %vm515_vm10, %v8038_v42, 0.0 }
 0x3d7   :  { %532 = vadd.xlane.f32.xlu1 %v531_v43 }
 0x3e8   :  { %633 = vrot.lane.b32.xlu1 %v8462_v7, %s8237_s0 }
 0x3eb   :  { %635 = vrot.lane.b32.xlu0 %v8450_v56, %s8237_s0 }
 0x3ec   :  { %683 = vrot.lane.b32.xlu1 %v8466_v11, %s8237_s0 }
 0x462   :  { %v530_v45 = vpop.xlane.xlu0 %529 }
 0x463   :  { %8039 = vrcp.f32 %v530_v45 }
 0x464   :  { %v533_v46 = vpop.xlane.xlu1 %532 }
 0x465   :  { %8041 = vrcp.f32 %v533_v46 }
 0x466   :  { %v636_v50 = vpop.permute.xlu0 %635 }
 0x467   :  { %v641_v53 = vsel %vm418_vm6, %v636_v50, 0 }
 0x468   :  { %v634_v57 = vpop.permute.xlu1 %633 }
 0x46c   :  { %v684_v58 = vpop.permute.xlu1 %683 }
 0x46d   :  { %v8040_v47 = vpop.eup %8039 }
 0x46e   :  { %v536_v48 = vmul.f32 %v8040_v47, %v8036_v40 }
 0x46f   :  { %v8042_v49 = vpop.eup %8041 }
 0x470   :  { %v538_v51 = vpack.c.bf16 %v536_v48, %v536_v48  ;;  %v537_v52 = vmul.f32 %v8042_v49, %v8038_v42 }
 0x472   :  { %7355 = vmatmul.mubr.msk.bf16.vlgmr.msra.gmra.mrb[8].mxu1 %vm515_vm10, %v538_v51  ;;  %v539_v54 = vpack.c.bf16 %v537_v52, %v537_v52 }
 0x473   :  { %7365 = vmatpush3.bf16.xpose.msra.mxu1 %v641_v53  ;;  %7366 = vmatprep.mubr.msk.bf16.mxu1 %vm8236_vm1, %v8235_v16 }
 0x474   :  { %7361 = vmatmul.mubr.msk.bf16.vlgmr.msra.gmra.mrb[12].mxu0 %vm515_vm10, %v539_v54  ;;  %7376 = vmatprep.subr.bf16.mxu1 %v8235_v16 }
 0x475   :  { %7371 = vmatpush3.bf16.xpose.msra.mxu0 %v691_v55  ;;  %7372 = vmatprep.mubr.msk.bf16.mxu0 %vm8236_vm1, %v8235_v16 }
 0x476   :  { %7382 = vmatprep.subr.bf16.mxu0 %v8235_v16 }
 0x47a   :  { %7367 = vmatmul.mubr.msk.bf16.vlgmr.msra.gmra.mrb[12].mxu1 %vm418_vm6, %v634_v57 }
 0x47b   :  { %7378 = vmatprep.mubr.msk.bf16.mxu1 %vm8236_vm1, %v8235_v16 }
 0x47c   :  { %7373 = vmatmul.mubr.msk.bf16.vlgmr.msra.gmra.mrb[16].mxu0 %vm418_vm6, %v684_v58 }
 0x47d   :  { %7384 = vmatprep.mubr.msk.bf16.mxu0 %vm8236_vm1, %v8235_v16 }
 0x545   :  { %v8522_v59 = vpop.f32.mrb[8].mxu1 }
 0x546   :  { %v7356_v60 = vpop.f32.mrb[9].mxu1 }
 0x547   :  { %v584_v62 = vpop.f32.mrb[10].mxu1  ;;  %v8524_v63 = vpop.f32.mrb[12].mxu0 }
 0x548   :  { %v7357_v0 = vpop.f32.mrb[11].mxu1  ;;  %v7362_v1 = vpop.f32.mrb[13].mxu0 }
 0x549   :  { %v630_v2 = vpop.f32.mrb[14].mxu0 }
 0x54a   :  { %v7363_v3 = vpop.f32.mrb[15].mxu0 }
 0x54d   :  { %v677_v4 = vpop.f32.mrb[12].mxu1 }
 0x54e   :  { %v733_v5 = vmul.f32 0.5, %v677_v4  ;;  %v7368_v6 = vpop.f32.mrb[13].mxu1 }
 0x54f   :  { %v680_v9 = vpop.f32.mrb[14].mxu1  ;;  %v727_v10 = vpop.f32.mrb[16].mxu0 }
 0x550   :  { %v734_v13 = vmul.f32 0.5, %v727_v10  ;;  %v7369_v14 = vpop.f32.mrb[15].mxu1  ;;  %v7374_v15 = vpop.f32.mrb[17].mxu0  ;;  %v735_v17 = vadd.f32 %v733_v5, %v8487_v19 }
 0x551   :  { %v730_v18 = vpop.f32.mrb[18].mxu0 }
 0x552   :  { %v7375_v20 = vpop.f32.mrb[19].mxu0  ;;  %v737_v21 = vsel %vm515_vm10, %v735_v17, -inf  ;;  %v736_v22 = vadd.f32 %v734_v13, %v8490_v24 }
 0x553   :  { %738 = vmax.xlane.f32.xlu0 %v737_v21 }
 0x554   :  { %v740_v23 = vsel %vm515_vm10, %v736_v22, -inf }
 0x555   :  { %741 = vmax.xlane.f32.xlu1 %v740_v23 }
 0x566   :  { %809 = vrot.lane.b32.xlu1 %v8468_v12, %s8237_s0 }
 0x56a   :  { %859 = vrot.lane.b32.xlu1 %v8450_v56, %s8238_s13 }
 0x56e   :  { %909 = vrot.lane.b32.xlu1 %v8453_v61, %s8238_s13 }
 0x572   :  { %907 = vrot.lane.b32.xlu1 %v8466_v11, %s8238_s13 }
 0x5e0   :  { %v739_v25 = vpop.xlane.xlu0 %738 }
 0x5e1   :  { %v743_v26 = vsub.f32 %v735_v17, %v739_v25 }
 0x5e2   :  { %v742_v27 = vpop.xlane.xlu1 %741 }
 0x5e3   :  { %v745_v28 = vmul.f32 1.442695, %v743_v26  ;;  %v744_v29 = vsub.f32 %v736_v22, %v742_v27 }
 0x5e5   :  { %8043 = vpow2.f32 %v745_v28  ;;  %v747_v30 = vmul.f32 1.442695, %v744_v29 }
 0x5e6   :  { %v810_v31 = vpop.permute.xlu1 %809 }
 0x5e7   :  { %8045 = vpow2.f32 %v747_v30  ;;  %v815_v32 = vsel %vm543_vm7, %v810_v31, 0 }
 0x5e8   :  { %7383 = vmatpush3.bf16.msra.mxu0 %v815_v32 }
 0x5e9   :  { %7394 = vmatprep.subr.bf16.mxu0 %v8235_v16 }
 0x5ea   :  { %v860_v42 = vpop.permute.xlu1 %859 }
 0x5eb   :  { %v865_v48 = vsel %vm418_vm6, %v860_v42, 0 }
 0x5ee   :  { %v910_v47 = vpop.permute.xlu1 %909 }
 0x5ef   :  { %v8044_v33 = vpop.eup %8043  ;;  %v915_v50 = vsel %vm418_vm6, %v910_v47, 0 }
 0x5f0   :  { %v749_v34 = vsel %vm515_vm10, %v8044_v33, 0.0 }
 0x5f1   :  { %v8046_v35 = vpop.eup %8045  ;;  %750 = vadd.xlane.f32.xlu0 %v749_v34 }
 0x5f2   :  { %v752_v36 = vsel %vm515_vm10, %v8046_v35, 0.0  ;;  %v908_v52 = vpop.permute.xlu1 %907 }
 0x5f5   :  { %753 = vadd.xlane.f32.xlu0 %v752_v36 }
 0x60b   :  { %761 = vrot.lane.b32.xlu0 %v8464_v8, %s8237_s0 }
 0x60f   :  { %857 = vrot.lane.b32.xlu0 %v8462_v7, %s8238_s13 }
 0x67e   :  { %v751_v37 = vpop.xlane.xlu0 %750 }
 0x67f   :  { %8047 = vrcp.f32 %v751_v37 }
 0x682   :  { %v754_v38 = vpop.xlane.xlu0 %753 }
 0x683   :  { %8049 = vrcp.f32 %v754_v38 }
 0x686   :  { %v762_v39 = vpop.permute.xlu0 %761 }
 0x687   :  { %v767_v40 = vsel %vm543_vm7, %v762_v39, 0 }
 0x688   :  { %7377 = vmatpush3.bf16.msra.mxu1 %v767_v40 }
 0x689   :  { %v8048_v41 = vpop.eup %8047  ;;  %7388 = vmatprep.subr.bf16.mxu1 %v8235_v16 }
 0x68a   :  { %v757_v43 = vmul.f32 %v8048_v41, %v8044_v33  ;;  %v858_v51 = vpop.permute.xlu0 %857 }
 0x68c   :  { %v759_v44 = vpack.c.bf16 %v757_v43, %v757_v43 }
 0x68d   :  { %v8050_v45 = vpop.eup %8049 }
 0x68e   :  { %7379 = vmatmul.mubr.msk.bf16.vlgmr.msra.gmra.mrb[16].mxu1 %vm515_vm10, %v759_v44  ;;  %v758_v46 = vmul.f32 %v8050_v45, %v8046_v35 }
 0x68f   :  { %7390 = vmatprep.mubr.msk.bf16.mxu1 %vm8236_vm1, %v8235_v16 }
 0x690   :  { %v760_v49 = vpack.c.bf16 %v758_v46, %v758_v46 }
 0x691   :  { %7389 = vmatpush3.bf16.xpose.msra.mxu1 %v865_v48 }
 0x692   :  { %7385 = vmatmul.mubr.msk.bf16.vlgmr.msra.gmra.mrb[20].mxu0 %vm515_vm10, %v760_v49  ;;  %7400 = vmatprep.subr.bf16.mxu1 %v8235_v16 }
 0x693   :  { %7395 = vmatpush3.bf16.xpose.msra.mxu0 %v915_v50  ;;  %7396 = vmatprep.mubr.msk.bf16.mxu0 %vm8236_vm1, %v8235_v16 }
 0x694   :  { %7406 = vmatprep.subr.bf16.mxu0 %v8235_v16 }
 0x698   :  { %7391 = vmatmul.mubr.msk.bf16.vlgmr.msra.gmra.mrb[20].mxu1 %vm418_vm6, %v858_v51 }
 0x699   :  { %7402 = vmatprep.mubr.msk.bf16.mxu1 %vm8236_vm1, %v8235_v16 }
 0x69a   :  { %7397 = vmatmul.mubr.msk.bf16.vlgmr.msra.gmra.mrb[24].mxu0 %vm418_vm6, %v908_v52 }
 0x69b   :  { %7408 = vmatprep.mubr.msk.bf16.mxu0 %vm8236_vm1, %v8235_v16 }
 0x761   :  { %v8564_v53 = vpop.f32.mrb[16].mxu1 }
 0x762   :  { %v7380_v54 = vpop.f32.mrb[17].mxu1 }
 0x763   :  { %v806_v55 = vpop.f32.mrb[18].mxu1 }
 0x764   :  { %v7381_v57 = vpop.f32.mrb[19].mxu1 }
 0x765   :  { %v8566_v58 = vpop.f32.mrb[20].mxu0 }
 0x766   :  { %v7813_v60 = vpack.i.bf16 %v8566_v58, %v8564_v53  ;;  %v7386_v62 = vpop.f32.mrb[21].mxu0 }
 0x767   :  { %v854_v0 = vpop.f32.mrb[22].mxu0 }
 0x768   :  { %v7387_v1 = vpop.f32.mrb[23].mxu0 }
 0x76b   :  { %v901_v2 = vpop.f32.mrb[20].mxu1 }
 0x76c   :  { %v957_v3 = vmul.f32 0.5, %v901_v2  ;;  %v7392_v4 = vpop.f32.mrb[21].mxu1 }
 0x76d   :  { %v904_v5 = vpop.f32.mrb[22].mxu1  ;;  %v951_v6 = vpop.f32.mrb[24].mxu0 }
 0x76e   :  { %v958_v9 = vmul.f32 0.5, %v951_v6  ;;  %v7393_v10 = vpop.f32.mrb[23].mxu1  ;;  %v7398_v13 = vpop.f32.mrb[25].mxu0  ;;  %v959_v14 = vadd.f32 %v957_v3, %v8487_v19 }
 0x76f   :  { %v954_v15 = vpop.f32.mrb[26].mxu0 }
 0x770   :  { %v7399_v17 = vpop.f32.mrb[27].mxu0  ;;  %v961_v18 = vsel %vm515_vm10, %v959_v14, -inf  ;;  %v960_v20 = vadd.f32 %v958_v9, %v8490_v24 }
 0x771   :  { %962 = vmax.xlane.f32.xlu0 %v961_v18 }
 0x772   :  { %v964_v21 = vsel %vm515_vm10, %v960_v20, -inf }
 0x773   :  { %965 = vmax.xlane.f32.xlu1 %v964_v21 }
 0x784   :  { %1033 = vrot.lane.b32.xlu1 %v8468_v12, %s8238_s13 }
 0x788   :  { %1083 = vrot.lane.b32.xlu1 %v8450_v56, %s8239_s21 }
 0x78c   :  { %1133 = vrot.lane.b32.xlu1 %v8453_v61, %s8239_s21 }
 0x790   :  { %1131 = vrot.lane.b32.xlu1 %v8466_v11, %s8239_s21 }
 0x7fe   :  { %v963_v22 = vpop.xlane.xlu0 %962 }
 0x7ff   :  { %v967_v23 = vsub.f32 %v959_v14, %v963_v22 }
 0x800   :  { %v966_v25 = vpop.xlane.xlu1 %965 }
 0x801   :  { %v969_v26 = vmul.f32 1.442695, %v967_v23  ;;  %v968_v27 = vsub.f32 %v960_v20, %v966_v25 }
 0x803   :  { %8051 = vpow2.f32 %v969_v26  ;;  %v971_v28 = vmul.f32 1.442695, %v968_v27 }
 0x804   :  { %v1034_v29 = vpop.permute.xlu1 %1033 }
 0x805   :  { %8053 = vpow2.f32 %v971_v28  ;;  %v1039_v30 = vsel %vm543_vm7, %v1034_v29, 0 }
 0x806   :  { %7407 = vmatpush3.bf16.msra.mxu0 %v1039_v30 }
 0x807   :  { %7418 = vmatprep.subr.bf16.mxu0 %v8235_v16 }
 0x808   :  { %v1084_v40 = vpop.permute.xlu1 %1083 }
 0x809   :  { %v1089_v46 = vsel %vm418_vm6, %v1084_v40, 0 }
 0x80c   :  { %v1134_v45 = vpop.permute.xlu1 %1133 }
 0x80d   :  { %v8052_v31 = vpop.eup %8051  ;;  %v1139_v48 = vsel %vm418_vm6, %v1134_v45, 0 }
 0x80e   :  { %v973_v32 = vsel %vm515_vm10, %v8052_v31, 0.0 }
 0x80f   :  { %v8054_v33 = vpop.eup %8053  ;;  %974 = vadd.xlane.f32.xlu0 %v973_v32 }
 0x810   :  { %v976_v34 = vsel %vm515_vm10, %v8054_v33, 0.0  ;;  %v1132_v50 = vpop.permute.xlu1 %1131 }
 0x813   :  { %977 = vadd.xlane.f32.xlu0 %v976_v34 }
 0x829   :  { %985 = vrot.lane.b32.xlu0 %v8464_v8, %s8238_s13 }
 0x82d   :  { %1081 = vrot.lane.b32.xlu0 %v8462_v7, %s8239_s21 }
 0x89c   :  { %v975_v35 = vpop.xlane.xlu0 %974 }
 0x89d   :  { %8055 = vrcp.f32 %v975_v35 }
 0x8a0   :  { %v978_v36 = vpop.xlane.xlu0 %977 }
 0x8a1   :  { %8057 = vrcp.f32 %v978_v36 }
 0x8a4   :  { %v986_v37 = vpop.permute.xlu0 %985 }
 0x8a5   :  { %v991_v38 = vsel %vm543_vm7, %v986_v37, 0 }
 0x8a6   :  { %7401 = vmatpush3.bf16.msra.mxu1 %v991_v38 }
 0x8a7   :  { %v8056_v39 = vpop.eup %8055  ;;  %7412 = vmatprep.subr.bf16.mxu1 %v8235_v16 }
 0x8a8   :  { %v981_v41 = vmul.f32 %v8056_v39, %v8052_v31  ;;  %v1082_v49 = vpop.permute.xlu0 %1081 }
 0x8aa   :  { %v983_v42 = vpack.c.bf16 %v981_v41, %v981_v41 }
 0x8ab   :  { %v8058_v43 = vpop.eup %8057 }
 0x8ac   :  { %7403 = vmatmul.mubr.msk.bf16.vlgmr.msra.gmra.mrb[24].mxu1 %vm515_vm10, %v983_v42  ;;  %v982_v44 = vmul.f32 %v8058_v43, %v8054_v33 }
 0x8ad   :  { %7414 = vmatprep.mubr.msk.bf16.mxu1 %vm8236_vm1, %v8235_v16 }
 0x8ae   :  { %v984_v47 = vpack.c.bf16 %v982_v44, %v982_v44 }
 0x8af   :  { %7413 = vmatpush3.bf16.xpose.msra.mxu1 %v1089_v46 }
 0x8b0   :  { %7409 = vmatmul.mubr.msk.bf16.vlgmr.msra.gmra.mrb[28].mxu0 %vm515_vm10, %v984_v47  ;;  %7424 = vmatprep.subr.bf16.mxu1 %v8235_v16 }
 0x8b1   :  { %7419 = vmatpush3.bf16.xpose.msra.mxu0 %v1139_v48  ;;  %7420 = vmatprep.mubr.msk.bf16.mxu0 %vm8236_vm1, %v8235_v16 }
 0x8b2   :  { %7430 = vmatprep.subr.bf16.mxu0 %v8235_v16 }
 0x8b6   :  { %7415 = vmatmul.mubr.msk.bf16.vlgmr.msra.gmra.mrb[28].mxu1 %vm418_vm6, %v1082_v49 }
 0x8b7   :  { %7426 = vmatprep.mubr.msk.bf16.mxu1 %vm8236_vm1, %v8235_v16 }
 0x8b8   :  { %7421 = vmatmul.mubr.msk.bf16.vlgmr.msra.gmra.mrb[32].mxu0 %vm418_vm6, %v1132_v50 }
 0x8b9   :  { %7432 = vmatprep.mubr.msk.bf16.mxu0 %vm8236_vm1, %v8235_v16 }
 0x97f   :  { %v8608_v51 = vpop.f32.mrb[24].mxu1 }
 0x980   :  { %v7404_v52 = vpop.f32.mrb[25].mxu1 }
 0x981   :  { %v1030_v54 = vpop.f32.mrb[26].mxu1 }
 0x982   :  { %v7405_v55 = vpop.f32.mrb[27].mxu1 }
 0x983   :  { %v8610_v57 = vpop.f32.mrb[28].mxu0 }
 0x984   :  { %v7818_v62 = vpack.i.bf16 %v8610_v57, %v8608_v51  ;;  %v7410_v0 = vpop.f32.mrb[29].mxu0 }
 0x985   :  { %v1078_v1 = vpop.f32.mrb[30].mxu0 }
 0x986   :  { %v7411_v2 = vpop.f32.mrb[31].mxu0 }
 0x989   :  { %v1125_v3 = vpop.f32.mrb[28].mxu1 }
 0x98a   :  { %v1181_v4 = vmul.f32 0.5, %v1125_v3  ;;  %v7416_v5 = vpop.f32.mrb[29].mxu1 }
 0x98b   :  { %v1128_v6 = vpop.f32.mrb[30].mxu1  ;;  %v1175_v9 = vpop.f32.mrb[32].mxu0 }
 0x98c   :  { %v1182_v10 = vmul.f32 0.5, %v1175_v9  ;;  %v7417_v13 = vpop.f32.mrb[31].mxu1  ;;  %v7422_v14 = vpop.f32.mrb[33].mxu0  ;;  %v1183_v15 = vadd.f32 %v1181_v4, %v8487_v19 }
 0x98d   :  { %v1178_v17 = vpop.f32.mrb[34].mxu0 }
 0x98e   :  { %v7423_v18 = vpop.f32.mrb[35].mxu0  ;;  %v1185_v20 = vsel %vm515_vm10, %v1183_v15, -inf  ;;  %v1184_v21 = vadd.f32 %v1182_v10, %v8490_v24 }
 0x98f   :  { %1186 = vmax.xlane.f32.xlu0 %v1185_v20 }
 0x990   :  { %v1188_v22 = vsel %vm515_vm10, %v1184_v21, -inf }
 0x991   :  { %1189 = vmax.xlane.f32.xlu1 %v1188_v22 }
 0x9a2   :  { %1257 = vrot.lane.b32.xlu1 %v8468_v12, %s8239_s21 }
 0x9a6   :  { %1307 = vrot.lane.b32.xlu1 %v8450_v56, %s8240_s25 }
 0x9aa   :  { %1357 = vrot.lane.b32.xlu1 %v8453_v61, %s8240_s25 }
 0x9ae   :  { %1355 = vrot.lane.b32.xlu1 %v8466_v11, %s8240_s25 }
 0xa1c   :  { %v1187_v23 = vpop.xlane.xlu0 %1186 }
 0xa1d   :  { %v1191_v25 = vsub.f32 %v1183_v15, %v1187_v23 }
 0xa1e   :  { %v1190_v26 = vpop.xlane.xlu1 %1189 }
 0xa1f   :  { %v1193_v27 = vmul.f32 1.442695, %v1191_v25  ;;  %v1192_v28 = vsub.f32 %v1184_v21, %v1190_v26 }
 0xa21   :  { %8059 = vpow2.f32 %v1193_v27  ;;  %v1195_v29 = vmul.f32 1.442695, %v1192_v28 }
 0xa22   :  { %v1258_v30 = vpop.permute.xlu1 %1257 }
 0xa23   :  { %8061 = vpow2.f32 %v1195_v29  ;;  %v1263_v31 = vsel %vm543_vm7, %v1258_v30, 0 }
 0xa24   :  { %7431 = vmatpush3.bf16.msra.mxu0 %v1263_v31 }
 0xa25   :  { %7442 = vmatprep.subr.bf16.mxu0 %v8235_v16 }
 0xa26   :  { %v1308_v41 = vpop.permute.xlu1 %1307 }
 0xa27   :  { %v1313_v47 = vsel %vm418_vm6, %v1308_v41, 0 }
 0xa2a   :  { %v1358_v46 = vpop.permute.xlu1 %1357 }
 0xa2b   :  { %v8060_v32 = vpop.eup %8059  ;;  %v1363_v49 = vsel %vm418_vm6, %v1358_v46, 0 }
 0xa2c   :  { %v1197_v33 = vsel %vm515_vm10, %v8060_v32, 0.0 }
 0xa2d   :  { %v8062_v34 = vpop.eup %8061  ;;  %1198 = vadd.xlane.f32.xlu0 %v1197_v33 }
 0xa2e   :  { %v1200_v35 = vsel %vm515_vm10, %v8062_v34, 0.0  ;;  %v1356_v52 = vpop.permute.xlu1 %1355 }
 0xa31   :  { %1201 = vadd.xlane.f32.xlu0 %v1200_v35 }
 0xa47   :  { %1209 = vrot.lane.b32.xlu0 %v8464_v8, %s8239_s21 }
 0xa4b   :  { %1305 = vrot.lane.b32.xlu0 %v8462_v7, %s8240_s25 }
 0xaba   :  { %v1199_v36 = vpop.xlane.xlu0 %1198 }
 0xabb   :  { %8063 = vrcp.f32 %v1199_v36 }
 0xabe   :  { %v1202_v37 = vpop.xlane.xlu0 %1201 }
 0xabf   :  { %8065 = vrcp.f32 %v1202_v37 }
 0xac2   :  { %v1210_v38 = vpop.permute.xlu0 %1209 }
 0xac3   :  { %v1215_v39 = vsel %vm543_vm7, %v1210_v38, 0 }
 0xac4   :  { %7425 = vmatpush3.bf16.msra.mxu1 %v1215_v39 }
 0xac5   :  { %v8064_v40 = vpop.eup %8063  ;;  %7436 = vmatprep.subr.bf16.mxu1 %v8235_v16 }
 0xac6   :  { %v1205_v42 = vmul.f32 %v8064_v40, %v8060_v32  ;;  %v1306_v50 = vpop.permute.xlu0 %1305 }
 0xac8   :  { %v1207_v43 = vpack.c.bf16 %v1205_v42, %v1205_v42 }
 0xac9   :  { %v8066_v44 = vpop.eup %8065 }
 0xaca   :  { %7427 = vmatmul.mubr.msk.bf16.vlgmr.msra.gmra.mrb[32].mxu1 %vm515_vm10, %v1207_v43  ;;  %v1206_v45 = vmul.f32 %v8066_v44, %v8062_v34 }
 0xacb   :  { %7438 = vmatprep.mubr.msk.bf16.mxu1 %vm8236_vm1, %v8235_v16 }
 0xacc   :  { %v1208_v48 = vpack.c.bf16 %v1206_v45, %v1206_v45 }
 0xacd   :  { %7437 = vmatpush3.bf16.xpose.msra.mxu1 %v1313_v47 }
 0xace   :  { %7433 = vmatmul.mubr.msk.bf16.vlgmr.msra.gmra.mrb[36].mxu0 %vm515_vm10, %v1208_v48  ;;  %7448 = vmatprep.subr.bf16.mxu1 %v8235_v16 }
 0xacf   :  { %7443 = vmatpush3.bf16.xpose.msra.mxu0 %v1363_v49  ;;  %7444 = vmatprep.mubr.msk.bf16.mxu0 %vm8236_vm1, %v8235_v16 }
 0xad0   :  { %7454 = vmatprep.subr.bf16.mxu0 %v8235_v16 }
 0xad4   :  { %7439 = vmatmul.mubr.msk.bf16.vlgmr.msra.gmra.mrb[36].mxu1 %vm418_vm6, %v1306_v50 }
 0xad5   :  { %7450 = vmatprep.mubr.msk.bf16.mxu1 %vm8236_vm1, %v8235_v16 }
 0xad6   :  { %7445 = vmatmul.mubr.msk.bf16.vlgmr.msra.gmra.mrb[40].mxu0 %vm418_vm6, %v1356_v52 }
 0xad7   :  { %7456 = vmatprep.mubr.msk.bf16.mxu0 %vm8236_vm1, %v8235_v16 }
 0xb9d   :  { %v8652_v54 = vpop.f32.mrb[32].mxu1 }
 0xb9e   :  { %v7428_v55 = vpop.f32.mrb[33].mxu1 }
 0xb9f   :  { %v1254_v0 = vpop.f32.mrb[34].mxu1 }
 0xba0   :  { %v7429_v1 = vpop.f32.mrb[35].mxu1 }
 0xba1   :  { %v8654_v2 = vpop.f32.mrb[36].mxu0 }
 0xba2   :  { %v7823_v3 = vpack.i.bf16 %v8654_v2, %v8652_v54  ;;  %v7434_v4 = vpop.f32.mrb[37].mxu0 }
 0xba3   :  { %v1302_v5 = vpop.f32.mrb[38].mxu0 }
 0xba4   :  { %v7435_v6 = vpop.f32.mrb[39].mxu0 }
 0xba7   :  { %v1349_v9 = vpop.f32.mrb[36].mxu1 }
 0xba8   :  { %v1405_v10 = vmul.f32 0.5, %v1349_v9  ;;  %v7440_v13 = vpop.f32.mrb[37].mxu1 }
 0xba9   :  { %v1352_v14 = vpop.f32.mrb[38].mxu1  ;;  %v1399_v15 = vpop.f32.mrb[40].mxu0 }
 0xbaa   :  { %v1406_v17 = vmul.f32 0.5, %v1399_v15  ;;  %v7441_v18 = vpop.f32.mrb[39].mxu1  ;;  %v7446_v20 = vpop.f32.mrb[41].mxu0  ;;  %v1407_v21 = vadd.f32 %v1405_v10, %v8487_v19 }
 0xbab   :  { %v1402_v22 = vpop.f32.mrb[42].mxu0 }
 0xbac   :  { %v7447_v23 = vpop.f32.mrb[43].mxu0  ;;  %v1409_v25 = vsel %vm515_vm10, %v1407_v21, -inf  ;;  %v1408_v26 = vadd.f32 %v1406_v17, %v8490_v24 }
 0xbad   :  { %1410 = vmax.xlane.f32.xlu0 %v1409_v25 }
 0xbae   :  { %v1412_v27 = vsel %vm515_vm10, %v1408_v26, -inf }
 0xbaf   :  { %1413 = vmax.xlane.f32.xlu1 %v1412_v27 }
 0xbc0   :  { %1481 = vrot.lane.b32.xlu1 %v8468_v12, %s8240_s25 }
 0xbc4   :  { %1531 = vrot.lane.b32.xlu1 %v8450_v56, %s8241_s19 }
 0xbc8   :  { %1581 = vrot.lane.b32.xlu1 %v8453_v61, %s8241_s19 }
 0xbcc   :  { %1579 = vrot.lane.b32.xlu1 %v8466_v11, %s8241_s19 }
 0xc3a   :  { %v1411_v28 = vpop.xlane.xlu0 %1410 }
 0xc3b   :  { %v1415_v29 = vsub.f32 %v1407_v21, %v1411_v28 }
 0xc3c   :  { %v1414_v30 = vpop.xlane.xlu1 %1413 }
 0xc3d   :  { %v1417_v31 = vmul.f32 1.442695, %v1415_v29  ;;  %v1416_v32 = vsub.f32 %v1408_v26, %v1414_v30 }
 0xc3f   :  { %8067 = vpow2.f32 %v1417_v31  ;;  %v1419_v33 = vmul.f32 1.442695, %v1416_v32 }
 0xc40   :  { %v1482_v34 = vpop.permute.xlu1 %1481 }
 0xc41   :  { %8069 = vpow2.f32 %v1419_v33  ;;  %v1487_v35 = vsel %vm543_vm7, %v1482_v34, 0 }
 0xc42   :  { %7455 = vmatpush3.bf16.msra.mxu0 %v1487_v35 }
 0xc43   :  { %7466 = vmatprep.subr.bf16.mxu0 %v8235_v16 }
 0xc44   :  { %v1532_v45 = vpop.permute.xlu1 %1531 }
 0xc45   :  { %v1537_v52 = vsel %vm418_vm6, %v1532_v45, 0 }
 0xc48   :  { %v1582_v50 = vpop.permute.xlu1 %1581 }
 0xc49   :  { %v8068_v36 = vpop.eup %8067  ;;  %v1587_v0 = vsel %vm418_vm6, %v1582_v50, 0 }
 0xc4a   :  { %v1421_v37 = vsel %vm515_vm10, %v8068_v36, 0.0 }
 0xc4b   :  { %v8070_v38 = vpop.eup %8069  ;;  %1422 = vadd.xlane.f32.xlu0 %v1421_v37 }
 0xc4c   :  { %v1424_v39 = vsel %vm515_vm10, %v8070_v38, 0.0  ;;  %v1580_v4 = vpop.permute.xlu1 %1579 }
 0xc4f   :  { %1425 = vadd.xlane.f32.xlu0 %v1424_v39 }
 0xc65   :  { %1433 = vrot.lane.b32.xlu0 %v8464_v8, %s8240_s25 }
 0xc69   :  { %1529 = vrot.lane.b32.xlu0 %v8462_v7, %s8241_s19 }
 0xcd8   :  { %v1423_v40 = vpop.xlane.xlu0 %1422 }
 0xcd9   :  { %8071 = vrcp.f32 %v1423_v40 }
 0xcdc   :  { %v1426_v41 = vpop.xlane.xlu0 %1425 }
 0xcdd   :  { %8073 = vrcp.f32 %v1426_v41 }
 0xce0   :  { %v1434_v42 = vpop.permute.xlu0 %1433 }
 0xce1   :  { %v1439_v43 = vsel %vm543_vm7, %v1434_v42, 0 }
 0xce2   :  { %7449 = vmatpush3.bf16.msra.mxu1 %v1439_v43 }
 0xce3   :  { %v8072_v44 = vpop.eup %8071  ;;  %7460 = vmatprep.subr.bf16.mxu1 %v8235_v16 }
 0xce4   :  { %v1429_v46 = vmul.f32 %v8072_v44, %v8068_v36  ;;  %v1530_v1 = vpop.permute.xlu0 %1529 }
 0xce6   :  { %v1431_v47 = vpack.c.bf16 %v1429_v46, %v1429_v46 }
 0xce7   :  { %v8074_v48 = vpop.eup %8073 }
 0xce8   :  { %7451 = vmatmul.mubr.msk.bf16.vlgmr.msra.gmra.mrb[40].mxu1 %vm515_vm10, %v1431_v47  ;;  %v1430_v49 = vmul.f32 %v8074_v48, %v8070_v38 }
 0xce9   :  { %7462 = vmatprep.mubr.msk.bf16.mxu1 %vm8236_vm1, %v8235_v16 }
 0xcea   :  { %v1432_v55 = vpack.c.bf16 %v1430_v49, %v1430_v49 }
 0xceb   :  { %7461 = vmatpush3.bf16.xpose.msra.mxu1 %v1537_v52 }
 0xcec   :  { %7457 = vmatmul.mubr.msk.bf16.vlgmr.msra.gmra.mrb[44].mxu0 %vm515_vm10, %v1432_v55  ;;  %7472 = vmatprep.subr.bf16.mxu1 %v8235_v16 }
 0xced   :  { %7467 = vmatpush3.bf16.xpose.msra.mxu0 %v1587_v0  ;;  %7468 = vmatprep.mubr.msk.bf16.mxu0 %vm8236_vm1, %v8235_v16 }
 0xcee   :  { %7478 = vmatprep.subr.bf16.mxu0 %v8235_v16 }
 0xcf2   :  { %7463 = vmatmul.mubr.msk.bf16.vlgmr.msra.gmra.mrb[44].mxu1 %vm418_vm6, %v1530_v1 }
 0xcf3   :  { %7474 = vmatprep.mubr.msk.bf16.mxu1 %vm8236_vm1, %v8235_v16 }
 0xcf4   :  { %7469 = vmatmul.mubr.msk.bf16.vlgmr.msra.gmra.mrb[48].mxu0 %vm418_vm6, %v1580_v4 }
 0xcf5   :  { %7480 = vmatprep.mubr.msk.bf16.mxu0 %vm8236_vm1, %v8235_v16 }
 0xdbb   :  { %v8696_v5 = vpop.f32.mrb[40].mxu1 }
 0xdbc   :  { %v7452_v6 = vpop.f32.mrb[41].mxu1 }
 0xdbd   :  { %v1478_v9 = vpop.f32.mrb[42].mxu1 }
 0xdbe   :  { %v7453_v10 = vpop.f32.mrb[43].mxu1 }
 0xdbf   :  { %v8698_v13 = vpop.f32.mrb[44].mxu0 }
 0xdc0   :  { %v7828_v14 = vpack.i.bf16 %v8698_v13, %v8696_v5  ;;  %v7458_v15 = vpop.f32.mrb[45].mxu0 }
 0xdc1   :  { %v1526_v17 = vpop.f32.mrb[46].mxu0 }
 0xdc2   :  { %v7459_v18 = vpop.f32.mrb[47].mxu0 }
 0xdc5   :  { %v1573_v20 = vpop.f32.mrb[44].mxu1 }
 0xdc6   :  { %v1629_v21 = vmul.f32 0.5, %v1573_v20  ;;  %v7464_v22 = vpop.f32.mrb[45].mxu1 }
 0xdc7   :  { %v1576_v23 = vpop.f32.mrb[46].mxu1  ;;  %v1623_v25 = vpop.f32.mrb[48].mxu0 }
 0xdc8   :  { %v1630_v26 = vmul.f32 0.5, %v1623_v25  ;;  %v7465_v27 = vpop.f32.mrb[47].mxu1  ;;  %v7470_v28 = vpop.f32.mrb[49].mxu0  ;;  %v1631_v29 = vadd.f32 %v1629_v21, %v8487_v19 }
 0xdc9   :  { %v1626_v30 = vpop.f32.mrb[50].mxu0 }
 0xdca   :  { %v7471_v31 = vpop.f32.mrb[51].mxu0  ;;  %v1633_v32 = vsel %vm515_vm10, %v1631_v29, -inf  ;;  %v1632_v33 = vadd.f32 %v1630_v26, %v8490_v24 }
 0xdcb   :  { %1634 = vmax.xlane.f32.xlu0 %v1633_v32 }
 0xdcc   :  { %v1636_v34 = vsel %vm515_vm10, %v1632_v33, -inf }
 0xdcd   :  { %1637 = vmax.xlane.f32.xlu1 %v1636_v34 }
 0xdde   :  { %1705 = vrot.lane.b32.xlu1 %v8468_v12, %s8241_s19 }
 0xde2   :  { %1755 = vrot.lane.b32.xlu1 %v8450_v56, %s8242_s24 }
 0xde6   :  { %1805 = vrot.lane.b32.xlu1 %v8453_v61, %s8242_s24 }
 0xdea   :  { %1803 = vrot.lane.b32.xlu1 %v8466_v11, %s8242_s24 }
 0xe58   :  { %v1635_v35 = vpop.xlane.xlu0 %1634 }
 0xe59   :  { %v1639_v36 = vsub.f32 %v1631_v29, %v1635_v35 }
 0xe5a   :  { %v1638_v37 = vpop.xlane.xlu1 %1637 }
 0xe5b   :  { %v1641_v38 = vmul.f32 1.442695, %v1639_v36  ;;  %v1640_v39 = vsub.f32 %v1632_v33, %v1638_v37 }
 0xe5d   :  { %8075 = vpow2.f32 %v1641_v38  ;;  %v1643_v40 = vmul.f32 1.442695, %v1640_v39 }
 0xe5e   :  { %v1706_v41 = vpop.permute.xlu1 %1705 }
 0xe5f   :  { %8077 = vpow2.f32 %v1643_v40  ;;  %v1711_v42 = vsel %vm543_vm7, %v1706_v41, 0 }
 0xe60   :  { %7479 = vmatpush3.bf16.msra.mxu0 %v1711_v42 }
 0xe61   :  { %7490 = vmatprep.subr.bf16.mxu0 %v8235_v16 }
 0xe62   :  { %v1756_v55 = vpop.permute.xlu1 %1755 }
 0xe63   :  { %v1761_v10 = vsel %vm418_vm6, %v1756_v55, 0 }
 0xe66   :  { %v1806_v9 = vpop.permute.xlu1 %1805 }
 0xe67   :  { %v8076_v43 = vpop.eup %8075  ;;  %v1811_v17 = vsel %vm418_vm6, %v1806_v9, 0 }
 0xe68   :  { %v1645_v44 = vsel %vm515_vm10, %v8076_v43, 0.0 }
 0xe69   :  { %v8078_v45 = vpop.eup %8077  ;;  %1646 = vadd.xlane.f32.xlu0 %v1645_v44 }
 0xe6a   :  { %v1648_v46 = vsel %vm515_vm10, %v8078_v45, 0.0  ;;  %v1804_v20 = vpop.permute.xlu1 %1803 }
 0xe6d   :  { %1649 = vadd.xlane.f32.xlu0 %v1648_v46 }
 0xe83   :  { %1657 = vrot.lane.b32.xlu0 %v8464_v8, %s8241_s19 }
 0xe87   :  { %1753 = vrot.lane.b32.xlu0 %v8462_v7, %s8242_s24 }
 0xef6   :  { %v1647_v47 = vpop.xlane.xlu0 %1646 }
 0xef7   :  { %8079 = vrcp.f32 %v1647_v47 }
 0xefa   :  { %v1650_v48 = vpop.xlane.xlu0 %1649 }
 0xefb   :  { %8081 = vrcp.f32 %v1650_v48 }
 0xefe   :  { %v1658_v49 = vpop.permute.xlu0 %1657 }
 0xeff   :  { %v1663_v50 = vsel %vm543_vm7, %v1658_v49, 0 }
 0xf00   :  { %7473 = vmatpush3.bf16.msra.mxu1 %v1663_v50 }
 0xf01   :  { %v8080_v52 = vpop.eup %8079  ;;  %7484 = vmatprep.subr.bf16.mxu1 %v8235_v16 }
 0xf02   :  { %v1653_v0 = vmul.f32 %v8080_v52, %v8076_v43  ;;  %v1754_v18 = vpop.permute.xlu0 %1753 }
 0xf04   :  { %v1655_v1 = vpack.c.bf16 %v1653_v0, %v1653_v0 }
 0xf05   :  { %v8082_v4 = vpop.eup %8081 }
 0xf06   :  { %7475 = vmatmul.mubr.msk.bf16.vlgmr.msra.gmra.mrb[48].mxu1 %vm515_vm10, %v1655_v1  ;;  %v1654_v6 = vmul.f32 %v8082_v4, %v8078_v45 }
 0xf07   :  { %7486 = vmatprep.mubr.msk.bf16.mxu1 %vm8236_vm1, %v8235_v16 }
 0xf08   :  { %v1656_v15 = vpack.c.bf16 %v1654_v6, %v1654_v6 }
 0xf09   :  { %7485 = vmatpush3.bf16.xpose.msra.mxu1 %v1761_v10 }
 0xf0a   :  { %7481 = vmatmul.mubr.msk.bf16.vlgmr.msra.gmra.mrb[52].mxu0 %vm515_vm10, %v1656_v15  ;;  %7496 = vmatprep.subr.bf16.mxu1 %v8235_v16 }
 0xf0b   :  { %7491 = vmatpush3.bf16.xpose.msra.mxu0 %v1811_v17  ;;  %7492 = vmatprep.mubr.msk.bf16.mxu0 %vm8236_vm1, %v8235_v16 }
 0xf0c   :  { %7502 = vmatprep.subr.bf16.mxu0 %v8235_v16 }
 0xf10   :  { %7487 = vmatmul.mubr.msk.bf16.vlgmr.msra.gmra.mrb[52].mxu1 %vm418_vm6, %v1754_v18 }
 0xf11   :  { %7498 = vmatprep.mubr.msk.bf16.mxu1 %vm8236_vm1, %v8235_v16 }
 0xf12   :  { %7493 = vmatmul.mubr.msk.bf16.vlgmr.msra.gmra.mrb[56].mxu0 %vm418_vm6, %v1804_v20 }
 0xf13   :  { %7504 = vmatprep.mubr.msk.bf16.mxu0 %vm8236_vm1, %v8235_v16 }
 0xfd9   :  { %v8740_v21 = vpop.f32.mrb[48].mxu1 }
 0xfda   :  { %v7476_v22 = vpop.f32.mrb[49].mxu1 }
 0xfdb   :  { %v1702_v23 = vpop.f32.mrb[50].mxu1 }
 0xfdc   :  { %v7477_v25 = vpop.f32.mrb[51].mxu1 }
 0xfdd   :  { %v8742_v26 = vpop.f32.mrb[52].mxu0 }
 0xfde   :  { %v7833_v27 = vpack.i.bf16 %v8742_v26, %v8740_v21  ;;  %v7482_v28 = vpop.f32.mrb[53].mxu0 }
 0xfdf   :  { %v1750_v29 = vpop.f32.mrb[54].mxu0 }
 0xfe0   :  { %v7483_v30 = vpop.f32.mrb[55].mxu0 }
 0xfe3   :  { %v1797_v31 = vpop.f32.mrb[52].mxu1 }
 0xfe4   :  { %v1853_v32 = vmul.f32 0.5, %v1797_v31  ;;  %v7488_v33 = vpop.f32.mrb[53].mxu1 }
 0xfe5   :  { %v1800_v34 = vpop.f32.mrb[54].mxu1  ;;  %v1847_v35 = vpop.f32.mrb[56].mxu0 }
 0xfe6   :  { %v1854_v36 = vmul.f32 0.5, %v1847_v35  ;;  %v7489_v37 = vpop.f32.mrb[55].mxu1  ;;  %v7494_v38 = vpop.f32.mrb[57].mxu0  ;;  %v1855_v39 = vadd.f32 %v1853_v32, %v8487_v19 }
 0xfe7   :  { %v1850_v40 = vpop.f32.mrb[58].mxu0 }
 0xfe8   :  { %v7495_v41 = vpop.f32.mrb[59].mxu0  ;;  %v1857_v42 = vsel %vm515_vm10, %v1855_v39, -inf  ;;  %v1856_v43 = vadd.f32 %v1854_v36, %v8490_v24 }
 0xfe9   :  { %1858 = vmax.xlane.f32.xlu0 %v1857_v42 }
 0xfea   :  { %v1860_v44 = vsel %vm515_vm10, %v1856_v43, -inf }
 0xfeb   :  { %1861 = vmax.xlane.f32.xlu1 %v1860_v44 }
 0xffc   :  { %1929 = vrot.lane.b32.xlu1 %v8468_v12, %s8242_s24 }
0x1000   :  { %1979 = vrot.lane.b32.xlu1 %v8450_v56, %s8243_s30 }
0x1004   :  { %2029 = vrot.lane.b32.xlu1 %v8453_v61, %s8243_s30 }
0x1008   :  { %2027 = vrot.lane.b32.xlu1 %v8466_v11, %s8243_s30 }
0x1076   :  { %v1859_v45 = vpop.xlane.xlu0 %1858 }
0x1077   :  { %v1863_v46 = vsub.f32 %v1855_v39, %v1859_v45 }
0x1078   :  { %v1862_v47 = vpop.xlane.xlu1 %1861 }
0x1079   :  { %v1865_v48 = vmul.f32 1.442695, %v1863_v46  ;;  %v1864_v49 = vsub.f32 %v1856_v43, %v1862_v47 }
0x107b   :  { %8083 = vpow2.f32 %v1865_v48  ;;  %v1867_v50 = vmul.f32 1.442695, %v1864_v49 }
0x107c   :  { %v1930_v52 = vpop.permute.xlu1 %1929 }
0x107d   :  { %8085 = vpow2.f32 %v1867_v50  ;;  %v1935_v55 = vsel %vm543_vm7, %v1930_v52, 0 }
0x107e   :  { %7503 = vmatpush3.bf16.msra.mxu0 %v1935_v55 }
0x107f   :  { %7514 = vmatprep.subr.bf16.mxu0 %v8235_v16 }
0x1080   :  { %v1980_v15 = vpop.permute.xlu1 %1979 }
0x1084   :  { %v2030_v23 = vpop.permute.xlu1 %2029 }
0x1085   :  { %v8084_v56 = vpop.eup %8083  ;;  %v2035_v28 = vsel %vm418_vm6, %v2030_v23, 0 }
0x1086   :  { %v1869_v61 = vsel %vm515_vm10, %v8084_v56, 0.0 }
0x1087   :  { %v8086_v0 = vpop.eup %8085  ;;  %1870 = vadd.xlane.f32.xlu0 %v1869_v61 }
0x1088   :  { %v1872_v11 = vsel %vm515_vm10, %v8086_v0, 0.0  ;;  %v2028_v30 = vpop.permute.xlu1 %2027 }
0x108b   :  { %1873 = vadd.xlane.f32.xlu0 %v1872_v11 }
0x10a1   :  { %1881 = vrot.lane.b32.xlu0 %v8464_v8, %s8242_s24 }
0x10a5   :  { %1977 = vrot.lane.b32.xlu0 %v8462_v7, %s8243_s30  ;;  %v1985_v7 = vsel %vm418_vm6, %v1980_v15, 0 }
0x1114   :  { %v1871_v1 = vpop.xlane.xlu0 %1870 }
0x1115   :  { %8087 = vrcp.f32 %v1871_v1 }
0x1118   :  { %v1874_v4 = vpop.xlane.xlu0 %1873 }
0x1119   :  { %8089 = vrcp.f32 %v1874_v4  ;;  %v7890_v4 = vld [vmem:[%s8342_s27 + $0x8] sm:$0xff]  }
0x111c   :  { %v1882_v6 = vpop.permute.xlu0 %1881 }
0x111d   :  { %v1887_v9 = vsel %vm543_vm7, %v1882_v6, 0 }
0x111e   :  { %7497 = vmatpush3.bf16.msra.mxu1 %v1887_v9 }
0x111f   :  { %v8088_v10 = vpop.eup %8087  ;;  %7508 = vmatprep.subr.bf16.mxu1 %v8235_v16 }
0x1120   :  { %v1877_v17 = vmul.f32 %v8088_v10, %v8084_v56  ;;  %v1978_v29 = vpop.permute.xlu0 %1977 }
0x1122   :  { %v1879_v18 = vpack.c.bf16 %v1877_v17, %v1877_v17 }
0x1123   :  { %v8090_v20 = vpop.eup %8089 }
0x1124   :  { %7499 = vmatmul.mubr.msk.bf16.vlgmr.msra.gmra.mrb[56].mxu1 %vm515_vm10, %v1879_v18  ;;  %v1878_v22 = vmul.f32 %v8090_v20, %v8086_v0 }
0x1125   :  { %7510 = vmatprep.mubr.msk.bf16.mxu1 %vm8236_vm1, %v8235_v16 }
0x1126   :  { %v1880_v25 = vpack.c.bf16 %v1878_v22, %v1878_v22 }
0x1127   :  { %7509 = vmatpush3.bf16.xpose.msra.mxu1 %v1985_v7 }
0x1128   :  { %7505 = vmatmul.mubr.msk.bf16.vlgmr.msra.gmra.mrb[60].mxu0 %vm515_vm10, %v1880_v25  ;;  %7520 = vmatprep.subr.bf16.mxu1 %v8235_v16 }
0x1129   :  { %7515 = vmatpush3.bf16.xpose.msra.mxu0 %v2035_v28  ;;  %7516 = vmatprep.mubr.msk.bf16.mxu0 %vm8236_vm1, %v8235_v16 }
0x112a   :  { %7526 = vmatprep.subr.bf16.mxu0 %v8235_v16 }
0x112e   :  { %7511 = vmatmul.mubr.msk.bf16.vlgmr.msra.gmra.mrb[60].mxu1 %vm418_vm6, %v1978_v29 }
0x112f   :  { %7522 = vmatprep.mubr.msk.bf16.mxu1 %vm8236_vm1, %v8235_v16 }
0x1130   :  { %7517 = vmatmul.mubr.msk.bf16.vlgmr.msra.gmra.mrb[64].mxu0 %vm418_vm6, %v2028_v30 }
0x1131   :  { %7528 = vmatprep.mubr.msk.bf16.mxu0 %vm8236_vm1, %v8235_v16 }
0x11f7   :  { %v1923_v31 = vpop.f32.mrb[56].mxu1 }
0x11f8   :  { %v7500_v32 = vpop.f32.mrb[57].mxu1 }
0x11f9   :  { %v1926_v33 = vpop.f32.mrb[58].mxu1 }
0x11fa   :  { %v7501_v34 = vpop.f32.mrb[59].mxu1 }
0x11fb   :  { %v1971_v35 = vpop.f32.mrb[60].mxu0 }
0x11fc   :  { %v7838_v36 = vpack.i.bf16 %v1971_v35, %v1923_v31  ;;  %v7506_v37 = vpop.f32.mrb[61].mxu0 }
0x11fd   :  { %v1974_v38 = vpop.f32.mrb[62].mxu0 }
0x11fe   :  { %v7507_v39 = vpop.f32.mrb[63].mxu0 }
0x1201   :  { %v2021_v40 = vpop.f32.mrb[60].mxu1 }
0x1202   :  { %v2077_v41 = vmul.f32 0.5, %v2021_v40  ;;  %v7512_v42 = vpop.f32.mrb[61].mxu1 }
0x1203   :  { %v2024_v43 = vpop.f32.mrb[62].mxu1  ;;  %v2071_v44 = vpop.f32.mrb[64].mxu0 }
0x1204   :  { %v2078_v45 = vmul.f32 0.5, %v2071_v44  ;;  %v7513_v46 = vpop.f32.mrb[63].mxu1  ;;  %v7518_v47 = vpop.f32.mrb[65].mxu0  ;;  %v2079_v48 = vadd.f32 %v2077_v41, %v8487_v19 }
0x1205   :  { %v2074_v49 = vpop.f32.mrb[66].mxu0 }
0x1206   :  { %v7519_v50 = vpop.f32.mrb[67].mxu0  ;;  %v2081_v52 = vsel %vm515_vm10, %v2079_v48, -inf  ;;  %v2080_v55 = vadd.f32 %v2078_v45, %v8490_v24 }
0x1207   :  { %2082 = vmax.xlane.f32.xlu0 %v2081_v52 }
0x1208   :  { %v2084_v56 = vsel %vm515_vm10, %v2080_v55, -inf }
0x1209   :  { %2085 = vmax.xlane.f32.xlu1 %v2084_v56 }
0x121a   :  { %2153 = vrot.lane.b32.xlu1 %v8468_v12, %s8243_s30 }
0x121e   :  { %7814 = vrot.lane.b32.xlu1 %v7813_v60, %s8244_s6 }
0x1222   :  { %7819 = vrot.lane.b32.xlu1 %v7818_v62, %s8245_s12 }
0x1226   :  { %7829 = vrot.lane.b32.xlu1 %v7828_v14, %s8246_s20 }
0x122a   :  { %7839 = vrot.lane.b32.xlu1 %v7838_v36, %s8247_s15 }
0x1294   :  { %v2083_v12 = vpop.xlane.xlu0 %2082 }
0x1295   :  { %v2087_v19 = vsub.f32 %v2079_v48, %v2083_v12 }
0x1296   :  { %v2086_v24 = vpop.xlane.xlu1 %2085 }
0x1297   :  { %v2089_v53 = vmul.f32 1.442695, %v2087_v19  ;;  %v2088_v58 = vsub.f32 %v2080_v55, %v2086_v24 }
0x1299   :  { %8091 = vpow2.f32 %v2089_v53  ;;  %v2091_v60 = vmul.f32 1.442695, %v2088_v58 }
0x129a   :  { %v2154_v61 = vpop.permute.xlu1 %2153 }
0x129b   :  { %8093 = vpow2.f32 %v2091_v60  ;;  %v2159_v51 = vsel %vm543_vm7, %v2154_v61, 0  ;;  %v6745_v61 = vld [vmem:[%s8347_s4] ss:$0 sm:$0xff]  ;;  %s9611_s4 = sld [smem:[#allocation12_spill]] }
0x129c   :  { %7527 = vmatpush3.bf16.msra.mxu0 %v2159_v51 }
0x129d   :  { %7540 = vmatprep.subr.bf16.mxu0 %v8235_v16 }
0x129e   :  { %v7815_v7 = vpop.permute.xlu1 %7814 }
0x129f   :  { %v7817_v29 = vunpack.i.h.bf16 %v7815_v7  ;;  %v7816_v30 = vunpack.i.l.bf16 %v7815_v7 }
0x12a1   :  { %v2258_v37 = vsel %vm418_vm6, %v8524_v63, %v7817_v29  ;;  %v2257_v38 = vsel %vm418_vm6, %v8522_v59, %v7816_v30 }
0x12a2   :  { %v7820_v25 = vpop.permute.xlu1 %7819 }
0x12a3   :  { %v8092_v57 = vpop.eup %8091  ;;  %v7822_v31 = vunpack.i.h.bf16 %v7820_v25  ;;  %v7821_v32 = vunpack.i.l.bf16 %v7820_v25  ;;  %v7894_v25 = vld [vmem:[%s8352_s14 + $0x8] sm:$0xff]  }
0x12a4   :  { %v2093_v62 = vsel %vm515_vm10, %v8092_v57, 0.0 }
0x12a5   :  { %v8094_v5 = vpop.eup %8093  ;;  %2094 = vadd.xlane.f32.xlu0 %v2093_v62  ;;  %v2259_v39 = vsel %vm515_vm10, %v2257_v38, %v7821_v32  ;;  %v2260_v40 = vsel %vm515_vm10, %v2258_v37, %v7822_v31 }
0x12a6   :  { %v2096_v13 = vsel %vm515_vm10, %v8094_v5, 0.0  ;;  %v7830_v33 = vpop.permute.xlu1 %7829 }
0x12a7   :  { %v7832_v45 = vunpack.i.h.bf16 %v7830_v33  ;;  %v7831_v46 = vunpack.i.l.bf16 %v7830_v33 }
0x12a9   :  { %2097 = vadd.xlane.f32.xlu0 %v2096_v13  ;;  %v8179_v13 = vld [vmem:[%s8262_s5] sm:$0xff] }
0x12aa   :  { %v7840_v47 = vpop.permute.xlu1 %7839 }
0x12ab   :  { %v7842_v50 = vunpack.i.h.bf16 %v7840_v47  ;;  %v7841_v52 = vunpack.i.l.bf16 %v7840_v47 }
0x12bf   :  { %2105 = vrot.lane.b32.xlu0 %v8464_v8, %s8243_s30 }
0x12c3   :  { %7824 = vrot.lane.b32.xlu0 %v7823_v3, %s8248_s16 }
0x12c7   :  { %7834 = vrot.lane.b32.xlu0 %v7833_v27, %s8249_s18  ;;  %v7889_v27 = vld [vmem:[%s8342_s27] sm:$0xff]   ;;  %s9607_s27 = sld [smem:[#allocation5_spill]] }
0x12cd   :  { %v131_v7 = vld [vmem:[%s9607_s27 + $0x8] sm:$0xff] }
0x1332   :  { %v2095_v14 = vpop.xlane.xlu0 %2094 }
0x1333   :  { %8095 = vrcp.f32 %v2095_v14 }
0x1336   :  { %v2098_v0 = vpop.xlane.xlu0 %2097 }
0x1337   :  { %8097 = vrcp.f32 %v2098_v0 }
0x133a   :  { %v2106_v11 = vpop.permute.xlu0 %2105 }
0x133b   :  { %v2111_v8 = vsel %vm543_vm7, %v2106_v11, 0 }
0x133c   :  { %7521 = vmatpush3.bf16.msra.mxu1 %v2111_v8  ;;  %v8180_v8 = vld [vmem:[%s8262_s5 + $0x8] sm:$0xff]  ;;  %s9608_s5 = sld [smem:[#allocation7_spill]] }
0x133d   :  { %v8096_v1 = vpop.eup %8095  ;;  %7532 = vmatprep.subr.bf16.mxu1 %v8235_v16 }
0x133e   :  { %v2101_v54 = vmul.f32 %v8096_v1, %v8092_v57  ;;  %v7825_v28 = vpop.permute.xlu0 %7824 }
0x133f   :  { %v7827_v34 = vunpack.i.h.bf16 %v7825_v28  ;;  %v7826_v35 = vunpack.i.l.bf16 %v7825_v28 }
0x1340   :  { %v2103_v2 = vpack.c.bf16 %v2101_v54, %v2101_v54 }
0x1341   :  { %v8098_v3 = vpop.eup %8097  ;;  %v2262_v41 = vsel %vm2261_vm11, %v2259_v39, %v7826_v35  ;;  %v2263_v42 = vsel %vm2261_vm11, %v2260_v40, %v7827_v34 }
0x1342   :  { %7523 = vmatmul.mubr.msk.bf16.vlgmr.msra.gmra.mrb[64].mxu1 %vm515_vm10, %v2103_v2  ;;  %v2102_v21 = vmul.f32 %v8098_v3, %v8094_v5  ;;  %v7835_v36 = vpop.permute.xlu0 %7834  ;;  %v2265_v63 = vsel %vm2264_vm12, %v2262_v41, %v7831_v46  ;;  %v2266_v48 = vsel %vm2264_vm12, %v2263_v42, %v7832_v45  ;;  %v6749_v45 = vld [vmem:[%s9608_s5] ss:$0 sm:$0xff] }
0x1343   :  { %7536 = vmatprep.mubr.msk.bf16.mxu1 %vm8236_vm1, %v8235_v16  ;;  %7533 = vmatpush3.bf16.msra.mxu1 %v7889_v27  ;;  %v7837_v43 = vunpack.i.h.bf16 %v7835_v36  ;;  %v7836_v44 = vunpack.i.l.bf16 %v7835_v36 }
0x1344   :  { %v2104_v26 = vpack.c.bf16 %v2102_v21, %v2102_v21  ;;  %7534 = vmatprep.subr.bf16.mxu1 %v8235_v16 }
0x1345   :  { %v2268_v59 = vsel %vm2267_vm13, %v2265_v63, %v7836_v44  ;;  %v2269_v49 = vsel %vm2267_vm13, %v2266_v48, %v7837_v43 }
0x1346   :  { %7529 = vmatmul.mubr.msk.bf16.vlgmr.msra.gmra.mrb[68].mxu0 %vm515_vm10, %v2104_v26  ;;  %v2271_v19 = vsel %vm2270_vm14, %v2268_v59, %v7841_v52  ;;  %v2272_v24 = vsel %vm2270_vm14, %v2269_v49, %v7842_v50 }
0x1347   :  { %7544 = vmatprep.mubr.msk.bf16.mxu0 %vm8236_vm1, %v8235_v16  ;;  %7535 = vmatpush3.bf16.msra.mxu1 %v7890_v4 }
0x1348   :  { %7548 = vmatprep.subr.bf16.mxu1 %v8235_v16 }
0x1415   :  { %v2147_v6 = vpop.f32.mrb[64].mxu1 }
0x1416   :  { %v7524_v9 = vpop.f32.mrb[65].mxu1 }
0x1417   :  { %v2150_v10 = vpop.f32.mrb[66].mxu1 }
0x1418   :  { %v7525_v15 = vpop.f32.mrb[67].mxu1 }
0x1419   :  { %v2195_v17 = vpop.f32.mrb[68].mxu0 }
0x141a   :  { %v7843_v18 = vpack.i.bf16 %v2195_v17, %v2147_v6  ;;  %v7530_v20 = vpop.f32.mrb[69].mxu0 }
0x141b   :  { %v2198_v22 = vpop.f32.mrb[70].mxu0  ;;  %v7893_v20 = vld [vmem:[%s8352_s14] sm:$0xff]   ;;  %s9610_s14 = sld [smem:[#allocation13_spill]] }
0x141c   :  { %7844 = vrot.lane.b32.xlu0 %v7843_v18, %s8250_s22  ;;  %v7531_v23 = vpop.f32.mrb[71].mxu0  ;;  %v7891_v18 = vld [vmem:[%s8362_s17] sm:$0xff]   ;;  %v7892_v22 = vld [vmem:[%s8362_s17 + $0x8] sm:$0xff]   ;;  %7541 = vmatpush3.bf16.msra.mxu0 %v7893_v20  ;;  %s9609_s17 = sld [smem:[#allocation8_spill]] }
0x141d   :  { %v130_v23 = vld [vmem:[%s9607_s27] sm:$0xff]  ;;  %7542 = vmatprep.subr.bf16.mxu0 %v8235_v16 }
0x141e   :  { %v2472_v28 = vpack.c.bf16 %v131_v7, %v130_v23 }
0x1420   :  { %7543 = vmatpush3.bf16.msra.mxu0 %v7894_v25 }
0x1421   :  { %7556 = vmatprep.subr.bf16.mxu0 %v8235_v16 }
0x1422   :  { %v6750_v49 = vld [vmem:[%s9609_s17] ss:$0 sm:$0xff] }
0x148e   :  { %v7845_v55 = vpop.permute.xlu0 %7844 }
0x148f   :  { %v7847_v56 = vunpack.i.h.bf16 %v7845_v55  ;;  %v7846_v12 = vunpack.i.l.bf16 %v7845_v55 }
0x1491   :  { %v2275_v53 = vsel %vm2273_vm15, %v2272_v24, %v7847_v56  ;;  %v2274_v58 = vsel %vm2273_vm15, %v2271_v19, %v7846_v12  ;;  %v7895_v56 = vld [vmem:[%s9610_s14] sm:$0xff]   ;;  %v7896_v19 = vld [vmem:[%s9610_s14 + $0x8] sm:$0xff]  }
0x1492   :  { %v2276_v60 = vpack.c.bf16 %v2275_v53, %v2274_v58  ;;  %v6755_v24 = vld [vmem:[%s9611_s4] ss:$0 sm:$0xff] }
0x1494   :  { %7537 = vmatmul.mubr.msk.bf16.vlgmr.msra.gmra.mrb[68].mxu1 %vm144_vm0, %v2276_v60 }
0x1495   :  { %7552 = vmatprep.mubr.msk.bf16.mxu1 %vm8236_vm1, %v8235_v16  ;;  %7549 = vmatpush3.bf16.msra.mxu1 %v7891_v18 }
0x1496   :  { %7550 = vmatprep.subr.bf16.mxu1 %v8235_v16 }
0x1499   :  { %7551 = vmatpush3.bf16.msra.mxu1 %v7892_v22 }
0x149a   :  { %7564 = vmatprep.subr.bf16.mxu1 %v8235_v16 }
0x149c   :  { %7553 = vmatmul.mubr.msk.bf16.vlgmr.msra.gmra.mrb[72].mxu1 %vm144_vm0, %v2472_v28 }
0x149d   :  { %7566 = vmatprep.mubr.msk.bf16.mxu1 %vm8236_vm1, %v8235_v16 }
0x1567   :  { %v2337_v51 = vpop.f32.mrb[68].mxu1 }
0x1568   :  { %v2338_v57 = vadd.f32 %v6745_v61, %v2337_v51  ;;  %v7538_v62 = vpop.f32.mrb[69].mxu1 }
0x1569   :  { %v2340_v5 = vpop.f32.mrb[70].mxu1 }
0x156a   :  { %v8851_v14 = vadd.f32 %v8179_v13, %v2338_v57  ;;  %v2341_v0 = vadd.f32 %v6745_v61, %v2340_v5  ;;  %v7539_v11 = vpop.f32.mrb[71].mxu1 }
0x156b   :  { %v6751_v11 = vld [vmem:[%s9612_s23] ss:$0 sm:$0xff] }
0x156c   :  { %v8854_v1 = vadd.f32 %v8180_v8, %v2341_v0  ;;  %v2346_v54 = vsel %vm144_vm0, %v8851_v14, 0.0 }
0x156d   :  { %2347 = vadd.xlane.f32.xlu1 %v2346_v54 }
0x156e   :  { %v2349_v2 = vsel %vm144_vm0, %v8854_v1, 0.0 }
0x156f   :  { %2350 = vadd.xlane.f32.xlu0 %v2349_v2  ;;  %v2533_v53 = vpop.f32.mrb[72].mxu1 }
0x1570   :  { %v2534_v58 = vadd.f32 %v6755_v24, %v2533_v53  ;;  %v7554_v60 = vpop.f32.mrb[73].mxu1 }
0x1571   :  { %v2536_v61 = vpop.f32.mrb[74].mxu1 }
0x1572   :  { %v8890_v51 = vpack.c.bf16 %v2534_v58, %v2534_v58  ;;  %v2537_v57 = vadd.f32 %v6755_v24, %v2536_v61  ;;  %v7555_v62 = vpop.f32.mrb[75].mxu1 }
0x1574   :  { %v8892_v5 = vpack.c.bf16 %v2537_v57, %v2537_v57  ;;  %v2626_v13 = vsel %vm418_vm6, %v8890_v51, 0 }
0x1575   :  { %7565 = vmatpush3.bf16.xpose.msra.mxu1 %v2626_v13 }
0x1576   :  { %v2672_v0 = vsel %vm418_vm6, %v8892_v5, 0  ;;  %7576 = vmatprep.subr.bf16.mxu1 %v8235_v16 }
0x15fa   :  { %v2348_v3 = vpop.xlane.xlu1 %2347 }
0x15fb   :  { %v2352_v21 = vmul.f32 0.03125, %v2348_v3 }
0x15fc   :  { %v2351_v26 = vpop.xlane.xlu0 %2350 }
0x15fd   :  { %v2354_v27 = vsub.f32 %v8851_v14, %v2352_v21  ;;  %v2353_v4 = vmul.f32 0.03125, %v2351_v26 }
0x15ff   :  { %v2355_v6 = vsub.f32 %v8854_v1, %v2353_v4  ;;  %v2356_v9 = vmul.f32 %v2354_v27, %v2354_v27 }
0x1601   :  { %v2358_v10 = vsel %vm144_vm0, %v2356_v9, 0.0  ;;  %v2357_v15 = vmul.f32 %v2355_v6, %v2355_v6 }
0x1602   :  { %2359 = vadd.xlane.f32.xlu0 %v2358_v10 }
0x1603   :  { %v2361_v17 = vsel %vm144_vm0, %v2357_v15, 0.0 }
0x1606   :  { %2362 = vadd.xlane.f32.xlu0 %v2361_v17  ;;  %v6759_v17 = vld [vmem:[%s9613_s26] ss:$0 sm:$0xff] }
0x168f   :  { %v2360_v29 = vpop.xlane.xlu0 %2359 }
0x1690   :  { %v2364_v30 = vmul.f32 0.032258064, %v2360_v29  ;;  %v138_v29 = vld [vmem:[%s9614_s28] sm:$0x1] }
0x1691   :  { %vm140_vm8 = vcmp.eq.f32.partialorder %v138_v29, 0.0 }
0x1692   :  { %8099 = vrsqrt.f32 %v2364_v30  ;;  %vm2368_vm2 = vcmp.eq.f32.partialorder %v2364_v30, inf  ;;  %v2371_v35 = vand.u32 2147483648, %v2364_v30  ;;  %vm2370_vm3 = vcmp.eq.f32.partialorder %v2364_v30, 0.0 }
0x1693   :  { %v2363_v31 = vpop.xlane.xlu0 %2362 }
0x1694   :  { %v2365_v32 = vmul.f32 0.032258064, %v2363_v31  ;;  %v139_v31 = vld [vmem:[%s9614_s28 + $0x1] sm:$0x1] }
0x1695   :  { %vm141_vm9 = vcmp.eq.f32.partialorder %v139_v31, 0.0 }
0x1696   :  { %8101 = vrsqrt.f32 %v2365_v32  ;;  %vm2375_vm4 = vcmp.eq.f32.partialorder %v2365_v32, inf  ;;  %v2378_v41 = vand.u32 2147483648, %v2365_v32  ;;  %vm2377_vm5 = vcmp.eq.f32.partialorder %v2365_v32, 0.0 }
0x169c   :  { %v8100_v33 = vpop.eup %8099 }
0x169d   :  { %v2367_v34 = vmul.f32 %v8100_v33, %v2364_v30  ;;  %v142_v33 = vsel %vm140_vm8, -1e+09, %v8235_v16 }
0x169f   :  { %v2369_v36 = vsel %vm2368_vm2, %v2364_v30, %v2367_v34  ;;  %v143_v34 = vsel %vm141_vm9, -1e+09, %v8235_v16 }
0x16a0   :  { %v8102_v37 = vpop.eup %8101  ;;  %v2372_v38 = vsel %vm2370_vm3, %v2371_v35, %v2369_v36 }
0x16a1   :  { %v2380_v39 = vadd.f32 1e-06, %v2372_v38  ;;  %v2374_v40 = vmul.f32 %v8102_v37, %v2365_v32 }
0x16a3   :  { %8103 = vrcp.f32 %v2380_v39  ;;  %v2376_v42 = vsel %vm2375_vm4, %v2365_v32, %v2374_v40 }
0x16a4   :  { %v2379_v43 = vsel %vm2377_vm5, %v2378_v41, %v2376_v42 }
0x16a5   :  { %v2381_v44 = vadd.f32 1e-06, %v2379_v43 }
0x16a7   :  { %8105 = vrcp.f32 %v2381_v44 }
0x16ad   :  { %v8104_v46 = vpop.eup %8103 }
0x16ae   :  { %v2391_v47 = vmul.f32 %v8104_v46, %v6749_v45 }
0x16b0   :  { %v2393_v59 = vmul.f32 %v2391_v47, %v2354_v27 }
0x16b1   :  { %v8106_v63 = vpop.eup %8105 }
0x16b2   :  { %v2392_v48 = vmul.f32 %v8106_v63, %v6749_v45  ;;  %v2402_v52 = vadd.f32 %v6750_v49, %v2393_v59 }
0x16b4   :  { %v2394_v50 = vmul.f32 %v2392_v48, %v2355_v6 }
0x16b6   :  { %v2403_v55 = vadd.f32 %v6750_v49, %v2394_v50 }
0x16b8   :  { %v2404_v12 = vpack.c.bf16 %v2403_v55, %v2402_v52 }
0x16ba   :  { %7545 = vmatmul.mubr.msk.bf16.vlgmr.msra.gmra.mrb[72].mxu0 %vm144_vm0, %v2404_v12 }
0x16bb   :  { %7557 = vmatpush3.bf16.msra.mxu0 %v7895_v56  ;;  %7560 = vmatprep.mubr.msk.bf16.mxu0 %vm8236_vm1, %v8235_v16 }
0x16bc   :  { %7558 = vmatprep.subr.bf16.mxu0 %v8235_v16 }
0x16bf   :  { %7559 = vmatpush3.bf16.msra.mxu0 %v7896_v19 }
0x16c0   :  { %7570 = vmatprep.subr.bf16.mxu0 %v8235_v16 }
0x16c2   :  { %7561 = vmatmul.mubr.msk.bf16.vlgmr.msra.gmra.mrb[76].mxu0 %vm144_vm0, %v2472_v28  ;;  %v2718_v28 = vlaneseq }
0x16c3   :  { %7572 = vmatprep.mubr.msk.bf16.mxu0 %vm8236_vm1, %v8235_v16 }
0x16c4   :  { %v8925_v30 = vshrl.u32 %v2718_v28, 7 }
0x16c6   :  { %v8929_v32 = vsub.s32 0, %v8925_v30 }
0x16c8   :  { %7571 = vmatpush3.bf16.xpose.msra.mxu0 %v2672_v0  ;;  %v8934_v35 = vrot.slane %v142_v33, %v8929_v32  ;;  %v8937_v39 = vrot.slane %v143_v34, %v8929_v32 }
0x16c9   :  { %7582 = vmatprep.subr.bf16.mxu0 %v8235_v16 }
0x178d   :  { %v2465_v8 = vpop.f32.mrb[72].mxu0 }
0x178e   :  { %v2466_v54 = vadd.f32 %v6751_v11, %v2465_v8  ;;  %v7546_v2 = vpop.f32.mrb[73].mxu0 }
0x178f   :  { %v2468_v3 = vpop.f32.mrb[74].mxu0 }
0x1790   :  { %v8901_v21 = vpack.c.bf16 %v2466_v54, %v2466_v54  ;;  %v2469_v26 = vadd.f32 %v6751_v11, %v2468_v3  ;;  %v7547_v27 = vpop.f32.mrb[75].mxu0 }
0x1792   :  { %v8903_v4 = vpack.c.bf16 %v2469_v26, %v2469_v26  ;;  %7567 = vmatmul.mubr.msk.bf16.vlgmr.msra.gmra.mrb[76].mxu1 %vm418_vm6, %v8901_v21 }
0x1793   :  { %7578 = vmatprep.mubr.msk.bf16.mxu1 %vm8236_vm1, %v8235_v16 }
0x1794   :  { %7573 = vmatmul.mubr.msk.bf16.vlgmr.msra.gmra.mrb[80].mxu0 %vm418_vm6, %v8903_v4 }
0x1795   :  { %v2597_v6 = vpop.f32.mrb[76].mxu0  ;;  %7584 = vmatprep.mubr.msk.bf16.mxu0 %vm8236_vm1, %v8235_v16 }
0x1796   :  { %v7562_v9 = vpop.f32.mrb[77].mxu0  ;;  %v2598_v18 = vadd.f32 %v6759_v17, %v2597_v6 }
0x1797   :  { %v2600_v10 = vpop.f32.mrb[78].mxu0 }
0x1798   :  { %v7563_v15 = vpop.f32.mrb[79].mxu0  ;;  %v2601_v20 = vadd.f32 %v6759_v17, %v2600_v10  ;;  %v8914_v22 = vpack.c.bf16 %v2598_v18, %v2598_v18 }
0x179a   :  { %v8916_v23 = vpack.c.bf16 %v2601_v20, %v2601_v20  ;;  %v2758_v7 = vsel %vm543_vm7, %v8914_v22, 0 }
0x179b   :  { %7577 = vmatpush3.bf16.msra.mxu1 %v2758_v7 }
0x179c   :  { %v2804_v25 = vsel %vm543_vm7, %v8916_v23, 0  ;;  %7588 = vmatprep.subr.bf16.mxu1 %v8235_v16 }
0x179d   :  { %7583 = vmatpush3.bf16.msra.mxu0 %v2804_v25 }
0x179e   :  { %7594 = vmatprep.subr.bf16.mxu0 %v8235_v16 }
0x1865   :  { %v2662_v36 = vpop.f32.mrb[76].mxu1 }
0x1866   :  { %v2714_v37 = vmul.f32 0.5, %v2662_v36  ;;  %v7568_v38 = vpop.f32.mrb[77].mxu1 }
0x1867   :  { %v2665_v40 = vpop.f32.mrb[78].mxu1  ;;  %v2708_v41 = vpop.f32.mrb[80].mxu0 }
0x1868   :  { %v2715_v42 = vmul.f32 0.5, %v2708_v41  ;;  %v7569_v43 = vpop.f32.mrb[79].mxu1  ;;  %v7574_v44 = vpop.f32.mrb[81].mxu0  ;;  %v2728_v45 = vadd.f32 %v8934_v35, %v2714_v37 }
0x1869   :  { %v2711_v46 = vpop.f32.mrb[82].mxu0 }
0x186a   :  { %v7575_v47 = vpop.f32.mrb[83].mxu0  ;;  %v2730_v63 = vsel %vm515_vm10, %v2728_v45, -inf  ;;  %v2729_v48 = vadd.f32 %v8937_v39, %v2715_v42 }
0x186b   :  { %2731 = vmax.xlane.f32.xlu1 %v2730_v63 }
0x186c   :  { %v2733_v59 = vsel %vm515_vm10, %v2729_v48, -inf }
0x186d   :  { %2734 = vmax.xlane.f32.xlu0 %v2733_v59 }
0x187c   :  { %2848 = vrot.lane.b32.xlu1 %v8890_v51, %s8237_s0 }
0x18f8   :  { %v2732_v49 = vpop.xlane.xlu1 %2731 }
0x18f9   :  { %v2736_v50 = vsub.f32 %v2728_v45, %v2732_v49 }
0x18fa   :  { %v2735_v52 = vpop.xlane.xlu0 %2734 }
0x18fb   :  { %v2738_v55 = vmul.f32 1.442695, %v2736_v50  ;;  %v2737_v56 = vsub.f32 %v2729_v48, %v2735_v52 }
0x18fc   :  { %v2849_v60 = vpop.permute.xlu1 %2848 }
0x18fd   :  { %8107 = vpow2.f32 %v2738_v55  ;;  %v2740_v12 = vmul.f32 1.442695, %v2737_v56  ;;  %v2854_v2 = vsel %vm418_vm6, %v2849_v60, 0 }
0x18ff   :  { %8109 = vpow2.f32 %v2740_v12 }
0x1907   :  { %v8108_v19 = vpop.eup %8107 }
0x1908   :  { %v2742_v24 = vsel %vm515_vm10, %v8108_v19, 0.0 }
0x1909   :  { %v8110_v53 = vpop.eup %8109  ;;  %2743 = vadd.xlane.f32.xlu1 %v2742_v24 }
0x190a   :  { %v2745_v58 = vsel %vm515_vm10, %v8110_v53, 0.0 }
0x190b   :  { %2746 = vadd.xlane.f32.xlu0 %v2745_v58 }
0x191a   :  { %2846 = vrot.lane.b32.xlu1 %v8901_v21, %s8237_s0 }
0x191e   :  { %2896 = vrot.lane.b32.xlu1 %v8903_v4, %s8237_s0 }
0x1921   :  { %2898 = vrot.lane.b32.xlu0 %v8892_v5, %s8237_s0 }
0x1996   :  { %v2744_v61 = vpop.xlane.xlu1 %2743 }
0x1997   :  { %8111 = vrcp.f32 %v2744_v61 }
0x1998   :  { %v2747_v57 = vpop.xlane.xlu0 %2746 }
0x1999   :  { %8113 = vrcp.f32 %v2747_v57 }
0x199a   :  { %v2847_v27 = vpop.permute.xlu1 %2846 }
0x199c   :  { %v2899_v54 = vpop.permute.xlu0 %2898 }
0x199d   :  { %v2904_v26 = vsel %vm418_vm6, %v2899_v54, 0 }
0x199e   :  { %v2897_v6 = vpop.permute.xlu1 %2896 }
0x19a1   :  { %v8112_v62 = vpop.eup %8111 }
0x19a2   :  { %v2750_v13 = vmul.f32 %v8112_v62, %v8108_v19 }
0x19a3   :  { %v8114_v0 = vpop.eup %8113 }
0x19a4   :  { %v2751_v11 = vmul.f32 %v8114_v0, %v8110_v53  ;;  %v2752_v8 = vpack.c.bf16 %v2750_v13, %v2750_v13 }
0x19a6   :  { %7579 = vmatmul.mubr.msk.bf16.vlgmr.msra.gmra.mrb[80].mxu1 %vm515_vm10, %v2752_v8  ;;  %v2753_v3 = vpack.c.bf16 %v2751_v11, %v2751_v11 }
0x19a7   :  { %7589 = vmatpush3.bf16.xpose.msra.mxu1 %v2854_v2  ;;  %7590 = vmatprep.mubr.msk.bf16.mxu1 %vm8236_vm1, %v8235_v16 }
0x19a8   :  { %7585 = vmatmul.mubr.msk.bf16.vlgmr.msra.gmra.mrb[84].mxu0 %vm515_vm10, %v2753_v3  ;;  %7600 = vmatprep.subr.bf16.mxu1 %v8235_v16 }
0x19a9   :  { %7595 = vmatpush3.bf16.xpose.msra.mxu0 %v2904_v26  ;;  %7596 = vmatprep.mubr.msk.bf16.mxu0 %vm8236_vm1, %v8235_v16 }
0x19aa   :  { %7606 = vmatprep.subr.bf16.mxu0 %v8235_v16 }
0x19ae   :  { %7591 = vmatmul.mubr.msk.bf16.vlgmr.msra.gmra.mrb[84].mxu1 %vm418_vm6, %v2847_v27 }
0x19af   :  { %7602 = vmatprep.mubr.msk.bf16.mxu1 %vm8236_vm1, %v8235_v16 }
0x19b0   :  { %7597 = vmatmul.mubr.msk.bf16.vlgmr.msra.gmra.mrb[88].mxu0 %vm418_vm6, %v2897_v6 }
0x19b1   :  { %7608 = vmatprep.mubr.msk.bf16.mxu0 %vm8236_vm1, %v8235_v16 }
0x1a79   :  { %v8969_v9 = vpop.f32.mrb[80].mxu1 }
0x1a7a   :  { %v7580_v10 = vpop.f32.mrb[81].mxu1 }
0x1a7b   :  { %v2797_v15 = vpop.f32.mrb[82].mxu1  ;;  %v8971_v17 = vpop.f32.mrb[84].mxu0 }
0x1a7c   :  { %v7581_v18 = vpop.f32.mrb[83].mxu1  ;;  %v7586_v20 = vpop.f32.mrb[85].mxu0 }
0x1a7d   :  { %v2843_v7 = vpop.f32.mrb[86].mxu0 }
0x1a7e   :  { %v7587_v25 = vpop.f32.mrb[87].mxu0 }
0x1a81   :  { %v2890_v28 = vpop.f32.mrb[84].mxu1 }
0x1a82   :  { %v2946_v29 = vmul.f32 0.5, %v2890_v28  ;;  %v7592_v31 = vpop.f32.mrb[85].mxu1 }
0x1a83   :  { %v2893_v33 = vpop.f32.mrb[86].mxu1  ;;  %v2940_v34 = vpop.f32.mrb[88].mxu0 }
0x1a84   :  { %v2948_v36 = vadd.f32 %v2946_v29, %v8934_v35  ;;  %v2947_v37 = vmul.f32 0.5, %v2940_v34  ;;  %v7593_v38 = vpop.f32.mrb[87].mxu1  ;;  %v7598_v40 = vpop.f32.mrb[89].mxu0 }
0x1a85   :  { %v2943_v41 = vpop.f32.mrb[90].mxu0 }
0x1a86   :  { %v7599_v42 = vpop.f32.mrb[91].mxu0  ;;  %v2950_v43 = vsel %vm515_vm10, %v2948_v36, -inf  ;;  %v2949_v44 = vadd.f32 %v2947_v37, %v8937_v39 }
0x1a87   :  { %2951 = vmax.xlane.f32.xlu1 %v2950_v43 }
0x1a88   :  { %v2953_v45 = vsel %vm515_vm10, %v2949_v44, -inf }
0x1a89   :  { %2954 = vmax.xlane.f32.xlu0 %v2953_v45 }
0x1a98   :  { %2974 = vrot.lane.b32.xlu1 %v8914_v22, %s8237_s0 }
0x1a9c   :  { %3072 = vrot.lane.b32.xlu1 %v8890_v51, %s8238_s13 }
0x1aa0   :  { %3122 = vrot.lane.b32.xlu1 %v8892_v5, %s8238_s13 }
0x1aa4   :  { %3070 = vrot.lane.b32.xlu1 %v8901_v21, %s8238_s13 }
0x1b14   :  { %v2952_v46 = vpop.xlane.xlu1 %2951 }
0x1b15   :  { %v2956_v47 = vsub.f32 %v2948_v36, %v2952_v46 }
0x1b16   :  { %v2955_v63 = vpop.xlane.xlu0 %2954 }
0x1b17   :  { %v2958_v48 = vmul.f32 1.442695, %v2956_v47  ;;  %v2957_v59 = vsub.f32 %v2949_v44, %v2955_v63 }
0x1b18   :  { %v2975_v49 = vpop.permute.xlu1 %2974 }
0x1b19   :  { %8115 = vpow2.f32 %v2958_v48  ;;  %v2960_v50 = vmul.f32 1.442695, %v2957_v59  ;;  %v2980_v52 = vsel %vm543_vm7, %v2975_v49, 0 }
0x1b1a   :  { %7601 = vmatpush3.bf16.msra.mxu1 %v2980_v52 }
0x1b1b   :  { %8117 = vpow2.f32 %v2960_v50  ;;  %7612 = vmatprep.subr.bf16.mxu1 %v8235_v16 }
0x1b1c   :  { %v3073_v57 = vpop.permute.xlu1 %3072 }
0x1b1d   :  { %v3078_v11 = vsel %vm418_vm6, %v3073_v57, 0 }
0x1b20   :  { %v3123_v54 = vpop.permute.xlu1 %3122 }
0x1b21   :  { %v3128_v3 = vsel %vm418_vm6, %v3123_v54, 0 }
0x1b23   :  { %v8116_v55 = vpop.eup %8115 }
0x1b24   :  { %v2962_v56 = vsel %vm515_vm10, %v8116_v55, 0.0  ;;  %v3071_v26 = vpop.permute.xlu1 %3070 }
0x1b25   :  { %v8118_v12 = vpop.eup %8117  ;;  %2963 = vadd.xlane.f32.xlu0 %v2962_v56 }
0x1b26   :  { %v2965_v19 = vsel %vm515_vm10, %v8118_v12, 0.0 }
0x1b29   :  { %2966 = vadd.xlane.f32.xlu0 %v2965_v19 }
0x1b3f   :  { %3022 = vrot.lane.b32.xlu0 %v8916_v23, %s8237_s0 }
0x1b43   :  { %3120 = vrot.lane.b32.xlu0 %v8903_v4, %s8238_s13 }
0x1bb2   :  { %v2964_v24 = vpop.xlane.xlu0 %2963 }
0x1bb3   :  { %8119 = vrcp.f32 %v2964_v24 }
0x1bb6   :  { %v2967_v53 = vpop.xlane.xlu0 %2966 }
0x1bb7   :  { %8121 = vrcp.f32 %v2967_v53 }
0x1bba   :  { %v3023_v58 = vpop.permute.xlu0 %3022 }
0x1bbb   :  { %v3028_v60 = vsel %vm543_vm7, %v3023_v58, 0 }
0x1bbc   :  { %7607 = vmatpush3.bf16.msra.mxu0 %v3028_v60 }
0x1bbd   :  { %v8120_v61 = vpop.eup %8119  ;;  %7618 = vmatprep.subr.bf16.mxu0 %v8235_v16 }
0x1bbe   :  { %v2970_v62 = vmul.f32 %v8120_v61, %v8116_v55  ;;  %v3121_v27 = vpop.permute.xlu0 %3120 }
0x1bc0   :  { %v2972_v13 = vpack.c.bf16 %v2970_v62, %v2970_v62 }
0x1bc1   :  { %v8122_v0 = vpop.eup %8121 }
0x1bc2   :  { %v2971_v8 = vmul.f32 %v8122_v0, %v8118_v12  ;;  %7603 = vmatmul.mubr.msk.bf16.vlgmr.msra.gmra.mrb[88].mxu1 %vm515_vm10, %v2972_v13 }
0x1bc3   :  { %7613 = vmatpush3.bf16.xpose.msra.mxu1 %v3078_v11  ;;  %7614 = vmatprep.mubr.msk.bf16.mxu1 %vm8236_vm1, %v8235_v16 }
0x1bc4   :  { %v2973_v2 = vpack.c.bf16 %v2971_v8, %v2971_v8  ;;  %7624 = vmatprep.subr.bf16.mxu1 %v8235_v16 }
0x1bc6   :  { %7609 = vmatmul.mubr.msk.bf16.vlgmr.msra.gmra.mrb[92].mxu0 %vm515_vm10, %v2973_v2 }
0x1bc7   :  { %7619 = vmatpush3.bf16.xpose.msra.mxu0 %v3128_v3  ;;  %7620 = vmatprep.mubr.msk.bf16.mxu0 %vm8236_vm1, %v8235_v16 }
0x1bc8   :  { %7630 = vmatprep.subr.bf16.mxu0 %v8235_v16 }
0x1bca   :  { %7615 = vmatmul.mubr.msk.bf16.vlgmr.msra.gmra.mrb[92].mxu1 %vm418_vm6, %v3071_v26 }
0x1bcb   :  { %7626 = vmatprep.mubr.msk.bf16.mxu1 %vm8236_vm1, %v8235_v16 }
0x1bce   :  { %7621 = vmatmul.mubr.msk.bf16.vlgmr.msra.gmra.mrb[96].mxu0 %vm418_vm6, %v3121_v27 }
0x1bcf   :  { %7632 = vmatprep.mubr.msk.bf16.mxu0 %vm8236_vm1, %v8235_v16 }
0x1c95   :  { %v9011_v6 = vpop.f32.mrb[88].mxu1 }
0x1c96   :  { %v7604_v10 = vpop.f32.mrb[89].mxu1 }
0x1c97   :  { %v3019_v15 = vpop.f32.mrb[90].mxu1 }
0x1c98   :  { %v7605_v18 = vpop.f32.mrb[91].mxu1 }
0x1c99   :  { %v9013_v20 = vpop.f32.mrb[92].mxu0 }
0x1c9a   :  { %v7848_v7 = vpack.i.bf16 %v9013_v20, %v9011_v6  ;;  %v7610_v25 = vpop.f32.mrb[93].mxu0 }
0x1c9b   :  { %v3067_v28 = vpop.f32.mrb[94].mxu0 }
0x1c9c   :  { %v7611_v29 = vpop.f32.mrb[95].mxu0 }
0x1c9d   :  { %v3114_v31 = vpop.f32.mrb[92].mxu1 }
0x1c9e   :  { %v3170_v33 = vmul.f32 0.5, %v3114_v31  ;;  %v7616_v34 = vpop.f32.mrb[93].mxu1 }
0x1c9f   :  { %v3117_v36 = vpop.f32.mrb[94].mxu1 }
0x1ca0   :  { %v3172_v37 = vadd.f32 %v3170_v33, %v8934_v35  ;;  %v7617_v38 = vpop.f32.mrb[95].mxu1 }
0x1ca1   :  { %v3164_v40 = vpop.f32.mrb[96].mxu0 }
0x1ca2   :  { %v3171_v41 = vmul.f32 0.5, %v3164_v40  ;;  %v7622_v42 = vpop.f32.mrb[97].mxu0  ;;  %v3174_v43 = vsel %vm515_vm10, %v3172_v37, -inf }
0x1ca3   :  { %3175 = vmax.xlane.f32.xlu1 %v3174_v43  ;;  %v3167_v44 = vpop.f32.mrb[98].mxu0 }
0x1ca4   :  { %v3173_v45 = vadd.f32 %v3171_v41, %v8937_v39  ;;  %v7623_v46 = vpop.f32.mrb[99].mxu0 }
0x1ca6   :  { %v3177_v47 = vsel %vm515_vm10, %v3173_v45, -inf }
0x1ca7   :  { %3178 = vmax.xlane.f32.xlu0 %v3177_v47 }
0x1cb4   :  { %3198 = vrot.lane.b32.xlu1 %v8914_v22, %s8238_s13 }
0x1cb8   :  { %3296 = vrot.lane.b32.xlu1 %v8890_v51, %s8239_s21 }
0x1cbc   :  { %3346 = vrot.lane.b32.xlu1 %v8892_v5, %s8239_s21 }
0x1cc0   :  { %3294 = vrot.lane.b32.xlu1 %v8901_v21, %s8239_s21 }
0x1d30   :  { %v3176_v63 = vpop.xlane.xlu1 %3175 }
0x1d31   :  { %v3180_v48 = vsub.f32 %v3172_v37, %v3176_v63 }
0x1d33   :  { %v3182_v59 = vmul.f32 1.442695, %v3180_v48 }
0x1d34   :  { %v3199_v49 = vpop.permute.xlu1 %3198  ;;  %v3179_v50 = vpop.xlane.xlu0 %3178 }
0x1d35   :  { %8123 = vpow2.f32 %v3182_v59  ;;  %v3204_v52 = vsel %vm543_vm7, %v3199_v49, 0  ;;  %v3181_v55 = vsub.f32 %v3173_v45, %v3179_v50 }
0x1d36   :  { %7625 = vmatpush3.bf16.msra.mxu1 %v3204_v52 }
0x1d37   :  { %v3184_v56 = vmul.f32 1.442695, %v3181_v55  ;;  %7636 = vmatprep.subr.bf16.mxu1 %v8235_v16 }
0x1d38   :  { %v3297_v13 = vpop.permute.xlu1 %3296 }
0x1d39   :  { %8125 = vpow2.f32 %v3184_v56  ;;  %v3302_v54 = vsel %vm418_vm6, %v3297_v13, 0 }
0x1d3c   :  { %v3347_v3 = vpop.permute.xlu1 %3346 }
0x1d3d   :  { %v3352_v27 = vsel %vm418_vm6, %v3347_v3, 0 }
0x1d3f   :  { %v8124_v12 = vpop.eup %8123 }
0x1d40   :  { %v3186_v19 = vsel %vm515_vm10, %v8124_v12, 0.0  ;;  %v3295_v10 = vpop.permute.xlu1 %3294 }
0x1d41   :  { %3187 = vadd.xlane.f32.xlu0 %v3186_v19 }
0x1d43   :  { %v8126_v24 = vpop.eup %8125 }
0x1d44   :  { %v3189_v53 = vsel %vm515_vm10, %v8126_v24, 0.0 }
0x1d45   :  { %3190 = vadd.xlane.f32.xlu0 %v3189_v53 }
0x1d5b   :  { %3246 = vrot.lane.b32.xlu0 %v8916_v23, %s8238_s13 }
0x1d5f   :  { %3344 = vrot.lane.b32.xlu0 %v8903_v4, %s8239_s21 }
0x1dce   :  { %v3188_v58 = vpop.xlane.xlu0 %3187 }
0x1dcf   :  { %8127 = vrcp.f32 %v3188_v58 }
0x1dd2   :  { %v3191_v60 = vpop.xlane.xlu0 %3190 }
0x1dd3   :  { %8129 = vrcp.f32 %v3191_v60 }
0x1dd6   :  { %v3247_v61 = vpop.permute.xlu0 %3246 }
0x1dd7   :  { %v3252_v57 = vsel %vm543_vm7, %v3247_v61, 0 }
0x1dd8   :  { %7631 = vmatpush3.bf16.msra.mxu0 %v3252_v57 }
0x1dd9   :  { %v8128_v62 = vpop.eup %8127  ;;  %7642 = vmatprep.subr.bf16.mxu0 %v8235_v16 }
0x1dda   :  { %v3194_v0 = vmul.f32 %v8128_v62, %v8124_v12  ;;  %v3345_v15 = vpop.permute.xlu0 %3344 }
0x1ddc   :  { %v3196_v11 = vpack.c.bf16 %v3194_v0, %v3194_v0 }
0x1ddd   :  { %v8130_v8 = vpop.eup %8129 }
0x1dde   :  { %v3195_v2 = vmul.f32 %v8130_v8, %v8126_v24  ;;  %7627 = vmatmul.mubr.msk.bf16.vlgmr.msra.gmra.mrb[96].mxu1 %vm515_vm10, %v3196_v11 }
0x1ddf   :  { %7637 = vmatpush3.bf16.xpose.msra.mxu1 %v3302_v54  ;;  %7638 = vmatprep.mubr.msk.bf16.mxu1 %vm8236_vm1, %v8235_v16 }
0x1de0   :  { %v3197_v26 = vpack.c.bf16 %v3195_v2, %v3195_v2  ;;  %7648 = vmatprep.subr.bf16.mxu1 %v8235_v16 }
0x1de2   :  { %7633 = vmatmul.mubr.msk.bf16.vlgmr.msra.gmra.mrb[100].mxu0 %vm515_vm10, %v3197_v26 }
0x1de3   :  { %7643 = vmatpush3.bf16.xpose.msra.mxu0 %v3352_v27  ;;  %7644 = vmatprep.mubr.msk.bf16.mxu0 %vm8236_vm1, %v8235_v16 }
0x1de4   :  { %7654 = vmatprep.subr.bf16.mxu0 %v8235_v16 }
0x1de6   :  { %7639 = vmatmul.mubr.msk.bf16.vlgmr.msra.gmra.mrb[100].mxu1 %vm418_vm6, %v3295_v10 }
0x1de7   :  { %7650 = vmatprep.mubr.msk.bf16.mxu1 %vm8236_vm1, %v8235_v16 }
0x1dea   :  { %7645 = vmatmul.mubr.msk.bf16.vlgmr.msra.gmra.mrb[104].mxu0 %vm418_vm6, %v3345_v15 }
0x1deb   :  { %7656 = vmatprep.mubr.msk.bf16.mxu0 %vm8236_vm1, %v8235_v16 }
0x1eb1   :  { %v9055_v18 = vpop.f32.mrb[96].mxu1 }
0x1eb2   :  { %v7628_v25 = vpop.f32.mrb[97].mxu1 }
0x1eb3   :  { %v3243_v28 = vpop.f32.mrb[98].mxu1 }
0x1eb4   :  { %v7629_v29 = vpop.f32.mrb[99].mxu1 }
0x1eb5   :  { %v9057_v31 = vpop.f32.mrb[100].mxu0 }
0x1eb6   :  { %v7853_v33 = vpack.i.bf16 %v9057_v31, %v9055_v18  ;;  %v7634_v34 = vpop.f32.mrb[101].mxu0 }
0x1eb7   :  { %v3291_v36 = vpop.f32.mrb[102].mxu0 }
0x1eb8   :  { %v7635_v37 = vpop.f32.mrb[103].mxu0 }
0x1eb9   :  { %v3338_v38 = vpop.f32.mrb[100].mxu1 }
0x1eba   :  { %v3394_v40 = vmul.f32 0.5, %v3338_v38  ;;  %v7640_v41 = vpop.f32.mrb[101].mxu1 }
0x1ebb   :  { %v3341_v42 = vpop.f32.mrb[102].mxu1 }
0x1ebc   :  { %v3396_v43 = vadd.f32 %v3394_v40, %v8934_v35  ;;  %v7641_v44 = vpop.f32.mrb[103].mxu1 }
0x1ebd   :  { %v3388_v45 = vpop.f32.mrb[104].mxu0 }
0x1ebe   :  { %v3395_v46 = vmul.f32 0.5, %v3388_v45  ;;  %v7646_v47 = vpop.f32.mrb[105].mxu0  ;;  %v3398_v63 = vsel %vm515_vm10, %v3396_v43, -inf }
0x1ebf   :  { %3399 = vmax.xlane.f32.xlu1 %v3398_v63  ;;  %v3391_v48 = vpop.f32.mrb[106].mxu0 }
0x1ec0   :  { %v3397_v59 = vadd.f32 %v3395_v46, %v8937_v39  ;;  %v7647_v49 = vpop.f32.mrb[107].mxu0 }
0x1ec2   :  { %v3401_v50 = vsel %vm515_vm10, %v3397_v59, -inf }
0x1ec3   :  { %3402 = vmax.xlane.f32.xlu0 %v3401_v50 }
0x1ed0   :  { %3422 = vrot.lane.b32.xlu1 %v8914_v22, %s8239_s21 }
0x1ed4   :  { %3520 = vrot.lane.b32.xlu1 %v8890_v51, %s8240_s25 }
0x1ed8   :  { %3570 = vrot.lane.b32.xlu1 %v8892_v5, %s8240_s25 }
0x1edc   :  { %3518 = vrot.lane.b32.xlu1 %v8901_v21, %s8240_s25 }
0x1f4c   :  { %v3400_v52 = vpop.xlane.xlu1 %3399 }
0x1f4d   :  { %v3404_v55 = vsub.f32 %v3396_v43, %v3400_v52 }
0x1f4f   :  { %v3406_v56 = vmul.f32 1.442695, %v3404_v55 }
0x1f50   :  { %v3423_v12 = vpop.permute.xlu1 %3422  ;;  %v3403_v19 = vpop.xlane.xlu0 %3402 }
0x1f51   :  { %8131 = vpow2.f32 %v3406_v56  ;;  %v3428_v24 = vsel %vm543_vm7, %v3423_v12, 0  ;;  %v3405_v53 = vsub.f32 %v3397_v59, %v3403_v19 }
0x1f52   :  { %7649 = vmatpush3.bf16.msra.mxu1 %v3428_v24 }
0x1f53   :  { %v3408_v58 = vmul.f32 1.442695, %v3405_v53  ;;  %7660 = vmatprep.subr.bf16.mxu1 %v8235_v16 }
0x1f54   :  { %v3521_v2 = vpop.permute.xlu1 %3520 }
0x1f55   :  { %8133 = vpow2.f32 %v3408_v58  ;;  %v3526_v10 = vsel %vm418_vm6, %v3521_v2, 0 }
0x1f58   :  { %v3571_v25 = vpop.permute.xlu1 %3570 }
0x1f59   :  { %v3576_v29 = vsel %vm418_vm6, %v3571_v25, 0 }
0x1f5b   :  { %v8132_v60 = vpop.eup %8131 }
0x1f5c   :  { %v3410_v61 = vsel %vm515_vm10, %v8132_v60, 0.0  ;;  %v3519_v34 = vpop.permute.xlu1 %3518 }
0x1f5d   :  { %3411 = vadd.xlane.f32.xlu0 %v3410_v61 }
0x1f5f   :  { %v8134_v57 = vpop.eup %8133 }
0x1f60   :  { %v3413_v62 = vsel %vm515_vm10, %v8134_v57, 0.0 }
0x1f61   :  { %3414 = vadd.xlane.f32.xlu0 %v3413_v62 }
0x1f77   :  { %3470 = vrot.lane.b32.xlu0 %v8916_v23, %s8239_s21 }
0x1f7b   :  { %3568 = vrot.lane.b32.xlu0 %v8903_v4, %s8240_s25 }
0x1fea   :  { %v3412_v13 = vpop.xlane.xlu0 %3411 }
0x1feb   :  { %8135 = vrcp.f32 %v3412_v13 }
0x1fee   :  { %v3415_v0 = vpop.xlane.xlu0 %3414 }
0x1fef   :  { %8137 = vrcp.f32 %v3415_v0 }
0x1ff2   :  { %v3471_v11 = vpop.permute.xlu0 %3470 }
0x1ff3   :  { %v3476_v8 = vsel %vm543_vm7, %v3471_v11, 0 }
0x1ff4   :  { %7655 = vmatpush3.bf16.msra.mxu0 %v3476_v8 }
0x1ff5   :  { %v8136_v54 = vpop.eup %8135  ;;  %7666 = vmatprep.subr.bf16.mxu0 %v8235_v16 }
0x1ff6   :  { %v3418_v3 = vmul.f32 %v8136_v54, %v8132_v60  ;;  %v3569_v36 = vpop.permute.xlu0 %3568 }
0x1ff8   :  { %v3420_v26 = vpack.c.bf16 %v3418_v3, %v3418_v3 }
0x1ff9   :  { %v8138_v27 = vpop.eup %8137 }
0x1ffa   :  { %v3419_v15 = vmul.f32 %v8138_v27, %v8134_v57  ;;  %7651 = vmatmul.mubr.msk.bf16.vlgmr.msra.gmra.mrb[104].mxu1 %vm515_vm10, %v3420_v26 }
0x1ffb   :  { %7661 = vmatpush3.bf16.xpose.msra.mxu1 %v3526_v10  ;;  %7662 = vmatprep.mubr.msk.bf16.mxu1 %vm8236_vm1, %v8235_v16 }
0x1ffc   :  { %v3421_v28 = vpack.c.bf16 %v3419_v15, %v3419_v15  ;;  %7672 = vmatprep.subr.bf16.mxu1 %v8235_v16 }
0x1ffe   :  { %7657 = vmatmul.mubr.msk.bf16.vlgmr.msra.gmra.mrb[108].mxu0 %vm515_vm10, %v3421_v28 }
0x1fff   :  { %7667 = vmatpush3.bf16.xpose.msra.mxu0 %v3576_v29  ;;  %7668 = vmatprep.mubr.msk.bf16.mxu0 %vm8236_vm1, %v8235_v16 }
0x2000   :  { %7678 = vmatprep.subr.bf16.mxu0 %v8235_v16 }
0x2002   :  { %7663 = vmatmul.mubr.msk.bf16.vlgmr.msra.gmra.mrb[108].mxu1 %vm418_vm6, %v3519_v34 }
0x2003   :  { %7674 = vmatprep.mubr.msk.bf16.mxu1 %vm8236_vm1, %v8235_v16 }
0x2006   :  { %7669 = vmatmul.mubr.msk.bf16.vlgmr.msra.gmra.mrb[112].mxu0 %vm418_vm6, %v3569_v36 }
0x2007   :  { %7680 = vmatprep.mubr.msk.bf16.mxu0 %vm8236_vm1, %v8235_v16 }
0x20cd   :  { %v9099_v37 = vpop.f32.mrb[104].mxu1 }
0x20ce   :  { %v7652_v38 = vpop.f32.mrb[105].mxu1 }
0x20cf   :  { %v3467_v40 = vpop.f32.mrb[106].mxu1 }
0x20d0   :  { %v7653_v41 = vpop.f32.mrb[107].mxu1 }
0x20d1   :  { %v9101_v42 = vpop.f32.mrb[108].mxu0 }
0x20d2   :  { %v7858_v43 = vpack.i.bf16 %v9101_v42, %v9099_v37  ;;  %v7658_v44 = vpop.f32.mrb[109].mxu0 }
0x20d3   :  { %v3515_v45 = vpop.f32.mrb[110].mxu0 }
0x20d4   :  { %v7659_v46 = vpop.f32.mrb[111].mxu0 }
0x20d5   :  { %v3562_v47 = vpop.f32.mrb[108].mxu1 }
0x20d6   :  { %v3618_v63 = vmul.f32 0.5, %v3562_v47  ;;  %v7664_v48 = vpop.f32.mrb[109].mxu1 }
0x20d7   :  { %v3565_v59 = vpop.f32.mrb[110].mxu1 }
0x20d8   :  { %v3620_v49 = vadd.f32 %v3618_v63, %v8934_v35  ;;  %v7665_v50 = vpop.f32.mrb[111].mxu1 }
0x20d9   :  { %v3612_v52 = vpop.f32.mrb[112].mxu0 }
0x20da   :  { %v3619_v55 = vmul.f32 0.5, %v3612_v52  ;;  %v7670_v56 = vpop.f32.mrb[113].mxu0  ;;  %v3622_v12 = vsel %vm515_vm10, %v3620_v49, -inf }
0x20db   :  { %3623 = vmax.xlane.f32.xlu1 %v3622_v12  ;;  %v3615_v19 = vpop.f32.mrb[114].mxu0 }
0x20dc   :  { %v3621_v24 = vadd.f32 %v3619_v55, %v8937_v39  ;;  %v7671_v53 = vpop.f32.mrb[115].mxu0 }
0x20de   :  { %v3625_v58 = vsel %vm515_vm10, %v3621_v24, -inf }
0x20df   :  { %3626 = vmax.xlane.f32.xlu0 %v3625_v58 }
0x20ec   :  { %3646 = vrot.lane.b32.xlu1 %v8914_v22, %s8240_s25 }
0x20f0   :  { %3744 = vrot.lane.b32.xlu1 %v8890_v51, %s8241_s19 }
0x20f4   :  { %3794 = vrot.lane.b32.xlu1 %v8892_v5, %s8241_s19 }
0x20f8   :  { %3742 = vrot.lane.b32.xlu1 %v8901_v21, %s8241_s19 }
0x2168   :  { %v3624_v60 = vpop.xlane.xlu1 %3623 }
0x2169   :  { %v3628_v61 = vsub.f32 %v3620_v49, %v3624_v60 }
0x216b   :  { %v3630_v57 = vmul.f32 1.442695, %v3628_v61 }
0x216c   :  { %v3647_v62 = vpop.permute.xlu1 %3646  ;;  %v3627_v13 = vpop.xlane.xlu0 %3626 }
0x216d   :  { %8139 = vpow2.f32 %v3630_v57  ;;  %v3652_v0 = vsel %vm543_vm7, %v3647_v62, 0  ;;  %v3629_v11 = vsub.f32 %v3621_v24, %v3627_v13 }
0x216e   :  { %7673 = vmatpush3.bf16.msra.mxu1 %v3652_v0 }
0x216f   :  { %v3632_v8 = vmul.f32 1.442695, %v3629_v11  ;;  %7684 = vmatprep.subr.bf16.mxu1 %v8235_v16 }
0x2170   :  { %v3745_v29 = vpop.permute.xlu1 %3744 }
0x2171   :  { %8141 = vpow2.f32 %v3632_v8  ;;  %v3750_v40 = vsel %vm418_vm6, %v3745_v29, 0 }
0x2174   :  { %v3795_v44 = vpop.permute.xlu1 %3794 }
0x2175   :  { %v3800_v46 = vsel %vm418_vm6, %v3795_v44, 0 }
0x2177   :  { %v8140_v54 = vpop.eup %8139 }
0x2178   :  { %v3634_v2 = vsel %vm515_vm10, %v8140_v54, 0.0  ;;  %v3743_v47 = vpop.permute.xlu1 %3742 }
0x2179   :  { %3635 = vadd.xlane.f32.xlu0 %v3634_v2 }
0x217b   :  { %v8142_v3 = vpop.eup %8141 }
0x217c   :  { %v3637_v26 = vsel %vm515_vm10, %v8142_v3, 0.0 }
0x217d   :  { %3638 = vadd.xlane.f32.xlu0 %v3637_v26 }
0x2193   :  { %3694 = vrot.lane.b32.xlu0 %v8916_v23, %s8240_s25 }
0x2197   :  { %3792 = vrot.lane.b32.xlu0 %v8903_v4, %s8241_s19 }
0x2206   :  { %v3636_v27 = vpop.xlane.xlu0 %3635 }
0x2207   :  { %8143 = vrcp.f32 %v3636_v27 }
0x220a   :  { %v3639_v10 = vpop.xlane.xlu0 %3638 }
0x220b   :  { %8145 = vrcp.f32 %v3639_v10 }
0x220e   :  { %v3695_v15 = vpop.permute.xlu0 %3694 }
0x220f   :  { %v3700_v25 = vsel %vm543_vm7, %v3695_v15, 0 }
0x2210   :  { %7679 = vmatpush3.bf16.msra.mxu0 %v3700_v25 }
0x2211   :  { %v8144_v28 = vpop.eup %8143  ;;  %7690 = vmatprep.subr.bf16.mxu0 %v8235_v16 }
0x2212   :  { %v3642_v34 = vmul.f32 %v8144_v28, %v8140_v54  ;;  %v3793_v63 = vpop.permute.xlu0 %3792 }
0x2214   :  { %v3644_v36 = vpack.c.bf16 %v3642_v34, %v3642_v34 }
0x2215   :  { %v8146_v38 = vpop.eup %8145 }
0x2216   :  { %v3643_v41 = vmul.f32 %v8146_v38, %v8142_v3  ;;  %7675 = vmatmul.mubr.msk.bf16.vlgmr.msra.gmra.mrb[112].mxu1 %vm515_vm10, %v3644_v36 }
0x2217   :  { %7685 = vmatpush3.bf16.xpose.msra.mxu1 %v3750_v40  ;;  %7686 = vmatprep.mubr.msk.bf16.mxu1 %vm8236_vm1, %v8235_v16 }
0x2218   :  { %v3645_v45 = vpack.c.bf16 %v3643_v41, %v3643_v41  ;;  %7696 = vmatprep.subr.bf16.mxu1 %v8235_v16 }
0x221a   :  { %7681 = vmatmul.mubr.msk.bf16.vlgmr.msra.gmra.mrb[116].mxu0 %vm515_vm10, %v3645_v45 }
0x221b   :  { %7691 = vmatpush3.bf16.xpose.msra.mxu0 %v3800_v46  ;;  %7692 = vmatprep.mubr.msk.bf16.mxu0 %vm8236_vm1, %v8235_v16 }
0x221c   :  { %7702 = vmatprep.subr.bf16.mxu0 %v8235_v16 }
0x221e   :  { %7687 = vmatmul.mubr.msk.bf16.vlgmr.msra.gmra.mrb[116].mxu1 %vm418_vm6, %v3743_v47 }
0x221f   :  { %7698 = vmatprep.mubr.msk.bf16.mxu1 %vm8236_vm1, %v8235_v16 }
0x2222   :  { %7693 = vmatmul.mubr.msk.bf16.vlgmr.msra.gmra.mrb[120].mxu0 %vm418_vm6, %v3793_v63 }
0x2223   :  { %7704 = vmatprep.mubr.msk.bf16.mxu0 %vm8236_vm1, %v8235_v16 }
0x22e9   :  { %v9143_v48 = vpop.f32.mrb[112].mxu1 }
0x22ea   :  { %v7676_v59 = vpop.f32.mrb[113].mxu1 }
0x22eb   :  { %v3691_v49 = vpop.f32.mrb[114].mxu1 }
0x22ec   :  { %v7677_v50 = vpop.f32.mrb[115].mxu1 }
0x22ed   :  { %v9145_v52 = vpop.f32.mrb[116].mxu0 }
0x22ee   :  { %v7863_v55 = vpack.i.bf16 %v9145_v52, %v9143_v48  ;;  %v7682_v56 = vpop.f32.mrb[117].mxu0  ;;  %v7897_v52 = vld [vmem:[%s9615_s1] sm:$0xff]  }
0x22ef   :  { %v3739_v12 = vpop.f32.mrb[118].mxu0 }
0x22f0   :  { %v7683_v19 = vpop.f32.mrb[119].mxu0 }
0x22f1   :  { %v3786_v24 = vpop.f32.mrb[116].mxu1 }
0x22f2   :  { %v3842_v53 = vmul.f32 0.5, %v3786_v24  ;;  %v7688_v58 = vpop.f32.mrb[117].mxu1 }
0x22f3   :  { %v3789_v60 = vpop.f32.mrb[118].mxu1 }
0x22f4   :  { %v3844_v61 = vadd.f32 %v3842_v53, %v8934_v35  ;;  %v7689_v57 = vpop.f32.mrb[119].mxu1 }
0x22f5   :  { %v3836_v62 = vpop.f32.mrb[120].mxu0 }
0x22f6   :  { %v3843_v13 = vmul.f32 0.5, %v3836_v62  ;;  %v7694_v0 = vpop.f32.mrb[121].mxu0  ;;  %v3846_v11 = vsel %vm515_vm10, %v3844_v61, -inf }
0x22f7   :  { %3847 = vmax.xlane.f32.xlu1 %v3846_v11  ;;  %v3839_v8 = vpop.f32.mrb[122].mxu0 }
0x22f8   :  { %v3845_v54 = vadd.f32 %v3843_v13, %v8937_v39  ;;  %v7695_v2 = vpop.f32.mrb[123].mxu0 }
0x22fa   :  { %v3849_v3 = vsel %vm515_vm10, %v3845_v54, -inf }
0x22fb   :  { %3850 = vmax.xlane.f32.xlu0 %v3849_v3 }
0x2308   :  { %3870 = vrot.lane.b32.xlu1 %v8914_v22, %s8241_s19 }
0x230c   :  { %3968 = vrot.lane.b32.xlu1 %v8890_v51, %s8242_s24 }
0x2310   :  { %4018 = vrot.lane.b32.xlu1 %v8892_v5, %s8242_s24 }
0x2314   :  { %3966 = vrot.lane.b32.xlu1 %v8901_v21, %s8242_s24 }
0x2384   :  { %v3848_v26 = vpop.xlane.xlu1 %3847 }
0x2385   :  { %v3852_v27 = vsub.f32 %v3844_v61, %v3848_v26 }
0x2387   :  { %v3854_v10 = vmul.f32 1.442695, %v3852_v27 }
0x2388   :  { %v3871_v15 = vpop.permute.xlu1 %3870  ;;  %v3851_v25 = vpop.xlane.xlu0 %3850 }
0x2389   :  { %8147 = vpow2.f32 %v3854_v10  ;;  %v3876_v28 = vsel %vm543_vm7, %v3871_v15, 0  ;;  %v3853_v29 = vsub.f32 %v3845_v54, %v3851_v25 }
0x238a   :  { %7697 = vmatpush3.bf16.msra.mxu1 %v3876_v28 }
0x238b   :  { %v3856_v34 = vmul.f32 1.442695, %v3853_v29  ;;  %7708 = vmatprep.subr.bf16.mxu1 %v8235_v16 }
0x238c   :  { %v3969_v59 = vpop.permute.xlu1 %3968 }
0x238d   :  { %8149 = vpow2.f32 %v3856_v34  ;;  %v3974_v12 = vsel %vm418_vm6, %v3969_v59, 0 }
0x2390   :  { %v4019_v24 = vpop.permute.xlu1 %4018 }
0x2391   :  { %v4024_v58 = vsel %vm418_vm6, %v4019_v24, 0 }
0x2393   :  { %v8148_v36 = vpop.eup %8147 }
0x2394   :  { %v3858_v38 = vsel %vm515_vm10, %v8148_v36, 0.0  ;;  %v3967_v60 = vpop.permute.xlu1 %3966 }
0x2395   :  { %3859 = vadd.xlane.f32.xlu0 %v3858_v38 }
0x2397   :  { %v8150_v40 = vpop.eup %8149 }
0x2398   :  { %v3861_v41 = vsel %vm515_vm10, %v8150_v40, 0.0 }
0x2399   :  { %3862 = vadd.xlane.f32.xlu0 %v3861_v41 }
0x23af   :  { %3918 = vrot.lane.b32.xlu0 %v8916_v23, %s8241_s19 }
0x23b3   :  { %4016 = vrot.lane.b32.xlu0 %v8903_v4, %s8242_s24 }
0x2422   :  { %v3860_v44 = vpop.xlane.xlu0 %3859 }
0x2423   :  { %8151 = vrcp.f32 %v3860_v44 }
0x2426   :  { %v3863_v45 = vpop.xlane.xlu0 %3862 }
0x2427   :  { %8153 = vrcp.f32 %v3863_v45 }
0x242a   :  { %v3919_v46 = vpop.permute.xlu0 %3918 }
0x242b   :  { %v3924_v47 = vsel %vm543_vm7, %v3919_v46, 0 }
0x242c   :  { %7703 = vmatpush3.bf16.msra.mxu0 %v3924_v47 }
0x242d   :  { %v8152_v63 = vpop.eup %8151  ;;  %7714 = vmatprep.subr.bf16.mxu0 %v8235_v16 }
0x242e   :  { %v3866_v49 = vmul.f32 %v8152_v63, %v8148_v36  ;;  %v4017_v61 = vpop.permute.xlu0 %4016 }
0x2430   :  { %v3868_v50 = vpack.c.bf16 %v3866_v49, %v3866_v49 }
0x2431   :  { %v8154_v56 = vpop.eup %8153 }
0x2432   :  { %v3867_v19 = vmul.f32 %v8154_v56, %v8150_v40  ;;  %7699 = vmatmul.mubr.msk.bf16.vlgmr.msra.gmra.mrb[120].mxu1 %vm515_vm10, %v3868_v50 }
0x2433   :  { %7709 = vmatpush3.bf16.xpose.msra.mxu1 %v3974_v12  ;;  %7710 = vmatprep.mubr.msk.bf16.mxu1 %vm8236_vm1, %v8235_v16 }
0x2434   :  { %v3869_v53 = vpack.c.bf16 %v3867_v19, %v3867_v19  ;;  %7720 = vmatprep.subr.bf16.mxu1 %v8235_v16 }
0x2436   :  { %7705 = vmatmul.mubr.msk.bf16.vlgmr.msra.gmra.mrb[124].mxu0 %vm515_vm10, %v3869_v53 }
0x2437   :  { %7715 = vmatpush3.bf16.xpose.msra.mxu0 %v4024_v58  ;;  %7716 = vmatprep.mubr.msk.bf16.mxu0 %vm8236_vm1, %v8235_v16 }
0x2438   :  { %7726 = vmatprep.subr.bf16.mxu0 %v8235_v16 }
0x243a   :  { %7711 = vmatmul.mubr.msk.bf16.vlgmr.msra.gmra.mrb[124].mxu1 %vm418_vm6, %v3967_v60 }
0x243b   :  { %7722 = vmatprep.mubr.msk.bf16.mxu1 %vm8236_vm1, %v8235_v16 }
0x243e   :  { %7717 = vmatmul.mubr.msk.bf16.vlgmr.msra.gmra.mrb[128].mxu0 %vm418_vm6, %v4017_v61 }
0x243f   :  { %7728 = vmatprep.mubr.msk.bf16.mxu0 %vm8236_vm1, %v8235_v16 }
0x2505   :  { %v9187_v57 = vpop.f32.mrb[120].mxu1 }
0x2506   :  { %v7700_v62 = vpop.f32.mrb[121].mxu1 }
0x2507   :  { %v3915_v13 = vpop.f32.mrb[122].mxu1 }
0x2508   :  { %v7701_v0 = vpop.f32.mrb[123].mxu1 }
0x2509   :  { %v9189_v11 = vpop.f32.mrb[124].mxu0 }
0x250a   :  { %v7868_v8 = vpack.i.bf16 %v9189_v11, %v9187_v57  ;;  %v7706_v54 = vpop.f32.mrb[125].mxu0 }
0x250b   :  { %v3963_v2 = vpop.f32.mrb[126].mxu0 }
0x250c   :  { %v7707_v3 = vpop.f32.mrb[127].mxu0 }
0x250d   :  { %v4010_v26 = vpop.f32.mrb[124].mxu1 }
0x250e   :  { %v4066_v27 = vmul.f32 0.5, %v4010_v26  ;;  %v7712_v10 = vpop.f32.mrb[125].mxu1 }
0x250f   :  { %v4013_v15 = vpop.f32.mrb[126].mxu1 }
0x2510   :  { %v4068_v25 = vadd.f32 %v4066_v27, %v8934_v35  ;;  %v7713_v28 = vpop.f32.mrb[127].mxu1 }
0x2511   :  { %v4060_v29 = vpop.f32.mrb[128].mxu0 }
0x2512   :  { %v4067_v34 = vmul.f32 0.5, %v4060_v29  ;;  %v7718_v36 = vpop.f32.mrb[129].mxu0  ;;  %v4070_v38 = vsel %vm515_vm10, %v4068_v25, -inf }
0x2513   :  { %4071 = vmax.xlane.f32.xlu1 %v4070_v38  ;;  %v4063_v40 = vpop.f32.mrb[130].mxu0 }
0x2514   :  { %v4069_v41 = vadd.f32 %v4067_v34, %v8937_v39  ;;  %v7719_v44 = vpop.f32.mrb[131].mxu0 }
0x2516   :  { %v4073_v45 = vsel %vm515_vm10, %v4069_v41, -inf }
0x2517   :  { %4074 = vmax.xlane.f32.xlu0 %v4073_v45 }
0x2524   :  { %4094 = vrot.lane.b32.xlu1 %v8914_v22, %s8242_s24 }
0x2528   :  { %4192 = vrot.lane.b32.xlu1 %v8890_v51, %s8243_s30 }
0x252c   :  { %4242 = vrot.lane.b32.xlu1 %v8892_v5, %s8243_s30 }
0x2530   :  { %4190 = vrot.lane.b32.xlu1 %v8901_v21, %s8243_s30 }
0x25a0   :  { %v4072_v46 = vpop.xlane.xlu1 %4071 }
0x25a1   :  { %v4076_v47 = vsub.f32 %v4068_v25, %v4072_v46 }
0x25a3   :  { %v4078_v63 = vmul.f32 1.442695, %v4076_v47 }
0x25a4   :  { %v4095_v59 = vpop.permute.xlu1 %4094  ;;  %v4075_v49 = vpop.xlane.xlu0 %4074 }
0x25a5   :  { %8155 = vpow2.f32 %v4078_v63  ;;  %v4100_v50 = vsel %vm543_vm7, %v4095_v59, 0  ;;  %v4077_v56 = vsub.f32 %v4069_v41, %v4075_v49 }
0x25a6   :  { %7721 = vmatpush3.bf16.msra.mxu1 %v4100_v50 }
0x25a7   :  { %v4080_v12 = vmul.f32 1.442695, %v4077_v56  ;;  %7732 = vmatprep.subr.bf16.mxu1 %v8235_v16 }
0x25a8   :  { %v4193_v62 = vpop.permute.xlu1 %4192 }
0x25a9   :  { %8157 = vpow2.f32 %v4080_v12  ;;  %v4198_v2 = vsel %vm418_vm6, %v4193_v62, 0 }
0x25af   :  { %v8156_v51 = vpop.eup %8155 }
0x25b0   :  { %v4082_v5 = vsel %vm515_vm10, %v8156_v51, 0.0 }
0x25b1   :  { %4083 = vadd.xlane.f32.xlu0 %v4082_v5 }
0x25b3   :  { %v8158_v19 = vpop.eup %8157 }
0x25b4   :  { %v4085_v21 = vsel %vm515_vm10, %v8158_v19, 0.0 }
0x25b5   :  { %4086 = vadd.xlane.f32.xlu0 %v4085_v21 }
0x25cb   :  { %4142 = vrot.lane.b32.xlu0 %v8916_v23, %s8242_s24 }
0x25cf   :  { %4240 = vrot.lane.b32.xlu0 %v8903_v4, %s8243_s30  ;;  %v4243_v4 = vpop.permute.xlu1 %4242 }
0x25d0   :  { %v4248_v27 = vsel %vm418_vm6, %v4243_v4, 0 }
0x25d3   :  { %v4191_v10 = vpop.permute.xlu1 %4190 }
0x263e   :  { %v4084_v24 = vpop.xlane.xlu0 %4083 }
0x263f   :  { %8159 = vrcp.f32 %v4084_v24 }
0x2642   :  { %v4087_v53 = vpop.xlane.xlu0 %4086 }
0x2643   :  { %8161 = vrcp.f32 %v4087_v53 }
0x2646   :  { %v4143_v58 = vpop.permute.xlu0 %4142 }
0x2647   :  { %v4148_v60 = vsel %vm543_vm7, %v4143_v58, 0 }
0x2648   :  { %7727 = vmatpush3.bf16.msra.mxu0 %v4148_v60 }
0x2649   :  { %v8160_v61 = vpop.eup %8159  ;;  %7738 = vmatprep.subr.bf16.mxu0 %v8235_v16 }
0x264a   :  { %v4090_v13 = vmul.f32 %v8160_v61, %v8156_v51  ;;  %v4241_v15 = vpop.permute.xlu0 %4240 }
0x264c   :  { %v4092_v0 = vpack.c.bf16 %v4090_v13, %v4090_v13 }
0x264d   :  { %v8162_v54 = vpop.eup %8161 }
0x264e   :  { %v4091_v3 = vmul.f32 %v8162_v54, %v8158_v19  ;;  %7723 = vmatmul.mubr.msk.bf16.vlgmr.msra.gmra.mrb[128].mxu1 %vm515_vm10, %v4092_v0 }
0x264f   :  { %7733 = vmatpush3.bf16.xpose.msra.mxu1 %v4198_v2  ;;  %7734 = vmatprep.mubr.msk.bf16.mxu1 %vm8236_vm1, %v8235_v16 }
0x2650   :  { %v4093_v26 = vpack.c.bf16 %v4091_v3, %v4091_v3  ;;  %7744 = vmatprep.subr.bf16.mxu1 %v8235_v16 }
0x2652   :  { %7729 = vmatmul.mubr.msk.bf16.vlgmr.msra.gmra.mrb[132].mxu0 %vm515_vm10, %v4093_v26 }
0x2653   :  { %7739 = vmatpush3.bf16.xpose.msra.mxu0 %v4248_v27  ;;  %7740 = vmatprep.mubr.msk.bf16.mxu0 %vm8236_vm1, %v8235_v16 }
0x2654   :  { %7750 = vmatprep.subr.bf16.mxu0 %v8235_v16 }
0x2656   :  { %7735 = vmatmul.mubr.msk.bf16.vlgmr.msra.gmra.mrb[132].mxu1 %vm418_vm6, %v4191_v10 }
0x2657   :  { %7746 = vmatprep.mubr.msk.bf16.mxu1 %vm8236_vm1, %v8235_v16 }
0x265a   :  { %7741 = vmatmul.mubr.msk.bf16.vlgmr.msra.gmra.mrb[136].mxu0 %vm418_vm6, %v4241_v15 }
0x265b   :  { %7752 = vmatprep.mubr.msk.bf16.mxu0 %vm8236_vm1, %v8235_v16 }
0x2721   :  { %v4136_v25 = vpop.f32.mrb[128].mxu1 }
0x2722   :  { %v7724_v28 = vpop.f32.mrb[129].mxu1 }
0x2723   :  { %v4139_v29 = vpop.f32.mrb[130].mxu1 }
0x2724   :  { %v7725_v34 = vpop.f32.mrb[131].mxu1 }
0x2725   :  { %v4184_v36 = vpop.f32.mrb[132].mxu0 }
0x2726   :  { %v7873_v38 = vpack.i.bf16 %v4184_v36, %v4136_v25  ;;  %v7730_v40 = vpop.f32.mrb[133].mxu0 }
0x2727   :  { %v4187_v41 = vpop.f32.mrb[134].mxu0 }
0x2728   :  { %v7731_v44 = vpop.f32.mrb[135].mxu0 }
0x2729   :  { %v4234_v45 = vpop.f32.mrb[132].mxu1 }
0x272a   :  { %v4290_v46 = vmul.f32 0.5, %v4234_v45  ;;  %v7736_v47 = vpop.f32.mrb[133].mxu1 }
0x272b   :  { %v4237_v63 = vpop.f32.mrb[134].mxu1 }
0x272c   :  { %v4292_v59 = vadd.f32 %v4290_v46, %v8934_v35  ;;  %v7737_v49 = vpop.f32.mrb[135].mxu1 }
0x272d   :  { %v4284_v50 = vpop.f32.mrb[136].mxu0 }
0x272e   :  { %v4291_v56 = vmul.f32 0.5, %v4284_v50  ;;  %v7742_v12 = vpop.f32.mrb[137].mxu0  ;;  %v4294_v51 = vsel %vm515_vm10, %v4292_v59, -inf }
0x272f   :  { %4295 = vmax.xlane.f32.xlu1 %v4294_v51  ;;  %v4287_v5 = vpop.f32.mrb[138].mxu0 }
0x2730   :  { %v4293_v19 = vadd.f32 %v4291_v56, %v8937_v39  ;;  %v7743_v21 = vpop.f32.mrb[139].mxu0 }
0x2732   :  { %v4297_v24 = vsel %vm515_vm10, %v4293_v19, -inf }
0x2733   :  { %4298 = vmax.xlane.f32.xlu0 %v4297_v24 }
0x2740   :  { %4318 = vrot.lane.b32.xlu1 %v8914_v22, %s8243_s30 }
0x2744   :  { %7849 = vrot.lane.b32.xlu1 %v7848_v7, %s8244_s6 }
0x2748   :  { %7854 = vrot.lane.b32.xlu1 %v7853_v33, %s8245_s12 }
0x274c   :  { %7859 = vrot.lane.b32.xlu1 %v7858_v43, %s8248_s16 }
0x2750   :  { %7869 = vrot.lane.b32.xlu1 %v7868_v8, %s8249_s18 }
0x27bc   :  { %v4296_v22 = vpop.xlane.xlu1 %4295 }
0x27bd   :  { %v4300_v35 = vsub.f32 %v4292_v59, %v4296_v22 }
0x27bf   :  { %v4302_v39 = vmul.f32 1.442695, %v4300_v35 }
0x27c0   :  { %v4319_v6 = vpop.permute.xlu1 %4318  ;;  %v4299_v20 = vpop.xlane.xlu0 %4298 }
0x27c1   :  { %8163 = vpow2.f32 %v4302_v39  ;;  %v4324_v7 = vsel %vm543_vm7, %v4319_v6, 0  ;;  %v4301_v18 = vsub.f32 %v4293_v19, %v4299_v20 }
0x27c2   :  { %7745 = vmatpush3.bf16.msra.mxu1 %v4324_v7 }
0x27c3   :  { %v4304_v31 = vmul.f32 1.442695, %v4301_v18  ;;  %7756 = vmatprep.subr.bf16.mxu1 %v8235_v16 }
0x27c4   :  { %v7850_v15 = vpop.permute.xlu1 %7849 }
0x27c5   :  { %8165 = vpow2.f32 %v4304_v31  ;;  %v7852_v34 = vunpack.i.h.bf16 %v7850_v15  ;;  %v7851_v36 = vunpack.i.l.bf16 %v7850_v15 }
0x27c7   :  { %v4471_v46 = vsel %vm418_vm6, %v8971_v17, %v7852_v34  ;;  %v4470_v47 = vsel %vm418_vm6, %v8969_v9, %v7851_v36  ;;  %v4637_v34 = vld [vmem:[%s9617_s7 + $0xc0] sm:$0xff]  ;;  %v4630_v36 = vld [vmem:[%s9617_s7 + $0x88] sm:$0xff] }
0x27c8   :  { %v7855_v25 = vpop.permute.xlu1 %7854 }
0x27cb   :  { %v8164_v33 = vpop.eup %8163 }
0x27cc   :  { %v4306_v37 = vsel %vm515_vm10, %v8164_v33, 0.0  ;;  %v7860_v29 = vpop.permute.xlu1 %7859 }
0x27cd   :  { %4307 = vadd.xlane.f32.xlu0 %v4306_v37  ;;  %v7862_v40 = vunpack.i.h.bf16 %v7860_v29  ;;  %v7861_v41 = vunpack.i.l.bf16 %v7860_v29  ;;  %v6801_v37 = vld [vmem:[%s9616_s2] ss:$0 sm:$0xff] }
0x27ce   :  { %v4629_v29 = vld [vmem:[%s9617_s7 + $0x80] sm:$0xff] }
0x27cf   :  { %v8166_v42 = vpop.eup %8165 }
0x27d0   :  { %v4309_v43 = vsel %vm515_vm10, %v8166_v42, 0.0  ;;  %v7870_v50 = vpop.permute.xlu1 %7869 }
0x27d1   :  { %4310 = vadd.xlane.f32.xlu0 %v4309_v43  ;;  %v7872_v21 = vunpack.i.h.bf16 %v7870_v50  ;;  %v7871_v24 = vunpack.i.l.bf16 %v7870_v50 }
0x27e7   :  { %4366 = vrot.lane.b32.xlu0 %v8916_v23, %s8243_s30 }
0x27eb   :  { %7864 = vrot.lane.b32.xlu0 %v7863_v55, %s8246_s20  ;;  %v7898_v55 = vld [vmem:[%s9615_s1 + $0x8] sm:$0xff]  }
0x27ef   :  { %7874 = vrot.lane.b32.xlu0 %v7873_v38, %s8247_s15  ;;  %v7856_v38 = vunpack.i.l.bf16 %v7855_v25 }
0x27f1   :  { %v4472_v59 = vsel %vm515_vm10, %v4470_v47, %v7856_v38  ;;  %v6824_v38 = vcombine.high %v4629_v29, %v4637_v34  ;;  %v4623_v47 = vld [vmem:[%s9617_s7 + $0x50] sm:$0xff] }
0x27f2   :  { %v4474_v56 = vsel %vm2261_vm11, %v4472_v59, %v7861_v41  ;;  %v8251_v41 = vmov 0  }
0x285a   :  { %v4308_v57 = vpop.xlane.xlu0 %4307 }
0x285b   :  { %8167 = vrcp.f32 %v4308_v57 }
0x285e   :  { %v4311_v11 = vpop.xlane.xlu0 %4310 }
0x285f   :  { %8169 = vrcp.f32 %v4311_v11 }
0x2862   :  { %v4367_v8 = vpop.permute.xlu0 %4366 }
0x2863   :  { %v4372_v53 = vsel %vm543_vm7, %v4367_v8, 0 }
0x2864   :  { %7751 = vmatpush3.bf16.msra.mxu0 %v4372_v53 }
0x2865   :  { %v8168_v58 = vpop.eup %8167 }
0x2866   :  { %v4314_v60 = vmul.f32 %v8168_v58, %v8164_v33  ;;  %v7865_v28 = vpop.permute.xlu0 %7864 }
0x2867   :  { %v7867_v44 = vunpack.i.h.bf16 %v7865_v28  ;;  %v7866_v45 = vunpack.i.l.bf16 %v7865_v28 }
0x2868   :  { %v4316_v23 = vpack.c.bf16 %v4314_v60, %v4314_v60 }
0x2869   :  { %v8170_v61 = vpop.eup %8169  ;;  %v4476_v5 = vsel %vm2264_vm12, %v4474_v56, %v7866_v45 }
0x286a   :  { %v4315_v62 = vmul.f32 %v8170_v61, %v8166_v42  ;;  %7747 = vmatmul.mubr.msk.bf16.vlgmr.msra.gmra.mrb[136].mxu1 %vm515_vm10, %v4316_v23  ;;  %v7875_v63 = vpop.permute.xlu0 %7874  ;;  %v4478_v22 = vsel %vm2267_vm13, %v4476_v5, %v7871_v24 }
0x286b   :  { %7760 = vmatprep.mubr.msk.bf16.mxu1 %vm8236_vm1, %v8235_v16  ;;  %7757 = vmatpush3.bf16.msra.mxu1 %v7897_v52  ;;  %v7877_v19 = vunpack.i.h.bf16 %v7875_v63  ;;  %v7876_v17 = vunpack.i.l.bf16 %v7875_v63  ;;  %v4616_v63 = vld [vmem:[%s9617_s7 + $0x18] sm:$0xff] }
0x286c   :  { %v4317_v48 = vpack.c.bf16 %v4315_v62, %v4315_v62  ;;  %7758 = vmatprep.subr.bf16.mxu1 %v8235_v16  ;;  %v7857_v16 = vunpack.i.h.bf16 %v7855_v25 }
0x286d   :  { %v4480_v20 = vsel %vm2270_vm14, %v4478_v22, %v7876_v17 }
0x286e   :  { %7753 = vmatmul.mubr.msk.bf16.vlgmr.msra.gmra.mrb[140].mxu0 %vm515_vm10, %v4317_v48  ;;  %v4473_v49 = vsel %vm515_vm10, %v4471_v46, %v7857_v16  ;;  %v6823_v16 = vcombine.low %v4629_v29, %v4637_v34  ;;  %v4615_v46 = vld [vmem:[%s9617_s7 + $0x10] sm:$0xff]  ;;  %v4634_v29 = vld [vmem:[%s9617_s7 + $0xa8] sm:$0xff] }
0x286f   :  { %7759 = vmatpush3.bf16.msra.mxu1 %v7898_v55  ;;  %v4475_v12 = vsel %vm2261_vm11, %v4473_v49, %v7862_v40  ;;  %v4638_v40 = vld [vmem:[%s9617_s7 + $0xc8] sm:$0xff]  ;;  %4924 = vmatprep.mubr.bf16.mxu0 %v8251_v41  ;;  %v6812_v59 = vcombine.high %v4615_v46, %v4623_v47  ;;  %v4624_v49 = vld [vmem:[%s9617_s7 + $0x58] sm:$0xff]  ;;  %v6811_v50 = vcombine.low %v4615_v46, %v4623_v47 }
0x2870   :  { %v4477_v51 = vsel %vm2264_vm12, %v4475_v12, %v7867_v44  ;;  %v6825_v44 = vcombine.low %v4630_v36, %v4638_v40  ;;  %v6826_v45 = vcombine.high %v4630_v36, %v4638_v40  ;;  %v6813_v56 = vcombine.low %v4616_v63, %v4624_v49  ;;  %v4642_v34 = vld [vmem:[%s9617_s7 + $0xe8] sm:$0xff]  ;;  %v4620_v46 = vld [vmem:[%s9617_s7 + $0x38] sm:$0xff] }
0x2871   :  { %v4479_v35 = vsel %vm2267_vm13, %v4477_v51, %v7872_v21  ;;  %v6814_v12 = vcombine.high %v4616_v63, %v4624_v49  ;;  %v6834_v40 = vcombine.high %v4634_v29, %v4642_v34  ;;  %v4628_v47 = vld [vmem:[%s9617_s7 + $0x78] sm:$0xff] }
0x2872   :  { %v4481_v7 = vsel %vm2270_vm14, %v4479_v35, %v7877_v19 }
0x293d   :  { %v4360_v13 = vpop.f32.mrb[136].mxu1 }
0x293e   :  { %v7748_v0 = vpop.f32.mrb[137].mxu1 }
0x293f   :  { %v4363_v54 = vpop.f32.mrb[138].mxu1 }
0x2940   :  { %v7749_v2 = vpop.f32.mrb[139].mxu1 }
0x2941   :  { %v4408_v3 = vpop.f32.mrb[140].mxu0 }
0x2942   :  { %v7878_v4 = vpack.i.bf16 %v4408_v3, %v4360_v13  ;;  %v7754_v26 = vpop.f32.mrb[141].mxu0  ;;  %v4613_v3 = vld [vmem:[%s9617_s7] sm:$0xff] }
0x2943   :  { %v4411_v27 = vpop.f32.mrb[142].mxu0  ;;  %v4614_v26 = vld [vmem:[%s9617_s7 + $0x8] sm:$0xff] }
0x2944   :  { %7879 = vrot.lane.b32.xlu1 %v7878_v4, %s8250_s22  ;;  %v7755_v10 = vpop.f32.mrb[143].mxu0  ;;  %v4621_v4 = vld [vmem:[%s9617_s7 + $0x40] sm:$0xff] }
0x2945   :  { %v6808_v27 = vcombine.high %v4613_v3, %v4621_v4  ;;  %v4622_v10 = vld [vmem:[%s9617_s7 + $0x48] sm:$0xff]  ;;  %v6807_v15 = vcombine.low %v4613_v3, %v4621_v4  ;;  %v4617_v3 = vld [vmem:[%s9617_s7 + $0x20] sm:$0xff] }
0x2946   :  { %v6809_v25 = vcombine.low %v4614_v26, %v4622_v10  ;;  %v6810_v28 = vcombine.high %v4614_v26, %v4622_v10  ;;  %v4625_v4 = vld [vmem:[%s9617_s7 + $0x60] sm:$0xff]  ;;  %v4626_v26 = vld [vmem:[%s9617_s7 + $0x68] sm:$0xff] }
0x2947   :  { %4892 = vmatprep.subr.bf16.mxu0 %v6808_v27  ;;  %v6816_v10 = vcombine.high %v4617_v3, %v4625_v4  ;;  %v6815_v36 = vcombine.low %v4617_v3, %v4625_v4  ;;  %v7925_v3 = vld [vmem:[%s8402_s9 + $0x30] sm:$0xff]  }
0x2948   :  { %4935 = vmatprep.subr.bf16.mxu1 %v6810_v28  ;;  %4893 = vmatpush1.bf16.msra.mxu0 %v6807_v15  ;;  %v4641_v28 = vld [vmem:[%s9617_s7 + $0xe0] sm:$0xff]  ;;  %v7926_v4 = vld [vmem:[%s8402_s9 + $0xb0] sm:$0xff]  }
0x2949   :  { %4894 = vmatprep.subr.bf16.mxu0 %v6824_v38 }
0x294c   :  { %4895 = vmatpush1.bf16.msra.mxu0 %v6823_v16 }
0x294d   :  { %4978 = vmatprep.subr.bf16.mxu0 %v6812_v59  ;;  %v6833_v59 = vcombine.low %v4634_v29, %v4642_v34  ;;  %v4659_v34 = vsub.s32 2, %v8925_v30 }
0x29b6   :  { %v7880_v9 = vpop.permute.xlu1 %7879 }
0x29b7   :  { %v7882_v39 = vunpack.i.h.bf16 %v7880_v9  ;;  %v7881_v6 = vunpack.i.l.bf16 %v7880_v9 }
0x29b9   :  { %v4483_v18 = vsel %vm2273_vm15, %v4481_v7, %v7882_v39  ;;  %v4482_v31 = vsel %vm2273_vm15, %v4480_v20, %v7881_v6 }
0x29ba   :  { %v4484_v33 = vpack.c.bf16 %v4483_v18, %v4482_v31 }
0x29bc   :  { %7761 = vmatmul.mubr.msk.bf16.vlgmr.msra.gmra.mrb[140].mxu1 %vm144_vm0, %v4484_v33 }
0x29bd   :  { %4936 = vmatpush1.bf16.msra.mxu1 %v6809_v25  ;;  %4967 = vmatprep.mubr.bf16.mxu1 %v8251_v41  ;;  %v4633_v25 = vld [vmem:[%s9617_s7 + $0xa0] sm:$0xff] }
0x29be   :  { %4937 = vmatprep.subr.bf16.mxu1 %v6826_v45  ;;  %v6832_v38 = vcombine.high %v4633_v25, %v4641_v28  ;;  %v4627_v45 = vld [vmem:[%s9617_s7 + $0x70] sm:$0xff]  ;;  %v6831_v63 = vcombine.low %v4633_v25, %v4641_v28  ;;  %v4675_v25 = vsub.s32 6, %v8925_v30  ;;  %v9411_v28 = vld [vmem:[%s8397_s8 + $0x8] sm:$0xff] }
0x29c0   :  { %v9414_v29 = vrot.slane %v9411_v28, %v4675_v25 }
0x29c1   :  { %4938 = vmatpush1.bf16.msra.mxu1 %v6825_v44  ;;  %v4619_v44 = vld [vmem:[%s9617_s7 + $0x30] sm:$0xff] }
0x29c2   :  { %5021 = vmatprep.subr.bf16.mxu1 %v6814_v12  ;;  %v6820_v49 = vcombine.high %v4619_v44, %v4627_v45  ;;  %v4643_v12 = vld [vmem:[%s9617_s7 + $0xf0] sm:$0xff] }
0x2a8f   :  { %v4545_v42 = vpop.f32.mrb[140].mxu1 }
0x2a90   :  { %v4546_v43 = vadd.f32 %v6801_v37, %v4545_v42  ;;  %v7762_v57 = vpop.f32.mrb[141].mxu1 }
0x2a91   :  { %v4548_v11 = vpop.f32.mrb[142].mxu1 }
0x2a92   :  { %v9292_v8 = vadd.f32 %v4546_v43, %v8851_v14  ;;  %v4549_v53 = vadd.f32 %v6801_v37, %v4548_v11  ;;  %v7763_v58 = vpop.f32.mrb[143].mxu1  ;;  %v6805_v37 = vld [vmem:[%s9618_s10] ss:$0 sm:$0xff] }
0x2a93   :  { %v6806_v58 = vld [vmem:[%s9619_s11] ss:$0 sm:$0xff] }
0x2a94   :  { %v9295_v60 = vadd.f32 %v4549_v53, %v8854_v1  ;;  %v4554_v23 = vsel %vm144_vm0, %v9292_v8, 0.0 }
0x2a95   :  { %4555 = vadd.xlane.f32.xlu0 %v4554_v23 }
0x2a96   :  { %v4557_v61 = vsel %vm144_vm0, %v9295_v60, 0.0 }
0x2a97   :  { %4558 = vadd.xlane.f32.xlu1 %v4557_v61  ;;  %v4631_v61 = vld [vmem:[%s9617_s7 + $0x90] sm:$0xff] }
0x2b22   :  { %v4556_v62 = vpop.xlane.xlu0 %4555 }
0x2b23   :  { %v4560_v14 = vmul.f32 0.03125, %v4556_v62  ;;  %v4639_v62 = vld [vmem:[%s9617_s7 + $0xd0] sm:$0xff] }
0x2b24   :  { %v4559_v48 = vpop.xlane.xlu1 %4558 }
0x2b25   :  { %v9302_v52 = vsub.f32 %v9292_v8, %v4560_v14  ;;  %v4561_v1 = vmul.f32 0.03125, %v4559_v48  ;;  %v4632_v14 = vld [vmem:[%s9617_s7 + $0x98] sm:$0xff] }
0x2b26   :  { %v4640_v48 = vld [vmem:[%s9617_s7 + $0xd8] sm:$0xff] }
0x2b27   :  { %v9305_v55 = vsub.f32 %v9295_v60, %v4561_v1  ;;  %v4564_v13 = vmul.f32 %v9302_v52, %v9302_v52  ;;  %v6829_v27 = vcombine.low %v4632_v14, %v4640_v48 }
0x2b29   :  { %v4566_v0 = vsel %vm144_vm0, %v4564_v13, 0.0  ;;  %v4565_v54 = vmul.f32 %v9305_v55, %v9305_v55 }
0x2b2a   :  { %4567 = vadd.xlane.f32.xlu0 %v4566_v0 }
0x2b2b   :  { %v4569_v2 = vsel %vm144_vm0, %v4565_v54, 0.0  ;;  %v6828_v54 = vcombine.high %v4631_v61, %v4639_v62 }
0x2b2e   :  { %4570 = vadd.xlane.f32.xlu0 %v4569_v2  ;;  %v6830_v2 = vcombine.high %v4632_v14, %v4640_v48  ;;  %v7918_v14 = vld [vmem:[%s8402_s9 + $0xa0] sm:$0xff]   ;;  %v7919_v48 = vld [vmem:[%s8402_s9 + $0x68] sm:$0xff]  }
0x2bb7   :  { %v4568_v51 = vpop.xlane.xlu0 %4567 }
0x2bb8   :  { %v4572_v5 = vmul.f32 0.032258064, %v4568_v51  ;;  %v4636_v51 = vld [vmem:[%s9617_s7 + $0xb8] sm:$0xff] }
0x2bba   :  { %8171 = vrsqrt.f32 %v4572_v5  ;;  %vm4576_vm1 = vcmp.eq.f32.partialorder %v4572_v5, inf  ;;  %v4579_v9 = vand.u32 2147483648, %v4572_v5  ;;  %vm4578_vm6 = vcmp.eq.f32.partialorder %v4572_v5, 0.0 }
0x2bbb   :  { %v4571_v19 = vpop.xlane.xlu0 %4570 }
0x2bbc   :  { %v4573_v17 = vmul.f32 0.032258064, %v4571_v19  ;;  %v6819_v19 = vcombine.low %v4619_v44, %v4627_v45 }
0x2bbe   :  { %8173 = vrsqrt.f32 %v4573_v17  ;;  %vm4583_vm7 = vcmp.eq.f32.partialorder %v4573_v17, inf  ;;  %v4586_v7 = vand.u32 2147483648, %v4573_v17  ;;  %vm4585_vm10 = vcmp.eq.f32.partialorder %v4573_v17, 0.0 }
0x2bc4   :  { %v8172_v21 = vpop.eup %8171 }
0x2bc5   :  { %v4575_v24 = vmul.f32 %v8172_v21, %v4572_v5 }
0x2bc7   :  { %v4577_v22 = vsel %vm4576_vm1, %v4572_v5, %v4575_v24  ;;  %v4644_v5 = vld [vmem:[%s9617_s7 + $0xf8] sm:$0xff] }
0x2bc8   :  { %v8174_v35 = vpop.eup %8173  ;;  %v4580_v39 = vsel %vm4578_vm6, %v4579_v9, %v4577_v22  ;;  %v6838_v24 = vcombine.high %v4636_v51, %v4644_v5  ;;  %v6837_v22 = vcombine.low %v4636_v51, %v4644_v5 }
0x2bc9   :  { %v4588_v6 = vadd.f32 1e-06, %v4580_v39  ;;  %v4582_v20 = vmul.f32 %v8174_v35, %v4573_v17  ;;  %v7899_v35 = vld [vmem:[%s8402_s9 + $0x40] sm:$0xff]  }
0x2bca   :  { %v7900_v39 = vld [vmem:[%s8402_s9 + $0xc0] sm:$0xff]  }
0x2bcb   :  { %8175 = vrcp.f32 %v4588_v6  ;;  %v4584_v18 = vsel %vm4583_vm7, %v4573_v17, %v4582_v20  ;;  %v6821_v17 = vcombine.low %v4620_v46, %v4628_v47  ;;  %v7901_v6 = vld [vmem:[%s8402_s9] sm:$0xff]  }
0x2bcc   :  { %v4587_v31 = vsel %vm4585_vm10, %v4586_v7, %v4584_v18  ;;  %v7902_v20 = vld [vmem:[%s8402_s9 + $0x80] sm:$0xff]   ;;  %v7903_v7 = vld [vmem:[%s8402_s9 + $0x48] sm:$0xff]  }
0x2bcd   :  { %v4589_v33 = vadd.f32 1e-06, %v4587_v31  ;;  %v7904_v18 = vld [vmem:[%s8402_s9 + $0xc8] sm:$0xff]  }
0x2bce   :  { %v7906_v31 = vld [vmem:[%s8402_s9 + $0x88] sm:$0xff]  }
0x2bcf   :  { %8177 = vrcp.f32 %v4589_v33  ;;  %v7907_v33 = vld [vmem:[%s8402_s9 + $0x50] sm:$0xff]  }
0x2bd5   :  { %v8176_v42 = vpop.eup %8175 }
0x2bd6   :  { %v4599_v43 = vmul.f32 %v8176_v42, %v6805_v37  ;;  %v7909_v42 = vld [vmem:[%s8402_s9 + $0x10] sm:$0xff]  }
0x2bd8   :  { %v4601_v11 = vmul.f32 %v4599_v43, %v9302_v52  ;;  %v4618_v52 = vld [vmem:[%s9617_s7 + $0x28] sm:$0xff]  ;;  %v7910_v43 = vld [vmem:[%s8402_s9 + $0x90] sm:$0xff]  }
0x2bd9   :  { %v8178_v57 = vpop.eup %8177  ;;  %v6818_v15 = vcombine.high %v4618_v52, %v4626_v26  ;;  %v6817_v16 = vcombine.low %v4618_v52, %v4626_v26  ;;  %v7927_v52 = vld [vmem:[%s8402_s9 + $0x78] sm:$0xff]  }
0x2bda   :  { %v4600_v53 = vmul.f32 %v8178_v57, %v6805_v37  ;;  %v4610_v1 = vadd.f32 %v6806_v58, %v4601_v11  ;;  %v7908_v37 = vld [vmem:[%s8402_s9 + $0xd0] sm:$0xff]   ;;  %v7911_v57 = vld [vmem:[%s8402_s9 + $0x58] sm:$0xff]  }
0x2bdb   :  { %v7912_v11 = vld [vmem:[%s8402_s9 + $0xd8] sm:$0xff]  }
0x2bdc   :  { %v4602_v23 = vmul.f32 %v4600_v53, %v9305_v55  ;;  %v6827_v55 = vcombine.low %v4631_v61, %v4639_v62  ;;  %v7913_v53 = vld [vmem:[%s8402_s9 + $0x18] sm:$0xff]   ;;  %v7916_v61 = vld [vmem:[%s8402_s9 + $0xe0] sm:$0xff]  }
0x2bdd   :  { %v7917_v62 = vld [vmem:[%s8402_s9 + $0x20] sm:$0xff]   ;;  %v7928_v26 = vld [vmem:[%s8402_s9 + $0xf8] sm:$0xff]  }
0x2bde   :  { %v4611_v13 = vadd.f32 %v6806_v58, %v4602_v23  ;;  %v7914_v58 = vld [vmem:[%s8402_s9 + $0x98] sm:$0xff]   ;;  %v7915_v23 = vld [vmem:[%s8402_s9 + $0x60] sm:$0xff]  }
0x2be0   :  { %v9335_v0 = vpack.c.bf16 %v4611_v13, %v4610_v1  ;;  %v7920_v1 = vld [vmem:[%s8402_s9 + $0xe8] sm:$0xff]  }
0x2be1   :  { %v7921_v13 = vld [vmem:[%s8402_s9 + $0x28] sm:$0xff]  }
0x2be2   :  { %6839 = vmatmul.mubr.msk.bf16.vlgmr.msra.gmra.mrb[144].mxu0 %vm144_vm0, %v9335_v0  ;;  %6840 = vmatmul.mubr.msk.bf16.vlgmr.msra.gmra.mrb[144].mxu1 %vm144_vm0, %v9335_v0 }
0x2be3   :  { %4979 = vmatpush1.bf16.msra.mxu0 %v6811_v50  ;;  %5022 = vmatpush1.bf16.msra.mxu1 %v6813_v56  ;;  %v6822_v50 = vcombine.high %v4620_v46, %v4628_v47  ;;  %v4635_v56 = vld [vmem:[%s9617_s7 + $0xb0] sm:$0xff]  ;;  %v4667_v47 = vsub.s32 4, %v8925_v30 }
0x2be4   :  { %4980 = vmatprep.subr.bf16.mxu0 %v6828_v54  ;;  %5023 = vmatprep.subr.bf16.mxu1 %v6830_v2  ;;  %v6836_v21 = vcombine.high %v4635_v56, %v4643_v12  ;;  %v6835_v9 = vcombine.low %v4635_v56, %v4643_v12  ;;  %v7923_v54 = vld [vmem:[%s8402_s9 + $0x70] sm:$0xff]  }
0x2be5   :  { %5010 = vmatprep.mubr.bf16.mxu0 %v8251_v41  ;;  %5053 = vmatprep.mubr.bf16.mxu1 %v8251_v41  ;;  %v7924_v2 = vld [vmem:[%s8402_s9 + $0xf0] sm:$0xff]  }
0x2be7   :  { %4981 = vmatpush1.bf16.msra.mxu0 %v6827_v55  ;;  %5024 = vmatpush1.bf16.msra.mxu1 %v6829_v27  ;;  %v7929_v55 = vld [vmem:[%s8402_s9 + $0x38] sm:$0xff]  }
0x2be8   :  { %5064 = vmatprep.subr.bf16.mxu0 %v6816_v10  ;;  %5107 = vmatprep.subr.bf16.mxu1 %v6818_v15  ;;  %v7930_v27 = vld [vmem:[%s8402_s9 + $0xb8] sm:$0xff]   ;;  %v7931_v10 = vld [vmem:[%s8402_s9 + $0x140] sm:$0xff]  }
0x2be9   :  { %v7932_v15 = vld [vmem:[%s8402_s9 + $0x1c0] sm:$0xff]  }
0x2bea   :  { %6841 = vmatmul.mubr.msk.bf16.vlgmr.msra.gmra.mrb[148].mxu0 %vm144_vm0, %v9335_v0  ;;  %6842 = vmatmul.mubr.msk.bf16.vlgmr.msra.gmra.mrb[148].mxu1 %vm144_vm0, %v9335_v0 }
0x2beb   :  { %5065 = vmatpush1.bf16.msra.mxu0 %v6815_v36  ;;  %5108 = vmatpush1.bf16.msra.mxu1 %v6817_v16  ;;  %v4645_v36 = vld [vmem:[%s8397_s8] sm:$0xff]  ;;  %v4655_v16 = vsub.s32 1, %v8925_v30 }
0x2bec   :  { %5066 = vmatprep.subr.bf16.mxu0 %v6832_v38  ;;  %5109 = vmatprep.subr.bf16.mxu1 %v6834_v40  ;;  %v4663_v38 = vsub.s32 3, %v8925_v30  ;;  %v4652_v40 = vrot.slane %v4645_v36, %v8929_v32  ;;  %v4660_v44 = vrot.slane %v4645_v36, %v4659_v34 }
0x2bed   :  { %5096 = vmatprep.mubr.bf16.mxu0 %v8251_v41  ;;  %5139 = vmatprep.mubr.bf16.mxu1 %v8251_v41  ;;  %v4656_v45 = vrot.slane %v4645_v36, %v4655_v16 }
0x2bee   :  { %v4664_v46 = vrot.slane %v4645_v36, %v4663_v38 }
0x2bef   :  { %5067 = vmatpush1.bf16.msra.mxu0 %v6831_v63  ;;  %5110 = vmatpush1.bf16.msra.mxu1 %v6833_v59 }
0x2bf0   :  { %5150 = vmatprep.subr.bf16.mxu0 %v6820_v49  ;;  %5193 = vmatprep.subr.bf16.mxu1 %v6822_v50  ;;  %v4671_v49 = vsub.s32 5, %v8925_v30  ;;  %v4679_v50 = vsub.s32 7, %v8925_v30 }
0x2bf2   :  { %6843 = vmatmul.mubr.msk.bf16.vlgmr.msra.gmra.mrb[152].mxu0 %vm144_vm0, %v9335_v0  ;;  %6844 = vmatmul.mubr.msk.bf16.vlgmr.msra.gmra.mrb[152].mxu1 %vm144_vm0, %v9335_v0 }
0x2bf3   :  { %5151 = vmatpush1.bf16.msra.mxu0 %v6819_v19  ;;  %5194 = vmatpush1.bf16.msra.mxu1 %v6821_v17 }
0x2bf4   :  { %5152 = vmatprep.subr.bf16.mxu0 %v6836_v21  ;;  %5195 = vmatprep.subr.bf16.mxu1 %v6838_v24 }
0x2bf5   :  { %5182 = vmatprep.mubr.bf16.mxu0 %v8251_v41  ;;  %5225 = vmatprep.mubr.bf16.mxu1 %v8251_v41  ;;  %v7905_v41 = vld [vmem:[%s8402_s9 + $0x8] sm:$0xff]  }
0x2bf7   :  { %5153 = vmatpush1.bf16.msra.mxu0 %v6835_v9  ;;  %5196 = vmatpush1.bf16.msra.mxu1 %v6837_v22 }
0x2bf8   :  { %7140 = vmatprep.subr.bf16.mxu0 %v7899_v35  ;;  %7162 = vmatprep.subr.bf16.mxu1 %v7900_v39 }
0x2bfa   :  { %6845 = vmatmul.mubr.msk.bf16.vlgmr.msra.gmra.mrb[156].mxu0 %vm144_vm0, %v9335_v0  ;;  %6846 = vmatmul.mubr.msk.bf16.vlgmr.msra.gmra.mrb[156].mxu1 %vm144_vm0, %v9335_v0  ;;  %v7922_v0 = vld [vmem:[%s8402_s9 + $0xa8] sm:$0xff]  }
0x2bfb   :  { %7141 = vmatpush3.bf16.msra.mxu0 %v7901_v6  ;;  %7163 = vmatpush3.bf16.msra.mxu1 %v7902_v20  ;;  %v4668_v6 = vrot.slane %v4645_v36, %v4667_v47  ;;  %v4676_v20 = vrot.slane %v4645_v36, %v4675_v25 }
0x2bfc   :  { %7142 = vmatprep.subr.bf16.mxu0 %v7903_v7  ;;  %7164 = vmatprep.subr.bf16.mxu1 %v7904_v18 }
0x2bff   :  { %7143 = vmatpush3.bf16.msra.mxu0 %v7905_v41  ;;  %7165 = vmatpush3.bf16.msra.mxu1 %v7906_v31  ;;  %v4672_v41 = vrot.slane %v4645_v36, %v4671_v49  ;;  %v4680_v31 = vrot.slane %v4645_v36, %v4679_v50  ;;  %v4692_v36 = vrot.slane %v9411_v28, %v4659_v34 }
0x2c00   :  { %7144 = vmatprep.subr.bf16.mxu0 %v7907_v33  ;;  %7166 = vmatprep.subr.bf16.mxu1 %v7908_v37  ;;  %v4696_v34 = vrot.slane %v9411_v28, %v4663_v38 }
0x2c03   :  { %7145 = vmatpush3.bf16.msra.mxu0 %v7909_v42  ;;  %7167 = vmatpush3.bf16.msra.mxu1 %v7910_v43 }
0x2c04   :  { %7146 = vmatprep.subr.bf16.mxu0 %v7911_v57  ;;  %7168 = vmatprep.subr.bf16.mxu1 %v7912_v11 }
0x2c07   :  { %7147 = vmatpush3.bf16.msra.mxu0 %v7913_v53  ;;  %7169 = vmatpush3.bf16.msra.mxu1 %v7914_v58 }
0x2c08   :  { %7148 = vmatprep.subr.bf16.mxu0 %v7915_v23  ;;  %7170 = vmatprep.subr.bf16.mxu1 %v7916_v61 }
0x2c0b   :  { %7149 = vmatpush3.bf16.msra.mxu0 %v7917_v62  ;;  %7171 = vmatpush3.bf16.msra.mxu1 %v7918_v14 }
0x2c0c   :  { %7150 = vmatprep.subr.bf16.mxu0 %v7919_v48  ;;  %7172 = vmatprep.subr.bf16.mxu1 %v7920_v1 }
0x2c0f   :  { %7151 = vmatpush3.bf16.msra.mxu0 %v7921_v13  ;;  %7173 = vmatpush3.bf16.msra.mxu1 %v7922_v0  ;;  %v7933_v13 = vld [vmem:[%s8402_s9 + $0x100] sm:$0xff]  }
0x2c10   :  { %7152 = vmatprep.subr.bf16.mxu0 %v7923_v54  ;;  %7174 = vmatprep.subr.bf16.mxu1 %v7924_v2  ;;  %v7934_v0 = vld [vmem:[%s8402_s9 + $0x180] sm:$0xff]  }
0x2c13   :  { %7153 = vmatpush3.bf16.msra.mxu0 %v7925_v3  ;;  %7175 = vmatpush3.bf16.msra.mxu1 %v7926_v4 }
0x2c14   :  { %7154 = vmatprep.subr.bf16.mxu0 %v7927_v52  ;;  %7176 = vmatprep.subr.bf16.mxu1 %v7928_v26  ;;  %v7935_v52 = vld [vmem:[%s8402_s9 + $0x148] sm:$0xff]  }
0x2c15   :  { %v7936_v26 = vld [vmem:[%s8402_s9 + $0x1c8] sm:$0xff]  }
0x2c17   :  { %7155 = vmatpush3.bf16.msra.mxu0 %v7929_v55  ;;  %7177 = vmatpush3.bf16.msra.mxu1 %v7930_v27  ;;  %v4684_v55 = vrot.slane %v9411_v28, %v8929_v32  ;;  %v4688_v32 = vrot.slane %v9411_v28, %v4655_v16  ;;  %v7940_v16 = vld [vmem:[%s8402_s9 + $0x1d0] sm:$0xff]  }
0x2c18   :  { %7184 = vmatprep.subr.bf16.mxu0 %v7931_v10  ;;  %7206 = vmatprep.subr.bf16.mxu1 %v7932_v15 }
0x2cb5   :  { %v4926_v63 = vpop.f32.mrb[144].mxu0  ;;  %v4969_v59 = vpop.f32.mrb[144].mxu1 }
0x2cb6   :  { %v4927_v56 = vadd.f32 %v4926_v63, %v4652_v40  ;;  %v4970_v12 = vadd.f32 %v4969_v59, %v4660_v44  ;;  %v4928_v51 = vpop.f32.mrb[145].mxu0  ;;  %v4971_v5 = vpop.f32.mrb[145].mxu1 }
0x2cb7   :  { %v4929_v19 = vadd.f32 %v4928_v51, %v4656_v45  ;;  %v4972_v17 = vadd.f32 %v4971_v5, %v4664_v46  ;;  %v4930_v21 = vpop.f32.mrb[146].mxu0  ;;  %v4973_v24 = vpop.f32.mrb[146].mxu1 }
0x2cb8   :  { %v4931_v9 = vadd.f32 %v4930_v21, %v4652_v40  ;;  %v4974_v22 = vadd.f32 %v4973_v24, %v4660_v44  ;;  %v4932_v35 = vpop.f32.mrb[147].mxu0  ;;  %v4975_v39 = vpop.f32.mrb[147].mxu1  ;;  %v5236_v33 = vmax.f32 %v4927_v56, 0.0  ;;  %v5238_v37 = vmax.f32 %v4970_v12, 0.0  ;;  %v7937_v56 = vld [vmem:[%s8402_s9 + $0x108] sm:$0xff]   ;;  %v7939_v21 = vld [vmem:[%s8402_s9 + $0x150] sm:$0xff]  }
0x2cb9   :  { %v4933_v7 = vadd.f32 %v4932_v35, %v4656_v45  ;;  %v4976_v18 = vadd.f32 %v4975_v39, %v4664_v46  ;;  %v5237_v57 = vmax.f32 %v4929_v19, 0.0  ;;  %v5239_v11 = vmax.f32 %v4972_v17, 0.0  ;;  %v7938_v12 = vld [vmem:[%s8402_s9 + $0x188] sm:$0xff]  }
0x2cba   :  { %v5252_v42 = vmax.f32 %v4931_v9, 0.0  ;;  %v5254_v43 = vmax.f32 %v4974_v22, 0.0 }
0x2cbb   :  { %v5253_v53 = vmax.f32 %v4933_v7, 0.0  ;;  %v5255_v58 = vmax.f32 %v4976_v18, 0.0 }
0x2cbc   :  { %v5268_v23 = vpack.c.bf16 %v5252_v42, %v5236_v33  ;;  %v5270_v61 = vpack.c.bf16 %v5254_v43, %v5238_v37 }
0x2cbd   :  { %v5269_v62 = vpack.c.bf16 %v5253_v53, %v5237_v57  ;;  %v5271_v14 = vpack.c.bf16 %v5255_v58, %v5239_v11  ;;  %v5012_v48 = vpop.f32.mrb[148].mxu0  ;;  %v5055_v1 = vpop.f32.mrb[148].mxu1  ;;  %v7943_v57 = vld [vmem:[%s8402_s9 + $0x158] sm:$0xff]  }
0x2cbe   :  { %v5013_v54 = vadd.f32 %v5012_v48, %v4668_v6  ;;  %v5056_v2 = vadd.f32 %v5055_v1, %v4676_v20  ;;  %v5014_v3 = vpop.f32.mrb[149].mxu0  ;;  %v5057_v4 = vpop.f32.mrb[149].mxu1  ;;  %v7944_v11 = vld [vmem:[%s8402_s9 + $0x1d8] sm:$0xff]  }
0x2cbf   :  { %v5015_v27 = vadd.f32 %v5014_v3, %v4672_v41  ;;  %v5058_v10 = vadd.f32 %v5057_v4, %v4680_v31  ;;  %v5016_v15 = vpop.f32.mrb[150].mxu0  ;;  %v5059_v25 = vpop.f32.mrb[150].mxu1  ;;  %6347 = vmatprep.mubr.bf16.mxu0 %v5269_v62  ;;  %6388 = vmatprep.mubr.bf16.mxu1 %v5271_v14  ;;  %v7945_v3 = vld [vmem:[%s8402_s9 + $0x118] sm:$0xff]  }
0x2cc0   :  { %v5017_v40 = vadd.f32 %v5016_v15, %v4668_v6  ;;  %v5060_v44 = vadd.f32 %v5059_v25, %v4676_v20  ;;  %v5018_v45 = vpop.f32.mrb[151].mxu0  ;;  %v5061_v46 = vpop.f32.mrb[151].mxu1  ;;  %6348 = vmatmul.mubr.bf16.vlgmr.msra.gmra.mrb[160].mxu0 %v5268_v23  ;;  %6389 = vmatmul.mubr.bf16.vlgmr.msra.gmra.mrb[160].mxu1 %v5270_v61  ;;  %v5240_v51 = vmax.f32 %v5013_v54, 0.0  ;;  %v5242_v5 = vmax.f32 %v5056_v2, 0.0  ;;  %v7946_v4 = vld [vmem:[%s8402_s9 + $0x198] sm:$0xff]  }
0x2cc1   :  { %v5019_v63 = vadd.f32 %v5018_v45, %v4672_v41  ;;  %v5062_v59 = vadd.f32 %v5061_v46, %v4680_v31  ;;  %7185 = vmatpush3.bf16.msra.mxu0 %v7933_v13  ;;  %7207 = vmatpush3.bf16.msra.mxu1 %v7934_v0  ;;  %v5241_v24 = vmax.f32 %v5015_v27, 0.0  ;;  %v5243_v9 = vmax.f32 %v5058_v10, 0.0  ;;  %v7941_v41 = vld [vmem:[%s8402_s9 + $0x110] sm:$0xff]  }
0x2cc2   :  { %v5256_v19 = vmax.f32 %v5017_v40, 0.0  ;;  %v5258_v17 = vmax.f32 %v5060_v44, 0.0  ;;  %7186 = vmatprep.subr.bf16.mxu0 %v7935_v52  ;;  %7208 = vmatprep.subr.bf16.mxu1 %v7936_v26  ;;  %v7942_v31 = vld [vmem:[%s8402_s9 + $0x190] sm:$0xff]   ;;  %v4700_v13 = vrot.slane %v9411_v28, %v4667_v47  ;;  %v4704_v0 = vrot.slane %v9411_v28, %v4671_v49  ;;  %v7947_v47 = vld [vmem:[%s8402_s9 + $0x160] sm:$0xff]  }
0x2cc3   :  { %v5257_v22 = vmax.f32 %v5019_v63, 0.0  ;;  %v5259_v35 = vmax.f32 %v5062_v59, 0.0  ;;  %v4712_v52 = vrot.slane %v9411_v28, %v4679_v50  ;;  %v7948_v49 = vld [vmem:[%s8402_s9 + $0x1e0] sm:$0xff]  }
0x2cc4   :  { %v9451_v39 = vpack.c.bf16 %v5256_v19, %v5240_v51  ;;  %v9453_v6 = vpack.c.bf16 %v5258_v17, %v5242_v5  ;;  %v7950_v63 = vld [vmem:[%s8402_s9 + $0x1a0] sm:$0xff]   ;;  %v7951_v51 = vld [vmem:[%s8402_s9 + $0x168] sm:$0xff]  }
0x2cc5   :  { %v5273_v38 = vpack.c.bf16 %v5257_v22, %v5241_v24  ;;  %v5275_v20 = vpack.c.bf16 %v5259_v35, %v5243_v9  ;;  %7187 = vmatpush3.bf16.msra.mxu0 %v7937_v56  ;;  %7209 = vmatpush3.bf16.msra.mxu1 %v7938_v12  ;;  %v5098_v7 = vpop.f32.mrb[152].mxu0  ;;  %v5141_v18 = vpop.f32.mrb[152].mxu1  ;;  %v7952_v5 = vld [vmem:[%s8402_s9 + $0x1e8] sm:$0xff]  }
0x2cc6   :  { %v5099_v33 = vadd.f32 %v5098_v7, %v4684_v55  ;;  %v5142_v37 = vadd.f32 %v5141_v18, %v4692_v36  ;;  %v5100_v42 = vpop.f32.mrb[153].mxu0  ;;  %v5143_v43 = vpop.f32.mrb[153].mxu1  ;;  %7188 = vmatprep.subr.bf16.mxu0 %v7939_v21  ;;  %7210 = vmatprep.subr.bf16.mxu1 %v7940_v16  ;;  %v7953_v7 = vld [vmem:[%s8402_s9 + $0x128] sm:$0xff]  }
0x2cc7   :  { %v5101_v53 = vadd.f32 %v5100_v42, %v4688_v32  ;;  %v5144_v58 = vadd.f32 %v5143_v43, %v4696_v34  ;;  %v5102_v23 = vpop.f32.mrb[154].mxu0  ;;  %v5145_v61 = vpop.f32.mrb[154].mxu1  ;;  %6429 = vmatprep.mubr.bf16.mxu0 %v5273_v38  ;;  %6470 = vmatprep.mubr.bf16.mxu1 %v5275_v20  ;;  %v7954_v18 = vld [vmem:[%s8402_s9 + $0x1a8] sm:$0xff]   ;;  %v7955_v42 = vld [vmem:[%s8402_s9 + $0x170] sm:$0xff]  }
0x2cc8   :  { %v5103_v62 = vadd.f32 %v5102_v23, %v4684_v55  ;;  %v5146_v14 = vadd.f32 %v5145_v61, %v4692_v36  ;;  %v5104_v48 = vpop.f32.mrb[155].mxu0  ;;  %v5147_v1 = vpop.f32.mrb[155].mxu1  ;;  %v5244_v26 = vmax.f32 %v5099_v33, 0.0  ;;  %v5246_v55 = vmax.f32 %v5142_v37, 0.0 }
0x2cc9   :  { %v5105_v54 = vadd.f32 %v5104_v48, %v4688_v32  ;;  %v5148_v2 = vadd.f32 %v5147_v1, %v4696_v34  ;;  %7189 = vmatpush3.bf16.msra.mxu0 %v7941_v41  ;;  %7211 = vmatpush3.bf16.msra.mxu1 %v7942_v31  ;;  %v5245_v15 = vmax.f32 %v5101_v53, 0.0  ;;  %v5247_v25 = vmax.f32 %v5144_v58, 0.0  ;;  %v7949_v32 = vld [vmem:[%s8402_s9 + $0x120] sm:$0xff]   ;;  %v7958_v48 = vld [vmem:[%s8402_s9 + $0x1b0] sm:$0xff]   ;;  %v7959_v1 = vld [vmem:[%s8402_s9 + $0x178] sm:$0xff]  }
0x2cca   :  { %v5260_v27 = vmax.f32 %v5103_v62, 0.0  ;;  %v5262_v10 = vmax.f32 %v5146_v14, 0.0  ;;  %7190 = vmatprep.subr.bf16.mxu0 %v7943_v57  ;;  %7212 = vmatprep.subr.bf16.mxu1 %v7944_v11  ;;  %v7957_v14 = vld [vmem:[%s8402_s9 + $0x130] sm:$0xff]  }
0x2ccb   :  { %v5261_v36 = vmax.f32 %v5105_v54, 0.0  ;;  %v5263_v40 = vmax.f32 %v5148_v2, 0.0  ;;  %v7962_v54 = vld [vmem:[%s8402_s9 + $0x1b8] sm:$0xff]   ;;  %v7963_v2 = vld [vmem:[%s8402_s9 + $0x240] sm:$0xff]  }
0x2ccc   :  { %v9472_v44 = vpack.c.bf16 %v5260_v27, %v5244_v26  ;;  %v9474_v30 = vpack.c.bf16 %v5262_v10, %v5246_v55  ;;  %v7967_v26 = vld [vmem:[%s8402_s9 + $0x248] sm:$0xff]  }
0x2ccd   :  { %v9476_v28 = vpack.c.bf16 %v5261_v36, %v5245_v15  ;;  %v9478_v50 = vpack.c.bf16 %v5263_v40, %v5247_v25  ;;  %7191 = vmatpush3.bf16.msra.mxu0 %v7945_v3  ;;  %7213 = vmatpush3.bf16.msra.mxu1 %v7946_v4  ;;  %v5184_v45 = vpop.f32.mrb[156].mxu0  ;;  %v5227_v46 = vpop.f32.mrb[156].mxu1  ;;  %v7964_v3 = vld [vmem:[%s8402_s9 + $0x2c0] sm:$0xff]   ;;  %v7968_v55 = vld [vmem:[%s8402_s9 + $0x2c8] sm:$0xff]   ;;  %v7975_v15 = vld [vmem:[%s8402_s9 + $0x258] sm:$0xff]  }
0x2cce   :  { %v5185_v59 = vadd.f32 %v5184_v45, %v4700_v13  ;;  %v5228_v56 = vadd.f32 %v5227_v46, %v9414_v29  ;;  %v5186_v12 = vpop.f32.mrb[157].mxu0  ;;  %v5229_v34 = vpop.f32.mrb[157].mxu1  ;;  %7192 = vmatprep.subr.bf16.mxu0 %v7947_v47  ;;  %7214 = vmatprep.subr.bf16.mxu1 %v7948_v49  ;;  %v7965_v4 = vld [vmem:[%s8402_s9 + $0x200] sm:$0xff]   ;;  %v7969_v27 = vld [vmem:[%s8402_s9 + $0x208] sm:$0xff]   ;;  %v7971_v47 = vld [vmem:[%s8402_s9 + $0x250] sm:$0xff]  }
0x2ccf   :  { %v5187_v19 = vadd.f32 %v5186_v12, %v4704_v0  ;;  %v5230_v17 = vadd.f32 %v5229_v34, %v4712_v52  ;;  %v5188_v21 = vpop.f32.mrb[158].mxu0  ;;  %v5231_v16 = vpop.f32.mrb[158].mxu1  ;;  %v7970_v10 = vld [vmem:[%s8402_s9 + $0x288] sm:$0xff]   ;;  %v7974_v49 = vld [vmem:[%s8402_s9 + $0x290] sm:$0xff]   ;;  %v7976_v25 = vld [vmem:[%s8402_s9 + $0x2d8] sm:$0xff]  }
0x2cd0   :  { %v5189_v24 = vadd.f32 %v5188_v21, %v4700_v13  ;;  %v5232_v9 = vadd.f32 %v5231_v16, %v9414_v29  ;;  %v5190_v22 = vpop.f32.mrb[159].mxu0  ;;  %v5233_v35 = vpop.f32.mrb[159].mxu1  ;;  %v5248_v41 = vmax.f32 %v5185_v59, 0.0  ;;  %v5250_v31 = vmax.f32 %v5228_v56, 0.0  ;;  %v7956_v29 = vld [vmem:[%s8402_s9 + $0x1f0] sm:$0xff]   ;;  %v7960_v13 = vld [vmem:[%s8402_s9 + $0x1f8] sm:$0xff]  }
0x2cd1   :  { %v5191_v38 = vadd.f32 %v5190_v22, %v4704_v0  ;;  %v5234_v20 = vadd.f32 %v5233_v35, %v4712_v52  ;;  %7193 = vmatpush3.bf16.msra.mxu0 %v7949_v32  ;;  %7215 = vmatpush3.bf16.msra.mxu1 %v7950_v63  ;;  %v5249_v43 = vmax.f32 %v5187_v19, 0.0  ;;  %v5251_v57 = vmax.f32 %v5230_v17, 0.0  ;;  %v7961_v0 = vld [vmem:[%s8402_s9 + $0x138] sm:$0xff]   ;;  %v7966_v52 = vld [vmem:[%s8402_s9 + $0x280] sm:$0xff]   ;;  %v7983_v32 = vld [vmem:[%s8402_s9 + $0x268] sm:$0xff]  }
0x2cd2   :  { %v5264_v33 = vmax.f32 %v5189_v24, 0.0  ;;  %v5266_v37 = vmax.f32 %v5232_v9, 0.0  ;;  %7194 = vmatprep.subr.bf16.mxu0 %v7951_v51  ;;  %7216 = vmatprep.subr.bf16.mxu1 %v7952_v5  ;;  %v7977_v36 = vld [vmem:[%s8402_s9 + $0x218] sm:$0xff]   ;;  %v7981_v45 = vld [vmem:[%s8402_s9 + $0x220] sm:$0xff]   ;;  %v7984_v63 = vld [vmem:[%s8402_s9 + $0x2e8] sm:$0xff]  }
0x2cd3   :  { %v5265_v11 = vmax.f32 %v5191_v38, 0.0  ;;  %v5267_v53 = vmax.f32 %v5234_v20, 0.0  ;;  %v7978_v40 = vld [vmem:[%s8402_s9 + $0x298] sm:$0xff]   ;;  %v7982_v46 = vld [vmem:[%s8402_s9 + $0x2a0] sm:$0xff]   ;;  %v7985_v59 = vld [vmem:[%s8402_s9 + $0x228] sm:$0xff]  }
0x2cd4   :  { %v9490_v58 = vpack.c.bf16 %v5264_v33, %v5248_v41  ;;  %v9492_v23 = vpack.c.bf16 %v5266_v37, %v5250_v31  ;;  %v7986_v56 = vld [vmem:[%s8402_s9 + $0x2a8] sm:$0xff]   ;;  %v7987_v12 = vld [vmem:[%s8402_s9 + $0x270] sm:$0xff]   ;;  %v7991_v19 = vld [vmem:[%s8402_s9 + $0x278] sm:$0xff]  }
0x2cd5   :  { %v9494_v61 = vpack.c.bf16 %v5265_v11, %v5249_v43  ;;  %v9496_v62 = vpack.c.bf16 %v5267_v53, %v5251_v57  ;;  %7195 = vmatpush3.bf16.msra.mxu0 %v7953_v7  ;;  %7217 = vmatpush3.bf16.msra.mxu1 %v7954_v18  ;;  %v7988_v34 = vld [vmem:[%s8402_s9 + $0x2f0] sm:$0xff]   ;;  %v7992_v17 = vld [vmem:[%s8402_s9 + $0x2f8] sm:$0xff]   ;;  %v7995_v24 = vld [vmem:[%s8402_s9 + $0x340] sm:$0xff]  }
0x2cd6   :  { %7196 = vmatprep.subr.bf16.mxu0 %v7955_v42  ;;  %7218 = vmatprep.subr.bf16.mxu1 %v7956_v29  ;;  %v7989_v51 = vld [vmem:[%s8402_s9 + $0x230] sm:$0xff]   ;;  %v7993_v21 = vld [vmem:[%s8402_s9 + $0x238] sm:$0xff]   ;;  %v7996_v9 = vld [vmem:[%s8402_s9 + $0x3c0] sm:$0xff]  }
0x2cd7   :  { %v7990_v5 = vld [vmem:[%s8402_s9 + $0x2b0] sm:$0xff]   ;;  %v7994_v16 = vld [vmem:[%s8402_s9 + $0x2b8] sm:$0xff]   ;;  %v7997_v22 = vld [vmem:[%s8402_s9 + $0x300] sm:$0xff]  }
0x2cd8   :  { %v7998_v35 = vld [vmem:[%s8402_s9 + $0x380] sm:$0xff]   ;;  %v7999_v38 = vld [vmem:[%s8402_s9 + $0x348] sm:$0xff]   ;;  %v8003_v41 = vld [vmem:[%s8402_s9 + $0x350] sm:$0xff]  }
0x2cd9   :  { %7197 = vmatpush3.bf16.msra.mxu0 %v7957_v14  ;;  %7219 = vmatpush3.bf16.msra.mxu1 %v7958_v48  ;;  %v8000_v20 = vld [vmem:[%s8402_s9 + $0x3c8] sm:$0xff]   ;;  %v8006_v31 = vld [vmem:[%s8402_s9 + $0x390] sm:$0xff]   ;;  %v8007_v33 = vld [vmem:[%s8402_s9 + $0x358] sm:$0xff]  }
0x2cda   :  { %7198 = vmatprep.subr.bf16.mxu0 %v7959_v1  ;;  %7220 = vmatprep.subr.bf16.mxu1 %v7960_v13  ;;  %v8001_v7 = vld [vmem:[%s8402_s9 + $0x308] sm:$0xff]   ;;  %v8008_v37 = vld [vmem:[%s8402_s9 + $0x3d8] sm:$0xff]   ;;  %v8011_v43 = vld [vmem:[%s8402_s9 + $0x360] sm:$0xff]  }
0x2cdb   :  { %v8002_v18 = vld [vmem:[%s8402_s9 + $0x388] sm:$0xff]   ;;  %v8009_v42 = vld [vmem:[%s8402_s9 + $0x318] sm:$0xff]   ;;  %v8012_v57 = vld [vmem:[%s8402_s9 + $0x3e0] sm:$0xff]  }
0x2cdc   :  { %v8010_v29 = vld [vmem:[%s8402_s9 + $0x398] sm:$0xff]   ;;  %v8013_v11 = vld [vmem:[%s8402_s9 + $0x320] sm:$0xff]   ;;  %v8017_v14 = vld [vmem:[%s8402_s9 + $0x328] sm:$0xff]  }
0x2cdd   :  { %7199 = vmatpush3.bf16.msra.mxu0 %v7961_v0  ;;  %7221 = vmatpush3.bf16.msra.mxu1 %v7962_v54  ;;  %v8014_v53 = vld [vmem:[%s8402_s9 + $0x3a0] sm:$0xff]   ;;  %v8018_v48 = vld [vmem:[%s8402_s9 + $0x3a8] sm:$0xff]   ;;  %v8019_v1 = vld [vmem:[%s8402_s9 + $0x370] sm:$0xff]  }
0x2cde   :  { %7228 = vmatprep.subr.bf16.mxu0 %v7963_v2  ;;  %7250 = vmatprep.subr.bf16.mxu1 %v7964_v3  ;;  %v8020_v13 = vld [vmem:[%s8402_s9 + $0x3f0] sm:$0xff]   ;;  %v8023_v2 = vld [vmem:[%s8402_s9 + $0x378] sm:$0xff]  }
0x2cdf   :  { %v8021_v0 = vld [vmem:[%s8402_s9 + $0x330] sm:$0xff]   ;;  %v8024_v3 = vld [vmem:[%s8402_s9 + $0x3f8] sm:$0xff]  }
0x2ce0   :  { %6430 = vmatmul.mubr.bf16.vlgmr.msra.gmra.mrb[164].mxu0 %v9451_v39  ;;  %6471 = vmatmul.mubr.bf16.vlgmr.msra.gmra.mrb[164].mxu1 %v9453_v6  ;;  %v7972_v39 = vld [vmem:[%s8402_s9 + $0x2d0] sm:$0xff]  }
0x2ce1   :  { %7229 = vmatpush3.bf16.msra.mxu0 %v7965_v4  ;;  %6511 = vmatprep.mubr.bf16.mxu0 %v9476_v28  ;;  %v7973_v6 = vld [vmem:[%s8402_s9 + $0x210] sm:$0xff]   ;;  %v7979_v28 = vld [vmem:[%s8402_s9 + $0x260] sm:$0xff]   ;;  %v8025_v4 = vld [vmem:[%s8402_s9 + $0x338] sm:$0xff]  }
0x2ce2   :  { %7251 = vmatpush3.bf16.msra.mxu1 %v7966_v52  ;;  %6552 = vmatprep.mubr.bf16.mxu1 %v9478_v50  ;;  %v7980_v50 = vld [vmem:[%s8402_s9 + $0x2e0] sm:$0xff]   ;;  %v8022_v54 = vld [vmem:[%s8402_s9 + $0x3b0] sm:$0xff]   ;;  %v8026_v52 = vld [vmem:[%s8402_s9 + $0x3b8] sm:$0xff]  }
0x2ce3   :  { %7230 = vmatprep.subr.bf16.mxu0 %v7967_v26  ;;  %7252 = vmatprep.subr.bf16.mxu1 %v7968_v55 }
0x2ce5   :  { %7231 = vmatpush3.bf16.msra.mxu0 %v7969_v27  ;;  %v6847_v27 = vld [vmem:[%s8407_s3] ss:$0 sm:$0xff] }
0x2ce6   :  { %7253 = vmatpush3.bf16.msra.mxu1 %v7970_v10  ;;  %7232 = vmatprep.subr.bf16.mxu0 %v7971_v47 }
0x2ce7   :  { %7254 = vmatprep.subr.bf16.mxu1 %v7972_v39 }
0x2ce9   :  { %7233 = vmatpush3.bf16.msra.mxu0 %v7973_v6 }
0x2cea   :  { %7255 = vmatpush3.bf16.msra.mxu1 %v7974_v49  ;;  %7234 = vmatprep.subr.bf16.mxu0 %v7975_v15 }
0x2ceb   :  { %7256 = vmatprep.subr.bf16.mxu1 %v7976_v25 }
0x2ced   :  { %7235 = vmatpush3.bf16.msra.mxu0 %v7977_v36 }
0x2cee   :  { %7257 = vmatpush3.bf16.msra.mxu1 %v7978_v40  ;;  %7236 = vmatprep.subr.bf16.mxu0 %v7979_v28 }
0x2cef   :  { %7258 = vmatprep.subr.bf16.mxu1 %v7980_v50 }
0x2cf1   :  { %7237 = vmatpush3.bf16.msra.mxu0 %v7981_v45 }
0x2cf2   :  { %7259 = vmatpush3.bf16.msra.mxu1 %v7982_v46  ;;  %7238 = vmatprep.subr.bf16.mxu0 %v7983_v32 }
0x2cf3   :  { %7260 = vmatprep.subr.bf16.mxu1 %v7984_v63 }
0x2cf5   :  { %7239 = vmatpush3.bf16.msra.mxu0 %v7985_v59 }
0x2cf6   :  { %7261 = vmatpush3.bf16.msra.mxu1 %v7986_v56  ;;  %7240 = vmatprep.subr.bf16.mxu0 %v7987_v12 }
0x2cf7   :  { %7262 = vmatprep.subr.bf16.mxu1 %v7988_v34 }
0x2cf9   :  { %7241 = vmatpush3.bf16.msra.mxu0 %v7989_v51 }
0x2cfa   :  { %7263 = vmatpush3.bf16.msra.mxu1 %v7990_v5  ;;  %7242 = vmatprep.subr.bf16.mxu0 %v7991_v19 }
0x2cfb   :  { %7264 = vmatprep.subr.bf16.mxu1 %v7992_v17 }
0x2cfd   :  { %7243 = vmatpush3.bf16.msra.mxu0 %v7993_v21 }
0x2cfe   :  { %7265 = vmatpush3.bf16.msra.mxu1 %v7994_v16  ;;  %7272 = vmatprep.subr.bf16.mxu0 %v7995_v24 }
0x2cff   :  { %7294 = vmatprep.subr.bf16.mxu1 %v7996_v9 }
0x2d00   :  { %6512 = vmatmul.mubr.bf16.vlgmr.msra.gmra.mrb[168].mxu0 %v9472_v44  ;;  %v8004_v44 = vld [vmem:[%s8402_s9 + $0x3d0] sm:$0xff]  }
0x2d01   :  { %6553 = vmatmul.mubr.bf16.vlgmr.msra.gmra.mrb[168].mxu1 %v9474_v30  ;;  %7273 = vmatpush3.bf16.msra.mxu0 %v7997_v22  ;;  %v8005_v30 = vld [vmem:[%s8402_s9 + $0x310] sm:$0xff]  }
0x2d02   :  { %6593 = vmatprep.mubr.bf16.mxu0 %v9494_v61  ;;  %7295 = vmatpush3.bf16.msra.mxu1 %v7998_v35  ;;  %v8015_v61 = vld [vmem:[%s8402_s9 + $0x368] sm:$0xff]  }
0x2d03   :  { %6634 = vmatprep.mubr.bf16.mxu1 %v9496_v62  ;;  %7274 = vmatprep.subr.bf16.mxu0 %v7999_v38  ;;  %v8016_v62 = vld [vmem:[%s8402_s9 + $0x3e8] sm:$0xff]   ;;  %s8252_s9 = smov [#allocation2]  }
0x2d04   :  { %7296 = vmatprep.subr.bf16.mxu1 %v8000_v20  ;;  %s6652_s3 = sshll.u32 %s8252_s9, 4  ;;  %s6653_s3 = int_to_ptr.vmem [resolvable:$true] %s6652_s3 }
0x2d05   :  { %7275 = vmatpush3.bf16.msra.mxu0 %v8001_v7  ;;  %s8181_s8 = scalar_lea.vmem %s6653_s3, 256  ;;  %p8186_p1 = scmp.lt.s32.totalorder %s6653_s3, %s6653_s3 }
0x2d06   :  { %7297 = vmatpush3.bf16.msra.mxu1 %v8002_v18  ;;  %7276 = vmatprep.subr.bf16.mxu0 %v8003_v41  ;;  %p8182_p0 = scmp.ne.s32.totalorder %s6653_s3, %s8181_s8  ;;  %p8187_p2 = scmp.lt.s32.totalorder %s8181_s8, %s8181_s8 }
0x2d07   :  { %7298 = vmatprep.subr.bf16.mxu1 %v8004_v44 }
0x2d08   :  { %p8188_p3 = por %p8187_p2, %p8186_p1 }
0x2d09   :  { %7277 = vmatpush3.bf16.msra.mxu0 %v8005_v30 }
0x2d0a   :  { %7299 = vmatpush3.bf16.msra.mxu1 %v8006_v31  ;;  %7278 = vmatprep.subr.bf16.mxu0 %v8007_v33  ;;  %p8189_p4 = pnand %p8188_p3, %p8182_p0 }
0x2d0b   :  { %7300 = vmatprep.subr.bf16.mxu1 %v8008_v37 }
0x2d0d   :  { %7279 = vmatpush3.bf16.msra.mxu0 %v8009_v42 }
0x2d0e   :  { %7301 = vmatpush3.bf16.msra.mxu1 %v8010_v29  ;;  %7280 = vmatprep.subr.bf16.mxu0 %v8011_v43 }
0x2d0f   :  { %7302 = vmatprep.subr.bf16.mxu1 %v8012_v57 }
0x2d11   :  { %7281 = vmatpush3.bf16.msra.mxu0 %v8013_v11 }
0x2d12   :  { %7303 = vmatpush3.bf16.msra.mxu1 %v8014_v53  ;;  %7282 = vmatprep.subr.bf16.mxu0 %v8015_v61 }
0x2d13   :  { %7304 = vmatprep.subr.bf16.mxu1 %v8016_v62 }
0x2d15   :  { %7283 = vmatpush3.bf16.msra.mxu0 %v8017_v14 }
0x2d16   :  { %7305 = vmatpush3.bf16.msra.mxu1 %v8018_v48  ;;  %7284 = vmatprep.subr.bf16.mxu0 %v8019_v1 }
0x2d17   :  { %7306 = vmatprep.subr.bf16.mxu1 %v8020_v13 }
0x2d19   :  { %7285 = vmatpush3.bf16.msra.mxu0 %v8021_v0 }
0x2d1a   :  { %7307 = vmatpush3.bf16.msra.mxu1 %v8022_v54  ;;  %7286 = vmatprep.subr.bf16.mxu0 %v8023_v2 }
0x2d1b   :  { %7308 = vmatprep.subr.bf16.mxu1 %v8024_v3 }
0x2d1d   :  { %7287 = vmatpush3.bf16.msra.mxu0 %v8025_v4 }
0x2d1e   :  { %7309 = vmatpush3.bf16.msra.mxu1 %v8026_v52 }
0x2d20   :  { %6594 = vmatmul.mubr.bf16.vlgmr.msra.gmra.mrb[172].mxu0 %v9490_v58 }
0x2d21   :  { %6635 = vmatmul.mubr.bf16.vlgmr.msra.gmra.mrb[172].mxu1 %v9492_v23 }
0x2d93   :  { %v7156_v26 = vpop.f32.mrb[160].mxu0  ;;  %v7178_v55 = vpop.f32.mrb[160].mxu1 }
0x2d94   :  { %v7157_v10 = vpop.f32.mrb[161].mxu0  ;;  %v7179_v47 = vpop.f32.mrb[161].mxu1 }
0x2d95   :  { %v7158_v39 = vadd.f32 %v7157_v10, %v7156_v26  ;;  %v7180_v6 = vadd.f32 %v7179_v47, %v7178_v55  ;;  %v7159_v49 = vpop.f32.mrb[162].mxu0  ;;  %v7181_v15 = vpop.f32.mrb[162].mxu1 }
0x2d96   :  { %v7160_v25 = vpop.f32.mrb[163].mxu0  ;;  %v7182_v36 = vpop.f32.mrb[163].mxu1 }
0x2d97   :  { %v6350_v40 = vadd.f32 %v7158_v39, %v6847_v27  ;;  %v7161_v28 = vadd.f32 %v7160_v25, %v7159_v49  ;;  %v7183_v50 = vadd.f32 %v7182_v36, %v7181_v15 }
0x2d99   :  { %v6391_v45 = vadd.f32 %v7180_v6, %v6350_v40  ;;  %v6353_v46 = vadd.f32 %v7161_v28, %v6847_v27 }
0x2d9b   :  { %v6394_v32 = vadd.f32 %v7183_v50, %v6353_v46 }
0x2db3   :  { %v7200_v58 = vpop.f32.mrb[164].mxu0  ;;  %v7222_v63 = vpop.f32.mrb[164].mxu1 }
0x2db4   :  { %v7201_v23 = vpop.f32.mrb[165].mxu0  ;;  %v7223_v59 = vpop.f32.mrb[165].mxu1 }
0x2db5   :  { %v7202_v56 = vadd.f32 %v7201_v23, %v7200_v58  ;;  %v7224_v12 = vadd.f32 %v7223_v59, %v7222_v63  ;;  %v7203_v34 = vpop.f32.mrb[166].mxu0  ;;  %v7225_v51 = vpop.f32.mrb[166].mxu1 }
0x2db6   :  { %v7204_v5 = vpop.f32.mrb[167].mxu0  ;;  %v7226_v19 = vpop.f32.mrb[167].mxu1 }
0x2db7   :  { %v6432_v17 = vadd.f32 %v7202_v56, %v6391_v45  ;;  %v7205_v21 = vadd.f32 %v7204_v5, %v7203_v34  ;;  %v7227_v16 = vadd.f32 %v7226_v19, %v7225_v51 }
0x2db9   :  { %v6473_v24 = vadd.f32 %v7224_v12, %v6432_v17  ;;  %v6435_v9 = vadd.f32 %v7205_v21, %v6394_v32 }
0x2dbb   :  { %v6476_v22 = vadd.f32 %v7227_v16, %v6435_v9 }
0x2dd3   :  { %v7244_v35 = vpop.f32.mrb[168].mxu0 }
0x2dd4   :  { %v7266_v38 = vpop.f32.mrb[168].mxu1  ;;  %v7245_v20 = vpop.f32.mrb[169].mxu0 }
0x2dd5   :  { %v7246_v7 = vadd.f32 %v7245_v20, %v7244_v35  ;;  %v7267_v18 = vpop.f32.mrb[169].mxu1  ;;  %v7247_v41 = vpop.f32.mrb[170].mxu0 }
0x2dd6   :  { %v7268_v44 = vadd.f32 %v7267_v18, %v7266_v38  ;;  %v7269_v30 = vpop.f32.mrb[170].mxu1  ;;  %v7248_v31 = vpop.f32.mrb[171].mxu0 }
0x2dd7   :  { %v6514_v33 = vadd.f32 %v7246_v7, %v6473_v24  ;;  %v7249_v37 = vadd.f32 %v7248_v31, %v7247_v41  ;;  %v7270_v42 = vpop.f32.mrb[171].mxu1 }
0x2dd8   :  { %v7271_v29 = vadd.f32 %v7270_v42, %v7269_v30 }
0x2dd9   :  { %v6555_v43 = vadd.f32 %v7268_v44, %v6514_v33  ;;  %v6517_v57 = vadd.f32 %v7249_v37, %v6476_v22 }
0x2ddb   :  { %v6558_v11 = vadd.f32 %v7271_v29, %v6517_v57 }
0x2df3   :  { %v7288_v53 = vpop.f32.mrb[172].mxu0 }
0x2df4   :  { %v7310_v61 = vpop.f32.mrb[172].mxu1  ;;  %v7289_v62 = vpop.f32.mrb[173].mxu0 }
0x2df5   :  { %v7290_v14 = vadd.f32 %v7289_v62, %v7288_v53  ;;  %v7311_v48 = vpop.f32.mrb[173].mxu1  ;;  %v7291_v1 = vpop.f32.mrb[174].mxu0 }
0x2df6   :  { %v7312_v13 = vadd.f32 %v7311_v48, %v7310_v61  ;;  %v7313_v0 = vpop.f32.mrb[174].mxu1  ;;  %v7292_v54 = vpop.f32.mrb[175].mxu0 }
0x2df7   :  { %v6596_v2 = vadd.f32 %v7290_v14, %v6555_v43  ;;  %v7293_v3 = vadd.f32 %v7292_v54, %v7291_v1  ;;  %v7314_v4 = vpop.f32.mrb[175].mxu1 }
0x2df8   :  { %v7315_v52 = vadd.f32 %v7314_v4, %v7313_v0 }
0x2df9   :  { %v6637_v26 = vadd.f32 %v7312_v13, %v6596_v2  ;;  %v6599_v55 = vadd.f32 %v7293_v3, %v6558_v11 }
0x2dfb   :  { %v6643_v27 = vadd.f32 %v6637_v26, %v9292_v8  ;;  %v6640_v10 = vadd.f32 %v7315_v52, %v6599_v55 }
0x2dfd   :  { %6645 = vst.msk [vmem:[#allocation2] sm:$0xff] %vm144_vm0, %v6643_v27  ;;  %v6644_v47 = vadd.f32 %v6640_v10, %v9295_v60 }
0x2dff   :  { %6646 = vst.msk [vmem:[#allocation2 + $0x8] sm:$0xff] %vm144_vm0, %v6644_v47 }
0x2e00   :  { %8192 = shalt.err (!%p8189_p4)
}
0x2e01   :  { %s8193_s0 = scalar_lea.hbm %s8412_s29, 256 }
0x2e02   :  { %p8194_p5 = scmp.ne.s32.totalorder %s8412_s29, %s8193_s0  ;;  %p8197_p6 = scmp.lt.u32.totalorder %s8193_s0, %s8412_s29 }
0x2e04   :  { %p8199_p7 = pnand %p8197_p6, %p8194_p5 }
0x2e06   :  { %8202 = shalt.err (!%p8199_p7)
}
0x2e07   :  { %s8253_s13 = smov 128  }
0x2e08   :  { %6658 = dma.vmem_to_hbm [thread:$0]  %s6653_s3, 256, %s8412_s29, [#allocation3], %s8253_s13, %s8253_s13, %s8245_s12  }
0x2e09   :  { %8203 = dma.done.wait [#allocation3], 256  }
0x2e0a   :  { %8204 = vsyncadd [#allocation3], 4294967040 }
0x2e0b   :  { %6662 = vsyncpa [#allocation3], 1 }

</bundles_post_ra>
